<compile_context>
chip_gen: v6e
topology: v6e:2x2x1
jax: 0.10.0
libtpu: 0.0.40
codegen_flags: <defaults>
</compile_context>

<pallas_src>
import functools

import jax
import jax.numpy as jnp
from jax import lax
from jax.experimental import pallas as pl
from jax.experimental.pallas import tpu as pltpu

EMBEDS_DIM = 512
NUM_CLASSES = 30
DIM_HEAD = 64
NUM_HEADS = 8
DIM_EMBED = DIM_HEAD * NUM_HEADS  # 512

# Safe on v5e/v6e/v7x: above every scoped default, well below physical VMEM.
VMEM_LIMIT_BYTES = 32 * 1024 * 1024

VGG19_CFG = [64, 64, 'M', 128, 128, 'M', 256, 256, 256, 256, 'M',
             512, 512, 512, 512, 'M', 512, 512, 512, 512, 'M']


# ----------------------------------------------------------------------------
# Tile selection
# ----------------------------------------------------------------------------
def _pick_tile(dim, target, align):
    """Largest `align`-multiple divisor of `dim` that is <= target (else dim)."""
    if dim <= target:
        return dim
    t = (target // align) * align
    while t >= align:
        if dim % t == 0:
            return t
        t -= align
    return dim  # pathological sizes only: whole axis resident


# ----------------------------------------------------------------------------
# Pallas kernels
# ----------------------------------------------------------------------------
def _matmul_kernel(relu, x_ref, w_ref, b_ref, o_ref, acc_ref):
    @pl.when(pl.program_id(2) == 0)
    def _():
        acc_ref[...] = jnp.zeros_like(acc_ref)

    acc_ref[...] += jnp.dot(x_ref[...], w_ref[...],
                            preferred_element_type=jnp.float32)

    @pl.when(pl.program_id(2) == pl.num_programs(2) - 1)
    def _():
        y = acc_ref[...] + b_ref[...]
        if relu:
            y = jnp.maximum(y, 0.0)
        o_ref[...] = y.astype(o_ref.dtype)


def pallas_matmul(x, w, bias=None, relu=False, tm=256, tn=512, tk=2048):
    """x:(M,K) @ w:(K,N) + bias, optional fused ReLU.  bf16 operands, f32 acc."""
    M, K = x.shape
    _, N = w.shape
    out_dtype = x.dtype
    if bias is None:
        bias = jnp.zeros((N,), jnp.float32)
    tm = _pick_tile(M, tm, 8)
    tn = _pick_tile(N, tn, 128)
    tk = _pick_tile(K, tk, 128)
    kernel = functools.partial(_matmul_kernel, relu)
    return pl.pallas_call(
        kernel,
        out_shape=jax.ShapeDtypeStruct((M, N), out_dtype),
        grid_spec=pltpu.PrefetchScalarGridSpec(
            num_scalar_prefetch=0,
            grid=(M // tm, N // tn, K // tk),
            in_specs=[pl.BlockSpec((tm, tk), lambda i, j, k: (i, k)),
                      pl.BlockSpec((tk, tn), lambda i, j, k: (k, j)),
                      # bias index depends only on j -> not re-fetched across k
                      pl.BlockSpec((1, tn), lambda i, j, k: (0, j))],
            out_specs=pl.BlockSpec((tm, tn), lambda i, j, k: (i, j)),
            scratch_shapes=[pltpu.VMEM((tm, tn), jnp.float32)]),
        compiler_params=pltpu.CompilerParams(
            dimension_semantics=("parallel", "parallel", "arbitrary"),
            vmem_limit_bytes=VMEM_LIMIT_BYTES),
    )(x.astype(jnp.bfloat16), w.astype(jnp.bfloat16),
      bias.reshape(1, N).astype(jnp.float32))


def _rms_matmul_kernel(scale, x_ref, g_ref, w_ref, o_ref):
    # ChannelRMSNorm prologue (F.normalize over channels * sqrt(dim) * gamma)
    x = x_ref[...]
    nrm = jnp.maximum(jnp.sqrt(jnp.sum(x * x, axis=-1, keepdims=True)), 1e-12)
    xn = (x / nrm) * (scale * g_ref[...])
    o_ref[...] = jnp.dot(xn.astype(jnp.bfloat16), w_ref[...],
                         preferred_element_type=jnp.float32).astype(o_ref.dtype)


def pallas_rms_matmul(x, gamma, w, tm=256, tn=1024):
    """Fused ChannelRMSNorm + 1x1-conv projection: norm(x) @ w.  K untiled."""
    M, C = x.shape
    _, N = w.shape
    tm = _pick_tile(M, tm, 8)
    tn = _pick_tile(N, tn, 128)
    kernel = functools.partial(_rms_matmul_kernel, float(C) ** 0.5)
    return pl.pallas_call(
        kernel,
        out_shape=jax.ShapeDtypeStruct((M, N), x.dtype),
        grid_spec=pltpu.PrefetchScalarGridSpec(
            num_scalar_prefetch=0,
            grid=(M // tm, N // tn),
            in_specs=[pl.BlockSpec((tm, C), lambda i, j: (i, 0)),
                      pl.BlockSpec((1, C), lambda i, j: (0, 0)),
                      pl.BlockSpec((C, tn), lambda i, j: (0, j))],
            out_specs=pl.BlockSpec((tm, tn), lambda i, j: (i, j))),
        compiler_params=pltpu.CompilerParams(
            dimension_semantics=("parallel", "parallel"),
            vmem_limit_bytes=VMEM_LIMIT_BYTES),
    )(x, gamma.reshape(1, C), w.astype(jnp.bfloat16))


def _attention_kernel(scale, q_ref, k_ref, v_ref, o_ref):
    q = q_ref[0]   # (NUM_HEADS, S, D)
    k = k_ref[0]
    v = v_ref[0]
    s = jnp.einsum('nsd,ntd->nst', q, k,
                   preferred_element_type=jnp.float32) * scale
    m = jnp.max(s, axis=-1, keepdims=True)
    p = jnp.exp(s - m)
    p = p * pl.reciprocal(jnp.sum(p, axis=-1, keepdims=True), approx=True)
    # matches reference: (softmax(qk) + 1e-8) @ v + 1e-8
    out = jnp.einsum('nst,ntd->nsd', p + 1e-8, v,
                     preferred_element_type=jnp.float32) + 1e-8
    o_ref[0] = out.astype(o_ref.dtype)


def pallas_attention(q, k, v, scale):
    """q/k/v: (B, NUM_HEADS, S, D) — all heads batched per grid step."""
    B, NH, S, D = q.shape
    kernel = functools.partial(_attention_kernel, scale)
    spec = pl.BlockSpec((1, NH, S, D), lambda b: (b, 0, 0, 0))
    return pl.pallas_call(
        kernel,
        out_shape=jax.ShapeDtypeStruct((B, NH, S, D), q.dtype),
        grid=(B,),
        in_specs=[spec, spec, spec],
        out_specs=spec,
        compiler_params=pltpu.CompilerParams(
            dimension_semantics=("parallel",)),
    )(q, k, v)


def _down_bn_relu_kernel(eps, x_ref, w_ref, g_ref, b_ref, o_ref, acc_ref):
    @pl.when(pl.program_id(1) == 0)
    def _():
        acc_ref[...] = jnp.zeros_like(acc_ref)

    acc_ref[...] += jnp.dot(x_ref[...], w_ref[...],
                            preferred_element_type=jnp.float32)

    @pl.when(pl.program_id(1) == pl.num_programs(1) - 1)
    def _():
        # BatchNorm2d training-mode semantics (module default): batch stats,
        # biased variance, computed per output channel over the full M rows
        # (full-M block is resident; N may be tiled since stats are per-channel).
        y = acc_ref[...]
        mean = jnp.mean(y, axis=0, keepdims=True)
        var = jnp.mean(jnp.square(y - mean), axis=0, keepdims=True)
        yn = (y - mean) * lax.rsqrt(var + eps) * g_ref[...] + b_ref[...]
        o_ref[...] = jnp.maximum(yn, 0.0).astype(o_ref.dtype)


def pallas_conv_bn_relu(x, w, gamma, beta, eps=1e-5, tn=256, tk=2048):
    """im2col conv matmul with fused BatchNorm(batch stats)+ReLU epilogue."""
    M, K = x.shape
    _, N = w.shape
    out_dtype = x.dtype
    tn = _pick_tile(N, tn, 128)
    tk = _pick_tile(K, tk, 128)
    kernel = functools.partial(_down_bn_relu_kernel, eps)
    return pl.pallas_call(
        kernel,
        out_shape=jax.ShapeDtypeStruct((M, N), out_dtype),
        grid_spec=pltpu.PrefetchScalarGridSpec(
            num_scalar_prefetch=0,
            grid=(N // tn, K // tk),
            in_specs=[pl.BlockSpec((M, tk), lambda j, k: (0, k)),
                      pl.BlockSpec((tk, tn), lambda j, k: (k, j)),
                      pl.BlockSpec((1, tn), lambda j, k: (0, j)),
                      pl.BlockSpec((1, tn), lambda j, k: (0, j))],
            out_specs=pl.BlockSpec((M, tn), lambda j, k: (0, j)),
            scratch_shapes=[pltpu.VMEM((M, tn), jnp.float32)]),
        compiler_params=pltpu.CompilerParams(
            dimension_semantics=("parallel", "arbitrary"),
            vmem_limit_bytes=VMEM_LIMIT_BYTES),
    )(x.astype(jnp.bfloat16), w.astype(jnp.bfloat16),
      gamma.reshape(1, N).astype(jnp.float32),
      beta.reshape(1, N).astype(jnp.float32))


# ----------------------------------------------------------------------------
# Head-major re-parametrization of the attention weights.
# Reference channel order is '(c n)' (channel = c*NUM_HEADS + n, a stride-8
# gather per head).  Permuting the projection weights' channel axis to
# head-major (n*DIM_HEAD + c) is mathematically identical but makes head
# split/merge a contiguous-chunk reshape.
# ----------------------------------------------------------------------------
def _head_perm():
    return jnp.arange(DIM_EMBED).reshape(DIM_HEAD, NUM_HEADS).T.reshape(-1)


def _head_major_qkv(wq, wk, wv):
    perm = _head_perm()
    wq_hm = wq[perm, :].T                                    # (dim, 512_hm)
    wkv_hm = jnp.concatenate([wk[perm, :].T, wv[perm, :].T], axis=1)  # (dim, 1024)
    return wq_hm, wkv_hm


def _head_major_proj(wproj):
    perm = _head_perm()
    return wproj[:, perm].T                                  # (512_hm, dim)


def _split_heads(t, B, HW):   # (B*HW, 512) head-major -> (B, NH, HW, DH)
    return t.reshape(B, HW, NUM_HEADS, DIM_HEAD).transpose(0, 2, 1, 3)


def _merge_heads(t, B, HW):   # (B, NH, HW, DH) -> (B*HW, 512) head-major
    return t.transpose(0, 2, 1, 3).reshape(B * HW, DIM_EMBED)


# ----------------------------------------------------------------------------
# Model blocks (Pallas hot path + JAX glue)
# ----------------------------------------------------------------------------
def cross_attention(x_tok, ctx_tok, p, B, HW):
    wq_hm, wkv_hm = _head_major_qkv(p['wq'], p['wk'], p['wv'])
    wproj_hm_t = _head_major_proj(p['wproj'])
    # Reference module applies self.norm (x's norm) to the context too — reproduce.
    # RMSNorm is fused as a prologue of the projection matmuls; K and V share one call.
    q = pallas_rms_matmul(x_tok, p['gamma'], wq_hm)          # (B*HW, 512)
    kv = pallas_rms_matmul(ctx_tok, p['gamma'], wkv_hm)      # (B*HW, 1024) = [K | V]
    k = kv[:, :DIM_EMBED]
    v = kv[:, DIM_EMBED:]
    attn = pallas_attention(_split_heads(q, B, HW),
                            _split_heads(k, B, HW),
                            _split_heads(v, B, HW),
                            DIM_HEAD ** -0.5)                # (B, NH, HW, DH)
    attn = _merge_heads(attn, B, HW)                         # (B*HW, 512) head-major
    return pallas_matmul(attn, wproj_hm_t)                   # 1x1 proj conv


def mutual_cross_attention(x1_tok, x2_tok, p, B, HW):
    y1 = cross_attention(x1_tok, x2_tok, p['block1'], B, HW)
    y2 = cross_attention(x2_tok, x1_tok, p['block2'], B, HW)
    yc = jnp.concatenate([y1, y2], axis=-1)
    return pallas_matmul(yc, p['wout'].T)


def vgg19_features(x, conv_params):
    # TODO(synk): pretrained frozen ImageNet VGG19 weights cannot be loaded
    # in-script; backbone runs as plain-JAX glue with deterministic random weights.
    h = x
    idx = 0
    for v in VGG19_CFG:
        if v == 'M':
            h = lax.reduce_window(h, jnp.array(-jnp.inf, h.dtype), lax.max,
                                  (1, 1, 2, 2), (1, 1, 2, 2), 'VALID')
        else:
            w, b = conv_params[idx]
            idx += 1
            h = lax.conv_general_dilated(h, w, (1, 1), ((1, 1), (1, 1)),
                                         dimension_numbers=('NCHW', 'OIHW', 'NCHW'))
            h = jnp.maximum(h + b[None, :, None, None], 0.0)
    return h


def adaptive_avg_pool2d(x, out_hw):
    B, C, H, W = x.shape
    OH, OW = out_hw
    rows = []
    for i in range(OH):
        hs, he = (i * H) // OH, -(-((i + 1) * H) // OH)
        cols = []
        for j in range(OW):
            ws, we = (j * W) // OW, -(-((j + 1) * W) // OW)
            cols.append(jnp.mean(x[:, :, hs:he, ws:we], axis=(2, 3)))
        rows.append(jnp.stack(cols, axis=-1))
    return jnp.stack(rows, axis=-2)  # (B, C, OH, OW)


def forward(params, img, img_patch1, img_patch2, seg, seg_patch1, seg_patch2):
    feats = [vgg19_features(t, params['vgg'])
             for t in (img, img_patch1, img_patch2, seg, seg_patch1, seg_patch2)]
    i1, i2, i3, s1, s2, s3 = feats
    B, C, H, W = i1.shape
    HW = H * W

    def tok(t):  # NCHW -> (B*H*W, C)
        return jnp.transpose(t, (0, 2, 3, 1)).reshape(B * HW, C)

    f1 = mutual_cross_attention(tok(i1), tok(s1), params['mca1'], B, HW)
    f2 = mutual_cross_attention(tok(i2), tok(s2), params['mca2'], B, HW)
    f3 = mutual_cross_attention(tok(i3), tok(s3), params['mca3'], B, HW)
    fcat = jnp.concatenate([f1, f2, f3], axis=-1)                  # (B*HW, 1536)

    # downsample: Conv2d(3*embeds, embeds, k=4, s=2, p=1) via im2col + fused
    # matmul + BatchNorm(batch stats) + ReLU Pallas kernel.
    cin = 3 * EMBEDS_DIM
    xs = fcat.reshape(B, H, W, cin)
    xp = jnp.pad(xs, ((0, 0), (1, 1), (1, 1), (0, 0)))
    OH = (H + 2 - 4) // 2 + 1
    OW = (W + 2 - 4) // 2 + 1
    patches = []
    for kh in range(4):
        for kw in range(4):
            patches.append(xp[:, kh:kh + (OH - 1) * 2 + 1:2,
                              kw:kw + (OW - 1) * 2 + 1:2, :])
    pt = jnp.stack(patches, axis=3)                                # (B,OH,OW,16,Cin)
    pt = jnp.transpose(pt, (0, 1, 2, 4, 3)).reshape(B * OH * OW, cin * 16)
    w_down = params['down_w'].reshape(EMBEDS_DIM, cin * 16)
    y = pallas_conv_bn_relu(pt, w_down.T, params['bn_g'], params['bn_b'])

    y = jnp.transpose(y.reshape(B, OH, OW, EMBEDS_DIM), (0, 3, 1, 2))
    y = adaptive_avg_pool2d(y, (4, 4))                             # (B, 512, 4, 4)
    y = y.reshape(B, EMBEDS_DIM * 16)                              # Flatten (NCHW order)

    h1 = pallas_matmul(y, params['fc1_w'].T, params['fc1_b'], relu=True)
    return pallas_matmul(h1, params['fc2_w'].T, params['fc2_b'])


# ----------------------------------------------------------------------------
# Deterministic parameter init (matches init_params: N(0, .02) conv/linear,
# zero biases, BN weight N(1, .02), BN bias 0, RMSNorm gamma = 1)
# ----------------------------------------------------------------------------
def init_model_params(key):
    ks = iter(jax.random.split(key, 256))

    def normal(shape, std):
        return jax.random.normal(next(ks), shape, jnp.float32) * std

    def cross_attn_params(dim, dim_ctx):
        return dict(
            gamma=jnp.ones((dim,), jnp.float32),
            gamma_ctx=jnp.ones((dim_ctx,), jnp.float32),  # present but unused (matches ref)
            wq=normal((DIM_EMBED, dim), 0.02),
            wk=normal((DIM_EMBED, dim_ctx), 0.02),
            wv=normal((DIM_EMBED, dim_ctx), 0.02),
            wproj=normal((dim, DIM_EMBED), 0.02),
        )

    def mca_params(in1, in2, out):
        return dict(block1=cross_attn_params(in1, in2),
                    block2=cross_attn_params(in2, in1),
                    wout=normal((out, in1 + in2), 0.02))

    vgg = []
    cin = 3
    for v in VGG19_CFG:
        if v == 'M':
            continue
        std = (2.0 / (cin * 9)) ** 0.5  # He-style substitute for pretrained weights
        vgg.append((normal((v, cin, 3, 3), std), jnp.zeros((v,), jnp.float32)))
        cin = v

    return dict(
        vgg=vgg,
        mca1=mca_params(512, 512, EMBEDS_DIM),
        mca2=mca_params(512, 512, EMBEDS_DIM),
        mca3=mca_params(512, 512, EMBEDS_DIM),
        down_w=normal((EMBEDS_DIM, 3 * EMBEDS_DIM, 4, 4), 0.02),
        bn_g=normal((EMBEDS_DIM,), 0.02) + 1.0,
        bn_b=jnp.zeros((EMBEDS_DIM,), jnp.float32),
        fc1_w=normal((EMBEDS_DIM, EMBEDS_DIM * 16), 0.02),
        fc1_b=jnp.zeros((EMBEDS_DIM,), jnp.float32),
        fc2_w=normal((NUM_CLASSES, EMBEDS_DIM), 0.02),
        fc2_b=jnp.zeros((NUM_CLASSES,), jnp.float32),
    )


if __name__ == "__main__":
    root = jax.random.PRNGKey(0)
    pkey, dkey = jax.random.split(root)
    params = init_model_params(pkey)

    shape = (2, 3, 64, 64)  # B=2, RGB 64x64 -> VGG19 features (2, 512, 2, 2)
    ikeys = jax.random.split(dkey, 6)
    inputs = [jax.random.normal(k, shape, jnp.float32) for k in ikeys]

    out = jax.jit(forward)(params, *inputs)
    out = jax.block_until_ready(out)
    assert out.shape == (2, NUM_CLASSES)
    assert bool(jnp.all(jnp.isfinite(out)))
    print("KERNEL_OK")
</pallas_src>

<mosaic_0001>
module attributes {stable_mosaic.version = 11 : i64} {
  func.func @_rms_matmul_kernel(%arg0: i32, %arg1: i32, %arg2: memref<8x512xf32, #tpu.memory_space<vmem>>, %arg3: memref<1x512xf32, #tpu.memory_space<vmem>>, %arg4: memref<512x1024xbf16, #tpu.memory_space<vmem>>, %arg5: memref<8x1024xf32, #tpu.memory_space<vmem>>) attributes {dimension_semantics = [#tpu.dimension_semantics<parallel>, #tpu.dimension_semantics<parallel>], iteration_bounds = array<i64: 1, 1>, scalar_prefetch = 0 : i64, scratch_operands = 0 : i64, tpu.core_type = #tpu.core_type<tc>, window_params = [{transform_indices = @transform_0, window_bounds = array<i64: 8, 512>}, {pipeline_mode = #tpu.pipeline_mode<synchronous>, transform_indices = @transform_1, window_bounds = array<i64: 1, 512>}, {transform_indices = @transform_2, window_bounds = array<i64: 512, 1024>}, {transform_indices = @transform_3, window_bounds = array<i64: 8, 1024>}]} {
    %c0 = arith.constant 0 : index
    %c0_0 = arith.constant 0 : index
    %0 = vector.load %arg2[%c0, %c0_0] : memref<8x512xf32, #tpu.memory_space<vmem>>, vector<8x512xf32>
    %1 = arith.mulf %0, %0 : vector<8x512xf32>
    %cst = arith.constant dense<0.000000e+00> : vector<8xf32>
    %2 = vector.multi_reduction <add>, %1, %cst [1] : vector<8x512xf32> to vector<8xf32>
    %3 = vector.shape_cast %2 : vector<8xf32> to vector<8x1xf32>
    %4 = math.sqrt %3 : vector<8x1xf32>
    %cst_1 = arith.constant 9.99999996E-13 : f32
    %5 = vector.broadcast %cst_1 : f32 to vector<8x1xf32>
    %6 = arith.maximumf %4, %5 : vector<8x1xf32>
    %7 = vector.broadcast %6 : vector<8x1xf32> to vector<8x512xf32>
    %8 = arith.divf %0, %7 : vector<8x512xf32>
    %c0_2 = arith.constant 0 : index
    %c0_3 = arith.constant 0 : index
    %9 = vector.load %arg3[%c0_2, %c0_3] : memref<1x512xf32, #tpu.memory_space<vmem>>, vector<1x512xf32>
    %cst_4 = arith.constant 22.6274166 : f32
    %10 = vector.broadcast %cst_4 : f32 to vector<1x512xf32>
    %11 = arith.mulf %10, %9 : vector<1x512xf32>
    %12 = vector.broadcast %11 : vector<1x512xf32> to vector<8x512xf32>
    %13 = arith.mulf %8, %12 : vector<8x512xf32>
    %14 = arith.truncf %13 : vector<8x512xf32> to vector<8x512xbf16>
    %c0_5 = arith.constant 0 : index
    %c0_6 = arith.constant 0 : index
    %15 = vector.load %arg4[%c0_5, %c0_6] : memref<512x1024xbf16, #tpu.memory_space<vmem>>, vector<512x1024xbf16>
    %cst_7 = arith.constant dense<0.000000e+00> : vector<8x1024xf32>
    %16 = tpu.matmul %14, %15, %cst_7 {dimension_numbers = #tpu.dot_dimension_numbers<[1], [0], [0], [1], [0, 0, 1, 1], [], []>} : vector<8x512xbf16>, vector<512x1024xbf16>, vector<8x1024xf32> -> vector<8x1024xf32>
    %c0_8 = arith.constant 0 : index
    %c0_9 = arith.constant 0 : index
    %17 = vector.load %arg5[%c0_8, %c0_9] : memref<8x1024xf32, #tpu.memory_space<vmem>>, vector<8x1024xf32>
    tpu.vector_store %arg5[%c0_8, %c0_9], %16 {strides = array<i32>} : memref<8x1024xf32, #tpu.memory_space<vmem>>, vector<8x1024xf32>,
    return
  }
  func.func @transform_0(%arg0: i32, %arg1: i32) -> (i32, i32) {
    %c0_i32 = arith.constant 0 : i32
    %c0_i32_0 = arith.constant 0 : i32
    return %arg0, %c0_i32 : i32, i32
  }
  func.func @transform_1(%arg0: i32, %arg1: i32) -> (i32, i32) {
    %c0_i32 = arith.constant 0 : i32
    %c0_i32_0 = arith.constant 0 : i32
    %c0_i32_1 = arith.constant 0 : i32
    return %c0_i32, %c0_i32_0 : i32, i32
  }
  func.func @transform_2(%arg0: i32, %arg1: i32) -> (i32, i32) {
    %c0_i32 = arith.constant 0 : i32
    %c0_i32_0 = arith.constant 0 : i32
    return %c0_i32, %arg1 : i32, i32
  }
  func.func @transform_3(%arg0: i32, %arg1: i32) -> (i32, i32) {
    %c0_i32 = arith.constant 0 : i32
    return %arg0, %arg1 : i32, i32
  }
}

module attributes {stable_mosaic.version = 11 : i64} {
  func.func @_rms_matmul_kernel(%arg0: i32, %arg1: i32, %arg2: memref<8x512xf32, #tpu.memory_space<vmem>>, %arg3: memref<1x512xf32, #tpu.memory_space<vmem>>, %arg4: memref<512x512xbf16, #tpu.memory_space<vmem>>, %arg5: memref<8x512xf32, #tpu.memory_space<vmem>>) attributes {dimension_semantics = [#tpu.dimension_semantics<parallel>, #tpu.dimension_semantics<parallel>], iteration_bounds = array<i64: 1, 1>, scalar_prefetch = 0 : i64, scratch_operands = 0 : i64, tpu.core_type = #tpu.core_type<tc>, window_params = [{transform_indices = @transform_0, window_bounds = array<i64: 8, 512>}, {pipeline_mode = #tpu.pipeline_mode<synchronous>, transform_indices = @transform_1, window_bounds = array<i64: 1, 512>}, {transform_indices = @transform_2, window_bounds = array<i64: 512, 512>}, {transform_indices = @transform_3, window_bounds = array<i64: 8, 512>}]} {
    %c0 = arith.constant 0 : index
    %c0_0 = arith.constant 0 : index
    %0 = vector.load %arg2[%c0, %c0_0] : memref<8x512xf32, #tpu.memory_space<vmem>>, vector<8x512xf32>
    %1 = arith.mulf %0, %0 : vector<8x512xf32>
    %cst = arith.constant dense<0.000000e+00> : vector<8xf32>
    %2 = vector.multi_reduction <add>, %1, %cst [1] : vector<8x512xf32> to vector<8xf32>
    %3 = vector.shape_cast %2 : vector<8xf32> to vector<8x1xf32>
    %4 = math.sqrt %3 : vector<8x1xf32>
    %cst_1 = arith.constant 9.99999996E-13 : f32
    %5 = vector.broadcast %cst_1 : f32 to vector<8x1xf32>
    %6 = arith.maximumf %4, %5 : vector<8x1xf32>
    %7 = vector.broadcast %6 : vector<8x1xf32> to vector<8x512xf32>
    %8 = arith.divf %0, %7 : vector<8x512xf32>
    %c0_2 = arith.constant 0 : index
    %c0_3 = arith.constant 0 : index
    %9 = vector.load %arg3[%c0_2, %c0_3] : memref<1x512xf32, #tpu.memory_space<vmem>>, vector<1x512xf32>
    %cst_4 = arith.constant 22.6274166 : f32
    %10 = vector.broadcast %cst_4 : f32 to vector<1x512xf32>
    %11 = arith.mulf %10, %9 : vector<1x512xf32>
    %12 = vector.broadcast %11 : vector<1x512xf32> to vector<8x512xf32>
    %13 = arith.mulf %8, %12 : vector<8x512xf32>
    %14 = arith.truncf %13 : vector<8x512xf32> to vector<8x512xbf16>
    %c0_5 = arith.constant 0 : index
    %c0_6 = arith.constant 0 : index
    %15 = vector.load %arg4[%c0_5, %c0_6] : memref<512x512xbf16, #tpu.memory_space<vmem>>, vector<512x512xbf16>
    %cst_7 = arith.constant dense<0.000000e+00> : vector<8x512xf32>
    %16 = tpu.matmul %14, %15, %cst_7 {dimension_numbers = #tpu.dot_dimension_numbers<[1], [0], [0], [1], [0, 0, 1, 1], [], []>} : vector<8x512xbf16>, vector<512x512xbf16>, vector<8x512xf32> -> vector<8x512xf32>
    %c0_8 = arith.constant 0 : index
    %c0_9 = arith.constant 0 : index
    %17 = vector.load %arg5[%c0_8, %c0_9] : memref<8x512xf32, #tpu.memory_space<vmem>>, vector<8x512xf32>
    tpu.vector_store %arg5[%c0_8, %c0_9], %16 {strides = array<i32>} : memref<8x512xf32, #tpu.memory_space<vmem>>, vector<8x512xf32>,
    return
  }
  func.func @transform_0(%arg0: i32, %arg1: i32) -> (i32, i32) {
    %c0_i32 = arith.constant 0 : i32
    %c0_i32_0 = arith.constant 0 : i32
    return %arg0, %c0_i32 : i32, i32
  }
  func.func @transform_1(%arg0: i32, %arg1: i32) -> (i32, i32) {
    %c0_i32 = arith.constant 0 : i32
    %c0_i32_0 = arith.constant 0 : i32
    %c0_i32_1 = arith.constant 0 : i32
    return %c0_i32, %c0_i32_0 : i32, i32
  }
  func.func @transform_2(%arg0: i32, %arg1: i32) -> (i32, i32) {
    %c0_i32 = arith.constant 0 : i32
    %c0_i32_0 = arith.constant 0 : i32
    return %c0_i32, %arg1 : i32, i32
  }
  func.func @transform_3(%arg0: i32, %arg1: i32) -> (i32, i32) {
    %c0_i32 = arith.constant 0 : i32
    return %arg0, %arg1 : i32, i32
  }
}

module attributes {stable_mosaic.version = 11 : i64} {
  func.func @_attention_kernel(%arg0: i32, %arg1: memref<1x8x4x64xf32, #tpu.memory_space<vmem>>, %arg2: memref<1x8x4x64xf32, #tpu.memory_space<vmem>>, %arg3: memref<1x8x4x64xf32, #tpu.memory_space<vmem>>, %arg4: memref<1x8x4x64xf32, #tpu.memory_space<vmem>>) attributes {dimension_semantics = [#tpu.dimension_semantics<parallel>], iteration_bounds = array<i64: 2>, scalar_prefetch = 0 : i64, scratch_operands = 0 : i64, tpu.core_type = #tpu.core_type<tc>, window_params = [{transform_indices = @transform_0, window_bounds = array<i64: 1, 8, 4, 64>}, {transform_indices = @transform_1, window_bounds = array<i64: 1, 8, 4, 64>}, {transform_indices = @transform_2, window_bounds = array<i64: 1, 8, 4, 64>}, {transform_indices = @transform_3, window_bounds = array<i64: 1, 8, 4, 64>}]} {
    %c0 = arith.constant 0 : index
    %c0_0 = arith.constant 0 : index
    %c0_1 = arith.constant 0 : index
    %c0_2 = arith.constant 0 : index
    %0 = vector.load %arg1[%c0, %c0_0, %c0_1, %c0_2] : memref<1x8x4x64xf32, #tpu.memory_space<vmem>>, vector<1x8x4x64xf32>
    %1 = vector.shape_cast %0 : vector<1x8x4x64xf32> to vector<8x4x64xf32>
    %c0_3 = arith.constant 0 : index
    %c0_4 = arith.constant 0 : index
    %c0_5 = arith.constant 0 : index
    %c0_6 = arith.constant 0 : index
    %2 = vector.load %arg2[%c0_3, %c0_4, %c0_5, %c0_6] : memref<1x8x4x64xf32, #tpu.memory_space<vmem>>, vector<1x8x4x64xf32>
    %3 = vector.shape_cast %2 : vector<1x8x4x64xf32> to vector<8x4x64xf32>
    %c0_7 = arith.constant 0 : index
    %c0_8 = arith.constant 0 : index
    %c0_9 = arith.constant 0 : index
    %c0_10 = arith.constant 0 : index
    %4 = vector.load %arg3[%c0_7, %c0_8, %c0_9, %c0_10] : memref<1x8x4x64xf32, #tpu.memory_space<vmem>>, vector<1x8x4x64xf32>
    %5 = vector.shape_cast %4 : vector<1x8x4x64xf32> to vector<8x4x64xf32>
    "tpu.trace_start"() <{level = 10 : i32, message = "nsd,ntd->nst"}> : () -> ()
    %cst = arith.constant dense<0.000000e+00> : vector<8x4x4xf32>
    %6 = tpu.matmul %1, %3, %cst {dimension_numbers = #tpu.dot_dimension_numbers<[2], [2], [1], [1], [0, 0, 0, 1, 1, 1], [0], [0]>} : vector<8x4x64xf32>, vector<8x4x64xf32>, vector<8x4x4xf32> -> vector<8x4x4xf32>
    "tpu.trace_stop"() : () -> ()
    %cst_11 = arith.constant 1.250000e-01 : f32
    %7 = vector.broadcast %cst_11 : f32 to vector<8x4x4xf32>
    %8 = arith.mulf %6, %7 : vector<8x4x4xf32>
    %cst_12 = arith.constant dense<0xFF800000> : vector<8x4xf32>
    %9 = vector.multi_reduction <maximumf>, %8, %cst_12 [2] : vector<8x4x4xf32> to vector<8x4xf32>
    %10 = vector.shape_cast %9 : vector<8x4xf32> to vector<8x4x1xf32>
    %11 = vector.broadcast %10 : vector<8x4x1xf32> to vector<8x4x4xf32>
    %12 = arith.subf %8, %11 : vector<8x4x4xf32>
    %13 = math.exp %12 : vector<8x4x4xf32>
    %cst_13 = arith.constant dense<0.000000e+00> : vector<8x4xf32>
    %14 = vector.multi_reduction <add>, %13, %cst_13 [2] : vector<8x4x4xf32> to vector<8x4xf32>
    %15 = vector.shape_cast %14 : vector<8x4xf32> to vector<8x4x1xf32>
    %16 = tpu.reciprocal %15 {approx = true} : vector<8x4x1xf32> -> vector<8x4x1xf32>
    %17 = vector.broadcast %16 : vector<8x4x1xf32> to vector<8x4x4xf32>
    %18 = arith.mulf %13, %17 : vector<8x4x4xf32>
    %cst_14 = arith.constant 9.99999993E-9 : f32
    %19 = vector.broadcast %cst_14 : f32 to vector<8x4x4xf32>
    %20 = arith.addf %18, %19 : vector<8x4x4xf32>
    "tpu.trace_start"() <{level = 10 : i32, message = "nst,ntd->nsd"}> : () -> ()
    %cst_15 = arith.constant dense<0.000000e+00> : vector<8x4x64xf32>
    %21 = tpu.matmul %20, %5, %cst_15 {dimension_numbers = #tpu.dot_dimension_numbers<[2], [1], [1], [2], [0, 0, 0, 1, 1, 2], [0], [0]>} : vector<8x4x4xf32>, vector<8x4x64xf32>, vector<8x4x64xf32> -> vector<8x4x64xf32>
    "tpu.trace_stop"() : () -> ()
    %cst_16 = arith.constant 9.99999993E-9 : f32
    %22 = vector.broadcast %cst_16 : f32 to vector<8x4x64xf32>
    %23 = arith.addf %21, %22 : vector<8x4x64xf32>
    %c0_17 = arith.constant 0 : index
    %c0_18 = arith.constant 0 : index
    %c0_19 = arith.constant 0 : index
    %c0_20 = arith.constant 0 : index
    %24 = vector.load %arg4[%c0_17, %c0_18, %c0_19, %c0_20] : memref<1x8x4x64xf32, #tpu.memory_space<vmem>>, vector<1x8x4x64xf32>
    %25 = vector.shape_cast %24 : vector<1x8x4x64xf32> to vector<8x4x64xf32>
    %26 = vector.shape_cast %23 : vector<8x4x64xf32> to vector<1x8x4x64xf32>
    tpu.vector_store %arg4[%c0_17, %c0_18, %c0_19, %c0_20], %26 {strides = array<i32>} : memref<1x8x4x64xf32, #tpu.memory_space<vmem>>, vector<1x8x4x64xf32>,
    return
  }
  func.func @transform_0(%arg0: i32) -> (i32, i32, i32, i32) {
    %c0_i32 = arith.constant 0 : i32
    %c0_i32_0 = arith.constant 0 : i32
    %c0_i32_1 = arith.constant 0 : i32
    %c0_i32_2 = arith.constant 0 : i32
    return %arg0, %c0_i32, %c0_i32_0, %c0_i32_1 : i32, i32, i32, i32
  }
  func.func @transform_1(%arg0: i32) -> (i32, i32, i32, i32) {
    %c0_i32 = arith.constant 0 : i32
    %c0_i32_0 = arith.constant 0 : i32
    %c0_i32_1 = arith.constant 0 : i32
    %c0_i32_2 = arith.constant 0 : i32
    return %arg0, %c0_i32, %c0_i32_0, %c0_i32_1 : i32, i32, i32, i32
  }
  func.func @transform_2(%arg0: i32) -> (i32, i32, i32, i32) {
    %c0_i32 = arith.constant 0 : i32
    %c0_i32_0 = arith.constant 0 : i32
    %c0_i32_1 = arith.constant 0 : i32
    %c0_i32_2 = arith.constant 0 : i32
    return %arg0, %c0_i32, %c0_i32_0, %c0_i32_1 : i32, i32, i32, i32
  }
  func.func @transform_3(%arg0: i32) -> (i32, i32, i32, i32) {
    %c0_i32 = arith.constant 0 : i32
    %c0_i32_0 = arith.constant 0 : i32
    %c0_i32_1 = arith.constant 0 : i32
    %c0_i32_2 = arith.constant 0 : i32
    return %arg0, %c0_i32, %c0_i32_0, %c0_i32_1 : i32, i32, i32, i32
  }
}

module attributes {stable_mosaic.version = 11 : i64} {
  func.func @_matmul_kernel(%arg0: i32, %arg1: i32, %arg2: i32, %arg3: memref<8x512xbf16, #tpu.memory_space<vmem>>, %arg4: memref<512x512xbf16, #tpu.memory_space<vmem>>, %arg5: memref<1x512xf32, #tpu.memory_space<vmem>>, %arg6: memref<8x512xf32, #tpu.memory_space<vmem>>, %arg7: memref<8x512xf32, #tpu.memory_space<vmem>>) attributes {dimension_semantics = [#tpu.dimension_semantics<parallel>, #tpu.dimension_semantics<parallel>, #tpu.dimension_semantics<arbitrary>], iteration_bounds = array<i64: 1, 1, 1>, scalar_prefetch = 0 : i64, scratch_operands = 1 : i64, tpu.core_type = #tpu.core_type<tc>, window_params = [{transform_indices = @transform_0, window_bounds = array<i64: 8, 512>}, {transform_indices = @transform_1, window_bounds = array<i64: 512, 512>}, {transform_indices = @transform_2, window_bounds = array<i64: 1, 512>}, {transform_indices = @transform_3, window_bounds = array<i64: 8, 512>}]} {
    %c0_i32 = arith.constant 0 : i32
    %0 = arith.cmpi eq, %arg2, %c0_i32 : i32
    %1 = arith.extui %0 : i1 to i32
    %c0_i32_0 = arith.constant 0 : i32
    %2 = arith.cmpi ne, %1, %c0_i32_0 : i32
    scf.if %2 {
      %cst_10 = arith.constant 0.000000e+00 : f32
      %12 = vector.broadcast %cst_10 : f32 to vector<8x512xf32>
      %c0_11 = arith.constant 0 : index
      %c0_12 = arith.constant 0 : index
      %13 = vector.load %arg7[%c0_11, %c0_12] : memref<8x512xf32, #tpu.memory_space<vmem>>, vector<8x512xf32>
      tpu.vector_store %arg7[%c0_11, %c0_12], %12 {strides = array<i32>} : memref<8x512xf32, #tpu.memory_space<vmem>>, vector<8x512xf32>,
    } else {
    }
    %c0 = arith.constant 0 : index
    %c0_1 = arith.constant 0 : index
    %3 = vector.load %arg7[%c0, %c0_1] : memref<8x512xf32, #tpu.memory_space<vmem>>, vector<8x512xf32>
    %c0_2 = arith.constant 0 : index
    %c0_3 = arith.constant 0 : index
    %4 = vector.load %arg3[%c0_2, %c0_3] : memref<8x512xbf16, #tpu.memory_space<vmem>>, vector<8x512xbf16>
    %c0_4 = arith.constant 0 : index
    %c0_5 = arith.constant 0 : index
    %5 = vector.load %arg4[%c0_4, %c0_5] : memref<512x512xbf16, #tpu.memory_space<vmem>>, vector<512x512xbf16>
    %cst = arith.constant dense<0.000000e+00> : vector<8x512xf32>
    %6 = tpu.matmul %4, %5, %cst {dimension_numbers = #tpu.dot_dimension_numbers<[1], [0], [0], [1], [0, 0, 1, 1], [], []>} : vector<8x512xbf16>, vector<512x512xbf16>, vector<8x512xf32> -> vector<8x512xf32>
    %7 = arith.addf %3, %6 : vector<8x512xf32>
    %c0_6 = arith.constant 0 : index
    %c0_7 = arith.constant 0 : index
    %8 = vector.load %arg7[%c0_6, %c0_7] : memref<8x512xf32, #tpu.memory_space<vmem>>, vector<8x512xf32>
    tpu.vector_store %arg7[%c0_6, %c0_7], %7 {strides = array<i32>} : memref<8x512xf32, #tpu.memory_space<vmem>>, vector<8x512xf32>,
    %c0_i32_8 = arith.constant 0 : i32
    %9 = arith.cmpi eq, %arg2, %c0_i32_8 : i32
    %10 = arith.extui %9 : i1 to i32
    %c0_i32_9 = arith.constant 0 : i32
    %11 = arith.cmpi ne, %10, %c0_i32_9 : i32
    scf.if %11 {
      %c0_10 = arith.constant 0 : index
      %c0_11 = arith.constant 0 : index
      %12 = vector.load %arg7[%c0_10, %c0_11] : memref<8x512xf32, #tpu.memory_space<vmem>>, vector<8x512xf32>
      %c0_12 = arith.constant 0 : index
      %c0_13 = arith.constant 0 : index
      %13 = vector.load %arg5[%c0_12, %c0_13] : memref<1x512xf32, #tpu.memory_space<vmem>>, vector<1x512xf32>
      %14 = vector.broadcast %13 : vector<1x512xf32> to vector<8x512xf32>
      %15 = arith.addf %12, %14 : vector<8x512xf32>
      %c0_14 = arith.constant 0 : index
      %c0_15 = arith.constant 0 : index
      %16 = vector.load %arg6[%c0_14, %c0_15] : memref<8x512xf32, #tpu.memory_space<vmem>>, vector<8x512xf32>
      tpu.vector_store %arg6[%c0_14, %c0_15], %15 {strides = array<i32>} : memref<8x512xf32, #tpu.memory_space<vmem>>, vector<8x512xf32>,
    } else {
    }
    return
  }
  func.func @transform_0(%arg0: i32, %arg1: i32, %arg2: i32) -> (i32, i32) {
    %c0_i32 = arith.constant 0 : i32
    return %arg0, %arg2 : i32, i32
  }
  func.func @transform_1(%arg0: i32, %arg1: i32, %arg2: i32) -> (i32, i32) {
    %c0_i32 = arith.constant 0 : i32
    return %arg2, %arg1 : i32, i32
  }
  func.func @transform_2(%arg0: i32, %arg1: i32, %arg2: i32) -> (i32, i32) {
    %c0_i32 = arith.constant 0 : i32
    %c0_i32_0 = arith.constant 0 : i32
    return %c0_i32, %arg1 : i32, i32
  }
  func.func @transform_3(%arg0: i32, %arg1: i32, %arg2: i32) -> (i32, i32) {
    %c0_i32 = arith.constant 0 : i32
    return %arg0, %arg1 : i32, i32
  }
}

module attributes {stable_mosaic.version = 11 : i64} {
  func.func @_matmul_kernel(%arg0: i32, %arg1: i32, %arg2: i32, %arg3: memref<8x1024xbf16, #tpu.memory_space<vmem>>, %arg4: memref<1024x512xbf16, #tpu.memory_space<vmem>>, %arg5: memref<1x512xf32, #tpu.memory_space<vmem>>, %arg6: memref<8x512xf32, #tpu.memory_space<vmem>>, %arg7: memref<8x512xf32, #tpu.memory_space<vmem>>) attributes {dimension_semantics = [#tpu.dimension_semantics<parallel>, #tpu.dimension_semantics<parallel>, #tpu.dimension_semantics<arbitrary>], iteration_bounds = array<i64: 1, 1, 1>, scalar_prefetch = 0 : i64, scratch_operands = 1 : i64, tpu.core_type = #tpu.core_type<tc>, window_params = [{transform_indices = @transform_0, window_bounds = array<i64: 8, 1024>}, {transform_indices = @transform_1, window_bounds = array<i64: 1024, 512>}, {transform_indices = @transform_2, window_bounds = array<i64: 1, 512>}, {transform_indices = @transform_3, window_bounds = array<i64: 8, 512>}]} {
    %c0_i32 = arith.constant 0 : i32
    %0 = arith.cmpi eq, %arg2, %c0_i32 : i32
    %1 = arith.extui %0 : i1 to i32
    %c0_i32_0 = arith.constant 0 : i32
    %2 = arith.cmpi ne, %1, %c0_i32_0 : i32
    scf.if %2 {
      %cst_10 = arith.constant 0.000000e+00 : f32
      %12 = vector.broadcast %cst_10 : f32 to vector<8x512xf32>
      %c0_11 = arith.constant 0 : index
      %c0_12 = arith.constant 0 : index
      %13 = vector.load %arg7[%c0_11, %c0_12] : memref<8x512xf32, #tpu.memory_space<vmem>>, vector<8x512xf32>
      tpu.vector_store %arg7[%c0_11, %c0_12], %12 {strides = array<i32>} : memref<8x512xf32, #tpu.memory_space<vmem>>, vector<8x512xf32>,
    } else {
    }
    %c0 = arith.constant 0 : index
    %c0_1 = arith.constant 0 : index
    %3 = vector.load %arg7[%c0, %c0_1] : memref<8x512xf32, #tpu.memory_space<vmem>>, vector<8x512xf32>
    %c0_2 = arith.constant 0 : index
    %c0_3 = arith.constant 0 : index
    %4 = vector.load %arg3[%c0_2, %c0_3] : memref<8x1024xbf16, #tpu.memory_space<vmem>>, vector<8x1024xbf16>
    %c0_4 = arith.constant 0 : index
    %c0_5 = arith.constant 0 : index
    %5 = vector.load %arg4[%c0_4, %c0_5] : memref<1024x512xbf16, #tpu.memory_space<vmem>>, vector<1024x512xbf16>
    %cst = arith.constant dense<0.000000e+00> : vector<8x512xf32>
    %6 = tpu.matmul %4, %5, %cst {dimension_numbers = #tpu.dot_dimension_numbers<[1], [0], [0], [1], [0, 0, 1, 1], [], []>} : vector<8x1024xbf16>, vector<1024x512xbf16>, vector<8x512xf32> -> vector<8x512xf32>
    %7 = arith.addf %3, %6 : vector<8x512xf32>
    %c0_6 = arith.constant 0 : index
    %c0_7 = arith.constant 0 : index
    %8 = vector.load %arg7[%c0_6, %c0_7] : memref<8x512xf32, #tpu.memory_space<vmem>>, vector<8x512xf32>
    tpu.vector_store %arg7[%c0_6, %c0_7], %7 {strides = array<i32>} : memref<8x512xf32, #tpu.memory_space<vmem>>, vector<8x512xf32>,
    %c0_i32_8 = arith.constant 0 : i32
    %9 = arith.cmpi eq, %arg2, %c0_i32_8 : i32
    %10 = arith.extui %9 : i1 to i32
    %c0_i32_9 = arith.constant 0 : i32
    %11 = arith.cmpi ne, %10, %c0_i32_9 : i32
    scf.if %11 {
      %c0_10 = arith.constant 0 : index
      %c0_11 = arith.constant 0 : index
      %12 = vector.load %arg7[%c0_10, %c0_11] : memref<8x512xf32, #tpu.memory_space<vmem>>, vector<8x512xf32>
      %c0_12 = arith.constant 0 : index
      %c0_13 = arith.constant 0 : index
      %13 = vector.load %arg5[%c0_12, %c0_13] : memref<1x512xf32, #tpu.memory_space<vmem>>, vector<1x512xf32>
      %14 = vector.broadcast %13 : vector<1x512xf32> to vector<8x512xf32>
      %15 = arith.addf %12, %14 : vector<8x512xf32>
      %c0_14 = arith.constant 0 : index
      %c0_15 = arith.constant 0 : index
      %16 = vector.load %arg6[%c0_14, %c0_15] : memref<8x512xf32, #tpu.memory_space<vmem>>, vector<8x512xf32>
      tpu.vector_store %arg6[%c0_14, %c0_15], %15 {strides = array<i32>} : memref<8x512xf32, #tpu.memory_space<vmem>>, vector<8x512xf32>,
    } else {
    }
    return
  }
  func.func @transform_0(%arg0: i32, %arg1: i32, %arg2: i32) -> (i32, i32) {
    %c0_i32 = arith.constant 0 : i32
    return %arg0, %arg2 : i32, i32
  }
  func.func @transform_1(%arg0: i32, %arg1: i32, %arg2: i32) -> (i32, i32) {
    %c0_i32 = arith.constant 0 : i32
    return %arg2, %arg1 : i32, i32
  }
  func.func @transform_2(%arg0: i32, %arg1: i32, %arg2: i32) -> (i32, i32) {
    %c0_i32 = arith.constant 0 : i32
    %c0_i32_0 = arith.constant 0 : i32
    return %c0_i32, %arg1 : i32, i32
  }
  func.func @transform_3(%arg0: i32, %arg1: i32, %arg2: i32) -> (i32, i32) {
    %c0_i32 = arith.constant 0 : i32
    return %arg0, %arg1 : i32, i32
  }
}

module attributes {stable_mosaic.version = 11 : i64} {
  func.func @_down_bn_relu_kernel(%arg0: i32, %arg1: i32, %arg2: memref<2x2048xbf16, #tpu.memory_space<vmem>>, %arg3: memref<2048x256xbf16, #tpu.memory_space<vmem>>, %arg4: memref<1x256xf32, #tpu.memory_space<vmem>>, %arg5: memref<1x256xf32, #tpu.memory_space<vmem>>, %arg6: memref<2x256xf32, #tpu.memory_space<vmem>>, %arg7: memref<2x256xf32, #tpu.memory_space<vmem>>) attributes {dimension_semantics = [#tpu.dimension_semantics<parallel>, #tpu.dimension_semantics<arbitrary>], iteration_bounds = array<i64: 2, 12>, scalar_prefetch = 0 : i64, scratch_operands = 1 : i64, tpu.core_type = #tpu.core_type<tc>, window_params = [{transform_indices = @transform_0, window_bounds = array<i64: 2, 2048>}, {transform_indices = @transform_1, window_bounds = array<i64: 2048, 256>}, {transform_indices = @transform_2, window_bounds = array<i64: 1, 256>}, {transform_indices = @transform_3, window_bounds = array<i64: 1, 256>}, {transform_indices = @transform_4, window_bounds = array<i64: 2, 256>}]} {
    %c0_i32 = arith.constant 0 : i32
    %0 = arith.cmpi eq, %arg1, %c0_i32 : i32
    %1 = arith.extui %0 : i1 to i32
    %c0_i32_0 = arith.constant 0 : i32
    %2 = arith.cmpi ne, %1, %c0_i32_0 : i32
    scf.if %2 {
      %cst_9 = arith.constant 0.000000e+00 : f32
      %12 = vector.broadcast %cst_9 : f32 to vector<2x256xf32>
      %c0_10 = arith.constant 0 : index
      %c0_11 = arith.constant 0 : index
      %13 = vector.load %arg7[%c0_10, %c0_11] : memref<2x256xf32, #tpu.memory_space<vmem>>, vector<2x256xf32>
      tpu.vector_store %arg7[%c0_10, %c0_11], %12 {strides = array<i32>} : memref<2x256xf32, #tpu.memory_space<vmem>>, vector<2x256xf32>,
    } else {
    }
    %c0 = arith.constant 0 : index
    %c0_1 = arith.constant 0 : index
    %3 = vector.load %arg7[%c0, %c0_1] : memref<2x256xf32, #tpu.memory_space<vmem>>, vector<2x256xf32>
    %c0_2 = arith.constant 0 : index
    %c0_3 = arith.constant 0 : index
    %4 = vector.load %arg2[%c0_2, %c0_3] : memref<2x2048xbf16, #tpu.memory_space<vmem>>, vector<2x2048xbf16>
    %c0_4 = arith.constant 0 : index
    %c0_5 = arith.constant 0 : index
    %5 = vector.load %arg3[%c0_4, %c0_5] : memref<2048x256xbf16, #tpu.memory_space<vmem>>, vector<2048x256xbf16>
    %cst = arith.constant dense<0.000000e+00> : vector<2x256xf32>
    %6 = tpu.matmul %4, %5, %cst {dimension_numbers = #tpu.dot_dimension_numbers<[1], [0], [0], [1], [0, 0, 1, 1], [], []>} : vector<2x2048xbf16>, vector<2048x256xbf16>, vector<2x256xf32> -> vector<2x256xf32>
    %7 = arith.addf %3, %6 : vector<2x256xf32>
    %c0_6 = arith.constant 0 : index
    %c0_7 = arith.constant 0 : index
    %8 = vector.load %arg7[%c0_6, %c0_7] : memref<2x256xf32, #tpu.memory_space<vmem>>, vector<2x256xf32>
    tpu.vector_store %arg7[%c0_6, %c0_7], %7 {strides = array<i32>} : memref<2x256xf32, #tpu.memory_space<vmem>>, vector<2x256xf32>,
    %c11_i32 = arith.constant 11 : i32
    %9 = arith.cmpi eq, %arg1, %c11_i32 : i32
    %10 = arith.extui %9 : i1 to i32
    %c0_i32_8 = arith.constant 0 : i32
    %11 = arith.cmpi ne, %10, %c0_i32_8 : i32
    scf.if %11 {
      %c0_9 = arith.constant 0 : index
      %c0_10 = arith.constant 0 : index
      %12 = vector.load %arg7[%c0_9, %c0_10] : memref<2x256xf32, #tpu.memory_space<vmem>>, vector<2x256xf32>
      %cst_11 = arith.constant dense<0.000000e+00> : vector<256xf32>
      %13 = vector.multi_reduction <add>, %12, %cst_11 [0] : vector<2x256xf32> to vector<256xf32>
      %14 = vector.shape_cast %13 : vector<256xf32> to vector<1x256xf32>
      %cst_12 = arith.constant 2.000000e+00 : f32
      %15 = vector.broadcast %cst_12 : f32 to vector<1x256xf32>
      %16 = arith.divf %14, %15 : vector<1x256xf32>
      %17 = vector.broadcast %16 : vector<1x256xf32> to vector<2x256xf32>
      %18 = arith.subf %12, %17 : vector<2x256xf32>
      %19 = arith.mulf %18, %18 : vector<2x256xf32>
      %cst_13 = arith.constant dense<0.000000e+00> : vector<256xf32>
      %20 = vector.multi_reduction <add>, %19, %cst_13 [0] : vector<2x256xf32> to vector<256xf32>
      %21 = vector.shape_cast %20 : vector<256xf32> to vector<1x256xf32>
      %cst_14 = arith.constant 2.000000e+00 : f32
      %22 = vector.broadcast %cst_14 : f32 to vector<1x256xf32>
      %23 = arith.divf %21, %22 : vector<1x256xf32>
      %24 = vector.broadcast %16 : vector<1x256xf32> to vector<2x256xf32>
      %25 = arith.subf %12, %24 : vector<2x256xf32>
      %cst_15 = arith.constant 9.99999974E-6 : f32
      %26 = vector.broadcast %cst_15 : f32 to vector<1x256xf32>
      %27 = arith.addf %23, %26 : vector<1x256xf32>
      %28 = math.rsqrt %27 : vector<1x256xf32>
      %29 = vector.broadcast %28 : vector<1x256xf32> to vector<2x256xf32>
      %30 = arith.mulf %25, %29 : vector<2x256xf32>
      %c0_16 = arith.constant 0 : index
      %c0_17 = arith.constant 0 : index
      %31 = vector.load %arg4[%c0_16, %c0_17] : memref<1x256xf32, #tpu.memory_space<vmem>>, vector<1x256xf32>
      %32 = vector.broadcast %31 : vector<1x256xf32> to vector<2x256xf32>
      %33 = arith.mulf %30, %32 : vector<2x256xf32>
      %c0_18 = arith.constant 0 : index
      %c0_19 = arith.constant 0 : index
      %34 = vector.load %arg5[%c0_18, %c0_19] : memref<1x256xf32, #tpu.memory_space<vmem>>, vector<1x256xf32>
      %35 = vector.broadcast %34 : vector<1x256xf32> to vector<2x256xf32>
      %36 = arith.addf %33, %35 : vector<2x256xf32>
      %cst_20 = arith.constant 0.000000e+00 : f32
      %37 = vector.broadcast %cst_20 : f32 to vector<2x256xf32>
      %38 = arith.maximumf %36, %37 : vector<2x256xf32>
      %c0_21 = arith.constant 0 : index
      %c0_22 = arith.constant 0 : index
      %39 = vector.load %arg6[%c0_21, %c0_22] : memref<2x256xf32, #tpu.memory_space<vmem>>, vector<2x256xf32>
      tpu.vector_store %arg6[%c0_21, %c0_22], %38 {strides = array<i32>} : memref<2x256xf32, #tpu.memory_space<vmem>>, vector<2x256xf32>,
    } else {
    }
    return
  }
  func.func @transform_0(%arg0: i32, %arg1: i32) -> (i32, i32) {
    %c0_i32 = arith.constant 0 : i32
    %c0_i32_0 = arith.constant 0 : i32
    return %c0_i32, %arg1 : i32, i32
  }
  func.func @transform_1(%arg0: i32, %arg1: i32) -> (i32, i32) {
    %c0_i32 = arith.constant 0 : i32
    return %arg1, %arg0 : i32, i32
  }
  func.func @transform_2(%arg0: i32, %arg1: i32) -> (i32, i32) {
    %c0_i32 = arith.constant 0 : i32
    %c0_i32_0 = arith.constant 0 : i32
    return %c0_i32, %arg0 : i32, i32
  }
  func.func @transform_3(%arg0: i32, %arg1: i32) -> (i32, i32) {
    %c0_i32 = arith.constant 0 : i32
    %c0_i32_0 = arith.constant 0 : i32
    return %c0_i32, %arg0 : i32, i32
  }
  func.func @transform_4(%arg0: i32, %arg1: i32) -> (i32, i32) {
    %c0_i32 = arith.constant 0 : i32
    %c0_i32_0 = arith.constant 0 : i32
    return %c0_i32, %arg0 : i32, i32
  }
}

module attributes {stable_mosaic.version = 11 : i64} {
  func.func @_matmul_kernel(%arg0: i32, %arg1: i32, %arg2: i32, %arg3: memref<2x2048xbf16, #tpu.memory_space<vmem>>, %arg4: memref<2048x512xbf16, #tpu.memory_space<vmem>>, %arg5: memref<1x512xf32, #tpu.memory_space<vmem>>, %arg6: memref<2x512xf32, #tpu.memory_space<vmem>>, %arg7: memref<2x512xf32, #tpu.memory_space<vmem>>) attributes {dimension_semantics = [#tpu.dimension_semantics<parallel>, #tpu.dimension_semantics<parallel>, #tpu.dimension_semantics<arbitrary>], iteration_bounds = array<i64: 1, 1, 4>, scalar_prefetch = 0 : i64, scratch_operands = 1 : i64, tpu.core_type = #tpu.core_type<tc>, window_params = [{transform_indices = @transform_0, window_bounds = array<i64: 2, 2048>}, {transform_indices = @transform_1, window_bounds = array<i64: 2048, 512>}, {transform_indices = @transform_2, window_bounds = array<i64: 1, 512>}, {transform_indices = @transform_3, window_bounds = array<i64: 2, 512>}]} {
    %c0_i32 = arith.constant 0 : i32
    %0 = arith.cmpi eq, %arg2, %c0_i32 : i32
    %1 = arith.extui %0 : i1 to i32
    %c0_i32_0 = arith.constant 0 : i32
    %2 = arith.cmpi ne, %1, %c0_i32_0 : i32
    scf.if %2 {
      %cst_9 = arith.constant 0.000000e+00 : f32
      %12 = vector.broadcast %cst_9 : f32 to vector<2x512xf32>
      %c0_10 = arith.constant 0 : index
      %c0_11 = arith.constant 0 : index
      %13 = vector.load %arg7[%c0_10, %c0_11] : memref<2x512xf32, #tpu.memory_space<vmem>>, vector<2x512xf32>
      tpu.vector_store %arg7[%c0_10, %c0_11], %12 {strides = array<i32>} : memref<2x512xf32, #tpu.memory_space<vmem>>, vector<2x512xf32>,
    } else {
    }
    %c0 = arith.constant 0 : index
    %c0_1 = arith.constant 0 : index
    %3 = vector.load %arg7[%c0, %c0_1] : memref<2x512xf32, #tpu.memory_space<vmem>>, vector<2x512xf32>
    %c0_2 = arith.constant 0 : index
    %c0_3 = arith.constant 0 : index
    %4 = vector.load %arg3[%c0_2, %c0_3] : memref<2x2048xbf16, #tpu.memory_space<vmem>>, vector<2x2048xbf16>
    %c0_4 = arith.constant 0 : index
    %c0_5 = arith.constant 0 : index
    %5 = vector.load %arg4[%c0_4, %c0_5] : memref<2048x512xbf16, #tpu.memory_space<vmem>>, vector<2048x512xbf16>
    %cst = arith.constant dense<0.000000e+00> : vector<2x512xf32>
    %6 = tpu.matmul %4, %5, %cst {dimension_numbers = #tpu.dot_dimension_numbers<[1], [0], [0], [1], [0, 0, 1, 1], [], []>} : vector<2x2048xbf16>, vector<2048x512xbf16>, vector<2x512xf32> -> vector<2x512xf32>
    %7 = arith.addf %3, %6 : vector<2x512xf32>
    %c0_6 = arith.constant 0 : index
    %c0_7 = arith.constant 0 : index
    %8 = vector.load %arg7[%c0_6, %c0_7] : memref<2x512xf32, #tpu.memory_space<vmem>>, vector<2x512xf32>
    tpu.vector_store %arg7[%c0_6, %c0_7], %7 {strides = array<i32>} : memref<2x512xf32, #tpu.memory_space<vmem>>, vector<2x512xf32>,
    %c3_i32 = arith.constant 3 : i32
    %9 = arith.cmpi eq, %arg2, %c3_i32 : i32
    %10 = arith.extui %9 : i1 to i32
    %c0_i32_8 = arith.constant 0 : i32
    %11 = arith.cmpi ne, %10, %c0_i32_8 : i32
    scf.if %11 {
      %c0_9 = arith.constant 0 : index
      %c0_10 = arith.constant 0 : index
      %12 = vector.load %arg7[%c0_9, %c0_10] : memref<2x512xf32, #tpu.memory_space<vmem>>, vector<2x512xf32>
      %c0_11 = arith.constant 0 : index
      %c0_12 = arith.constant 0 : index
      %13 = vector.load %arg5[%c0_11, %c0_12] : memref<1x512xf32, #tpu.memory_space<vmem>>, vector<1x512xf32>
      %14 = vector.broadcast %13 : vector<1x512xf32> to vector<2x512xf32>
      %15 = arith.addf %12, %14 : vector<2x512xf32>
      %cst_13 = arith.constant 0.000000e+00 : f32
      %16 = vector.broadcast %cst_13 : f32 to vector<2x512xf32>
      %17 = arith.maximumf %15, %16 : vector<2x512xf32>
      %c0_14 = arith.constant 0 : index
      %c0_15 = arith.constant 0 : index
      %18 = vector.load %arg6[%c0_14, %c0_15] : memref<2x512xf32, #tpu.memory_space<vmem>>, vector<2x512xf32>
      tpu.vector_store %arg6[%c0_14, %c0_15], %17 {strides = array<i32>} : memref<2x512xf32, #tpu.memory_space<vmem>>, vector<2x512xf32>,
    } else {
    }
    return
  }
  func.func @transform_0(%arg0: i32, %arg1: i32, %arg2: i32) -> (i32, i32) {
    %c0_i32 = arith.constant 0 : i32
    return %arg0, %arg2 : i32, i32
  }
  func.func @transform_1(%arg0: i32, %arg1: i32, %arg2: i32) -> (i32, i32) {
    %c0_i32 = arith.constant 0 : i32
    return %arg2, %arg1 : i32, i32
  }
  func.func @transform_2(%arg0: i32, %arg1: i32, %arg2: i32) -> (i32, i32) {
    %c0_i32 = arith.constant 0 : i32
    %c0_i32_0 = arith.constant 0 : i32
    return %c0_i32, %arg1 : i32, i32
  }
  func.func @transform_3(%arg0: i32, %arg1: i32, %arg2: i32) -> (i32, i32) {
    %c0_i32 = arith.constant 0 : i32
    return %arg0, %arg1 : i32, i32
  }
}

module attributes {stable_mosaic.version = 11 : i64} {
  func.func @_matmul_kernel(%arg0: i32, %arg1: i32, %arg2: i32, %arg3: memref<2x512xbf16, #tpu.memory_space<vmem>>, %arg4: memref<512x30xbf16, #tpu.memory_space<vmem>>, %arg5: memref<1x30xf32, #tpu.memory_space<vmem>>, %arg6: memref<2x30xf32, #tpu.memory_space<vmem>>, %arg7: memref<2x30xf32, #tpu.memory_space<vmem>>) attributes {dimension_semantics = [#tpu.dimension_semantics<parallel>, #tpu.dimension_semantics<parallel>, #tpu.dimension_semantics<arbitrary>], iteration_bounds = array<i64: 1, 1, 1>, scalar_prefetch = 0 : i64, scratch_operands = 1 : i64, tpu.core_type = #tpu.core_type<tc>, window_params = [{transform_indices = @transform_0, window_bounds = array<i64: 2, 512>}, {transform_indices = @transform_1, window_bounds = array<i64: 512, 30>}, {transform_indices = @transform_2, window_bounds = array<i64: 1, 30>}, {transform_indices = @transform_3, window_bounds = array<i64: 2, 30>}]} {
    %c0_i32 = arith.constant 0 : i32
    %0 = arith.cmpi eq, %arg2, %c0_i32 : i32
    %1 = arith.extui %0 : i1 to i32
    %c0_i32_0 = arith.constant 0 : i32
    %2 = arith.cmpi ne, %1, %c0_i32_0 : i32
    scf.if %2 {
      %cst_10 = arith.constant 0.000000e+00 : f32
      %12 = vector.broadcast %cst_10 : f32 to vector<2x30xf32>
      %c0_11 = arith.constant 0 : index
      %c0_12 = arith.constant 0 : index
      %13 = vector.load %arg7[%c0_11, %c0_12] : memref<2x30xf32, #tpu.memory_space<vmem>>, vector<2x30xf32>
      tpu.vector_store %arg7[%c0_11, %c0_12], %12 {strides = array<i32>} : memref<2x30xf32, #tpu.memory_space<vmem>>, vector<2x30xf32>,
    } else {
    }
    %c0 = arith.constant 0 : index
    %c0_1 = arith.constant 0 : index
    %3 = vector.load %arg7[%c0, %c0_1] : memref<2x30xf32, #tpu.memory_space<vmem>>, vector<2x30xf32>
    %c0_2 = arith.constant 0 : index
    %c0_3 = arith.constant 0 : index
    %4 = vector.load %arg3[%c0_2, %c0_3] : memref<2x512xbf16, #tpu.memory_space<vmem>>, vector<2x512xbf16>
    %c0_4 = arith.constant 0 : index
    %c0_5 = arith.constant 0 : index
    %5 = vector.load %arg4[%c0_4, %c0_5] : memref<512x30xbf16, #tpu.memory_space<vmem>>, vector<512x30xbf16>
    %cst = arith.constant dense<0.000000e+00> : vector<2x30xf32>
    %6 = tpu.matmul %4, %5, %cst {dimension_numbers = #tpu.dot_dimension_numbers<[1], [0], [0], [1], [0, 0, 1, 1], [], []>} : vector<2x512xbf16>, vector<512x30xbf16>, vector<2x30xf32> -> vector<2x30xf32>
    %7 = arith.addf %3, %6 : vector<2x30xf32>
    %c0_6 = arith.constant 0 : index
    %c0_7 = arith.constant 0 : index
    %8 = vector.load %arg7[%c0_6, %c0_7] : memref<2x30xf32, #tpu.memory_space<vmem>>, vector<2x30xf32>
    tpu.vector_store %arg7[%c0_6, %c0_7], %7 {strides = array<i32>} : memref<2x30xf32, #tpu.memory_space<vmem>>, vector<2x30xf32>,
    %c0_i32_8 = arith.constant 0 : i32
    %9 = arith.cmpi eq, %arg2, %c0_i32_8 : i32
    %10 = arith.extui %9 : i1 to i32
    %c0_i32_9 = arith.constant 0 : i32
    %11 = arith.cmpi ne, %10, %c0_i32_9 : i32
    scf.if %11 {
      %c0_10 = arith.constant 0 : index
      %c0_11 = arith.constant 0 : index
      %12 = vector.load %arg7[%c0_10, %c0_11] : memref<2x30xf32, #tpu.memory_space<vmem>>, vector<2x30xf32>
      %c0_12 = arith.constant 0 : index
      %c0_13 = arith.constant 0 : index
      %13 = vector.load %arg5[%c0_12, %c0_13] : memref<1x30xf32, #tpu.memory_space<vmem>>, vector<1x30xf32>
      %14 = vector.broadcast %13 : vector<1x30xf32> to vector<2x30xf32>
      %15 = arith.addf %12, %14 : vector<2x30xf32>
      %c0_14 = arith.constant 0 : index
      %c0_15 = arith.constant 0 : index
      %16 = vector.load %arg6[%c0_14, %c0_15] : memref<2x30xf32, #tpu.memory_space<vmem>>, vector<2x30xf32>
      tpu.vector_store %arg6[%c0_14, %c0_15], %15 {strides = array<i32>} : memref<2x30xf32, #tpu.memory_space<vmem>>, vector<2x30xf32>,
    } else {
    }
    return
  }
  func.func @transform_0(%arg0: i32, %arg1: i32, %arg2: i32) -> (i32, i32) {
    %c0_i32 = arith.constant 0 : i32
    return %arg0, %arg2 : i32, i32
  }
  func.func @transform_1(%arg0: i32, %arg1: i32, %arg2: i32) -> (i32, i32) {
    %c0_i32 = arith.constant 0 : i32
    return %arg2, %arg1 : i32, i32
  }
  func.func @transform_2(%arg0: i32, %arg1: i32, %arg2: i32) -> (i32, i32) {
    %c0_i32 = arith.constant 0 : i32
    %c0_i32_0 = arith.constant 0 : i32
    return %c0_i32, %arg1 : i32, i32
  }
  func.func @transform_3(%arg0: i32, %arg1: i32, %arg2: i32) -> (i32, i32) {
    %c0_i32 = arith.constant 0 : i32
    return %arg0, %arg1 : i32, i32
  }
}

</mosaic_0001>

<bundles_post_ra>
// kernel: forward.31
= control target key start
LH: loop header
LB: loop body
LE: loop exit
PB: predicated region body
PF: predicated region fallthrough
CT: control target
= control target key end

     0   :  { %s3100_s0 = inlined_call_operand.vmem [shape: f32[8,512], index: 0, kind: input, shape index: {}]   ;;  %s3101_s2 = inlined_call_operand.vmem [shape: bf16[512,1024], index: 2, kind: input, shape index: {}]   ;;  %s3102_s1 = inlined_call_operand.vmem [shape: f32[1,512], index: 1, kind: input, shape index: {}]   ;;  %s3103_s3 = inlined_call_operand.vmem [shape: f32[8,1024], index: 3, kind: output, shape index: {}]  }
   0x1   :  { %v2230_v0 = vld [vmem:[%s3100_s0] sm:$0xff]  ;;  %v2235_v1 = vld [vmem:[%s3100_s0 + $0x8] sm:$0xff]  ;;  %v2240_v2 = vld [vmem:[%s3100_s0 + $0x10] sm:$0xff] }
   0x2   :  { %v2245_v3 = vld [vmem:[%s3100_s0 + $0x18] sm:$0xff]  ;;  %v18_v4 = vmul.f32 %v2230_v0, %v2230_v0  ;;  %v19_v5 = vmul.f32 %v2235_v1, %v2235_v1  ;;  %v20_v6 = vmul.f32 %v2240_v2, %v2240_v2  ;;  %v127_v7 = vld [vmem:[%s3101_s2 + $0x1c0] sm:$0xff] }
   0x3   :  { %v131_v8 = vld [vmem:[%s3101_s2 + $0x1e0] sm:$0xff]  ;;  %v21_v14 = vmul.f32 %v2245_v3, %v2245_v3 }
   0x4   :  { %v2004_v9 = vcombine.high %v127_v7, %v131_v8  ;;  %v255_v10 = vld [vmem:[%s3101_s2 + $0x5c0] sm:$0xff]  ;;  %v2003_v12 = vcombine.low %v127_v7, %v131_v8  ;;  %v22_v15 = vadd.f32 %v19_v5, %v18_v4 }
   0x5   :  { %v259_v11 = vld [vmem:[%s3101_s2 + $0x5e0] sm:$0xff] }
   0x6   :  { %v119_v13 = vld [vmem:[%s3101_s2 + $0x180] sm:$0xff]  ;;  %v2132_v16 = vcombine.high %v255_v10, %v259_v11  ;;  %v2131_v17 = vcombine.low %v255_v10, %v259_v11  ;;  %1607 = vmatprep.subr.bf16.mxu0 %v2004_v9  ;;  %v23_v26 = vadd.f32 %v22_v15, %v20_v6 }
   0x7   :  { %v123_v18 = vld [vmem:[%s3101_s2 + $0x1a0] sm:$0xff]  ;;  %1608 = vmatpush1.bf16.msra.mxu0 %v2003_v12 }
   0x8   :  { %v247_v19 = vld [vmem:[%s3101_s2 + $0x580] sm:$0xff]  ;;  %v1996_v21 = vcombine.high %v119_v13, %v123_v18  ;;  %1648 = vmatprep.subr.bf16.mxu1 %v2132_v16  ;;  %v1995_v27 = vcombine.low %v119_v13, %v123_v18  ;;  %v24_v31 = vadd.f32 %v23_v26, %v21_v14 }
   0x9   :  { %v251_v20 = vld [vmem:[%s3101_s2 + $0x5a0] sm:$0xff]  ;;  %1649 = vmatpush1.bf16.msra.mxu1 %v2131_v17 }
   0xa   :  { %v2124_v22 = vcombine.high %v247_v19, %v251_v20  ;;  %v111_v23 = vld [vmem:[%s3101_s2 + $0x140] sm:$0xff]  ;;  %1609 = vmatprep.subr.bf16.mxu0 %v1996_v21  ;;  %v2123_v29 = vcombine.low %v247_v19, %v251_v20  ;;  %25 = vadd.xlane.f32.xlu0 %v24_v31 }
   0xb   :  { %v115_v24 = vld [vmem:[%s3101_s2 + $0x160] sm:$0xff]  ;;  %1610 = vmatpush1.bf16.msra.mxu0 %v1995_v27 }
   0xc   :  { %v239_v25 = vld [vmem:[%s3101_s2 + $0x540] sm:$0xff]  ;;  %v1988_v30 = vcombine.high %v111_v23, %v115_v24  ;;  %1650 = vmatprep.subr.bf16.mxu1 %v2124_v22  ;;  %v1987_v37 = vcombine.low %v111_v23, %v115_v24 }
   0xd   :  { %v243_v28 = vld [vmem:[%s3101_s2 + $0x560] sm:$0xff]  ;;  %1651 = vmatpush1.bf16.msra.mxu1 %v2123_v29 }
   0xe   :  { %v2116_v32 = vcombine.high %v239_v25, %v243_v28  ;;  %v103_v33 = vld [vmem:[%s3101_s2 + $0x100] sm:$0xff]  ;;  %1611 = vmatprep.subr.bf16.mxu0 %v1988_v30  ;;  %v2115_v38 = vcombine.low %v239_v25, %v243_v28 }
   0xf   :  { %v107_v34 = vld [vmem:[%s3101_s2 + $0x120] sm:$0xff]  ;;  %1612 = vmatpush1.bf16.msra.mxu0 %v1987_v37 }
  0x10   :  { %v231_v35 = vld [vmem:[%s3101_s2 + $0x500] sm:$0xff]  ;;  %v1980_v39 = vcombine.high %v103_v33, %v107_v34  ;;  %1652 = vmatprep.subr.bf16.mxu1 %v2116_v32  ;;  %v1979_v45 = vcombine.low %v103_v33, %v107_v34 }
  0x11   :  { %v235_v36 = vld [vmem:[%s3101_s2 + $0x520] sm:$0xff]  ;;  %1653 = vmatpush1.bf16.msra.mxu1 %v2115_v38 }
  0x12   :  { %v2108_v40 = vcombine.high %v231_v35, %v235_v36  ;;  %v95_v41 = vld [vmem:[%s3101_s2 + $0xc0] sm:$0xff]  ;;  %1613 = vmatprep.subr.bf16.mxu0 %v1980_v39  ;;  %v2107_v46 = vcombine.low %v231_v35, %v235_v36 }
  0x13   :  { %v99_v42 = vld [vmem:[%s3101_s2 + $0xe0] sm:$0xff]  ;;  %1614 = vmatpush1.bf16.msra.mxu0 %v1979_v45 }
  0x14   :  { %v223_v43 = vld [vmem:[%s3101_s2 + $0x4c0] sm:$0xff]  ;;  %v1972_v47 = vcombine.high %v95_v41, %v99_v42  ;;  %1654 = vmatprep.subr.bf16.mxu1 %v2108_v40  ;;  %v1971_v53 = vcombine.low %v95_v41, %v99_v42 }
  0x15   :  { %v227_v44 = vld [vmem:[%s3101_s2 + $0x4e0] sm:$0xff]  ;;  %1655 = vmatpush1.bf16.msra.mxu1 %v2107_v46 }
  0x16   :  { %v2100_v48 = vcombine.high %v223_v43, %v227_v44  ;;  %v87_v49 = vld [vmem:[%s3101_s2 + $0x80] sm:$0xff]  ;;  %1615 = vmatprep.subr.bf16.mxu0 %v1972_v47  ;;  %v2099_v54 = vcombine.low %v223_v43, %v227_v44 }
  0x17   :  { %v91_v50 = vld [vmem:[%s3101_s2 + $0xa0] sm:$0xff]  ;;  %1616 = vmatpush1.bf16.msra.mxu0 %v1971_v53 }
  0x18   :  { %v215_v51 = vld [vmem:[%s3101_s2 + $0x480] sm:$0xff]  ;;  %v1964_v55 = vcombine.high %v87_v49, %v91_v50  ;;  %1656 = vmatprep.subr.bf16.mxu1 %v2100_v48  ;;  %v1963_v61 = vcombine.low %v87_v49, %v91_v50 }
  0x19   :  { %v219_v52 = vld [vmem:[%s3101_s2 + $0x4a0] sm:$0xff]  ;;  %1657 = vmatpush1.bf16.msra.mxu1 %v2099_v54 }
  0x1a   :  { %v2092_v56 = vcombine.high %v215_v51, %v219_v52  ;;  %v79_v57 = vld [vmem:[%s3101_s2 + $0x40] sm:$0xff]  ;;  %1617 = vmatprep.subr.bf16.mxu0 %v1964_v55  ;;  %v2091_v62 = vcombine.low %v215_v51, %v219_v52 }
  0x1b   :  { %v83_v58 = vld [vmem:[%s3101_s2 + $0x60] sm:$0xff]  ;;  %1618 = vmatpush1.bf16.msra.mxu0 %v1963_v61 }
  0x1c   :  { %v207_v59 = vld [vmem:[%s3101_s2 + $0x440] sm:$0xff]  ;;  %v1956_v63 = vcombine.high %v79_v57, %v83_v58  ;;  %1658 = vmatprep.subr.bf16.mxu1 %v2092_v56  ;;  %v1955_v9 = vcombine.low %v79_v57, %v83_v58 }
  0x1d   :  { %v211_v60 = vld [vmem:[%s3101_s2 + $0x460] sm:$0xff]  ;;  %1659 = vmatpush1.bf16.msra.mxu1 %v2091_v62 }
  0x1e   :  { %v2084_v4 = vcombine.high %v207_v59, %v211_v60  ;;  %v71_v5 = vld [vmem:[%s3101_s2] sm:$0xff]  ;;  %1619 = vmatprep.subr.bf16.mxu0 %v1956_v63  ;;  %v2083_v10 = vcombine.low %v207_v59, %v211_v60 }
  0x1f   :  { %v75_v6 = vld [vmem:[%s3101_s2 + $0x20] sm:$0xff]  ;;  %1620 = vmatpush1.bf16.msra.mxu0 %v1955_v9 }
  0x20   :  { %v199_v7 = vld [vmem:[%s3101_s2 + $0x400] sm:$0xff]  ;;  %v1948_v11 = vcombine.high %v71_v5, %v75_v6  ;;  %1660 = vmatprep.subr.bf16.mxu1 %v2084_v4  ;;  %v1947_v17 = vcombine.low %v71_v5, %v75_v6 }
  0x21   :  { %v203_v8 = vld [vmem:[%s3101_s2 + $0x420] sm:$0xff]  ;;  %1661 = vmatpush1.bf16.msra.mxu1 %v2083_v10 }
  0x22   :  { %v2076_v12 = vcombine.high %v199_v7, %v203_v8  ;;  %v191_v13 = vld [vmem:[%s3101_s2 + $0x3c0] sm:$0xff]  ;;  %1621 = vmatprep.subr.bf16.mxu0 %v1948_v11  ;;  %v2075_v18 = vcombine.low %v199_v7, %v203_v8 }
  0x23   :  { %v195_v14 = vld [vmem:[%s3101_s2 + $0x3e0] sm:$0xff]  ;;  %1622 = vmatpush1.bf16.msra.mxu0 %v1947_v17 }
  0x24   :  { %v319_v15 = vld [vmem:[%s3101_s2 + $0x7c0] sm:$0xff]  ;;  %v2068_v19 = vcombine.high %v191_v13, %v195_v14  ;;  %1662 = vmatprep.subr.bf16.mxu1 %v2076_v12  ;;  %v2067_v25 = vcombine.low %v191_v13, %v195_v14  ;;  %v2450_v13 = vld [vmem:[%s3101_s2 + $0x1c8] sm:$0xff] }
  0x25   :  { %v323_v16 = vld [vmem:[%s3101_s2 + $0x7e0] sm:$0xff]  ;;  %1663 = vmatpush1.bf16.msra.mxu1 %v2075_v18  ;;  %v2455_v14 = vld [vmem:[%s3101_s2 + $0x1e8] sm:$0xff] }
  0x26   :  { %v2196_v20 = vcombine.high %v319_v15, %v323_v16  ;;  %v183_v21 = vld [vmem:[%s3101_s2 + $0x380] sm:$0xff]  ;;  %1623 = vmatprep.subr.bf16.mxu0 %v2068_v19  ;;  %v2195_v26 = vcombine.low %v319_v15, %v323_v16  ;;  %v2460_v15 = vld [vmem:[%s3101_s2 + $0x5c8] sm:$0xff] }
  0x27   :  { %v187_v22 = vld [vmem:[%s3101_s2 + $0x3a0] sm:$0xff]  ;;  %1624 = vmatpush2.bf16.msra.mxu0 %v2067_v25  ;;  %v2465_v18 = vld [vmem:[%s3101_s2 + $0x5e8] sm:$0xff]  ;;  %v2006_v25 = vcombine.high %v2450_v13, %v2455_v14 }
  0x28   :  { %v311_v23 = vld [vmem:[%s3101_s2 + $0x780] sm:$0xff]  ;;  %v2060_v27 = vcombine.high %v183_v21, %v187_v22  ;;  %1664 = vmatprep.subr.bf16.mxu1 %v2196_v20  ;;  %v2059_v33 = vcombine.low %v183_v21, %v187_v22  ;;  %v2005_v20 = vcombine.low %v2450_v13, %v2455_v14  ;;  %v2133_v21 = vcombine.low %v2460_v15, %v2465_v18 }
  0x29   :  { %v315_v24 = vld [vmem:[%s3101_s2 + $0x7a0] sm:$0xff]  ;;  %1665 = vmatpush2.bf16.msra.mxu1 %v2195_v26  ;;  %v2134_v26 = vcombine.high %v2460_v15, %v2465_v18  ;;  %v100_v18 = vld [vmem:[%s3101_s2 + $0xe8] sm:$0xff] }
  0x2a   :  { %v2188_v28 = vcombine.high %v311_v23, %v315_v24  ;;  %v175_v29 = vld [vmem:[%s3101_s2 + $0x340] sm:$0xff]  ;;  %1625 = vmatprep.subr.bf16.mxu0 %v2060_v27  ;;  %v2187_v34 = vcombine.low %v311_v23, %v315_v24 }
  0x2b   :  { %v179_v30 = vld [vmem:[%s3101_s2 + $0x360] sm:$0xff]  ;;  %1626 = vmatpush2.bf16.msra.mxu0 %v2059_v33 }
  0x2c   :  { %v303_v31 = vld [vmem:[%s3101_s2 + $0x740] sm:$0xff]  ;;  %v2052_v35 = vcombine.high %v175_v29, %v179_v30  ;;  %1666 = vmatprep.subr.bf16.mxu1 %v2188_v28  ;;  %v2051_v41 = vcombine.low %v175_v29, %v179_v30 }
  0x2d   :  { %v307_v32 = vld [vmem:[%s3101_s2 + $0x760] sm:$0xff]  ;;  %1667 = vmatpush2.bf16.msra.mxu1 %v2187_v34  ;;  %v43_v34 = vlaneseq }
  0x2e   :  { %v2180_v36 = vcombine.high %v303_v31, %v307_v32  ;;  %v167_v37 = vld [vmem:[%s3101_s2 + $0x300] sm:$0xff]  ;;  %1627 = vmatprep.subr.bf16.mxu0 %v2052_v35  ;;  %v2179_v42 = vcombine.low %v303_v31, %v307_v32 }
  0x2f   :  { %v171_v38 = vld [vmem:[%s3101_s2 + $0x320] sm:$0xff]  ;;  %1628 = vmatpush2.bf16.msra.mxu0 %v2051_v41 }
  0x30   :  { %v295_v39 = vld [vmem:[%s3101_s2 + $0x700] sm:$0xff]  ;;  %v2044_v43 = vcombine.high %v167_v37, %v171_v38  ;;  %1668 = vmatprep.subr.bf16.mxu1 %v2180_v36  ;;  %v2043_v49 = vcombine.low %v167_v37, %v171_v38  ;;  %v44_v36 = vshrl.u32 %v43_v34, 7  ;;  %v84_v34 = vld [vmem:[%s3101_s2 + $0x68] sm:$0xff] }
  0x31   :  { %v299_v40 = vld [vmem:[%s3101_s2 + $0x720] sm:$0xff]  ;;  %1669 = vmatpush2.bf16.msra.mxu1 %v2179_v42 }
  0x32   :  { %v2172_v44 = vcombine.high %v295_v39, %v299_v40  ;;  %v159_v45 = vld [vmem:[%s3101_s2 + $0x2c0] sm:$0xff]  ;;  %1629 = vmatprep.subr.bf16.mxu0 %v2044_v43  ;;  %v2171_v50 = vcombine.low %v295_v39, %v299_v40  ;;  %v49_v38 = vsub.s32 1, %v44_v36  ;;  %v57_v39 = vsub.s32 3, %v44_v36 }
  0x33   :  { %v163_v46 = vld [vmem:[%s3101_s2 + $0x2e0] sm:$0xff]  ;;  %1630 = vmatpush2.bf16.msra.mxu0 %v2043_v49  ;;  %v45_v40 = vsub.s32 0, %v44_v36  ;;  %v53_v41 = vsub.s32 2, %v44_v36  ;;  %v212_v36 = vld [vmem:[%s3101_s2 + $0x468] sm:$0xff] }
  0x34   :  { %v287_v47 = vld [vmem:[%s3101_s2 + $0x6c0] sm:$0xff]  ;;  %v2036_v51 = vcombine.high %v159_v45, %v163_v46  ;;  %1670 = vmatprep.subr.bf16.mxu1 %v2172_v44  ;;  %v2035_v57 = vcombine.low %v159_v45, %v163_v46 }
  0x35   :  { %v291_v48 = vld [vmem:[%s3101_s2 + $0x6e0] sm:$0xff]  ;;  %1671 = vmatpush2.bf16.msra.mxu1 %v2171_v50 }
  0x36   :  { %v2164_v52 = vcombine.high %v287_v47, %v291_v48  ;;  %v151_v53 = vld [vmem:[%s3101_s2 + $0x280] sm:$0xff]  ;;  %1631 = vmatprep.subr.bf16.mxu0 %v2036_v51  ;;  %v2163_v58 = vcombine.low %v287_v47, %v291_v48 }
  0x37   :  { %v155_v54 = vld [vmem:[%s3101_s2 + $0x2a0] sm:$0xff]  ;;  %1632 = vmatpush2.bf16.msra.mxu0 %v2035_v57 }
  0x38   :  { %v279_v55 = vld [vmem:[%s3101_s2 + $0x680] sm:$0xff]  ;;  %v2028_v59 = vcombine.high %v151_v53, %v155_v54  ;;  %1672 = vmatprep.subr.bf16.mxu1 %v2164_v52  ;;  %v2027_v5 = vcombine.low %v151_v53, %v155_v54 }
  0x39   :  { %v283_v56 = vld [vmem:[%s3101_s2 + $0x6a0] sm:$0xff]  ;;  %1673 = vmatpush2.bf16.msra.mxu1 %v2163_v58 }
  0x3a   :  { %v2156_v60 = vcombine.high %v279_v55, %v283_v56  ;;  %v143_v61 = vld [vmem:[%s3101_s2 + $0x240] sm:$0xff]  ;;  %1633 = vmatprep.subr.bf16.mxu0 %v2028_v59  ;;  %v2155_v6 = vcombine.low %v279_v55, %v283_v56  ;;  %v120_v55 = vld [vmem:[%s3101_s2 + $0x188] sm:$0xff] }
  0x3b   :  { %v147_v62 = vld [vmem:[%s3101_s2 + $0x260] sm:$0xff]  ;;  %1634 = vmatpush2.bf16.msra.mxu0 %v2027_v5  ;;  %v124_v56 = vld [vmem:[%s3101_s2 + $0x1a8] sm:$0xff] }
  0x3c   :  { %v271_v63 = vld [vmem:[%s3101_s2 + $0x640] sm:$0xff]  ;;  %v2020_v7 = vcombine.high %v143_v61, %v147_v62  ;;  %1674 = vmatprep.subr.bf16.mxu1 %v2156_v60  ;;  %v2019_v16 = vcombine.low %v143_v61, %v147_v62  ;;  %v112_v59 = vld [vmem:[%s3101_s2 + $0x148] sm:$0xff]  ;;  %v1998_v60 = vcombine.high %v120_v55, %v124_v56  ;;  %v1997_v5 = vcombine.low %v120_v55, %v124_v56 }
  0x3d   :  { %v275_v4 = vld [vmem:[%s3101_s2 + $0x660] sm:$0xff]  ;;  %1675 = vmatpush2.bf16.msra.mxu1 %v2155_v6  ;;  %v116_v62 = vld [vmem:[%s3101_s2 + $0x168] sm:$0xff] }
  0x3e   :  { %v135_v8 = vld [vmem:[%s3101_s2 + $0x200] sm:$0xff]  ;;  %v2148_v9 = vcombine.high %v271_v63, %v275_v4  ;;  %v2147_v17 = vcombine.low %v271_v63, %v275_v4  ;;  %1635 = vmatprep.subr.bf16.mxu0 %v2020_v7  ;;  %v240_v63 = vld [vmem:[%s3101_s2 + $0x548] sm:$0xff]  ;;  %v1990_v7 = vcombine.high %v112_v59, %v116_v62  ;;  %v1989_v13 = vcombine.low %v112_v59, %v116_v62 }
  0x3f   :  { %v139_v10 = vld [vmem:[%s3101_s2 + $0x220] sm:$0xff]  ;;  %1636 = vmatpush2.bf16.msra.mxu0 %v2019_v16  ;;  %v244_v4 = vld [vmem:[%s3101_s2 + $0x568] sm:$0xff] }
  0x40   :  { %v263_v11 = vld [vmem:[%s3101_s2 + $0x600] sm:$0xff]  ;;  %v2012_v19 = vcombine.high %v135_v8, %v139_v10  ;;  %1676 = vmatprep.subr.bf16.mxu1 %v2148_v9  ;;  %v2011_v23 = vcombine.low %v135_v8, %v139_v10  ;;  %v2118_v8 = vcombine.high %v240_v63, %v244_v4  ;;  %v104_v9 = vld [vmem:[%s3101_s2 + $0x108] sm:$0xff]  ;;  %v2117_v14 = vcombine.low %v240_v63, %v244_v4 }
  0x41   :  { %v267_v12 = vld [vmem:[%s3101_s2 + $0x620] sm:$0xff]  ;;  %1677 = vmatpush2.bf16.msra.mxu1 %v2147_v17  ;;  %v108_v10 = vld [vmem:[%s3101_s2 + $0x128] sm:$0xff] }
  0x42   :  { %v2140_v22 = vcombine.high %v263_v11, %v267_v12  ;;  %1637 = vmatprep.subr.bf16.mxu0 %v2012_v19  ;;  %v2139_v24 = vcombine.low %v263_v11, %v267_v12  ;;  %v40_v35 = vld [vmem:[%s3102_s1] sm:$0xf]  ;;  %v232_v11 = vld [vmem:[%s3101_s2 + $0x508] sm:$0xff]  ;;  %v1982_v15 = vcombine.high %v104_v9, %v108_v10 }
  0x43   :  { %1638 = vmatpush2.bf16.msra.mxu0 %v2011_v23  ;;  %v41_v37 = vmul.f32 22.627417, %v40_v35  ;;  %v236_v12 = vld [vmem:[%s3101_s2 + $0x528] sm:$0xff] }
  0x44   :  { %1678 = vmatprep.subr.bf16.mxu1 %v2140_v22  ;;  %1689 = vmatprep.subr.bf16.mxu0 %v2006_v25  ;;  %v2110_v16 = vcombine.high %v232_v11, %v236_v12  ;;  %v96_v17 = vld [vmem:[%s3101_s2 + $0xc8] sm:$0xff]  ;;  %v2109_v22 = vcombine.low %v232_v11, %v236_v12 }
  0x45   :  { %1679 = vmatpush2.bf16.msra.mxu1 %v2139_v24  ;;  %v50_v42 = vrot.slane %v41_v37, %v49_v38  ;;  %v58_v43 = vrot.slane %v41_v37, %v57_v39  ;;  %v46_v44 = vrot.slane %v41_v37, %v45_v40  ;;  %v54_v45 = vrot.slane %v41_v37, %v53_v41  ;;  %v224_v19 = vld [vmem:[%s3101_s2 + $0x4c8] sm:$0xff] }
  0x46   :  { %1730 = vmatprep.subr.bf16.mxu1 %v2134_v26  ;;  %v1974_v23 = vcombine.high %v96_v17, %v100_v18  ;;  %v88_v25 = vld [vmem:[%s3101_s2 + $0x88] sm:$0xff] }
  0x47   :  { %v92_v26 = vld [vmem:[%s3101_s2 + $0xa8] sm:$0xff] }
  0x48   :  { %v208_v35 = vld [vmem:[%s3101_s2 + $0x448] sm:$0xff]  ;;  %v1965_v37 = vcombine.low %v88_v25, %v92_v26 }
  0x49   :  { %v2086_v40 = vcombine.high %v208_v35, %v212_v36  ;;  %v72_v41 = vld [vmem:[%s3101_s2 + $0x8] sm:$0xff] }
  0x4a   :  { %v312_v59 = vld [vmem:[%s3101_s2 + $0x788] sm:$0xff] }
  0x93   :  { %v26_v27 = vpop.xlane.xlu0 %25 }
  0x94   :  { %2203 = vrsqrt.f32 %v26_v27  ;;  %vm29_vm0 = vcmp.eq.f32.partialorder %v26_v27, inf  ;;  %v32_v30 = vand.u32 2147483648, %v26_v27  ;;  %vm31_vm1 = vcmp.eq.f32.partialorder %v26_v27, 0.0 }
  0xa1   :  { %v2204_v28 = vpop.eup %2203 }
  0xa2   :  { %v28_v29 = vmul.f32 %v2204_v28, %v26_v27  ;;  %v220_v28 = vld [vmem:[%s3101_s2 + $0x4a8] sm:$0xff] }
  0xa4   :  { %v30_v31 = vsel %vm29_vm0, %v26_v27, %v28_v29  ;;  %v216_v27 = vld [vmem:[%s3101_s2 + $0x488] sm:$0xff]  ;;  %v1973_v29 = vcombine.low %v96_v17, %v100_v18 }
  0xa5   :  { %v33_v32 = vsel %vm31_vm1, %v32_v30, %v30_v31  ;;  %v1966_v31 = vcombine.high %v88_v25, %v92_v26  ;;  %v2093_v38 = vcombine.low %v216_v27, %v220_v28 }
  0xa6   :  { %v34_v33 = vmax.f32 %v33_v32, 1e-12  ;;  %v2094_v32 = vcombine.high %v216_v27, %v220_v28 }
  0xa8   :  { %2205 = vrcp.f32 %v34_v33  ;;  %v80_v33 = vld [vmem:[%s3101_s2 + $0x48] sm:$0xff] }
  0xa9   :  { %v1958_v39 = vcombine.high %v80_v33, %v84_v34 }
  0xb5   :  { %v2206_v46 = vpop.eup %2205 }
  0xb6   :  { %v37_v47 = vmul.f32 %v2206_v46, %v2235_v1  ;;  %v39_v48 = vmul.f32 %v2206_v46, %v2245_v3  ;;  %v36_v49 = vmul.f32 %v2206_v46, %v2230_v0  ;;  %v38_v50 = vmul.f32 %v2206_v46, %v2240_v2  ;;  %v248_v1 = vld [vmem:[%s3101_s2 + $0x588] sm:$0xff] }
  0xb7   :  { %v252_v0 = vld [vmem:[%s3101_s2 + $0x5a8] sm:$0xff]  ;;  %v2085_v46 = vcombine.low %v208_v35, %v212_v36 }
  0xb8   :  { %v64_v51 = vmul.f32 %v50_v42, %v37_v47  ;;  %v66_v52 = vmul.f32 %v58_v43, %v39_v48  ;;  %v63_v53 = vmul.f32 %v46_v44, %v36_v49  ;;  %v65_v54 = vmul.f32 %v54_v45, %v38_v50  ;;  %v76_v42 = vld [vmem:[%s3101_s2 + $0x28] sm:$0xff] }
  0xb9   :  { %v2126_v61 = vcombine.high %v248_v1, %v252_v0  ;;  %v2125_v6 = vcombine.low %v248_v1, %v252_v0  ;;  %v200_v43 = vld [vmem:[%s3101_s2 + $0x408] sm:$0xff]  ;;  %v1957_v45 = vcombine.low %v80_v33, %v84_v34  ;;  %v1950_v47 = vcombine.high %v72_v41, %v76_v42 }
  0xba   :  { %v2494_v2 = vpack.c.bf16 %v64_v51, %v64_v51  ;;  %v2496_v3 = vpack.c.bf16 %v66_v52, %v66_v52  ;;  %v2498_v57 = vpack.c.bf16 %v63_v53, %v63_v53  ;;  %v2500_v58 = vpack.c.bf16 %v65_v54, %v65_v54  ;;  %v204_v44 = vld [vmem:[%s3101_s2 + $0x428] sm:$0xff] }
  0xbb   :  { %v2078_v48 = vcombine.high %v200_v43, %v204_v44  ;;  %v192_v49 = vld [vmem:[%s3101_s2 + $0x3c8] sm:$0xff]  ;;  %v1949_v53 = vcombine.low %v72_v41, %v76_v42  ;;  %v2077_v54 = vcombine.low %v200_v43, %v204_v44 }
  0xbc   :  { %1639 = vmatprep.mubr.bf16.mxu0 %v2494_v2  ;;  %1680 = vmatprep.mubr.bf16.mxu1 %v2496_v3  ;;  %v196_v50 = vld [vmem:[%s3101_s2 + $0x3e8] sm:$0xff] }
  0xbd   :  { %1640 = vmatmul.mubr.bf16.vlgmr.msra.gmra.mxu0 %v2498_v57  ;;  %1681 = vmatmul.mubr.bf16.vlgmr.msra.gmra.mxu1 %v2500_v58  ;;  %v320_v51 = vld [vmem:[%s3101_s2 + $0x7c8] sm:$0xff]  ;;  %v2070_v55 = vcombine.high %v192_v49, %v196_v50 }
  0xbe   :  { %1690 = vmatpush1.bf16.msra.mxu0 %v2005_v20  ;;  %1731 = vmatpush1.bf16.msra.mxu1 %v2133_v21  ;;  %v228_v20 = vld [vmem:[%s3101_s2 + $0x4e8] sm:$0xff]  ;;  %v1981_v21 = vcombine.low %v104_v9, %v108_v10 }
  0xbf   :  { %1721 = vmatprep.mubr.bf16.mxu0 %v2494_v2  ;;  %1762 = vmatprep.mubr.bf16.mxu1 %v2496_v3  ;;  %v2102_v24 = vcombine.high %v224_v19, %v228_v20  ;;  %v2101_v30 = vcombine.low %v224_v19, %v228_v20  ;;  %v324_v52 = vld [vmem:[%s3101_s2 + $0x7e8] sm:$0xff] }
  0xc0   :  { %1691 = vmatprep.subr.bf16.mxu0 %v1998_v60  ;;  %1732 = vmatprep.subr.bf16.mxu1 %v2126_v61  ;;  %v2198_v56 = vcombine.high %v320_v51, %v324_v52  ;;  %v184_v1 = vld [vmem:[%s3101_s2 + $0x388] sm:$0xff]  ;;  %v2069_v61 = vcombine.low %v192_v49, %v196_v50  ;;  %v2197_v62 = vcombine.low %v320_v51, %v324_v52 }
  0xc1   :  { %v188_v0 = vld [vmem:[%s3101_s2 + $0x3a8] sm:$0xff] }
  0xc2   :  { %1692 = vmatpush1.bf16.msra.mxu0 %v1997_v5  ;;  %1733 = vmatpush1.bf16.msra.mxu1 %v2125_v6  ;;  %v316_v60 = vld [vmem:[%s3101_s2 + $0x7a8] sm:$0xff]  ;;  %v2062_v63 = vcombine.high %v184_v1, %v188_v0  ;;  %v2061_v9 = vcombine.low %v184_v1, %v188_v0 }
  0xc3   :  { %1693 = vmatprep.subr.bf16.mxu0 %v1990_v7  ;;  %1734 = vmatprep.subr.bf16.mxu1 %v2118_v8  ;;  %v2190_v4 = vcombine.high %v312_v59, %v316_v60  ;;  %v176_v5 = vld [vmem:[%s3101_s2 + $0x348] sm:$0xff]  ;;  %v2189_v10 = vcombine.low %v312_v59, %v316_v60 }
  0xc4   :  { %v180_v6 = vld [vmem:[%s3101_s2 + $0x368] sm:$0xff] }
  0xc5   :  { %v304_v7 = vld [vmem:[%s3101_s2 + $0x748] sm:$0xff]  ;;  %v2054_v11 = vcombine.high %v176_v5, %v180_v6  ;;  %v2053_v17 = vcombine.low %v176_v5, %v180_v6 }
  0xc6   :  { %1694 = vmatpush1.bf16.msra.mxu0 %v1989_v13  ;;  %1735 = vmatpush1.bf16.msra.mxu1 %v2117_v14  ;;  %v308_v8 = vld [vmem:[%s3101_s2 + $0x768] sm:$0xff] }
  0xc7   :  { %1695 = vmatprep.subr.bf16.mxu0 %v1982_v15  ;;  %1736 = vmatprep.subr.bf16.mxu1 %v2110_v16  ;;  %v2182_v12 = vcombine.high %v304_v7, %v308_v8  ;;  %v168_v13 = vld [vmem:[%s3101_s2 + $0x308] sm:$0xff]  ;;  %v2181_v18 = vcombine.low %v304_v7, %v308_v8 }
  0xc8   :  { %v172_v14 = vld [vmem:[%s3101_s2 + $0x328] sm:$0xff] }
  0xc9   :  { %v296_v15 = vld [vmem:[%s3101_s2 + $0x708] sm:$0xff]  ;;  %v2046_v19 = vcombine.high %v168_v13, %v172_v14  ;;  %v2045_v25 = vcombine.low %v168_v13, %v172_v14 }
  0xca   :  { %1696 = vmatpush1.bf16.msra.mxu0 %v1981_v21  ;;  %1737 = vmatpush1.bf16.msra.mxu1 %v2109_v22  ;;  %v300_v16 = vld [vmem:[%s3101_s2 + $0x728] sm:$0xff] }
  0xcb   :  { %1697 = vmatprep.subr.bf16.mxu0 %v1974_v23  ;;  %1738 = vmatprep.subr.bf16.mxu1 %v2102_v24  ;;  %v2174_v20 = vcombine.high %v296_v15, %v300_v16  ;;  %v160_v21 = vld [vmem:[%s3101_s2 + $0x2c8] sm:$0xff]  ;;  %v2173_v26 = vcombine.low %v296_v15, %v300_v16 }
  0xcc   :  { %v164_v22 = vld [vmem:[%s3101_s2 + $0x2e8] sm:$0xff] }
  0xcd   :  { %v288_v23 = vld [vmem:[%s3101_s2 + $0x6c8] sm:$0xff]  ;;  %v2038_v27 = vcombine.high %v160_v21, %v164_v22  ;;  %v2037_v33 = vcombine.low %v160_v21, %v164_v22 }
  0xce   :  { %1698 = vmatpush1.bf16.msra.mxu0 %v1973_v29  ;;  %1739 = vmatpush1.bf16.msra.mxu1 %v2101_v30  ;;  %v292_v24 = vld [vmem:[%s3101_s2 + $0x6e8] sm:$0xff] }
  0xcf   :  { %1699 = vmatprep.subr.bf16.mxu0 %v1966_v31  ;;  %1740 = vmatprep.subr.bf16.mxu1 %v2094_v32  ;;  %v2166_v28 = vcombine.high %v288_v23, %v292_v24  ;;  %v152_v29 = vld [vmem:[%s3101_s2 + $0x288] sm:$0xff]  ;;  %v2165_v34 = vcombine.low %v288_v23, %v292_v24 }
  0xd0   :  { %v156_v30 = vld [vmem:[%s3101_s2 + $0x2a8] sm:$0xff] }
  0xd1   :  { %v280_v31 = vld [vmem:[%s3101_s2 + $0x688] sm:$0xff]  ;;  %v2030_v35 = vcombine.high %v152_v29, %v156_v30  ;;  %v2029_v41 = vcombine.low %v152_v29, %v156_v30 }
  0xd2   :  { %1700 = vmatpush1.bf16.msra.mxu0 %v1965_v37  ;;  %1741 = vmatpush1.bf16.msra.mxu1 %v2093_v38  ;;  %v284_v32 = vld [vmem:[%s3101_s2 + $0x6a8] sm:$0xff] }
  0xd3   :  { %1701 = vmatprep.subr.bf16.mxu0 %v1958_v39  ;;  %1742 = vmatprep.subr.bf16.mxu1 %v2086_v40  ;;  %v2158_v36 = vcombine.high %v280_v31, %v284_v32  ;;  %v144_v37 = vld [vmem:[%s3101_s2 + $0x248] sm:$0xff]  ;;  %v2157_v42 = vcombine.low %v280_v31, %v284_v32 }
  0xd4   :  { %v148_v38 = vld [vmem:[%s3101_s2 + $0x268] sm:$0xff] }
  0xd5   :  { %v272_v39 = vld [vmem:[%s3101_s2 + $0x648] sm:$0xff]  ;;  %v2022_v43 = vcombine.high %v144_v37, %v148_v38  ;;  %v2021_v49 = vcombine.low %v144_v37, %v148_v38 }
  0xd6   :  { %1702 = vmatpush1.bf16.msra.mxu0 %v1957_v45  ;;  %1743 = vmatpush1.bf16.msra.mxu1 %v2085_v46  ;;  %v276_v40 = vld [vmem:[%s3101_s2 + $0x668] sm:$0xff] }
  0xd7   :  { %1703 = vmatprep.subr.bf16.mxu0 %v1950_v47  ;;  %1744 = vmatprep.subr.bf16.mxu1 %v2078_v48  ;;  %v2150_v44 = vcombine.high %v272_v39, %v276_v40  ;;  %v136_v45 = vld [vmem:[%s3101_s2 + $0x208] sm:$0xff]  ;;  %v2149_v50 = vcombine.low %v272_v39, %v276_v40 }
  0xd8   :  { %v140_v46 = vld [vmem:[%s3101_s2 + $0x228] sm:$0xff] }
  0xd9   :  { %v264_v47 = vld [vmem:[%s3101_s2 + $0x608] sm:$0xff]  ;;  %v2014_v51 = vcombine.high %v136_v45, %v140_v46  ;;  %v2013_v1 = vcombine.low %v136_v45, %v140_v46 }
  0xda   :  { %1704 = vmatpush1.bf16.msra.mxu0 %v1949_v53  ;;  %1745 = vmatpush1.bf16.msra.mxu1 %v2077_v54  ;;  %v268_v48 = vld [vmem:[%s3101_s2 + $0x628] sm:$0xff]  ;;  %v129_v53 = vld [vmem:[%s3101_s2 + $0x1d0] sm:$0xff] }
  0xdb   :  { %1705 = vmatprep.subr.bf16.mxu0 %v2070_v55  ;;  %1746 = vmatprep.subr.bf16.mxu1 %v2198_v56  ;;  %v2142_v52 = vcombine.high %v264_v47, %v268_v48  ;;  %v133_v54 = vld [vmem:[%s3101_s2 + $0x1f0] sm:$0xff]  ;;  %v2141_v0 = vcombine.low %v264_v47, %v268_v48 }
  0xdc   :  { %v257_v55 = vld [vmem:[%s3101_s2 + $0x5d0] sm:$0xff]  ;;  %v2008_v59 = vcombine.high %v129_v53, %v133_v54  ;;  %v2007_v5 = vcombine.low %v129_v53, %v133_v54 }
  0xdd   :  { %v261_v56 = vld [vmem:[%s3101_s2 + $0x5f0] sm:$0xff] }
  0xde   :  { %1706 = vmatpush2.bf16.msra.mxu0 %v2069_v61  ;;  %1747 = vmatpush2.bf16.msra.mxu1 %v2197_v62  ;;  %v2136_v60 = vcombine.high %v257_v55, %v261_v56  ;;  %v121_v61 = vld [vmem:[%s3101_s2 + $0x190] sm:$0xff]  ;;  %v2135_v6 = vcombine.low %v257_v55, %v261_v56 }
  0xdf   :  { %1707 = vmatprep.subr.bf16.mxu0 %v2062_v63  ;;  %1748 = vmatprep.subr.bf16.mxu1 %v2190_v4  ;;  %v125_v62 = vld [vmem:[%s3101_s2 + $0x1b0] sm:$0xff] }
  0xe0   :  { %v249_v63 = vld [vmem:[%s3101_s2 + $0x590] sm:$0xff]  ;;  %v2000_v7 = vcombine.high %v121_v61, %v125_v62  ;;  %v1999_v13 = vcombine.low %v121_v61, %v125_v62 }
  0xe1   :  { %v253_v4 = vld [vmem:[%s3101_s2 + $0x5b0] sm:$0xff] }
  0xe2   :  { %1708 = vmatpush2.bf16.msra.mxu0 %v2061_v9  ;;  %1749 = vmatpush2.bf16.msra.mxu1 %v2189_v10  ;;  %v2128_v8 = vcombine.high %v249_v63, %v253_v4  ;;  %v113_v9 = vld [vmem:[%s3101_s2 + $0x150] sm:$0xff]  ;;  %v2127_v14 = vcombine.low %v249_v63, %v253_v4 }
  0xe3   :  { %1709 = vmatprep.subr.bf16.mxu0 %v2054_v11  ;;  %1750 = vmatprep.subr.bf16.mxu1 %v2182_v12  ;;  %v117_v10 = vld [vmem:[%s3101_s2 + $0x170] sm:$0xff] }
  0xe4   :  { %v241_v11 = vld [vmem:[%s3101_s2 + $0x550] sm:$0xff]  ;;  %v1992_v15 = vcombine.high %v113_v9, %v117_v10  ;;  %v1991_v21 = vcombine.low %v113_v9, %v117_v10 }
  0xe5   :  { %v245_v12 = vld [vmem:[%s3101_s2 + $0x570] sm:$0xff] }
  0xe6   :  { %1710 = vmatpush2.bf16.msra.mxu0 %v2053_v17  ;;  %1751 = vmatpush2.bf16.msra.mxu1 %v2181_v18  ;;  %v2120_v16 = vcombine.high %v241_v11, %v245_v12  ;;  %v105_v17 = vld [vmem:[%s3101_s2 + $0x110] sm:$0xff]  ;;  %v2119_v22 = vcombine.low %v241_v11, %v245_v12 }
  0xe7   :  { %1711 = vmatprep.subr.bf16.mxu0 %v2046_v19  ;;  %1752 = vmatprep.subr.bf16.mxu1 %v2174_v20  ;;  %v109_v18 = vld [vmem:[%s3101_s2 + $0x130] sm:$0xff] }
  0xe8   :  { %v233_v19 = vld [vmem:[%s3101_s2 + $0x510] sm:$0xff]  ;;  %v1984_v23 = vcombine.high %v105_v17, %v109_v18  ;;  %v1983_v29 = vcombine.low %v105_v17, %v109_v18 }
  0xe9   :  { %v237_v20 = vld [vmem:[%s3101_s2 + $0x530] sm:$0xff] }
  0xea   :  { %1712 = vmatpush2.bf16.msra.mxu0 %v2045_v25  ;;  %1753 = vmatpush2.bf16.msra.mxu1 %v2173_v26  ;;  %v2112_v24 = vcombine.high %v233_v19, %v237_v20  ;;  %v97_v25 = vld [vmem:[%s3101_s2 + $0xd0] sm:$0xff]  ;;  %v2111_v30 = vcombine.low %v233_v19, %v237_v20 }
  0xeb   :  { %1713 = vmatprep.subr.bf16.mxu0 %v2038_v27  ;;  %1754 = vmatprep.subr.bf16.mxu1 %v2166_v28  ;;  %v101_v26 = vld [vmem:[%s3101_s2 + $0xf0] sm:$0xff] }
  0xec   :  { %v225_v27 = vld [vmem:[%s3101_s2 + $0x4d0] sm:$0xff]  ;;  %v1976_v31 = vcombine.high %v97_v25, %v101_v26  ;;  %v1975_v37 = vcombine.low %v97_v25, %v101_v26 }
  0xed   :  { %v229_v28 = vld [vmem:[%s3101_s2 + $0x4f0] sm:$0xff] }
  0xee   :  { %1714 = vmatpush2.bf16.msra.mxu0 %v2037_v33  ;;  %1755 = vmatpush2.bf16.msra.mxu1 %v2165_v34  ;;  %v2104_v32 = vcombine.high %v225_v27, %v229_v28  ;;  %v89_v33 = vld [vmem:[%s3101_s2 + $0x90] sm:$0xff]  ;;  %v2103_v38 = vcombine.low %v225_v27, %v229_v28 }
  0xef   :  { %1715 = vmatprep.subr.bf16.mxu0 %v2030_v35  ;;  %1756 = vmatprep.subr.bf16.mxu1 %v2158_v36  ;;  %v93_v34 = vld [vmem:[%s3101_s2 + $0xb0] sm:$0xff] }
  0xf0   :  { %v217_v35 = vld [vmem:[%s3101_s2 + $0x490] sm:$0xff]  ;;  %v1968_v39 = vcombine.high %v89_v33, %v93_v34  ;;  %v1967_v45 = vcombine.low %v89_v33, %v93_v34 }
  0xf1   :  { %v221_v36 = vld [vmem:[%s3101_s2 + $0x4b0] sm:$0xff] }
  0xf2   :  { %1716 = vmatpush2.bf16.msra.mxu0 %v2029_v41  ;;  %1757 = vmatpush2.bf16.msra.mxu1 %v2157_v42  ;;  %v2096_v40 = vcombine.high %v217_v35, %v221_v36  ;;  %v81_v41 = vld [vmem:[%s3101_s2 + $0x50] sm:$0xff]  ;;  %v2095_v46 = vcombine.low %v217_v35, %v221_v36 }
  0xf3   :  { %1717 = vmatprep.subr.bf16.mxu0 %v2022_v43  ;;  %1758 = vmatprep.subr.bf16.mxu1 %v2150_v44  ;;  %v85_v42 = vld [vmem:[%s3101_s2 + $0x70] sm:$0xff] }
  0xf4   :  { %v209_v43 = vld [vmem:[%s3101_s2 + $0x450] sm:$0xff]  ;;  %v1960_v47 = vcombine.high %v81_v41, %v85_v42  ;;  %v1959_v53 = vcombine.low %v81_v41, %v85_v42 }
  0xf5   :  { %v213_v44 = vld [vmem:[%s3101_s2 + $0x470] sm:$0xff] }
  0xf6   :  { %1718 = vmatpush2.bf16.msra.mxu0 %v2021_v49  ;;  %1759 = vmatpush2.bf16.msra.mxu1 %v2149_v50  ;;  %v2088_v48 = vcombine.high %v209_v43, %v213_v44  ;;  %v73_v49 = vld [vmem:[%s3101_s2 + $0x10] sm:$0xff]  ;;  %v2087_v54 = vcombine.low %v209_v43, %v213_v44 }
  0xf7   :  { %1719 = vmatprep.subr.bf16.mxu0 %v2014_v51  ;;  %1760 = vmatprep.subr.bf16.mxu1 %v2142_v52  ;;  %v77_v50 = vld [vmem:[%s3101_s2 + $0x30] sm:$0xff] }
  0xf8   :  { %v201_v51 = vld [vmem:[%s3101_s2 + $0x410] sm:$0xff]  ;;  %v1952_v55 = vcombine.high %v73_v49, %v77_v50  ;;  %v1951_v61 = vcombine.low %v73_v49, %v77_v50 }
  0xf9   :  { %v205_v52 = vld [vmem:[%s3101_s2 + $0x430] sm:$0xff] }
  0xfa   :  { %1720 = vmatpush2.bf16.msra.mxu0 %v2013_v1  ;;  %1761 = vmatpush2.bf16.msra.mxu1 %v2141_v0  ;;  %v2080_v56 = vcombine.high %v201_v51, %v205_v52  ;;  %v193_v1 = vld [vmem:[%s3101_s2 + $0x3d0] sm:$0xff]  ;;  %v2079_v62 = vcombine.low %v201_v51, %v205_v52 }
  0xfb   :  { %1771 = vmatprep.subr.bf16.mxu0 %v2008_v59  ;;  %1812 = vmatprep.subr.bf16.mxu1 %v2136_v60  ;;  %v197_v0 = vld [vmem:[%s3101_s2 + $0x3f0] sm:$0xff] }
  0xfc   :  { %v321_v59 = vld [vmem:[%s3101_s2 + $0x7d0] sm:$0xff]  ;;  %v2072_v63 = vcombine.high %v193_v1, %v197_v0  ;;  %v2071_v9 = vcombine.low %v193_v1, %v197_v0 }
  0xfd   :  { %1722 = vmatmul.mubr.bf16.vlgmr.msra.gmra.mxu0 %v2498_v57  ;;  %1763 = vmatmul.mubr.bf16.vlgmr.msra.gmra.mxu1 %v2500_v58  ;;  %v325_v60 = vld [vmem:[%s3101_s2 + $0x7f0] sm:$0xff] }
  0xfe   :  { %1772 = vmatpush1.bf16.msra.mxu0 %v2007_v5  ;;  %1803 = vmatprep.mubr.bf16.mxu0 %v2494_v2  ;;  %v2200_v4 = vcombine.high %v321_v59, %v325_v60  ;;  %v185_v5 = vld [vmem:[%s3101_s2 + $0x390] sm:$0xff]  ;;  %v2199_v10 = vcombine.low %v321_v59, %v325_v60 }
  0xff   :  { %1813 = vmatpush1.bf16.msra.mxu1 %v2135_v6  ;;  %1844 = vmatprep.mubr.bf16.mxu1 %v2496_v3  ;;  %v189_v6 = vld [vmem:[%s3101_s2 + $0x3b0] sm:$0xff] }
 0x100   :  { %1773 = vmatprep.subr.bf16.mxu0 %v2000_v7  ;;  %1814 = vmatprep.subr.bf16.mxu1 %v2128_v8  ;;  %v313_v7 = vld [vmem:[%s3101_s2 + $0x790] sm:$0xff]  ;;  %v2064_v11 = vcombine.high %v185_v5, %v189_v6  ;;  %v2063_v17 = vcombine.low %v185_v5, %v189_v6 }
 0x101   :  { %v317_v8 = vld [vmem:[%s3101_s2 + $0x7b0] sm:$0xff] }
 0x102   :  { %1774 = vmatpush1.bf16.msra.mxu0 %v1999_v13  ;;  %v2192_v12 = vcombine.high %v313_v7, %v317_v8  ;;  %v177_v13 = vld [vmem:[%s3101_s2 + $0x350] sm:$0xff]  ;;  %v2191_v18 = vcombine.low %v313_v7, %v317_v8 }
 0x103   :  { %1815 = vmatpush1.bf16.msra.mxu1 %v2127_v14  ;;  %1775 = vmatprep.subr.bf16.mxu0 %v1992_v15  ;;  %v181_v14 = vld [vmem:[%s3101_s2 + $0x370] sm:$0xff] }
 0x104   :  { %1816 = vmatprep.subr.bf16.mxu1 %v2120_v16  ;;  %v305_v15 = vld [vmem:[%s3101_s2 + $0x750] sm:$0xff]  ;;  %v2056_v19 = vcombine.high %v177_v13, %v181_v14  ;;  %v2055_v25 = vcombine.low %v177_v13, %v181_v14  ;;  %v254_v13 = vld [vmem:[%s3101_s2 + $0x5b8] sm:$0xff] }
 0x105   :  { %v309_v16 = vld [vmem:[%s3101_s2 + $0x770] sm:$0xff] }
 0x106   :  { %1776 = vmatpush1.bf16.msra.mxu0 %v1991_v21  ;;  %v2184_v20 = vcombine.high %v305_v15, %v309_v16  ;;  %v169_v21 = vld [vmem:[%s3101_s2 + $0x310] sm:$0xff]  ;;  %v2183_v26 = vcombine.low %v305_v15, %v309_v16  ;;  %v114_v16 = vld [vmem:[%s3101_s2 + $0x158] sm:$0xff] }
 0x107   :  { %1817 = vmatpush1.bf16.msra.mxu1 %v2119_v22  ;;  %1777 = vmatprep.subr.bf16.mxu0 %v1984_v23  ;;  %v173_v22 = vld [vmem:[%s3101_s2 + $0x330] sm:$0xff] }
 0x108   :  { %1818 = vmatprep.subr.bf16.mxu1 %v2112_v24  ;;  %v297_v23 = vld [vmem:[%s3101_s2 + $0x710] sm:$0xff]  ;;  %v2048_v27 = vcombine.high %v169_v21, %v173_v22  ;;  %v2047_v33 = vcombine.low %v169_v21, %v173_v22 }
 0x109   :  { %v301_v24 = vld [vmem:[%s3101_s2 + $0x730] sm:$0xff] }
 0x10a   :  { %1778 = vmatpush1.bf16.msra.mxu0 %v1983_v29  ;;  %v2176_v28 = vcombine.high %v297_v23, %v301_v24  ;;  %v161_v29 = vld [vmem:[%s3101_s2 + $0x2d0] sm:$0xff]  ;;  %v2175_v34 = vcombine.low %v297_v23, %v301_v24 }
 0x10b   :  { %1819 = vmatpush1.bf16.msra.mxu1 %v2111_v30  ;;  %1779 = vmatprep.subr.bf16.mxu0 %v1976_v31  ;;  %v165_v30 = vld [vmem:[%s3101_s2 + $0x2f0] sm:$0xff] }
 0x10c   :  { %1820 = vmatprep.subr.bf16.mxu1 %v2104_v32  ;;  %v289_v31 = vld [vmem:[%s3101_s2 + $0x6d0] sm:$0xff]  ;;  %v2040_v35 = vcombine.high %v161_v29, %v165_v30  ;;  %v2039_v41 = vcombine.low %v161_v29, %v165_v30 }
 0x10d   :  { %v293_v32 = vld [vmem:[%s3101_s2 + $0x6f0] sm:$0xff] }
 0x10e   :  { %1780 = vmatpush1.bf16.msra.mxu0 %v1975_v37  ;;  %v2168_v36 = vcombine.high %v289_v31, %v293_v32  ;;  %v153_v37 = vld [vmem:[%s3101_s2 + $0x290] sm:$0xff]  ;;  %v2167_v42 = vcombine.low %v289_v31, %v293_v32  ;;  %v98_v31 = vld [vmem:[%s3101_s2 + $0xd8] sm:$0xff] }
 0x10f   :  { %1821 = vmatpush1.bf16.msra.mxu1 %v2103_v38  ;;  %1781 = vmatprep.subr.bf16.mxu0 %v1968_v39  ;;  %v157_v38 = vld [vmem:[%s3101_s2 + $0x2b0] sm:$0xff]  ;;  %v102_v32 = vld [vmem:[%s3101_s2 + $0xf8] sm:$0xff] }
 0x110   :  { %1822 = vmatprep.subr.bf16.mxu1 %v2096_v40  ;;  %v281_v39 = vld [vmem:[%s3101_s2 + $0x690] sm:$0xff]  ;;  %v2032_v43 = vcombine.high %v153_v37, %v157_v38  ;;  %v2031_v49 = vcombine.low %v153_v37, %v157_v38  ;;  %v1978_v37 = vcombine.high %v98_v31, %v102_v32 }
 0x111   :  { %v285_v40 = vld [vmem:[%s3101_s2 + $0x6b0] sm:$0xff] }
 0x112   :  { %1782 = vmatpush1.bf16.msra.mxu0 %v1967_v45  ;;  %v2160_v44 = vcombine.high %v281_v39, %v285_v40  ;;  %v145_v45 = vld [vmem:[%s3101_s2 + $0x250] sm:$0xff]  ;;  %v2159_v50 = vcombine.low %v281_v39, %v285_v40  ;;  %v90_v39 = vld [vmem:[%s3101_s2 + $0x98] sm:$0xff] }
 0x113   :  { %1823 = vmatpush1.bf16.msra.mxu1 %v2095_v46  ;;  %1783 = vmatprep.subr.bf16.mxu0 %v1960_v47  ;;  %v149_v46 = vld [vmem:[%s3101_s2 + $0x270] sm:$0xff]  ;;  %v94_v40 = vld [vmem:[%s3101_s2 + $0xb8] sm:$0xff] }
 0x114   :  { %1824 = vmatprep.subr.bf16.mxu1 %v2088_v48  ;;  %v273_v47 = vld [vmem:[%s3101_s2 + $0x650] sm:$0xff]  ;;  %v2024_v51 = vcombine.high %v145_v45, %v149_v46  ;;  %v2023_v1 = vcombine.low %v145_v45, %v149_v46  ;;  %v1970_v45 = vcombine.high %v90_v39, %v94_v40 }
 0x115   :  { %v277_v48 = vld [vmem:[%s3101_s2 + $0x670] sm:$0xff] }
 0x116   :  { %1784 = vmatpush1.bf16.msra.mxu0 %v1959_v53  ;;  %v2152_v52 = vcombine.high %v273_v47, %v277_v48  ;;  %v137_v53 = vld [vmem:[%s3101_s2 + $0x210] sm:$0xff]  ;;  %v2151_v0 = vcombine.low %v273_v47, %v277_v48  ;;  %v82_v47 = vld [vmem:[%s3101_s2 + $0x58] sm:$0xff] }
 0x117   :  { %1825 = vmatpush1.bf16.msra.mxu1 %v2087_v54  ;;  %1785 = vmatprep.subr.bf16.mxu0 %v1952_v55  ;;  %v141_v54 = vld [vmem:[%s3101_s2 + $0x230] sm:$0xff]  ;;  %v86_v48 = vld [vmem:[%s3101_s2 + $0x78] sm:$0xff] }
 0x118   :  { %1826 = vmatprep.subr.bf16.mxu1 %v2080_v56  ;;  %v265_v55 = vld [vmem:[%s3101_s2 + $0x610] sm:$0xff]  ;;  %v2016_v59 = vcombine.high %v137_v53, %v141_v54  ;;  %v2015_v5 = vcombine.low %v137_v53, %v141_v54  ;;  %v1962_v53 = vcombine.high %v82_v47, %v86_v48 }
 0x119   :  { %v269_v56 = vld [vmem:[%s3101_s2 + $0x630] sm:$0xff] }
 0x11a   :  { %1786 = vmatpush1.bf16.msra.mxu0 %v1951_v61  ;;  %v2144_v60 = vcombine.high %v265_v55, %v269_v56  ;;  %v130_v61 = vld [vmem:[%s3101_s2 + $0x1d8] sm:$0xff]  ;;  %v2143_v6 = vcombine.low %v265_v55, %v269_v56 }
 0x11b   :  { %1827 = vmatpush1.bf16.msra.mxu1 %v2079_v62  ;;  %1787 = vmatprep.subr.bf16.mxu0 %v2072_v63  ;;  %v134_v62 = vld [vmem:[%s3101_s2 + $0x1f8] sm:$0xff] }
 0x11c   :  { %1828 = vmatprep.subr.bf16.mxu1 %v2200_v4  ;;  %v258_v63 = vld [vmem:[%s3101_s2 + $0x5d8] sm:$0xff]  ;;  %v2010_v7 = vcombine.high %v130_v61, %v134_v62 }
 0x11d   :  { %v262_v4 = vld [vmem:[%s3101_s2 + $0x5f8] sm:$0xff] }
 0x11e   :  { %1788 = vmatpush2.bf16.msra.mxu0 %v2071_v9  ;;  %v2138_v8 = vcombine.high %v258_v63, %v262_v4  ;;  %v122_v9 = vld [vmem:[%s3101_s2 + $0x198] sm:$0xff]  ;;  %v2137_v14 = vcombine.low %v258_v63, %v262_v4 }
 0x11f   :  { %1829 = vmatpush2.bf16.msra.mxu1 %v2199_v10  ;;  %1789 = vmatprep.subr.bf16.mxu0 %v2064_v11  ;;  %v126_v10 = vld [vmem:[%s3101_s2 + $0x1b8] sm:$0xff]  ;;  %v2009_v11 = vcombine.low %v130_v61, %v134_v62 }
 0x120   :  { %1830 = vmatprep.subr.bf16.mxu1 %v2192_v12  ;;  %v250_v12 = vld [vmem:[%s3101_s2 + $0x598] sm:$0xff]  ;;  %v2002_v15 = vcombine.high %v122_v9, %v126_v10  ;;  %v2001_v21 = vcombine.low %v122_v9, %v126_v10 }
 0x121   :  { %v2129_v22 = vcombine.low %v250_v12, %v254_v13  ;;  %v74_v55 = vld [vmem:[%s3101_s2 + $0x18] sm:$0xff] }
 0x122   :  { %1790 = vmatpush2.bf16.msra.mxu0 %v2063_v17  ;;  %v118_v17 = vld [vmem:[%s3101_s2 + $0x178] sm:$0xff] }
 0x123   :  { %1831 = vmatpush2.bf16.msra.mxu1 %v2191_v18  ;;  %1791 = vmatprep.subr.bf16.mxu0 %v2056_v19  ;;  %v2130_v18 = vcombine.high %v250_v12, %v254_v13  ;;  %v242_v19 = vld [vmem:[%s3101_s2 + $0x558] sm:$0xff]  ;;  %v1994_v23 = vcombine.high %v114_v16, %v118_v17 }
 0x124   :  { %1832 = vmatprep.subr.bf16.mxu1 %v2184_v20  ;;  %v246_v20 = vld [vmem:[%s3101_s2 + $0x578] sm:$0xff] }
 0x125   :  { %v2122_v24 = vcombine.high %v242_v19, %v246_v20  ;;  %v78_v56 = vld [vmem:[%s3101_s2 + $0x38] sm:$0xff] }
 0x126   :  { %1792 = vmatpush2.bf16.msra.mxu0 %v2055_v25  ;;  %v106_v25 = vld [vmem:[%s3101_s2 + $0x118] sm:$0xff]  ;;  %v1954_v61 = vcombine.high %v74_v55, %v78_v56 }
 0x127   :  { %1833 = vmatpush2.bf16.msra.mxu1 %v2183_v26  ;;  %1793 = vmatprep.subr.bf16.mxu0 %v2048_v27  ;;  %v110_v26 = vld [vmem:[%s3101_s2 + $0x138] sm:$0xff] }
 0x128   :  { %1834 = vmatprep.subr.bf16.mxu1 %v2176_v28  ;;  %v238_v27 = vld [vmem:[%s3101_s2 + $0x538] sm:$0xff]  ;;  %v2121_v28 = vcombine.low %v242_v19, %v246_v20  ;;  %v1986_v29 = vcombine.high %v106_v25, %v110_v26 }
 0x129   :  { %v194_v63 = vld [vmem:[%s3101_s2 + $0x3d8] sm:$0xff] }
 0x12a   :  { %1794 = vmatpush2.bf16.msra.mxu0 %v2047_v33  ;;  %v226_v33 = vld [vmem:[%s3101_s2 + $0x4d8] sm:$0xff] }
 0x12b   :  { %1835 = vmatpush2.bf16.msra.mxu1 %v2175_v34  ;;  %1795 = vmatprep.subr.bf16.mxu0 %v2040_v35  ;;  %v230_v34 = vld [vmem:[%s3101_s2 + $0x4f8] sm:$0xff]  ;;  %v1985_v35 = vcombine.low %v106_v25, %v110_v26 }
 0x12c   :  { %1836 = vmatprep.subr.bf16.mxu1 %v2168_v36  ;;  %v2106_v38 = vcombine.high %v226_v33, %v230_v34  ;;  %v198_v4 = vld [vmem:[%s3101_s2 + $0x3f8] sm:$0xff] }
 0x12d   :  { %v2074_v9 = vcombine.high %v194_v63, %v198_v4  ;;  %v190_v12 = vld [vmem:[%s3101_s2 + $0x3b8] sm:$0xff] }
 0x12e   :  { %1796 = vmatpush2.bf16.msra.mxu0 %v2039_v41  ;;  %v218_v41 = vld [vmem:[%s3101_s2 + $0x498] sm:$0xff] }
 0x12f   :  { %1837 = vmatpush2.bf16.msra.mxu1 %v2167_v42  ;;  %1797 = vmatprep.subr.bf16.mxu0 %v2032_v43  ;;  %v222_v42 = vld [vmem:[%s3101_s2 + $0x4b8] sm:$0xff]  ;;  %v1977_v43 = vcombine.low %v98_v31, %v102_v32 }
 0x130   :  { %1838 = vmatprep.subr.bf16.mxu1 %v2160_v44  ;;  %v2105_v44 = vcombine.low %v226_v33, %v230_v34  ;;  %v2098_v46 = vcombine.high %v218_v41, %v222_v42  ;;  %v314_v13 = vld [vmem:[%s3101_s2 + $0x798] sm:$0xff] }
 0x131   :  { %v178_v19 = vld [vmem:[%s3101_s2 + $0x358] sm:$0xff] }
 0x132   :  { %1798 = vmatpush2.bf16.msra.mxu0 %v2031_v49  ;;  %v210_v49 = vld [vmem:[%s3101_s2 + $0x458] sm:$0xff] }
 0x133   :  { %1839 = vmatpush2.bf16.msra.mxu1 %v2159_v50  ;;  %1799 = vmatprep.subr.bf16.mxu0 %v2024_v51  ;;  %v214_v50 = vld [vmem:[%s3101_s2 + $0x478] sm:$0xff]  ;;  %v1969_v51 = vcombine.low %v90_v39, %v94_v40 }
 0x134   :  { %1840 = vmatprep.subr.bf16.mxu1 %v2152_v52  ;;  %v2097_v52 = vcombine.low %v218_v41, %v222_v42  ;;  %v2090_v54 = vcombine.high %v210_v49, %v214_v50  ;;  %v182_v20 = vld [vmem:[%s3101_s2 + $0x378] sm:$0xff] }
 0x135   :  { %v2058_v25 = vcombine.high %v178_v19, %v182_v20  ;;  %v162_v33 = vld [vmem:[%s3101_s2 + $0x2d8] sm:$0xff] }
 0x136   :  { %1800 = vmatpush2.bf16.msra.mxu0 %v2023_v1  ;;  %v202_v1 = vld [vmem:[%s3101_s2 + $0x418] sm:$0xff] }
 0x137   :  { %1841 = vmatpush2.bf16.msra.mxu1 %v2151_v0  ;;  %1801 = vmatprep.subr.bf16.mxu0 %v2016_v59  ;;  %v206_v0 = vld [vmem:[%s3101_s2 + $0x438] sm:$0xff]  ;;  %v1961_v59 = vcombine.low %v82_v47, %v86_v48 }
 0x138   :  { %1842 = vmatprep.subr.bf16.mxu1 %v2144_v60  ;;  %v2089_v60 = vcombine.low %v210_v49, %v214_v50  ;;  %v2082_v62 = vcombine.high %v202_v1, %v206_v0  ;;  %v166_v34 = vld [vmem:[%s3101_s2 + $0x2f8] sm:$0xff] }
 0x139   :  { %v2042_v39 = vcombine.high %v162_v33, %v166_v34  ;;  %v154_v41 = vld [vmem:[%s3101_s2 + $0x298] sm:$0xff] }
 0x13a   :  { %1802 = vmatpush2.bf16.msra.mxu0 %v2015_v5  ;;  %v322_v5 = vld [vmem:[%s3101_s2 + $0x7d8] sm:$0xff] }
 0x13b   :  { %1843 = vmatpush2.bf16.msra.mxu1 %v2143_v6  ;;  %1853 = vmatprep.subr.bf16.mxu0 %v2010_v7  ;;  %v326_v6 = vld [vmem:[%s3101_s2 + $0x7f8] sm:$0xff]  ;;  %v1953_v7 = vcombine.low %v74_v55, %v78_v56 }
 0x13c   :  { %1894 = vmatprep.subr.bf16.mxu1 %v2138_v8  ;;  %v2081_v8 = vcombine.low %v202_v1, %v206_v0  ;;  %v2202_v10 = vcombine.high %v322_v5, %v326_v6  ;;  %v158_v42 = vld [vmem:[%s3101_s2 + $0x2b8] sm:$0xff] }
 0x13d   :  { %1804 = vmatmul.mubr.bf16.vlgmr.msra.gmra.mxu0 %v2498_v57  ;;  %v2034_v47 = vcombine.high %v154_v41, %v158_v42  ;;  %v146_v49 = vld [vmem:[%s3101_s2 + $0x258] sm:$0xff] }
 0x13e   :  { %1845 = vmatmul.mubr.bf16.vlgmr.msra.gmra.mxu1 %v2500_v58  ;;  %1854 = vmatpush1.bf16.msra.mxu0 %v2009_v11  ;;  %v186_v11 = vld [vmem:[%s3101_s2 + $0x398] sm:$0xff] }
 0x13f   :  { %1885 = vmatprep.mubr.bf16.mxu0 %v2494_v2  ;;  %1895 = vmatpush1.bf16.msra.mxu1 %v2137_v14  ;;  %v234_v2 = vld [vmem:[%s3101_s2 + $0x518] sm:$0xff] }
 0x140   :  { %1926 = vmatprep.mubr.bf16.mxu1 %v2496_v3  ;;  %1855 = vmatprep.subr.bf16.mxu0 %v2002_v15  ;;  %v1993_v3 = vcombine.low %v114_v16, %v118_v17  ;;  %v2114_v30 = vcombine.high %v234_v2, %v238_v27  ;;  %v2113_v36 = vcombine.low %v234_v2, %v238_v27  ;;  %v318_v14 = vld [vmem:[%s3101_s2 + $0x7b8] sm:$0xff] }
 0x141   :  { %1896 = vmatprep.subr.bf16.mxu1 %v2130_v18  ;;  %v2073_v15 = vcombine.low %v194_v63, %v198_v4  ;;  %v2201_v16 = vcombine.low %v322_v5, %v326_v6  ;;  %v2066_v17 = vcombine.high %v186_v11, %v190_v12  ;;  %v2194_v18 = vcombine.high %v314_v13, %v318_v14  ;;  %v170_v2 = vld [vmem:[%s3101_s2 + $0x318] sm:$0xff] }
 0x142   :  { %1856 = vmatpush1.bf16.msra.mxu0 %v2001_v21  ;;  %v306_v21 = vld [vmem:[%s3101_s2 + $0x758] sm:$0xff] }
 0x143   :  { %1897 = vmatpush1.bf16.msra.mxu1 %v2129_v22  ;;  %1857 = vmatprep.subr.bf16.mxu0 %v1994_v23  ;;  %v310_v22 = vld [vmem:[%s3101_s2 + $0x778] sm:$0xff]  ;;  %v2065_v23 = vcombine.low %v186_v11, %v190_v12 }
 0x144   :  { %1898 = vmatprep.subr.bf16.mxu1 %v2122_v24  ;;  %v2193_v24 = vcombine.low %v314_v13, %v318_v14  ;;  %v2186_v26 = vcombine.high %v306_v21, %v310_v22  ;;  %v174_v27 = vld [vmem:[%s3101_s2 + $0x338] sm:$0xff] }
 0x145   :  { %v2050_v31 = vcombine.high %v170_v2, %v174_v27  ;;  %v150_v50 = vld [vmem:[%s3101_s2 + $0x278] sm:$0xff] }
 0x146   :  { %1858 = vmatpush1.bf16.msra.mxu0 %v1993_v3  ;;  %v298_v3 = vld [vmem:[%s3101_s2 + $0x718] sm:$0xff]  ;;  %v2026_v55 = vcombine.high %v146_v49, %v150_v50 }
 0x147   :  { %1899 = vmatpush1.bf16.msra.mxu1 %v2121_v28  ;;  %1859 = vmatprep.subr.bf16.mxu0 %v1986_v29  ;;  %v302_v28 = vld [vmem:[%s3101_s2 + $0x738] sm:$0xff]  ;;  %v2057_v29 = vcombine.low %v178_v19, %v182_v20 }
 0x148   :  { %1900 = vmatprep.subr.bf16.mxu1 %v2114_v30  ;;  %v2185_v30 = vcombine.low %v306_v21, %v310_v22  ;;  %v2178_v32 = vcombine.high %v298_v3, %v302_v28  ;;  %v138_v1 = vld [vmem:[%s3101_s2 + $0x218] sm:$0xff] }
 0x149   :  { %v142_v0 = vld [vmem:[%s3101_s2 + $0x238] sm:$0xff] }
 0x14a   :  { %1860 = vmatpush1.bf16.msra.mxu0 %v1985_v35  ;;  %v290_v35 = vld [vmem:[%s3101_s2 + $0x6d8] sm:$0xff]  ;;  %v2018_v63 = vcombine.high %v138_v1, %v142_v0  ;;  %v2017_v5 = vcombine.low %v138_v1, %v142_v0 }
 0x14b   :  { %1901 = vmatpush1.bf16.msra.mxu1 %v2113_v36  ;;  %1861 = vmatprep.subr.bf16.mxu0 %v1978_v37  ;;  %v294_v36 = vld [vmem:[%s3101_s2 + $0x6f8] sm:$0xff]  ;;  %v2049_v37 = vcombine.low %v170_v2, %v174_v27 }
 0x14c   :  { %1902 = vmatprep.subr.bf16.mxu1 %v2106_v38  ;;  %v2177_v38 = vcombine.low %v298_v3, %v302_v28  ;;  %v2170_v40 = vcombine.high %v290_v35, %v294_v36 }
 0x14e   :  { %1862 = vmatpush1.bf16.msra.mxu0 %v1977_v43  ;;  %v282_v43 = vld [vmem:[%s3101_s2 + $0x698] sm:$0xff] }
 0x14f   :  { %1903 = vmatpush1.bf16.msra.mxu1 %v2105_v44  ;;  %1863 = vmatprep.subr.bf16.mxu0 %v1970_v45  ;;  %v286_v44 = vld [vmem:[%s3101_s2 + $0x6b8] sm:$0xff]  ;;  %v2041_v45 = vcombine.low %v162_v33, %v166_v34 }
 0x150   :  { %1904 = vmatprep.subr.bf16.mxu1 %v2098_v46  ;;  %v2169_v46 = vcombine.low %v290_v35, %v294_v36  ;;  %v2162_v48 = vcombine.high %v282_v43, %v286_v44 }
 0x152   :  { %1864 = vmatpush1.bf16.msra.mxu0 %v1969_v51  ;;  %v274_v51 = vld [vmem:[%s3101_s2 + $0x658] sm:$0xff] }
 0x153   :  { %1905 = vmatpush1.bf16.msra.mxu1 %v2097_v52  ;;  %1865 = vmatprep.subr.bf16.mxu0 %v1962_v53  ;;  %v278_v52 = vld [vmem:[%s3101_s2 + $0x678] sm:$0xff]  ;;  %v2033_v53 = vcombine.low %v154_v41, %v158_v42 }
 0x154   :  { %1906 = vmatprep.subr.bf16.mxu1 %v2090_v54  ;;  %v2161_v54 = vcombine.low %v282_v43, %v286_v44  ;;  %v2154_v56 = vcombine.high %v274_v51, %v278_v52 }
 0x156   :  { %1866 = vmatpush1.bf16.msra.mxu0 %v1961_v59  ;;  %v266_v59 = vld [vmem:[%s3101_s2 + $0x618] sm:$0xff] }
 0x157   :  { %1907 = vmatpush1.bf16.msra.mxu1 %v2089_v60  ;;  %1867 = vmatprep.subr.bf16.mxu0 %v1954_v61  ;;  %v270_v60 = vld [vmem:[%s3101_s2 + $0x638] sm:$0xff]  ;;  %v2025_v61 = vcombine.low %v146_v49, %v150_v50 }
 0x158   :  { %1908 = vmatprep.subr.bf16.mxu1 %v2082_v62  ;;  %v2153_v62 = vcombine.low %v274_v51, %v278_v52  ;;  %v2146_v4 = vcombine.high %v266_v59, %v270_v60  ;;  %v2145_v6 = vcombine.low %v266_v59, %v270_v60 }
 0x15a   :  { %1868 = vmatpush1.bf16.msra.mxu0 %v1953_v7 }
 0x15b   :  { %1909 = vmatpush1.bf16.msra.mxu1 %v2081_v8  ;;  %1869 = vmatprep.subr.bf16.mxu0 %v2074_v9 }
 0x15c   :  { %1910 = vmatprep.subr.bf16.mxu1 %v2202_v10 }
 0x15e   :  { %1870 = vmatpush2.bf16.msra.mxu0 %v2073_v15 }
 0x15f   :  { %1911 = vmatpush2.bf16.msra.mxu1 %v2201_v16  ;;  %1871 = vmatprep.subr.bf16.mxu0 %v2066_v17 }
 0x160   :  { %1912 = vmatprep.subr.bf16.mxu1 %v2194_v18 }
 0x162   :  { %1872 = vmatpush2.bf16.msra.mxu0 %v2065_v23 }
 0x163   :  { %1913 = vmatpush2.bf16.msra.mxu1 %v2193_v24  ;;  %1873 = vmatprep.subr.bf16.mxu0 %v2058_v25 }
 0x164   :  { %1914 = vmatprep.subr.bf16.mxu1 %v2186_v26 }
 0x166   :  { %1874 = vmatpush2.bf16.msra.mxu0 %v2057_v29 }
 0x167   :  { %1915 = vmatpush2.bf16.msra.mxu1 %v2185_v30  ;;  %1875 = vmatprep.subr.bf16.mxu0 %v2050_v31 }
 0x168   :  { %1916 = vmatprep.subr.bf16.mxu1 %v2178_v32 }
 0x16a   :  { %1876 = vmatpush2.bf16.msra.mxu0 %v2049_v37 }
 0x16b   :  { %1917 = vmatpush2.bf16.msra.mxu1 %v2177_v38  ;;  %1877 = vmatprep.subr.bf16.mxu0 %v2042_v39 }
 0x16c   :  { %1918 = vmatprep.subr.bf16.mxu1 %v2170_v40 }
 0x16e   :  { %1878 = vmatpush2.bf16.msra.mxu0 %v2041_v45 }
 0x16f   :  { %1919 = vmatpush2.bf16.msra.mxu1 %v2169_v46  ;;  %1879 = vmatprep.subr.bf16.mxu0 %v2034_v47 }
 0x170   :  { %1920 = vmatprep.subr.bf16.mxu1 %v2162_v48 }
 0x172   :  { %1880 = vmatpush2.bf16.msra.mxu0 %v2033_v53 }
 0x173   :  { %1921 = vmatpush2.bf16.msra.mxu1 %v2161_v54  ;;  %1881 = vmatprep.subr.bf16.mxu0 %v2026_v55 }
 0x174   :  { %1922 = vmatprep.subr.bf16.mxu1 %v2154_v56 }
 0x176   :  { %1882 = vmatpush2.bf16.msra.mxu0 %v2025_v61 }
 0x177   :  { %1923 = vmatpush2.bf16.msra.mxu1 %v2153_v62  ;;  %1883 = vmatprep.subr.bf16.mxu0 %v2018_v63 }
 0x178   :  { %1924 = vmatprep.subr.bf16.mxu1 %v2146_v4 }
 0x17a   :  { %1884 = vmatpush2.bf16.msra.mxu0 %v2017_v5 }
 0x17b   :  { %1925 = vmatpush2.bf16.msra.mxu1 %v2145_v6 }
 0x17d   :  { %1886 = vmatmul.mubr.bf16.vlgmr.msra.gmra.mxu0 %v2498_v57  ;;  %v1641_v7 = vpop.f32.mrf.mxu0  ;;  %v1682_v8 = vpop.f32.mrf.mxu1 }
 0x17e   :  { %1927 = vmatmul.mubr.bf16.vlgmr.msra.gmra.mxu1 %v2500_v58  ;;  %v1683_v9 = vadd.f32 %v1682_v8, %v1641_v7 }
 0x17f   :  { %v1643_v10 = vpop.f32.mrf.mxu0  ;;  %v1684_v11 = vpop.f32.mrf.mxu1 }
 0x180   :  { %1935 = vst [vmem:[%s3103_s3] sm:$0xff] %v1683_v9  ;;  %v1685_v12 = vadd.f32 %v1684_v11, %v1643_v10 }
 0x181   :  { %v1645_v13 = vpop.f32.mrf.mxu0  ;;  %v1686_v14 = vpop.f32.mrf.mxu1 }
 0x182   :  { %1936 = vst [vmem:[%s3103_s3 + $0x8] sm:$0xff] %v1685_v12 }
 0x183   :  { %v1646_v15 = vpop.f32.mrf.mxu0  ;;  %v1687_v57 = vpop.f32.mrf.mxu1 }
 0x1bd   :  { %v1723_v16 = vpop.f32.mrf.mxu0  ;;  %v1764_v17 = vpop.f32.mrf.mxu1 }
 0x1be   :  { %v1765_v18 = vadd.f32 %v1764_v17, %v1723_v16 }
 0x1bf   :  { %v1725_v58 = vpop.f32.mrf.mxu0  ;;  %v1766_v19 = vpop.f32.mrf.mxu1 }
 0x1c0   :  { %1937 = vst [vmem:[%s3103_s3 + $0x10] sm:$0xff] %v1765_v18  ;;  %v1767_v20 = vadd.f32 %v1766_v19, %v1725_v58 }
 0x1c1   :  { %v1727_v21 = vpop.f32.mrf.mxu0  ;;  %v1768_v22 = vpop.f32.mrf.mxu1 }
 0x1c2   :  { %1938 = vst [vmem:[%s3103_s3 + $0x18] sm:$0xff] %v1767_v20 }
 0x1c3   :  { %v1728_v23 = vpop.f32.mrf.mxu0  ;;  %v1769_v24 = vpop.f32.mrf.mxu1 }
 0x1fd   :  { %v1805_v25 = vpop.f32.mrf.mxu0 }
 0x1fe   :  { %v1846_v26 = vpop.f32.mrf.mxu1 }
 0x1ff   :  { %v1847_v2 = vadd.f32 %v1846_v26, %v1805_v25  ;;  %v1807_v27 = vpop.f32.mrf.mxu0 }
 0x200   :  { %v1848_v3 = vpop.f32.mrf.mxu1 }
 0x201   :  { %1939 = vst [vmem:[%s3103_s3 + $0x20] sm:$0xff] %v1847_v2  ;;  %v1849_v28 = vadd.f32 %v1848_v3, %v1807_v27  ;;  %v1809_v29 = vpop.f32.mrf.mxu0 }
 0x202   :  { %v1850_v30 = vpop.f32.mrf.mxu1 }
 0x203   :  { %1940 = vst [vmem:[%s3103_s3 + $0x28] sm:$0xff] %v1849_v28  ;;  %v1810_v31 = vpop.f32.mrf.mxu0 }
 0x204   :  { %v1851_v32 = vpop.f32.mrf.mxu1 }
 0x23d   :  { %v1887_v33 = vpop.f32.mrf.mxu0 }
 0x23e   :  { %v1928_v34 = vpop.f32.mrf.mxu1 }
 0x23f   :  { %v1929_v35 = vadd.f32 %v1928_v34, %v1887_v33  ;;  %v1889_v36 = vpop.f32.mrf.mxu0 }
 0x240   :  { %v1930_v37 = vpop.f32.mrf.mxu1 }
 0x241   :  { %1941 = vst [vmem:[%s3103_s3 + $0x30] sm:$0xff] %v1929_v35  ;;  %v1931_v38 = vadd.f32 %v1930_v37, %v1889_v36  ;;  %v1891_v39 = vpop.f32.mrf.mxu0 }
 0x242   :  { %v1932_v40 = vpop.f32.mrf.mxu1 }
 0x243   :  { %1942 = vst [vmem:[%s3103_s3 + $0x38] sm:$0xff] %v1931_v38  ;;  %v1892_v41 = vpop.f32.mrf.mxu0 }
 0x244   :  { %v1933_v42 = vpop.f32.mrf.mxu1 }

// kernel: forward.30
= control target key start
LH: loop header
LB: loop body
LE: loop exit
PB: predicated region body
PF: predicated region fallthrough
CT: control target
= control target key end

     0   :  { %s1794_s0 = inlined_call_operand.vmem [shape: f32[8,512], index: 0, kind: input, shape index: {}]   ;;  %s1795_s2 = inlined_call_operand.vmem [shape: bf16[512,512], index: 2, kind: input, shape index: {}]   ;;  %s1796_s1 = inlined_call_operand.vmem [shape: f32[1,512], index: 1, kind: input, shape index: {}]   ;;  %s1797_s3 = inlined_call_operand.vmem [shape: f32[8,512], index: 3, kind: output, shape index: {}]  }
   0x1   :  { %v1358_v0 = vld [vmem:[%s1794_s0] sm:$0xff]  ;;  %v1363_v1 = vld [vmem:[%s1794_s0 + $0x8] sm:$0xff]  ;;  %v1368_v2 = vld [vmem:[%s1794_s0 + $0x10] sm:$0xff] }
   0x2   :  { %v1373_v3 = vld [vmem:[%s1794_s0 + $0x18] sm:$0xff]  ;;  %v18_v4 = vmul.f32 %v1358_v0, %v1358_v0  ;;  %v19_v5 = vmul.f32 %v1363_v1, %v1363_v1  ;;  %v20_v6 = vmul.f32 %v1368_v2, %v1368_v2  ;;  %v1139_v7 = vld [vmem:[%s1795_s2 + $0xe4] ss:$16 sps:$4 sm:$0xff]   ;;  %v1143_v11 = vld [vmem:[%s1795_s2 + $0xe0] ss:$16 sps:$4 sm:$0xff]  }
   0x3   :  { %v21_v8 = vmul.f32 %v1373_v3, %v1373_v3  ;;  %v1141_v10 = vld [vmem:[%s1795_s2 + $0x2e4] ss:$16 sps:$4 sm:$0xff]   ;;  %v1144_v12 = vld [vmem:[%s1795_s2 + $0x2e0] ss:$16 sps:$4 sm:$0xff]   ;;  %839 = vmatprep.subr.bf16.mxu0 %v1139_v7 }
   0x4   :  { %v22_v9 = vadd.f32 %v19_v5, %v18_v4  ;;  %v1145_v13 = vld [vmem:[%s1795_s2 + $0xc4] ss:$16 sps:$4 sm:$0xff]   ;;  %880 = vmatprep.subr.bf16.mxu1 %v1141_v10  ;;  %840 = vmatpush1.bf16.msra.mxu0 %v1143_v11  ;;  %v1149_v16 = vld [vmem:[%s1795_s2 + $0xc0] ss:$16 sps:$4 sm:$0xff]  }
   0x5   :  { %v1147_v15 = vld [vmem:[%s1795_s2 + $0x2c4] ss:$16 sps:$4 sm:$0xff]   ;;  %881 = vmatpush1.bf16.msra.mxu1 %v1144_v12  ;;  %841 = vmatprep.subr.bf16.mxu0 %v1145_v13  ;;  %v1150_v17 = vld [vmem:[%s1795_s2 + $0x2c0] ss:$16 sps:$4 sm:$0xff]  }
   0x6   :  { %v23_v14 = vadd.f32 %v22_v9, %v20_v6  ;;  %882 = vmatprep.subr.bf16.mxu1 %v1147_v15  ;;  %v1151_v19 = vld [vmem:[%s1795_s2 + $0xa4] ss:$16 sps:$4 sm:$0xff]   ;;  %v1155_v21 = vld [vmem:[%s1795_s2 + $0xa0] ss:$16 sps:$4 sm:$0xff]   ;;  %v1237_v15 = vld [vmem:[%s1795_s2 + $0xec] ss:$16 sps:$4 sm:$0xff]  }
   0x7   :  { %v1153_v20 = vld [vmem:[%s1795_s2 + $0x2a4] ss:$16 sps:$4 sm:$0xff]   ;;  %v1156_v22 = vld [vmem:[%s1795_s2 + $0x2a0] ss:$16 sps:$4 sm:$0xff]  }
   0x8   :  { %v24_v18 = vadd.f32 %v23_v14, %v21_v8  ;;  %842 = vmatpush1.bf16.msra.mxu0 %v1149_v16  ;;  %v1157_v23 = vld [vmem:[%s1795_s2 + $0x84] ss:$16 sps:$4 sm:$0xff]   ;;  %v1161_v25 = vld [vmem:[%s1795_s2 + $0x80] ss:$16 sps:$4 sm:$0xff]   ;;  %v1240_v16 = vld [vmem:[%s1795_s2 + $0x2ec] ss:$16 sps:$4 sm:$0xff]  }
   0x9   :  { %883 = vmatpush1.bf16.msra.mxu1 %v1150_v17  ;;  %843 = vmatprep.subr.bf16.mxu0 %v1151_v19  ;;  %v1159_v24 = vld [vmem:[%s1795_s2 + $0x284] ss:$16 sps:$4 sm:$0xff]   ;;  %v1162_v26 = vld [vmem:[%s1795_s2 + $0x280] ss:$16 sps:$4 sm:$0xff]  }
   0xa   :  { %25 = vadd.xlane.f32.xlu0 %v24_v18  ;;  %884 = vmatprep.subr.bf16.mxu1 %v1153_v20  ;;  %v1163_v27 = vld [vmem:[%s1795_s2 + $0x64] ss:$16 sps:$4 sm:$0xff]   ;;  %v1167_v29 = vld [vmem:[%s1795_s2 + $0x60] ss:$16 sps:$4 sm:$0xff]  }
   0xb   :  { %v1165_v28 = vld [vmem:[%s1795_s2 + $0x264] ss:$16 sps:$4 sm:$0xff]   ;;  %v1168_v30 = vld [vmem:[%s1795_s2 + $0x260] ss:$16 sps:$4 sm:$0xff]  }
   0xc   :  { %844 = vmatpush1.bf16.msra.mxu0 %v1155_v21  ;;  %v1169_v31 = vld [vmem:[%s1795_s2 + $0x44] ss:$16 sps:$4 sm:$0xff]   ;;  %v1173_v33 = vld [vmem:[%s1795_s2 + $0x40] ss:$16 sps:$4 sm:$0xff]  }
   0xd   :  { %885 = vmatpush1.bf16.msra.mxu1 %v1156_v22  ;;  %845 = vmatprep.subr.bf16.mxu0 %v1157_v23  ;;  %v1171_v32 = vld [vmem:[%s1795_s2 + $0x244] ss:$16 sps:$4 sm:$0xff]   ;;  %v1174_v34 = vld [vmem:[%s1795_s2 + $0x240] ss:$16 sps:$4 sm:$0xff]  }
   0xe   :  { %886 = vmatprep.subr.bf16.mxu1 %v1159_v24  ;;  %v1175_v35 = vld [vmem:[%s1795_s2 + $0x24] ss:$16 sps:$4 sm:$0xff]   ;;  %v1179_v37 = vld [vmem:[%s1795_s2 + $0x20] ss:$16 sps:$4 sm:$0xff]   ;;  %v43_v24 = vlaneseq }
   0xf   :  { %v1177_v36 = vld [vmem:[%s1795_s2 + $0x224] ss:$16 sps:$4 sm:$0xff]   ;;  %v1180_v38 = vld [vmem:[%s1795_s2 + $0x220] ss:$16 sps:$4 sm:$0xff]  }
  0x10   :  { %846 = vmatpush1.bf16.msra.mxu0 %v1161_v25  ;;  %v1181_v39 = vld [vmem:[%s1795_s2 + $0x4] ss:$16 sps:$4 sm:$0xff]   ;;  %v1185_v41 = vld [vmem:[%s1795_s2] ss:$16 sps:$4 sm:$0xff]  }
  0x11   :  { %887 = vmatpush1.bf16.msra.mxu1 %v1162_v26  ;;  %847 = vmatprep.subr.bf16.mxu0 %v1163_v27  ;;  %v1183_v40 = vld [vmem:[%s1795_s2 + $0x204] ss:$16 sps:$4 sm:$0xff]   ;;  %v1186_v42 = vld [vmem:[%s1795_s2 + $0x200] ss:$16 sps:$4 sm:$0xff]   ;;  %v44_v26 = vshrl.u32 %v43_v24, 7 }
  0x12   :  { %888 = vmatprep.subr.bf16.mxu1 %v1165_v28  ;;  %v1187_v43 = vld [vmem:[%s1795_s2 + $0x1e4] ss:$16 sps:$4 sm:$0xff]   ;;  %v1191_v45 = vld [vmem:[%s1795_s2 + $0x1e0] ss:$16 sps:$4 sm:$0xff]   ;;  %v1300_v24 = vld [vmem:[%s1795_s2 + $0x3ac] ss:$16 sps:$4 sm:$0xff]  }
  0x13   :  { %v1189_v44 = vld [vmem:[%s1795_s2 + $0x3e4] ss:$16 sps:$4 sm:$0xff]   ;;  %v1192_v46 = vld [vmem:[%s1795_s2 + $0x3e0] ss:$16 sps:$4 sm:$0xff]   ;;  %v49_v28 = vsub.s32 1, %v44_v26 }
  0x14   :  { %848 = vmatpush1.bf16.msra.mxu0 %v1167_v29  ;;  %v1193_v47 = vld [vmem:[%s1795_s2 + $0x1c4] ss:$16 sps:$4 sm:$0xff]   ;;  %v1197_v49 = vld [vmem:[%s1795_s2 + $0x1c0] ss:$16 sps:$4 sm:$0xff]   ;;  %v57_v29 = vsub.s32 3, %v44_v26 }
  0x15   :  { %889 = vmatpush1.bf16.msra.mxu1 %v1168_v30  ;;  %849 = vmatprep.subr.bf16.mxu0 %v1169_v31  ;;  %v1195_v48 = vld [vmem:[%s1795_s2 + $0x3c4] ss:$16 sps:$4 sm:$0xff]   ;;  %v1198_v50 = vld [vmem:[%s1795_s2 + $0x3c0] ss:$16 sps:$4 sm:$0xff]   ;;  %v45_v30 = vsub.s32 0, %v44_v26  ;;  %v53_v31 = vsub.s32 2, %v44_v26 }
  0x16   :  { %890 = vmatprep.subr.bf16.mxu1 %v1171_v32  ;;  %v1199_v51 = vld [vmem:[%s1795_s2 + $0x1a4] ss:$16 sps:$4 sm:$0xff]   ;;  %v1203_v53 = vld [vmem:[%s1795_s2 + $0x1a0] ss:$16 sps:$4 sm:$0xff]   ;;  %v1298_v26 = vld [vmem:[%s1795_s2 + $0x3a8] ss:$16 sps:$4 sm:$0xff]  }
  0x17   :  { %v1201_v52 = vld [vmem:[%s1795_s2 + $0x3a4] ss:$16 sps:$4 sm:$0xff]   ;;  %v1204_v54 = vld [vmem:[%s1795_s2 + $0x3a0] ss:$16 sps:$4 sm:$0xff]  }
  0x18   :  { %850 = vmatpush1.bf16.msra.mxu0 %v1173_v33  ;;  %v1205_v55 = vld [vmem:[%s1795_s2 + $0x184] ss:$16 sps:$4 sm:$0xff]   ;;  %v1209_v57 = vld [vmem:[%s1795_s2 + $0x180] ss:$16 sps:$4 sm:$0xff]  }
  0x19   :  { %891 = vmatpush1.bf16.msra.mxu1 %v1174_v34  ;;  %851 = vmatprep.subr.bf16.mxu0 %v1175_v35  ;;  %v1207_v56 = vld [vmem:[%s1795_s2 + $0x384] ss:$16 sps:$4 sm:$0xff]   ;;  %v1210_v58 = vld [vmem:[%s1795_s2 + $0x380] ss:$16 sps:$4 sm:$0xff]  }
  0x1a   :  { %892 = vmatprep.subr.bf16.mxu1 %v1177_v36  ;;  %v1211_v59 = vld [vmem:[%s1795_s2 + $0x164] ss:$16 sps:$4 sm:$0xff]   ;;  %v1215_v61 = vld [vmem:[%s1795_s2 + $0x160] ss:$16 sps:$4 sm:$0xff]  }
  0x1b   :  { %v1213_v60 = vld [vmem:[%s1795_s2 + $0x364] ss:$16 sps:$4 sm:$0xff]   ;;  %v1216_v62 = vld [vmem:[%s1795_s2 + $0x360] ss:$16 sps:$4 sm:$0xff]  }
  0x1c   :  { %852 = vmatpush1.bf16.msra.mxu0 %v1179_v37  ;;  %v1217_v63 = vld [vmem:[%s1795_s2 + $0x144] ss:$16 sps:$4 sm:$0xff]   ;;  %v1221_v5 = vld [vmem:[%s1795_s2 + $0x140] ss:$16 sps:$4 sm:$0xff]  }
  0x1d   :  { %893 = vmatpush1.bf16.msra.mxu1 %v1180_v38  ;;  %853 = vmatprep.subr.bf16.mxu0 %v1181_v39  ;;  %v1219_v4 = vld [vmem:[%s1795_s2 + $0x344] ss:$16 sps:$4 sm:$0xff]   ;;  %v1222_v6 = vld [vmem:[%s1795_s2 + $0x340] ss:$16 sps:$4 sm:$0xff]  }
  0x1e   :  { %894 = vmatprep.subr.bf16.mxu1 %v1183_v40  ;;  %v1223_v7 = vld [vmem:[%s1795_s2 + $0x124] ss:$16 sps:$4 sm:$0xff]   ;;  %v1227_v9 = vld [vmem:[%s1795_s2 + $0x120] ss:$16 sps:$4 sm:$0xff]  }
  0x1f   :  { %v1225_v8 = vld [vmem:[%s1795_s2 + $0x324] ss:$16 sps:$4 sm:$0xff]   ;;  %v1228_v10 = vld [vmem:[%s1795_s2 + $0x320] ss:$16 sps:$4 sm:$0xff]  }
  0x20   :  { %854 = vmatpush1.bf16.msra.mxu0 %v1185_v41  ;;  %v1229_v11 = vld [vmem:[%s1795_s2 + $0x104] ss:$16 sps:$4 sm:$0xff]   ;;  %v1233_v13 = vld [vmem:[%s1795_s2 + $0x100] ss:$16 sps:$4 sm:$0xff]  }
  0x21   :  { %895 = vmatpush1.bf16.msra.mxu1 %v1186_v42  ;;  %855 = vmatprep.subr.bf16.mxu0 %v1187_v43  ;;  %v1231_v12 = vld [vmem:[%s1795_s2 + $0x304] ss:$16 sps:$4 sm:$0xff]   ;;  %v1234_v14 = vld [vmem:[%s1795_s2 + $0x300] ss:$16 sps:$4 sm:$0xff]  }
  0x22   :  { %896 = vmatprep.subr.bf16.mxu1 %v1189_v44  ;;  %v40_v25 = vld [vmem:[%s1796_s1] sm:$0xf] }
  0x23   :  { %v41_v27 = vmul.f32 22.627417, %v40_v25  ;;  %v1295_v25 = vld [vmem:[%s1795_s2 + $0x1a8] ss:$16 sps:$4 sm:$0xff]  }
  0x24   :  { %856 = vmatpush2.bf16.msra.mxu0 %v1191_v45 }
  0x25   :  { %897 = vmatpush2.bf16.msra.mxu1 %v1192_v46  ;;  %857 = vmatprep.subr.bf16.mxu0 %v1193_v47  ;;  %v50_v32 = vrot.slane %v41_v27, %v49_v28  ;;  %v58_v33 = vrot.slane %v41_v27, %v57_v29  ;;  %v46_v34 = vrot.slane %v41_v27, %v45_v30  ;;  %v1235_v47 = vld [vmem:[%s1795_s2 + $0xe8] ss:$16 sps:$4 sm:$0xff]   ;;  %v1306_v28 = vld [vmem:[%s1795_s2 + $0x38c] ss:$16 sps:$4 sm:$0xff]  }
  0x26   :  { %898 = vmatprep.subr.bf16.mxu1 %v1195_v48  ;;  %v54_v35 = vrot.slane %v41_v27, %v53_v31  ;;  %v1303_v27 = vld [vmem:[%s1795_s2 + $0x18c] ss:$16 sps:$4 sm:$0xff]   ;;  %v1301_v29 = vld [vmem:[%s1795_s2 + $0x188] ss:$16 sps:$4 sm:$0xff]  }
  0x27   :  { %v1304_v30 = vld [vmem:[%s1795_s2 + $0x388] ss:$16 sps:$4 sm:$0xff]   ;;  %v1309_v31 = vld [vmem:[%s1795_s2 + $0x16c] ss:$16 sps:$4 sm:$0xff]  }
  0x28   :  { %858 = vmatpush2.bf16.msra.mxu0 %v1197_v49  ;;  %v1241_v49 = vld [vmem:[%s1795_s2 + $0xc8] ss:$16 sps:$4 sm:$0xff]  }
  0x29   :  { %899 = vmatpush2.bf16.msra.mxu1 %v1198_v50  ;;  %859 = vmatprep.subr.bf16.mxu0 %v1199_v51  ;;  %v1244_v50 = vld [vmem:[%s1795_s2 + $0x2c8] ss:$16 sps:$4 sm:$0xff]   ;;  %v1249_v51 = vld [vmem:[%s1795_s2 + $0xac] ss:$16 sps:$4 sm:$0xff]  }
  0x2a   :  { %900 = vmatprep.subr.bf16.mxu1 %v1201_v52  ;;  %v1252_v52 = vld [vmem:[%s1795_s2 + $0x2ac] ss:$16 sps:$4 sm:$0xff]  }
  0x2c   :  { %860 = vmatpush2.bf16.msra.mxu0 %v1203_v53  ;;  %v1247_v53 = vld [vmem:[%s1795_s2 + $0xa8] ss:$16 sps:$4 sm:$0xff]  }
  0x2d   :  { %901 = vmatpush2.bf16.msra.mxu1 %v1204_v54  ;;  %861 = vmatprep.subr.bf16.mxu0 %v1205_v55  ;;  %v1250_v54 = vld [vmem:[%s1795_s2 + $0x2a8] ss:$16 sps:$4 sm:$0xff]   ;;  %v1255_v55 = vld [vmem:[%s1795_s2 + $0x8c] ss:$16 sps:$4 sm:$0xff]  }
  0x2e   :  { %902 = vmatprep.subr.bf16.mxu1 %v1207_v56  ;;  %v1258_v56 = vld [vmem:[%s1795_s2 + $0x28c] ss:$16 sps:$4 sm:$0xff]  }
  0x30   :  { %862 = vmatpush2.bf16.msra.mxu0 %v1209_v57  ;;  %v1253_v57 = vld [vmem:[%s1795_s2 + $0x88] ss:$16 sps:$4 sm:$0xff]  }
  0x31   :  { %903 = vmatpush2.bf16.msra.mxu1 %v1210_v58  ;;  %863 = vmatprep.subr.bf16.mxu0 %v1211_v59  ;;  %v1256_v58 = vld [vmem:[%s1795_s2 + $0x288] ss:$16 sps:$4 sm:$0xff]   ;;  %v1261_v59 = vld [vmem:[%s1795_s2 + $0x6c] ss:$16 sps:$4 sm:$0xff]  }
  0x32   :  { %904 = vmatprep.subr.bf16.mxu1 %v1213_v60  ;;  %v1264_v60 = vld [vmem:[%s1795_s2 + $0x26c] ss:$16 sps:$4 sm:$0xff]  }
  0x34   :  { %864 = vmatpush2.bf16.msra.mxu0 %v1215_v61  ;;  %v1259_v61 = vld [vmem:[%s1795_s2 + $0x68] ss:$16 sps:$4 sm:$0xff]  }
  0x35   :  { %905 = vmatpush2.bf16.msra.mxu1 %v1216_v62  ;;  %865 = vmatprep.subr.bf16.mxu0 %v1217_v63  ;;  %v1262_v62 = vld [vmem:[%s1795_s2 + $0x268] ss:$16 sps:$4 sm:$0xff]   ;;  %v1267_v63 = vld [vmem:[%s1795_s2 + $0x4c] ss:$16 sps:$4 sm:$0xff]  }
  0x36   :  { %906 = vmatprep.subr.bf16.mxu1 %v1219_v4  ;;  %v1270_v4 = vld [vmem:[%s1795_s2 + $0x24c] ss:$16 sps:$4 sm:$0xff]  }
  0x38   :  { %866 = vmatpush2.bf16.msra.mxu0 %v1221_v5  ;;  %v1265_v5 = vld [vmem:[%s1795_s2 + $0x48] ss:$16 sps:$4 sm:$0xff]  }
  0x39   :  { %907 = vmatpush2.bf16.msra.mxu1 %v1222_v6  ;;  %867 = vmatprep.subr.bf16.mxu0 %v1223_v7  ;;  %v1268_v6 = vld [vmem:[%s1795_s2 + $0x248] ss:$16 sps:$4 sm:$0xff]   ;;  %v1273_v7 = vld [vmem:[%s1795_s2 + $0x2c] ss:$16 sps:$4 sm:$0xff]  }
  0x3a   :  { %908 = vmatprep.subr.bf16.mxu1 %v1225_v8  ;;  %v1276_v8 = vld [vmem:[%s1795_s2 + $0x22c] ss:$16 sps:$4 sm:$0xff]  }
  0x3c   :  { %868 = vmatpush2.bf16.msra.mxu0 %v1227_v9  ;;  %v1271_v9 = vld [vmem:[%s1795_s2 + $0x28] ss:$16 sps:$4 sm:$0xff]  }
  0x3d   :  { %909 = vmatpush2.bf16.msra.mxu1 %v1228_v10  ;;  %869 = vmatprep.subr.bf16.mxu0 %v1229_v11  ;;  %v1274_v10 = vld [vmem:[%s1795_s2 + $0x228] ss:$16 sps:$4 sm:$0xff]   ;;  %v1279_v11 = vld [vmem:[%s1795_s2 + $0xc] ss:$16 sps:$4 sm:$0xff]  }
  0x3e   :  { %910 = vmatprep.subr.bf16.mxu1 %v1231_v12  ;;  %v1282_v12 = vld [vmem:[%s1795_s2 + $0x20c] ss:$16 sps:$4 sm:$0xff]  }
  0x40   :  { %870 = vmatpush2.bf16.msra.mxu0 %v1233_v13  ;;  %v1277_v13 = vld [vmem:[%s1795_s2 + $0x8] ss:$16 sps:$4 sm:$0xff]  }
  0x41   :  { %911 = vmatpush2.bf16.msra.mxu1 %v1234_v14  ;;  %921 = vmatprep.subr.bf16.mxu0 %v1237_v15  ;;  %v1280_v14 = vld [vmem:[%s1795_s2 + $0x208] ss:$16 sps:$4 sm:$0xff]   ;;  %v1285_v15 = vld [vmem:[%s1795_s2 + $0x1ec] ss:$16 sps:$4 sm:$0xff]  }
  0x42   :  { %962 = vmatprep.subr.bf16.mxu1 %v1240_v16  ;;  %v1288_v16 = vld [vmem:[%s1795_s2 + $0x3ec] ss:$16 sps:$4 sm:$0xff]  }
  0x93   :  { %v26_v17 = vpop.xlane.xlu0 %25 }
  0x94   :  { %1331 = vrsqrt.f32 %v26_v17  ;;  %vm29_vm0 = vcmp.eq.f32.partialorder %v26_v17, inf  ;;  %v32_v20 = vand.u32 2147483648, %v26_v17  ;;  %vm31_vm1 = vcmp.eq.f32.partialorder %v26_v17, 0.0 }
  0xa1   :  { %v1332_v18 = vpop.eup %1331 }
  0xa2   :  { %v28_v19 = vmul.f32 %v1332_v18, %v26_v17  ;;  %v1286_v18 = vld [vmem:[%s1795_s2 + $0x3e8] ss:$16 sps:$4 sm:$0xff]  }
  0xa4   :  { %v30_v21 = vsel %vm29_vm0, %v26_v17, %v28_v19  ;;  %v1283_v17 = vld [vmem:[%s1795_s2 + $0x1e8] ss:$16 sps:$4 sm:$0xff]   ;;  %v1291_v19 = vld [vmem:[%s1795_s2 + $0x1cc] ss:$16 sps:$4 sm:$0xff]  }
  0xa5   :  { %v33_v22 = vsel %vm31_vm1, %v32_v20, %v30_v21  ;;  %v1294_v20 = vld [vmem:[%s1795_s2 + $0x3cc] ss:$16 sps:$4 sm:$0xff]   ;;  %v1289_v21 = vld [vmem:[%s1795_s2 + $0x1c8] ss:$16 sps:$4 sm:$0xff]  }
  0xa6   :  { %v34_v23 = vmax.f32 %v33_v22, 1e-12  ;;  %v1292_v22 = vld [vmem:[%s1795_s2 + $0x3c8] ss:$16 sps:$4 sm:$0xff]  }
  0xa8   :  { %1333 = vrcp.f32 %v34_v23  ;;  %v1297_v23 = vld [vmem:[%s1795_s2 + $0x1ac] ss:$16 sps:$4 sm:$0xff]  }
  0xb5   :  { %v1334_v36 = vpop.eup %1333 }
  0xb6   :  { %v37_v37 = vmul.f32 %v1334_v36, %v1363_v1  ;;  %v39_v38 = vmul.f32 %v1334_v36, %v1373_v3  ;;  %v36_v39 = vmul.f32 %v1334_v36, %v1358_v0  ;;  %v38_v40 = vmul.f32 %v1334_v36, %v1368_v2  ;;  %v1238_v1 = vld [vmem:[%s1795_s2 + $0x2e8] ss:$16 sps:$4 sm:$0xff]   ;;  %v1243_v0 = vld [vmem:[%s1795_s2 + $0xcc] ss:$16 sps:$4 sm:$0xff]  }
  0xb7   :  { %v1246_v2 = vld [vmem:[%s1795_s2 + $0x2cc] ss:$16 sps:$4 sm:$0xff]  }
  0xb8   :  { %v64_v41 = vmul.f32 %v50_v32, %v37_v37  ;;  %v66_v42 = vmul.f32 %v58_v33, %v39_v38  ;;  %v63_v43 = vmul.f32 %v46_v34, %v36_v39  ;;  %v65_v44 = vmul.f32 %v54_v35, %v38_v40  ;;  %v1312_v32 = vld [vmem:[%s1795_s2 + $0x36c] ss:$16 sps:$4 sm:$0xff]   ;;  %v1307_v33 = vld [vmem:[%s1795_s2 + $0x168] ss:$16 sps:$4 sm:$0xff]  }
  0xb9   :  { %v1310_v34 = vld [vmem:[%s1795_s2 + $0x368] ss:$16 sps:$4 sm:$0xff]   ;;  %v1315_v35 = vld [vmem:[%s1795_s2 + $0x14c] ss:$16 sps:$4 sm:$0xff]  }
  0xba   :  { %v68_v45 = vpack.c.bf16 %v64_v41, %v64_v41  ;;  %v70_v46 = vpack.c.bf16 %v66_v42, %v66_v42  ;;  %v1594_v48 = vpack.c.bf16 %v63_v43, %v63_v43  ;;  %v1596_v3 = vpack.c.bf16 %v65_v44, %v65_v44  ;;  %v1318_v36 = vld [vmem:[%s1795_s2 + $0x34c] ss:$16 sps:$4 sm:$0xff]   ;;  %v1313_v37 = vld [vmem:[%s1795_s2 + $0x148] ss:$16 sps:$4 sm:$0xff]  }
  0xbb   :  { %v1316_v38 = vld [vmem:[%s1795_s2 + $0x348] ss:$16 sps:$4 sm:$0xff]   ;;  %v1321_v39 = vld [vmem:[%s1795_s2 + $0x12c] ss:$16 sps:$4 sm:$0xff]  }
  0xbc   :  { %871 = vmatprep.mubr.bf16.mxu0 %v68_v45  ;;  %912 = vmatprep.mubr.bf16.mxu1 %v70_v46  ;;  %v1324_v40 = vld [vmem:[%s1795_s2 + $0x32c] ss:$16 sps:$4 sm:$0xff]   ;;  %v1319_v41 = vld [vmem:[%s1795_s2 + $0x128] ss:$16 sps:$4 sm:$0xff]  }
  0xbd   :  { %872 = vmatmul.mubr.bf16.vlgmr.msra.gmra.mxu0 %v1594_v48  ;;  %913 = vmatmul.mubr.bf16.vlgmr.msra.gmra.mxu1 %v1596_v3  ;;  %v1322_v42 = vld [vmem:[%s1795_s2 + $0x328] ss:$16 sps:$4 sm:$0xff]   ;;  %v1327_v43 = vld [vmem:[%s1795_s2 + $0x10c] ss:$16 sps:$4 sm:$0xff]  }
  0xbe   :  { %922 = vmatpush1.bf16.msra.mxu0 %v1235_v47  ;;  %963 = vmatpush1.bf16.msra.mxu1 %v1238_v1  ;;  %v1330_v44 = vld [vmem:[%s1795_s2 + $0x30c] ss:$16 sps:$4 sm:$0xff]  }
  0xbf   :  { %953 = vmatprep.mubr.bf16.mxu0 %v68_v45  ;;  %994 = vmatprep.mubr.bf16.mxu1 %v70_v46  ;;  %v1325_v45 = vld [vmem:[%s1795_s2 + $0x108] ss:$16 sps:$4 sm:$0xff]  }
  0xc0   :  { %923 = vmatprep.subr.bf16.mxu0 %v1243_v0  ;;  %964 = vmatprep.subr.bf16.mxu1 %v1246_v2  ;;  %v1328_v46 = vld [vmem:[%s1795_s2 + $0x308] ss:$16 sps:$4 sm:$0xff]  }
  0xc2   :  { %924 = vmatpush1.bf16.msra.mxu0 %v1241_v49  ;;  %965 = vmatpush1.bf16.msra.mxu1 %v1244_v50 }
  0xc3   :  { %925 = vmatprep.subr.bf16.mxu0 %v1249_v51  ;;  %966 = vmatprep.subr.bf16.mxu1 %v1252_v52 }
  0xc6   :  { %926 = vmatpush1.bf16.msra.mxu0 %v1247_v53  ;;  %967 = vmatpush1.bf16.msra.mxu1 %v1250_v54 }
  0xc7   :  { %927 = vmatprep.subr.bf16.mxu0 %v1255_v55  ;;  %968 = vmatprep.subr.bf16.mxu1 %v1258_v56 }
  0xca   :  { %928 = vmatpush1.bf16.msra.mxu0 %v1253_v57  ;;  %969 = vmatpush1.bf16.msra.mxu1 %v1256_v58 }
  0xcb   :  { %929 = vmatprep.subr.bf16.mxu0 %v1261_v59  ;;  %970 = vmatprep.subr.bf16.mxu1 %v1264_v60 }
  0xce   :  { %930 = vmatpush1.bf16.msra.mxu0 %v1259_v61  ;;  %971 = vmatpush1.bf16.msra.mxu1 %v1262_v62 }
  0xcf   :  { %931 = vmatprep.subr.bf16.mxu0 %v1267_v63  ;;  %972 = vmatprep.subr.bf16.mxu1 %v1270_v4 }
  0xd2   :  { %932 = vmatpush1.bf16.msra.mxu0 %v1265_v5  ;;  %973 = vmatpush1.bf16.msra.mxu1 %v1268_v6 }
  0xd3   :  { %933 = vmatprep.subr.bf16.mxu0 %v1273_v7  ;;  %974 = vmatprep.subr.bf16.mxu1 %v1276_v8 }
  0xd6   :  { %934 = vmatpush1.bf16.msra.mxu0 %v1271_v9  ;;  %975 = vmatpush1.bf16.msra.mxu1 %v1274_v10 }
  0xd7   :  { %935 = vmatprep.subr.bf16.mxu0 %v1279_v11  ;;  %976 = vmatprep.subr.bf16.mxu1 %v1282_v12 }
  0xda   :  { %936 = vmatpush1.bf16.msra.mxu0 %v1277_v13  ;;  %977 = vmatpush1.bf16.msra.mxu1 %v1280_v14 }
  0xdb   :  { %937 = vmatprep.subr.bf16.mxu0 %v1285_v15  ;;  %978 = vmatprep.subr.bf16.mxu1 %v1288_v16 }
  0xde   :  { %938 = vmatpush2.bf16.msra.mxu0 %v1283_v17  ;;  %979 = vmatpush2.bf16.msra.mxu1 %v1286_v18 }
  0xdf   :  { %939 = vmatprep.subr.bf16.mxu0 %v1291_v19  ;;  %980 = vmatprep.subr.bf16.mxu1 %v1294_v20 }
  0xe2   :  { %940 = vmatpush2.bf16.msra.mxu0 %v1289_v21  ;;  %981 = vmatpush2.bf16.msra.mxu1 %v1292_v22 }
  0xe3   :  { %941 = vmatprep.subr.bf16.mxu0 %v1297_v23  ;;  %982 = vmatprep.subr.bf16.mxu1 %v1300_v24 }
  0xe6   :  { %942 = vmatpush2.bf16.msra.mxu0 %v1295_v25  ;;  %983 = vmatpush2.bf16.msra.mxu1 %v1298_v26 }
  0xe7   :  { %943 = vmatprep.subr.bf16.mxu0 %v1303_v27  ;;  %984 = vmatprep.subr.bf16.mxu1 %v1306_v28 }
  0xea   :  { %944 = vmatpush2.bf16.msra.mxu0 %v1301_v29  ;;  %985 = vmatpush2.bf16.msra.mxu1 %v1304_v30 }
  0xeb   :  { %945 = vmatprep.subr.bf16.mxu0 %v1309_v31  ;;  %986 = vmatprep.subr.bf16.mxu1 %v1312_v32 }
  0xee   :  { %946 = vmatpush2.bf16.msra.mxu0 %v1307_v33  ;;  %987 = vmatpush2.bf16.msra.mxu1 %v1310_v34 }
  0xef   :  { %947 = vmatprep.subr.bf16.mxu0 %v1315_v35  ;;  %988 = vmatprep.subr.bf16.mxu1 %v1318_v36 }
  0xf2   :  { %948 = vmatpush2.bf16.msra.mxu0 %v1313_v37  ;;  %989 = vmatpush2.bf16.msra.mxu1 %v1316_v38 }
  0xf3   :  { %949 = vmatprep.subr.bf16.mxu0 %v1321_v39  ;;  %990 = vmatprep.subr.bf16.mxu1 %v1324_v40 }
  0xf6   :  { %950 = vmatpush2.bf16.msra.mxu0 %v1319_v41  ;;  %991 = vmatpush2.bf16.msra.mxu1 %v1322_v42 }
  0xf7   :  { %951 = vmatprep.subr.bf16.mxu0 %v1327_v43  ;;  %992 = vmatprep.subr.bf16.mxu1 %v1330_v44 }
  0xfa   :  { %952 = vmatpush2.bf16.msra.mxu0 %v1325_v45  ;;  %993 = vmatpush2.bf16.msra.mxu1 %v1328_v46 }
  0xfd   :  { %954 = vmatmul.mubr.bf16.vlgmr.msra.gmra.mxu0 %v1594_v48  ;;  %995 = vmatmul.mubr.bf16.vlgmr.msra.gmra.mxu1 %v1596_v3 }
 0x17d   :  { %v873_v47 = vpop.f32.mrf.mxu0  ;;  %v914_v1 = vpop.f32.mrf.mxu1 }
 0x17e   :  { %v915_v0 = vadd.f32 %v914_v1, %v873_v47 }
 0x17f   :  { %v875_v2 = vpop.f32.mrf.mxu0  ;;  %v916_v49 = vpop.f32.mrf.mxu1 }
 0x180   :  { %1003 = vst [vmem:[%s1797_s3] sm:$0xff] %v915_v0  ;;  %v917_v50 = vadd.f32 %v916_v49, %v875_v2 }
 0x181   :  { %v877_v51 = vpop.f32.mrf.mxu0  ;;  %v918_v52 = vpop.f32.mrf.mxu1 }
 0x182   :  { %1004 = vst [vmem:[%s1797_s3 + $0x8] sm:$0xff] %v917_v50 }
 0x183   :  { %v878_v53 = vpop.f32.mrf.mxu0  ;;  %v919_v48 = vpop.f32.mrf.mxu1 }
 0x1bd   :  { %v955_v54 = vpop.f32.mrf.mxu0  ;;  %v996_v3 = vpop.f32.mrf.mxu1 }
 0x1be   :  { %v997_v55 = vadd.f32 %v996_v3, %v955_v54 }
 0x1bf   :  { %v957_v56 = vpop.f32.mrf.mxu0  ;;  %v998_v57 = vpop.f32.mrf.mxu1 }
 0x1c0   :  { %1005 = vst [vmem:[%s1797_s3 + $0x10] sm:$0xff] %v997_v55  ;;  %v999_v58 = vadd.f32 %v998_v57, %v957_v56 }
 0x1c1   :  { %v959_v59 = vpop.f32.mrf.mxu0  ;;  %v1000_v60 = vpop.f32.mrf.mxu1 }
 0x1c2   :  { %1006 = vst [vmem:[%s1797_s3 + $0x18] sm:$0xff] %v999_v58 }
 0x1c3   :  { %v960_v61 = vpop.f32.mrf.mxu0  ;;  %v1001_v62 = vpop.f32.mrf.mxu1 }

// kernel: forward.32
= control target key start
LH: loop header
LB: loop body
LE: loop exit
PB: predicated region body
PF: predicated region fallthrough
CT: control target
= control target key end

     0   :  { %s1882_s12 = smov 0   ;;  %s2067_s0 = inlined_call_operand.vmem [shape: f32[2,8,4,64], index: 0, kind: input, shape index: {}]   ;;  %s2068_s1 = inlined_call_operand.vmem [shape: f32[2,8,4,64], index: 1, kind: input, shape index: {}]   ;;  %s2069_s2 = inlined_call_operand.vmem [shape: f32[2,8,4,64], index: 2, kind: input, shape index: {}]   ;;  %s2070_s3 = inlined_call_operand.vmem [shape: f32[2,8,4,64], index: 3, kind: output, shape index: {}]  }
   0x1 LB: > { %s1647_s13 = sadd.s32 4294967295, %s1858_s12   ;;  %p1651_p0 = scmp.ge.s32.totalorder %s1858_s12, 1  ;;  %s1858_s12 = sphi %s1882_s12, %s13_s12  }
   0x2   : > { %p157_p1 = scmp.lt.s32.totalorder %s1858_s12, 3 }
   0x4   : > { %p158_p2 = pnand %p1651_p0, %p157_p1 }
   0x5   : > { %p191_p3 = scmp.lt.s32.totalorder (!%p158_p2), %s1647_s13, 1 }
   0x6   : > { %161 = sbr.rel (%p158_p2) target bundleno = 739 (0x2e3), region = 32 }
   0xb   : > { %v1860_v0 = vmov 0.0   ;;  %vm1861_vm0 = vmmov 0   ;;  %s2072_s13 = smov (!%p191_p3, %s1647_s13), 1  ;;  %vm235_vm1 = vcmask 523264   ;;  %vm852_vm2 = vcmask 27648  }
   0xc   : > { %1730 = vmatprep.subr.mxu0 %v1860_v0  ;;  %1732 = vmatprep.mubr.msk.f32.mxu0 %vm1861_vm0, %v1860_v0  ;;  %s1896_s14 = sshll.u32 %s2072_s13, 5  ;;  %vm953_vm3 = vcmask 1043456   ;;  %vm949_vm4 = vcmask 31744   ;;  %vm1559_vm5 = vcmask 519168  }
   0xd   : > { %1735 = vmatprep.subr.mxu1 %v1860_v0  ;;  %1737 = vmatprep.mubr.msk.f32.mxu1 %vm1861_vm0, %v1860_v0  ;;  %s1902_s17 = scalar_lea.vmem %s2068_s1, %s1896_s14  ;;  %s1908_s20 = scalar_lea.vmem %s2067_s0, %s1896_s14 }
   0xe   : > { %v219_v1 = vld [vmem:[%s1902_s17] sm:$0xf]  ;;  %v220_v2 = vld [vmem:[%s1902_s17 + $0x4] sm:$0xf]  ;;  %v221_v5 = vld [vmem:[%s1902_s17 + $0x8] sm:$0xf]  ;;  %s1995_s23 = scalar_lea.vmem %s2069_s2, %s1896_s14  ;;  %s2046_s26 = scalar_lea.vmem %s2070_s3, %s1896_s14 }
   0xf   : > { %1731 = vmatpush3.xpose.msk.msra.mxu0 %vm235_vm1, %v219_v1  ;;  %v211_v3 = vld [vmem:[%s1908_s20] sm:$0xf]  ;;  %1736 = vmatpush3.xpose.msk.msra.mxu1 %vm235_vm1, %v220_v2  ;;  %v212_v4 = vld [vmem:[%s1908_s20 + $0x4] sm:$0xf]  ;;  %v222_v6 = vld [vmem:[%s1902_s17 + $0xc] sm:$0xf] }
  0x10   : > { %1740 = vmatprep.subr.mxu0 %v1860_v0  ;;  %1745 = vmatprep.subr.mxu1 %v1860_v0  ;;  %v213_v7 = vld [vmem:[%s1908_s20 + $0x8] sm:$0xf]  ;;  %v223_v8 = vld [vmem:[%s1902_s17 + $0x10] sm:$0xf]  ;;  %v214_v9 = vld [vmem:[%s1908_s20 + $0xc] sm:$0xf] }
  0x11   : > { %v224_v10 = vld [vmem:[%s1902_s17 + $0x14] sm:$0xf]  ;;  %v215_v11 = vld [vmem:[%s1908_s20 + $0x10] sm:$0xf]  ;;  %v225_v12 = vld [vmem:[%s1902_s17 + $0x18] sm:$0xf] }
  0x12   : > { %1733 = vmatmul.mubr.msk.f32.vlgmr.msra.gmra.mxu0 %vm235_vm1, %v211_v3  ;;  %1738 = vmatmul.mubr.msk.f32.vlgmr.msra.gmra.mxu1 %vm235_vm1, %v212_v4  ;;  %v216_v13 = vld [vmem:[%s1908_s20 + $0x14] sm:$0xf]  ;;  %v226_v14 = vld [vmem:[%s1902_s17 + $0x1c] sm:$0xf]  ;;  %v217_v15 = vld [vmem:[%s1908_s20 + $0x18] sm:$0xf] }
  0x13   : > { %1741 = vmatpush3.xpose.msk.msra.mxu0 %vm235_vm1, %v221_v5  ;;  %1742 = vmatprep.mubr.msk.f32.mxu0 %vm1861_vm0, %v1860_v0  ;;  %v218_v16 = vld [vmem:[%s1908_s20 + $0x1c] sm:$0xf] }
  0x14   : > { %1746 = vmatpush3.xpose.msk.msra.mxu1 %vm235_vm1, %v222_v6  ;;  %1750 = vmatprep.subr.mxu0 %v1860_v0 }
  0x15   : > { %1747 = vmatprep.mubr.msk.f32.mxu1 %vm1861_vm0, %v1860_v0  ;;  %1755 = vmatprep.subr.mxu1 %v1860_v0 }
  0x16   : > { %1743 = vmatmul.mubr.msk.f32.vlgmr.msra.gmra.mxu0 %vm235_vm1, %v213_v7 }
  0x17   : > { %1751 = vmatpush3.xpose.msk.msra.mxu0 %vm235_vm1, %v223_v8  ;;  %1748 = vmatmul.mubr.msk.f32.vlgmr.msra.gmra.mxu1 %vm235_vm1, %v214_v9 }
  0x18   : > { %1752 = vmatprep.mubr.msk.f32.mxu0 %vm1861_vm0, %v1860_v0  ;;  %1756 = vmatpush3.xpose.msk.msra.mxu1 %vm235_vm1, %v224_v10 }
  0x19   : > { %1760 = vmatprep.subr.mxu0 %v1860_v0  ;;  %1757 = vmatprep.mubr.msk.f32.mxu1 %vm1861_vm0, %v1860_v0 }
  0x1a   : > { %1753 = vmatmul.mubr.msk.f32.vlgmr.msra.gmra.mxu0 %vm235_vm1, %v215_v11  ;;  %1765 = vmatprep.subr.mxu1 %v1860_v0 }
  0x1b   : > { %1761 = vmatpush3.xpose.msk.msra.mxu0 %vm235_vm1, %v225_v12  ;;  %1758 = vmatmul.mubr.msk.f32.vlgmr.msra.gmra.mxu1 %vm235_vm1, %v216_v13 }
  0x1c   : > { %1762 = vmatprep.mubr.msk.f32.mxu0 %vm1861_vm0, %v1860_v0  ;;  %1766 = vmatpush3.xpose.msk.msra.mxu1 %vm235_vm1, %v226_v14 }
  0x1d   : > { %1767 = vmatprep.mubr.msk.f32.mxu1 %vm1861_vm0, %v1860_v0  ;;  %1770 = vmatprep.subr.mxu0 %v1860_v0 }
  0x1e   : > { %1763 = vmatmul.mubr.msk.f32.vlgmr.msra.gmra.mxu0 %vm235_vm1, %v217_v15  ;;  %1775 = vmatprep.subr.mxu1 %v1860_v0 }
  0x1f   : > { %1768 = vmatmul.mubr.msk.f32.vlgmr.msra.gmra.mxu1 %vm235_vm1, %v218_v16  ;;  %1772 = vmatprep.mubr.msk.f32.mxu0 %vm1861_vm0, %v1860_v0 }
  0x20   : > { %1777 = vmatprep.mubr.msk.f32.mxu1 %vm1861_vm0, %v1860_v0 }
  0xd2   : > { %v308_v17 = vpop.f32.mrf.mxu0  ;;  %v384_v18 = vpop.f32.mrf.mxu1 }
  0xd3   : > { %v844_v19 = vmul.f32 0.125, %v308_v17  ;;  %v845_v20 = vmul.f32 0.125, %v384_v18 }
  0xd4   : > { %v1734_v21 = vpop.f32.mrf.mxu0  ;;  %v1739_v22 = vpop.f32.mrf.mxu1 }
  0xd5   : > { %v853_v23 = vsel %vm852_vm2, %v844_v19, -inf  ;;  %v856_v27 = vsel %vm852_vm2, %v845_v20, -inf }
  0xd6   : > { %854 = vmax.xlane.f32.xlu0 %v853_v23  ;;  %v460_v24 = vpop.f32.mrf.mxu0 }
  0xd7   : > { %v846_v25 = vmul.f32 0.125, %v460_v24  ;;  %v536_v26 = vpop.f32.mrf.mxu1 }
  0xd8   : > { %v1744_v28 = vpop.f32.mrf.mxu0  ;;  %v847_v29 = vmul.f32 0.125, %v536_v26  ;;  %v227_v26 = vld [vmem:[%s1995_s23] sm:$0xf] }
  0xd9   : > { %v859_v30 = vsel %vm852_vm2, %v846_v25, -inf  ;;  %v1749_v31 = vpop.f32.mrf.mxu1  ;;  %1771 = vmatpush3.msk.msra.mxu0 %vm953_vm3, %v227_v26 }
  0xda   : > { %857 = vmax.xlane.f32.xlu0 %v856_v27  ;;  %860 = vmax.xlane.f32.xlu1 %v859_v30  ;;  %v612_v32 = vpop.f32.mrf.mxu0  ;;  %v862_v35 = vsel %vm852_vm2, %v847_v29, -inf  ;;  %v228_v27 = vld [vmem:[%s1995_s23 + $0x4] sm:$0xf] }
  0xdb   : > { %v848_v33 = vmul.f32 0.125, %v612_v32  ;;  %v688_v34 = vpop.f32.mrf.mxu1  ;;  %1776 = vmatpush3.msk.msra.mxu1 %vm953_vm3, %v228_v27  ;;  %1780 = vmatprep.subr.mxu0 %v1860_v0 }
  0xdc   : > { %v1754_v36 = vpop.f32.mrf.mxu0  ;;  %v849_v37 = vmul.f32 0.125, %v688_v34  ;;  %1785 = vmatprep.subr.mxu1 %v1860_v0 }
  0xdd   : > { %v865_v38 = vsel %vm852_vm2, %v848_v33, -inf  ;;  %v1759_v39 = vpop.f32.mrf.mxu1 }
  0xde   : > { %863 = vmax.xlane.f32.xlu1 %v862_v35  ;;  %866 = vmax.xlane.f32.xlu0 %v865_v38  ;;  %v764_v40 = vpop.f32.mrf.mxu0  ;;  %v868_v43 = vsel %vm852_vm2, %v849_v37, -inf  ;;  %v229_v39 = vld [vmem:[%s1995_s23 + $0x8] sm:$0xf] }
  0xdf   : > { %v850_v41 = vmul.f32 0.125, %v764_v40  ;;  %v840_v42 = vpop.f32.mrf.mxu1 }
  0xe0   : > { %v851_v44 = vmul.f32 0.125, %v840_v42  ;;  %v1764_v45 = vpop.f32.mrf.mxu0 }
  0xe1   : > { %v871_v46 = vsel %vm852_vm2, %v850_v41, -inf  ;;  %v1769_v47 = vpop.f32.mrf.mxu1  ;;  %v230_v45 = vld [vmem:[%s1995_s23 + $0xc] sm:$0xf] }
  0xe2   : > { %869 = vmax.xlane.f32.xlu1 %v868_v43  ;;  %872 = vmax.xlane.f32.xlu0 %v871_v46  ;;  %v874_v48 = vsel %vm852_vm2, %v851_v44, -inf }
  0xe6   : > { %875 = vmax.xlane.f32.xlu1 %v874_v48  ;;  %v231_v48 = vld [vmem:[%s1995_s23 + $0x10] sm:$0xf] }
 0x15f   : > { %v855_v49 = vpop.xlane.xlu0 %854 }
 0x160   : > { %v877_v50 = vsub.f32 %v844_v19, %v855_v49 }
 0x162   : > { %v885_v51 = vmul.f32 1.442695, %v877_v50 }
 0x163   : > { %v858_v52 = vpop.xlane.xlu0 %857  ;;  %v861_v53 = vpop.xlane.xlu1 %860 }
 0x164   : > { %1820 = vpow2.f32 %v885_v51  ;;  %v878_v54 = vsub.f32 %v845_v20, %v858_v52  ;;  %v879_v55 = vsub.f32 %v846_v25, %v861_v53  ;;  %v232_v53 = vld [vmem:[%s1995_s23 + $0x14] sm:$0xf] }
 0x166   : > { %v887_v56 = vmul.f32 1.442695, %v878_v54  ;;  %v889_v57 = vmul.f32 1.442695, %v879_v55 }
 0x167   : > { %v864_v58 = vpop.xlane.xlu1 %863  ;;  %v867_v59 = vpop.xlane.xlu0 %866 }
 0x168   : > { %1822 = vpow2.f32 %v887_v56  ;;  %v880_v60 = vsub.f32 %v847_v29, %v864_v58  ;;  %v881_v61 = vsub.f32 %v848_v33, %v867_v59  ;;  %v233_v56 = vld [vmem:[%s1995_s23 + $0x18] sm:$0xf] }
 0x169   : > { %1824 = vpow2.f32 %v889_v57 }
 0x16a   : > { %v891_v62 = vmul.f32 1.442695, %v880_v60  ;;  %v893_v63 = vmul.f32 1.442695, %v881_v61  ;;  %v234_v61 = vld [vmem:[%s1995_s23 + $0x1c] sm:$0xf] }
 0x16b   : > { %v870_v1 = vpop.xlane.xlu1 %869  ;;  %v873_v2 = vpop.xlane.xlu0 %872 }
 0x16c   : > { %1826 = vpow2.f32 %v891_v62  ;;  %v882_v3 = vsub.f32 %v849_v37, %v870_v1  ;;  %v883_v4 = vsub.f32 %v850_v41, %v873_v2 }
 0x16d   : > { %1828 = vpow2.f32 %v893_v63 }
 0x16e   : > { %v895_v5 = vmul.f32 1.442695, %v882_v3  ;;  %v897_v6 = vmul.f32 1.442695, %v883_v4 }
 0x16f   : > { %v876_v7 = vpop.xlane.xlu1 %875 }
 0x170   : > { %1830 = vpow2.f32 %v895_v5  ;;  %v884_v8 = vsub.f32 %v851_v44, %v876_v7 }
 0x171   : > { %v1821_v9 = vpop.eup %1820  ;;  %1832 = vpow2.f32 %v897_v6 }
 0x172   : > { %v899_v10 = vmul.f32 1.442695, %v884_v8  ;;  %v901_v11 = vsel %vm852_vm2, %v1821_v9, 0.0 }
 0x173   : > { %902 = vadd.xlane.f32.xlu0 %v901_v11 }
 0x174   : > { %1834 = vpow2.f32 %v899_v10 }
 0x175   : > { %v1823_v12 = vpop.eup %1822 }
 0x176   : > { %v1825_v13 = vpop.eup %1824  ;;  %v904_v14 = vsel %vm852_vm2, %v1823_v12, 0.0 }
 0x177   : > { %905 = vadd.xlane.f32.xlu1 %v904_v14  ;;  %v907_v15 = vsel %vm852_vm2, %v1825_v13, 0.0 }
 0x178   : > { %908 = vadd.xlane.f32.xlu0 %v907_v15 }
 0x179   : > { %v1827_v16 = vpop.eup %1826 }
 0x17a   : > { %v1829_v17 = vpop.eup %1828  ;;  %v910_v18 = vsel %vm852_vm2, %v1827_v16, 0.0 }
 0x17b   : > { %911 = vadd.xlane.f32.xlu1 %v910_v18  ;;  %v913_v19 = vsel %vm852_vm2, %v1829_v17, 0.0 }
 0x17c   : > { %914 = vadd.xlane.f32.xlu0 %v913_v19 }
 0x17d   : > { %v1979_v20 = vpop.eup %1830 }
 0x17e   : > { %v1981_v21 = vpop.eup %1832  ;;  %v916_v22 = vsel %vm852_vm2, %v1979_v20, 0.0 }
 0x17f   : > { %917 = vadd.xlane.f32.xlu1 %v916_v22  ;;  %v919_v23 = vsel %vm852_vm2, %v1981_v21, 0.0 }
 0x180   : > { %920 = vadd.xlane.f32.xlu0 %v919_v23 }
 0x181   : > { %v1987_v24 = vpop.eup %1834 }
 0x182   : > { %v922_v25 = vsel %vm852_vm2, %v1987_v24, 0.0 }
 0x183   : > { %923 = vadd.xlane.f32.xlu1 %v922_v25 }
 0x1fc   : > { %v903_v28 = vpop.xlane.xlu0 %902 }
 0x1fd   : > { %1836 = vrcp.f32 %v903_v28 }
 0x200   : > { %v906_v29 = vpop.xlane.xlu1 %905 }
 0x201   : > { %1838 = vrcp.f32 %v906_v29  ;;  %v909_v30 = vpop.xlane.xlu0 %908 }
 0x202   : > { %1840 = vrcp.f32 %v909_v30 }
 0x204   : > { %v912_v31 = vpop.xlane.xlu1 %911 }
 0x205   : > { %1842 = vrcp.f32 %v912_v31  ;;  %v915_v32 = vpop.xlane.xlu0 %914 }
 0x206   : > { %1844 = vrcp.f32 %v915_v32 }
 0x208   : > { %v918_v33 = vpop.xlane.xlu1 %917 }
 0x209   : > { %1846 = vrcp.f32 %v918_v33  ;;  %v921_v34 = vpop.xlane.xlu0 %920 }
 0x20a   : > { %v1837_v35 = vpop.eup %1836  ;;  %1848 = vrcp.f32 %v921_v34 }
 0x20b   : > { %v933_v36 = vmul.f32 %v1837_v35, %v1821_v9 }
 0x20c   : > { %v924_v37 = vpop.xlane.xlu1 %923 }
 0x20d   : > { %1850 = vrcp.f32 %v924_v37  ;;  %v941_v38 = vadd.f32 1e-08, %v933_v36 }
 0x20e   : > { %v1839_v40 = vpop.eup %1838 }
 0x20f   : > { %v1841_v41 = vpop.eup %1840  ;;  %1773 = vmatmul.mubr.msk.f32.vlgmr.msra.gmra.mxu0 %vm949_vm4, %v941_v38  ;;  %v934_v42 = vmul.f32 %v1839_v40, %v1823_v12 }
 0x210   : > { %1781 = vmatpush3.msk.msra.mxu0 %vm953_vm3, %v229_v39  ;;  %1782 = vmatprep.mubr.msk.f32.mxu0 %vm1861_vm0, %v1860_v0  ;;  %v935_v43 = vmul.f32 %v1841_v41, %v1825_v13 }
 0x211   : > { %v942_v44 = vadd.f32 1e-08, %v934_v42  ;;  %1790 = vmatprep.subr.mxu0 %v1860_v0 }
 0x212   : > { %v1843_v46 = vpop.eup %1842  ;;  %v943_v47 = vadd.f32 1e-08, %v935_v43 }
 0x213   : > { %v1845_v49 = vpop.eup %1844  ;;  %1778 = vmatmul.mubr.msk.f32.vlgmr.msra.gmra.mxu1 %vm949_vm4, %v942_v44  ;;  %v936_v50 = vmul.f32 %v1843_v46, %v1827_v16 }
 0x214   : > { %1783 = vmatmul.mubr.msk.f32.vlgmr.msra.gmra.mxu0 %vm949_vm4, %v943_v47  ;;  %1786 = vmatpush3.msk.msra.mxu1 %vm953_vm3, %v230_v45  ;;  %v937_v51 = vmul.f32 %v1845_v49, %v1829_v17 }
 0x215   : > { %1787 = vmatprep.mubr.msk.f32.mxu1 %vm1861_vm0, %v1860_v0  ;;  %1791 = vmatpush3.msk.msra.mxu0 %vm953_vm3, %v231_v48  ;;  %v944_v52 = vadd.f32 1e-08, %v936_v50 }
 0x216   : > { %v1847_v54 = vpop.eup %1846  ;;  %1792 = vmatprep.mubr.msk.f32.mxu0 %vm1861_vm0, %v1860_v0  ;;  %v945_v55 = vadd.f32 1e-08, %v937_v51  ;;  %1795 = vmatprep.subr.mxu1 %v1860_v0 }
 0x217   : > { %v1849_v57 = vpop.eup %1848  ;;  %1788 = vmatmul.mubr.msk.f32.vlgmr.msra.gmra.mxu1 %vm949_vm4, %v944_v52  ;;  %1800 = vmatprep.subr.mxu0 %v1860_v0  ;;  %v938_v58 = vmul.f32 %v1847_v54, %v1979_v20 }
 0x218   : > { %1793 = vmatmul.mubr.msk.f32.vlgmr.msra.gmra.mxu0 %vm949_vm4, %v945_v55  ;;  %1796 = vmatpush3.msk.msra.mxu1 %vm953_vm3, %v232_v53  ;;  %v939_v59 = vmul.f32 %v1849_v57, %v1981_v21 }
 0x219   : > { %1797 = vmatprep.mubr.msk.f32.mxu1 %vm1861_vm0, %v1860_v0  ;;  %1801 = vmatpush3.msk.msra.mxu0 %vm953_vm3, %v233_v56  ;;  %v946_v60 = vadd.f32 1e-08, %v938_v58 }
 0x21a   : > { %v1851_v62 = vpop.eup %1850  ;;  %1802 = vmatprep.mubr.msk.f32.mxu0 %vm1861_vm0, %v1860_v0  ;;  %v947_v63 = vadd.f32 1e-08, %v939_v59  ;;  %1805 = vmatprep.subr.mxu1 %v1860_v0 }
 0x21b   : > { %1798 = vmatmul.mubr.msk.f32.vlgmr.msra.gmra.mxu1 %vm949_vm4, %v946_v60  ;;  %v940_v1 = vmul.f32 %v1851_v62, %v1987_v24 }
 0x21c   : > { %1803 = vmatmul.mubr.msk.f32.vlgmr.msra.gmra.mxu0 %vm949_vm4, %v947_v63  ;;  %1806 = vmatpush3.msk.msra.mxu1 %vm953_vm3, %v234_v61 }
 0x21d   : > { %1807 = vmatprep.mubr.msk.f32.mxu1 %vm1861_vm0, %v1860_v0  ;;  %v948_v2 = vadd.f32 1e-08, %v940_v1 }
 0x21f   : > { %1808 = vmatmul.mubr.msk.f32.vlgmr.msra.gmra.mxu1 %vm949_vm4, %v948_v2 }
 0x2cf   : > { %v1023_v3 = vpop.f32.mrf.mxu0 }
 0x2d0   : > { %v1024_v4 = vadd.f32 1e-08, %v1023_v3 }
 0x2d1   : > { %v1774_v5 = vpop.f32.mrf.mxu0 }
 0x2d2   : > { %1560 = vst.msk [vmem:[%s2046_s26] sm:$0xf] %vm1559_vm5, %v1024_v4 }
 0x2d3   : > { %v1099_v0 = vpop.f32.mrf.mxu1 }
 0x2d4   : > { %v1100_v6 = vadd.f32 1e-08, %v1099_v0  ;;  %v1175_v7 = vpop.f32.mrf.mxu0 }
 0x2d5   : > { %v1176_v8 = vadd.f32 1e-08, %v1175_v7  ;;  %v1779_v9 = vpop.f32.mrf.mxu1 }
 0x2d6   : > { %1561 = vst.msk [vmem:[%s2046_s26 + $0x4] sm:$0xf] %vm1559_vm5, %v1100_v6  ;;  %v1784_v10 = vpop.f32.mrf.mxu0 }
 0x2d7   : > { %1562 = vst.msk [vmem:[%s2046_s26 + $0x8] sm:$0xf] %vm1559_vm5, %v1176_v8  ;;  %v1251_v11 = vpop.f32.mrf.mxu1 }
 0x2d8   : > { %v1252_v12 = vadd.f32 1e-08, %v1251_v11  ;;  %v1327_v13 = vpop.f32.mrf.mxu0 }
 0x2d9   : > { %v1328_v14 = vadd.f32 1e-08, %v1327_v13  ;;  %v1789_v15 = vpop.f32.mrf.mxu1 }
 0x2da   : > { %1563 = vst.msk [vmem:[%s2046_s26 + $0xc] sm:$0xf] %vm1559_vm5, %v1252_v12  ;;  %v1794_v16 = vpop.f32.mrf.mxu0 }
 0x2db   : > { %1564 = vst.msk [vmem:[%s2046_s26 + $0x10] sm:$0xf] %vm1559_vm5, %v1328_v14  ;;  %v1403_v17 = vpop.f32.mrf.mxu1 }
 0x2dc   : > { %v1404_v18 = vadd.f32 1e-08, %v1403_v17  ;;  %v1479_v19 = vpop.f32.mrf.mxu0 }
 0x2dd   : > { %v1480_v20 = vadd.f32 1e-08, %v1479_v19  ;;  %v1799_v21 = vpop.f32.mrf.mxu1 }
 0x2de   : > { %1565 = vst.msk [vmem:[%s2046_s26 + $0x14] sm:$0xf] %vm1559_vm5, %v1404_v18  ;;  %v1804_v22 = vpop.f32.mrf.mxu0 }
 0x2df   : > { %1566 = vst.msk [vmem:[%s2046_s26 + $0x18] sm:$0xf] %vm1559_vm5, %v1480_v20  ;;  %v1555_v23 = vpop.f32.mrf.mxu1 }
 0x2e0   : > { %v1556_v24 = vadd.f32 1e-08, %v1555_v23 }
 0x2e1   : > { %v1809_v25 = vpop.f32.mrf.mxu1 }
 0x2e2   : > { %1567 = vst.msk [vmem:[%s2046_s26 + $0x1c] sm:$0xf] %vm1559_vm5, %v1556_v24 }
 0x2e3 PF: > { %s13_s12 = sadd.s32 1, %s1858_s12  }
 0x2e4   : > { %p10_p4 = scmp.ge.s32.totalorder %s13_s12, 4  }
 0x2e6   :  { %12 = sbr.rel (!%p10_p4) target bundleno = 1 (0x1), region = 68 }

// kernel: forward.33
= control target key start
LH: loop header
LB: loop body
LE: loop exit
PB: predicated region body
PF: predicated region fallthrough
CT: control target
= control target key end

     0   :  { %s1788_s1 = inlined_call_operand.vmem [shape: bf16[512,512], index: 1, kind: input, shape index: {}]   ;;  %s1789_s0 = inlined_call_operand.vmem [shape: bf16[8,512], index: 0, kind: input, shape index: {}]   ;;  %s1790_s2 = inlined_call_operand.vmem [shape: f32[1,512], index: 2, kind: input, shape index: {}]   ;;  %s1791_s3 = inlined_call_operand.vmem [shape: f32[8,512], index: 3, kind: output, shape index: {}]  }
   0x1   :  { %v1155_v0 = vld [vmem:[%s1788_s1 + $0xe4] ss:$16 sps:$4 sm:$0xff]   ;;  %v1159_v2 = vld [vmem:[%s1788_s1 + $0xe0] ss:$16 sps:$4 sm:$0xff]   ;;  %v27_v48 = vld [vmem:[%s1789_s0 + $0x8] sm:$0xff] }
   0x2   :  { %v1157_v1 = vld [vmem:[%s1788_s1 + $0x2e4] ss:$16 sps:$4 sm:$0xff]   ;;  %810 = vmatprep.subr.bf16.mxu0 %v1155_v0  ;;  %v1160_v3 = vld [vmem:[%s1788_s1 + $0x2e0] ss:$16 sps:$4 sm:$0xff]   ;;  %v1026_v51 = vcombine.high %v27_v48, %v27_v48 }
   0x3   :  { %851 = vmatprep.subr.bf16.mxu1 %v1157_v1  ;;  %v1161_v4 = vld [vmem:[%s1788_s1 + $0xc4] ss:$16 sps:$4 sm:$0xff]   ;;  %811 = vmatpush1.bf16.msra.mxu0 %v1159_v2  ;;  %v1165_v6 = vld [vmem:[%s1788_s1 + $0xc0] ss:$16 sps:$4 sm:$0xff]  }
   0x4   :  { %852 = vmatpush1.bf16.msra.mxu1 %v1160_v3  ;;  %v1163_v5 = vld [vmem:[%s1788_s1 + $0x2c4] ss:$16 sps:$4 sm:$0xff]   ;;  %812 = vmatprep.subr.bf16.mxu0 %v1161_v4  ;;  %v1166_v7 = vld [vmem:[%s1788_s1 + $0x2c0] ss:$16 sps:$4 sm:$0xff]   ;;  %v1257_v4 = vld [vmem:[%s1788_s1 + $0xec] ss:$16 sps:$4 sm:$0xff]  }
   0x5   :  { %853 = vmatprep.subr.bf16.mxu1 %v1163_v5  ;;  %v1167_v8 = vld [vmem:[%s1788_s1 + $0xa4] ss:$16 sps:$4 sm:$0xff]   ;;  %v1171_v10 = vld [vmem:[%s1788_s1 + $0xa0] ss:$16 sps:$4 sm:$0xff]   ;;  %883 = vmatprep.mubr.bf16.mxu1 %v1026_v51  ;;  %v1260_v5 = vld [vmem:[%s1788_s1 + $0x2ec] ss:$16 sps:$4 sm:$0xff]  }
   0x6   :  { %v1169_v9 = vld [vmem:[%s1788_s1 + $0x2a4] ss:$16 sps:$4 sm:$0xff]   ;;  %v1172_v11 = vld [vmem:[%s1788_s1 + $0x2a0] ss:$16 sps:$4 sm:$0xff]  }
   0x7   :  { %813 = vmatpush1.bf16.msra.mxu0 %v1165_v6  ;;  %v1173_v12 = vld [vmem:[%s1788_s1 + $0x84] ss:$16 sps:$4 sm:$0xff]   ;;  %v1177_v14 = vld [vmem:[%s1788_s1 + $0x80] ss:$16 sps:$4 sm:$0xff]  }
   0x8   :  { %854 = vmatpush1.bf16.msra.mxu1 %v1166_v7  ;;  %814 = vmatprep.subr.bf16.mxu0 %v1167_v8  ;;  %v1175_v13 = vld [vmem:[%s1788_s1 + $0x284] ss:$16 sps:$4 sm:$0xff]   ;;  %v1178_v15 = vld [vmem:[%s1788_s1 + $0x280] ss:$16 sps:$4 sm:$0xff]   ;;  %v1580_v7 = vcombine.low %v27_v48, %v27_v48  ;;  %v1255_v8 = vld [vmem:[%s1788_s1 + $0xe8] ss:$16 sps:$4 sm:$0xff]  }
   0x9   :  { %855 = vmatprep.subr.bf16.mxu1 %v1169_v9  ;;  %v1179_v16 = vld [vmem:[%s1788_s1 + $0x64] ss:$16 sps:$4 sm:$0xff]   ;;  %v1183_v18 = vld [vmem:[%s1788_s1 + $0x60] ss:$16 sps:$4 sm:$0xff]   ;;  %v1258_v9 = vld [vmem:[%s1788_s1 + $0x2e8] ss:$16 sps:$4 sm:$0xff]  }
   0xa   :  { %v1181_v17 = vld [vmem:[%s1788_s1 + $0x264] ss:$16 sps:$4 sm:$0xff]   ;;  %v1184_v19 = vld [vmem:[%s1788_s1 + $0x260] ss:$16 sps:$4 sm:$0xff]   ;;  %v1315_v48 = vld [vmem:[%s1788_s1 + $0x1a8] ss:$16 sps:$4 sm:$0xff]  }
   0xb   :  { %815 = vmatpush1.bf16.msra.mxu0 %v1171_v10  ;;  %v1185_v20 = vld [vmem:[%s1788_s1 + $0x44] ss:$16 sps:$4 sm:$0xff]   ;;  %v1189_v22 = vld [vmem:[%s1788_s1 + $0x40] ss:$16 sps:$4 sm:$0xff]   ;;  %v1263_v10 = vld [vmem:[%s1788_s1 + $0xcc] ss:$16 sps:$4 sm:$0xff]  }
   0xc   :  { %856 = vmatpush1.bf16.msra.mxu1 %v1172_v11  ;;  %816 = vmatprep.subr.bf16.mxu0 %v1173_v12  ;;  %v1187_v21 = vld [vmem:[%s1788_s1 + $0x244] ss:$16 sps:$4 sm:$0xff]   ;;  %v1190_v23 = vld [vmem:[%s1788_s1 + $0x240] ss:$16 sps:$4 sm:$0xff]   ;;  %v1266_v11 = vld [vmem:[%s1788_s1 + $0x2cc] ss:$16 sps:$4 sm:$0xff]  }
   0xd   :  { %857 = vmatprep.subr.bf16.mxu1 %v1175_v13  ;;  %v1191_v24 = vld [vmem:[%s1788_s1 + $0x24] ss:$16 sps:$4 sm:$0xff]   ;;  %v1195_v26 = vld [vmem:[%s1788_s1 + $0x20] ss:$16 sps:$4 sm:$0xff]   ;;  %v1261_v12 = vld [vmem:[%s1788_s1 + $0xc8] ss:$16 sps:$4 sm:$0xff]  }
   0xe   :  { %v1193_v25 = vld [vmem:[%s1788_s1 + $0x224] ss:$16 sps:$4 sm:$0xff]   ;;  %v1196_v27 = vld [vmem:[%s1788_s1 + $0x220] ss:$16 sps:$4 sm:$0xff]   ;;  %v1264_v13 = vld [vmem:[%s1788_s1 + $0x2c8] ss:$16 sps:$4 sm:$0xff]  }
   0xf   :  { %817 = vmatpush1.bf16.msra.mxu0 %v1177_v14  ;;  %v1197_v28 = vld [vmem:[%s1788_s1 + $0x4] ss:$16 sps:$4 sm:$0xff]   ;;  %v1201_v30 = vld [vmem:[%s1788_s1] ss:$16 sps:$4 sm:$0xff]   ;;  %v1269_v14 = vld [vmem:[%s1788_s1 + $0xac] ss:$16 sps:$4 sm:$0xff]  }
  0x10   :  { %858 = vmatpush1.bf16.msra.mxu1 %v1178_v15  ;;  %818 = vmatprep.subr.bf16.mxu0 %v1179_v16  ;;  %v1199_v29 = vld [vmem:[%s1788_s1 + $0x204] ss:$16 sps:$4 sm:$0xff]   ;;  %v1202_v31 = vld [vmem:[%s1788_s1 + $0x200] ss:$16 sps:$4 sm:$0xff]   ;;  %v1272_v15 = vld [vmem:[%s1788_s1 + $0x2ac] ss:$16 sps:$4 sm:$0xff]  }
  0x11   :  { %859 = vmatprep.subr.bf16.mxu1 %v1181_v17  ;;  %v1203_v32 = vld [vmem:[%s1788_s1 + $0x1e4] ss:$16 sps:$4 sm:$0xff]   ;;  %v1207_v34 = vld [vmem:[%s1788_s1 + $0x1e0] ss:$16 sps:$4 sm:$0xff]   ;;  %v1267_v16 = vld [vmem:[%s1788_s1 + $0xa8] ss:$16 sps:$4 sm:$0xff]  }
  0x12   :  { %v1205_v33 = vld [vmem:[%s1788_s1 + $0x3e4] ss:$16 sps:$4 sm:$0xff]   ;;  %v1208_v35 = vld [vmem:[%s1788_s1 + $0x3e0] ss:$16 sps:$4 sm:$0xff]   ;;  %v1270_v17 = vld [vmem:[%s1788_s1 + $0x2a8] ss:$16 sps:$4 sm:$0xff]  }
  0x13   :  { %819 = vmatpush1.bf16.msra.mxu0 %v1183_v18  ;;  %v1209_v36 = vld [vmem:[%s1788_s1 + $0x1c4] ss:$16 sps:$4 sm:$0xff]   ;;  %v1213_v38 = vld [vmem:[%s1788_s1 + $0x1c0] ss:$16 sps:$4 sm:$0xff]   ;;  %v1275_v18 = vld [vmem:[%s1788_s1 + $0x8c] ss:$16 sps:$4 sm:$0xff]  }
  0x14   :  { %860 = vmatpush1.bf16.msra.mxu1 %v1184_v19  ;;  %820 = vmatprep.subr.bf16.mxu0 %v1185_v20  ;;  %v1211_v37 = vld [vmem:[%s1788_s1 + $0x3c4] ss:$16 sps:$4 sm:$0xff]   ;;  %v1214_v39 = vld [vmem:[%s1788_s1 + $0x3c0] ss:$16 sps:$4 sm:$0xff]   ;;  %v1278_v19 = vld [vmem:[%s1788_s1 + $0x28c] ss:$16 sps:$4 sm:$0xff]  }
  0x15   :  { %861 = vmatprep.subr.bf16.mxu1 %v1187_v21  ;;  %v1215_v40 = vld [vmem:[%s1788_s1 + $0x1a4] ss:$16 sps:$4 sm:$0xff]   ;;  %v1219_v42 = vld [vmem:[%s1788_s1 + $0x1a0] ss:$16 sps:$4 sm:$0xff]   ;;  %v1273_v20 = vld [vmem:[%s1788_s1 + $0x88] ss:$16 sps:$4 sm:$0xff]  }
  0x16   :  { %v1217_v41 = vld [vmem:[%s1788_s1 + $0x3a4] ss:$16 sps:$4 sm:$0xff]   ;;  %v1220_v43 = vld [vmem:[%s1788_s1 + $0x3a0] ss:$16 sps:$4 sm:$0xff]   ;;  %v1276_v21 = vld [vmem:[%s1788_s1 + $0x288] ss:$16 sps:$4 sm:$0xff]  }
  0x17   :  { %821 = vmatpush1.bf16.msra.mxu0 %v1189_v22  ;;  %v1221_v44 = vld [vmem:[%s1788_s1 + $0x184] ss:$16 sps:$4 sm:$0xff]   ;;  %v1225_v49 = vld [vmem:[%s1788_s1 + $0x180] ss:$16 sps:$4 sm:$0xff]   ;;  %v1281_v22 = vld [vmem:[%s1788_s1 + $0x6c] ss:$16 sps:$4 sm:$0xff]  }
  0x18   :  { %862 = vmatpush1.bf16.msra.mxu1 %v1190_v23  ;;  %822 = vmatprep.subr.bf16.mxu0 %v1191_v24  ;;  %v1223_v45 = vld [vmem:[%s1788_s1 + $0x384] ss:$16 sps:$4 sm:$0xff]   ;;  %v1226_v50 = vld [vmem:[%s1788_s1 + $0x380] ss:$16 sps:$4 sm:$0xff]   ;;  %v1284_v23 = vld [vmem:[%s1788_s1 + $0x26c] ss:$16 sps:$4 sm:$0xff]  }
  0x19   :  { %863 = vmatprep.subr.bf16.mxu1 %v1193_v25  ;;  %v26_v46 = vld [vmem:[%s1789_s0] sm:$0xff]  ;;  %v1279_v24 = vld [vmem:[%s1788_s1 + $0x68] ss:$16 sps:$4 sm:$0xff]  }
  0x1a   :  { %v1512_v47 = vcombine.high %v26_v46, %v26_v46  ;;  %v1227_v52 = vld [vmem:[%s1788_s1 + $0x164] ss:$16 sps:$4 sm:$0xff]   ;;  %v1231_v54 = vld [vmem:[%s1788_s1 + $0x160] ss:$16 sps:$4 sm:$0xff]   ;;  %v1578_v6 = vcombine.low %v26_v46, %v26_v46  ;;  %v1282_v25 = vld [vmem:[%s1788_s1 + $0x268] ss:$16 sps:$4 sm:$0xff]  }
  0x1b   :  { %823 = vmatpush1.bf16.msra.mxu0 %v1195_v26  ;;  %v1229_v53 = vld [vmem:[%s1788_s1 + $0x364] ss:$16 sps:$4 sm:$0xff]   ;;  %v1232_v55 = vld [vmem:[%s1788_s1 + $0x360] ss:$16 sps:$4 sm:$0xff]   ;;  %v1287_v26 = vld [vmem:[%s1788_s1 + $0x4c] ss:$16 sps:$4 sm:$0xff]  }
  0x1c   :  { %864 = vmatpush1.bf16.msra.mxu1 %v1196_v27  ;;  %824 = vmatprep.subr.bf16.mxu0 %v1197_v28  ;;  %v1233_v56 = vld [vmem:[%s1788_s1 + $0x144] ss:$16 sps:$4 sm:$0xff]   ;;  %v1237_v58 = vld [vmem:[%s1788_s1 + $0x140] ss:$16 sps:$4 sm:$0xff]   ;;  %v1290_v27 = vld [vmem:[%s1788_s1 + $0x24c] ss:$16 sps:$4 sm:$0xff]  }
  0x1d   :  { %865 = vmatprep.subr.bf16.mxu1 %v1199_v29  ;;  %842 = vmatprep.mubr.bf16.mxu0 %v1512_v47  ;;  %v1235_v57 = vld [vmem:[%s1788_s1 + $0x344] ss:$16 sps:$4 sm:$0xff]   ;;  %v1238_v59 = vld [vmem:[%s1788_s1 + $0x340] ss:$16 sps:$4 sm:$0xff]   ;;  %v1285_v28 = vld [vmem:[%s1788_s1 + $0x48] ss:$16 sps:$4 sm:$0xff]  }
  0x1e   :  { %v1239_v60 = vld [vmem:[%s1788_s1 + $0x124] ss:$16 sps:$4 sm:$0xff]   ;;  %v1243_v62 = vld [vmem:[%s1788_s1 + $0x120] ss:$16 sps:$4 sm:$0xff]   ;;  %v1288_v29 = vld [vmem:[%s1788_s1 + $0x248] ss:$16 sps:$4 sm:$0xff]  }
  0x1f   :  { %825 = vmatpush1.bf16.msra.mxu0 %v1201_v30  ;;  %v1241_v61 = vld [vmem:[%s1788_s1 + $0x324] ss:$16 sps:$4 sm:$0xff]   ;;  %v1244_v63 = vld [vmem:[%s1788_s1 + $0x320] ss:$16 sps:$4 sm:$0xff]   ;;  %v1293_v30 = vld [vmem:[%s1788_s1 + $0x2c] ss:$16 sps:$4 sm:$0xff]  }
  0x20   :  { %866 = vmatpush1.bf16.msra.mxu1 %v1202_v31  ;;  %826 = vmatprep.subr.bf16.mxu0 %v1203_v32  ;;  %v1245_v0 = vld [vmem:[%s1788_s1 + $0x104] ss:$16 sps:$4 sm:$0xff]   ;;  %v1249_v2 = vld [vmem:[%s1788_s1 + $0x100] ss:$16 sps:$4 sm:$0xff]   ;;  %v1296_v31 = vld [vmem:[%s1788_s1 + $0x22c] ss:$16 sps:$4 sm:$0xff]  }
  0x21   :  { %867 = vmatprep.subr.bf16.mxu1 %v1205_v33  ;;  %v1247_v1 = vld [vmem:[%s1788_s1 + $0x304] ss:$16 sps:$4 sm:$0xff]   ;;  %v1250_v3 = vld [vmem:[%s1788_s1 + $0x300] ss:$16 sps:$4 sm:$0xff]   ;;  %v1291_v32 = vld [vmem:[%s1788_s1 + $0x28] ss:$16 sps:$4 sm:$0xff]  }
  0x22   :  { %v1294_v33 = vld [vmem:[%s1788_s1 + $0x228] ss:$16 sps:$4 sm:$0xff]   ;;  %v1317_v46 = vld [vmem:[%s1788_s1 + $0x1ac] ss:$16 sps:$4 sm:$0xff]  }
  0x23   :  { %827 = vmatpush2.bf16.msra.mxu0 %v1207_v34  ;;  %v1299_v34 = vld [vmem:[%s1788_s1 + $0xc] ss:$16 sps:$4 sm:$0xff]  }
  0x24   :  { %868 = vmatpush2.bf16.msra.mxu1 %v1208_v35  ;;  %828 = vmatprep.subr.bf16.mxu0 %v1209_v36  ;;  %v1302_v35 = vld [vmem:[%s1788_s1 + $0x20c] ss:$16 sps:$4 sm:$0xff]   ;;  %v1297_v36 = vld [vmem:[%s1788_s1 + $0x8] ss:$16 sps:$4 sm:$0xff]  }
  0x25   :  { %869 = vmatprep.subr.bf16.mxu1 %v1211_v37  ;;  %v1300_v37 = vld [vmem:[%s1788_s1 + $0x208] ss:$16 sps:$4 sm:$0xff]  }
  0x27   :  { %829 = vmatpush2.bf16.msra.mxu0 %v1213_v38  ;;  %v1305_v38 = vld [vmem:[%s1788_s1 + $0x1ec] ss:$16 sps:$4 sm:$0xff]  }
  0x28   :  { %870 = vmatpush2.bf16.msra.mxu1 %v1214_v39  ;;  %830 = vmatprep.subr.bf16.mxu0 %v1215_v40  ;;  %v1308_v39 = vld [vmem:[%s1788_s1 + $0x3ec] ss:$16 sps:$4 sm:$0xff]   ;;  %v1303_v40 = vld [vmem:[%s1788_s1 + $0x1e8] ss:$16 sps:$4 sm:$0xff]  }
  0x29   :  { %871 = vmatprep.subr.bf16.mxu1 %v1217_v41  ;;  %v1306_v41 = vld [vmem:[%s1788_s1 + $0x3e8] ss:$16 sps:$4 sm:$0xff]  }
  0x2b   :  { %831 = vmatpush2.bf16.msra.mxu0 %v1219_v42  ;;  %v1311_v42 = vld [vmem:[%s1788_s1 + $0x1cc] ss:$16 sps:$4 sm:$0xff]  }
  0x2c   :  { %872 = vmatpush2.bf16.msra.mxu1 %v1220_v43  ;;  %832 = vmatprep.subr.bf16.mxu0 %v1221_v44  ;;  %v1314_v43 = vld [vmem:[%s1788_s1 + $0x3cc] ss:$16 sps:$4 sm:$0xff]   ;;  %v1309_v44 = vld [vmem:[%s1788_s1 + $0x1c8] ss:$16 sps:$4 sm:$0xff]  }
  0x2d   :  { %873 = vmatprep.subr.bf16.mxu1 %v1223_v45  ;;  %v1312_v45 = vld [vmem:[%s1788_s1 + $0x3c8] ss:$16 sps:$4 sm:$0xff]  }
  0x2f   :  { %833 = vmatpush2.bf16.msra.mxu0 %v1225_v49  ;;  %v1318_v49 = vld [vmem:[%s1788_s1 + $0x3a8] ss:$16 sps:$4 sm:$0xff]  }
  0x30   :  { %874 = vmatpush2.bf16.msra.mxu1 %v1226_v50  ;;  %834 = vmatprep.subr.bf16.mxu0 %v1227_v52  ;;  %v1323_v50 = vld [vmem:[%s1788_s1 + $0x18c] ss:$16 sps:$4 sm:$0xff]   ;;  %v1321_v52 = vld [vmem:[%s1788_s1 + $0x188] ss:$16 sps:$4 sm:$0xff]  }
  0x31   :  { %875 = vmatprep.subr.bf16.mxu1 %v1229_v53  ;;  %v1324_v53 = vld [vmem:[%s1788_s1 + $0x388] ss:$16 sps:$4 sm:$0xff]  }
  0x33   :  { %835 = vmatpush2.bf16.msra.mxu0 %v1231_v54  ;;  %v1329_v54 = vld [vmem:[%s1788_s1 + $0x16c] ss:$16 sps:$4 sm:$0xff]  }
  0x34   :  { %876 = vmatpush2.bf16.msra.mxu1 %v1232_v55  ;;  %836 = vmatprep.subr.bf16.mxu0 %v1233_v56  ;;  %v1332_v55 = vld [vmem:[%s1788_s1 + $0x36c] ss:$16 sps:$4 sm:$0xff]   ;;  %v1327_v56 = vld [vmem:[%s1788_s1 + $0x168] ss:$16 sps:$4 sm:$0xff]  }
  0x35   :  { %877 = vmatprep.subr.bf16.mxu1 %v1235_v57  ;;  %v1330_v57 = vld [vmem:[%s1788_s1 + $0x368] ss:$16 sps:$4 sm:$0xff]  }
  0x37   :  { %837 = vmatpush2.bf16.msra.mxu0 %v1237_v58  ;;  %v1335_v58 = vld [vmem:[%s1788_s1 + $0x14c] ss:$16 sps:$4 sm:$0xff]  }
  0x38   :  { %878 = vmatpush2.bf16.msra.mxu1 %v1238_v59  ;;  %838 = vmatprep.subr.bf16.mxu0 %v1239_v60  ;;  %v1338_v59 = vld [vmem:[%s1788_s1 + $0x34c] ss:$16 sps:$4 sm:$0xff]   ;;  %v1333_v60 = vld [vmem:[%s1788_s1 + $0x148] ss:$16 sps:$4 sm:$0xff]  }
  0x39   :  { %879 = vmatprep.subr.bf16.mxu1 %v1241_v61  ;;  %v1336_v61 = vld [vmem:[%s1788_s1 + $0x348] ss:$16 sps:$4 sm:$0xff]  }
  0x3b   :  { %839 = vmatpush2.bf16.msra.mxu0 %v1243_v62  ;;  %v1341_v62 = vld [vmem:[%s1788_s1 + $0x12c] ss:$16 sps:$4 sm:$0xff]  }
  0x3c   :  { %880 = vmatpush2.bf16.msra.mxu1 %v1244_v63  ;;  %840 = vmatprep.subr.bf16.mxu0 %v1245_v0  ;;  %v1344_v63 = vld [vmem:[%s1788_s1 + $0x32c] ss:$16 sps:$4 sm:$0xff]   ;;  %v1339_v0 = vld [vmem:[%s1788_s1 + $0x128] ss:$16 sps:$4 sm:$0xff]  }
  0x3d   :  { %881 = vmatprep.subr.bf16.mxu1 %v1247_v1  ;;  %v1342_v1 = vld [vmem:[%s1788_s1 + $0x328] ss:$16 sps:$4 sm:$0xff]  }
  0x3f   :  { %841 = vmatpush2.bf16.msra.mxu0 %v1249_v2  ;;  %v1347_v2 = vld [vmem:[%s1788_s1 + $0x10c] ss:$16 sps:$4 sm:$0xff]  }
  0x40   :  { %882 = vmatpush2.bf16.msra.mxu1 %v1250_v3  ;;  %892 = vmatprep.subr.bf16.mxu0 %v1257_v4  ;;  %v1350_v3 = vld [vmem:[%s1788_s1 + $0x30c] ss:$16 sps:$4 sm:$0xff]   ;;  %v1345_v4 = vld [vmem:[%s1788_s1 + $0x108] ss:$16 sps:$4 sm:$0xff]  }
  0x41   :  { %933 = vmatprep.subr.bf16.mxu1 %v1260_v5  ;;  %v1348_v5 = vld [vmem:[%s1788_s1 + $0x308] ss:$16 sps:$4 sm:$0xff]  }
  0x42   :  { %843 = vmatmul.mubr.bf16.vlgmr.msra.gmra.mxu0 %v1578_v6 }
  0x43   :  { %884 = vmatmul.mubr.bf16.vlgmr.msra.gmra.mxu1 %v1580_v7  ;;  %893 = vmatpush1.bf16.msra.mxu0 %v1255_v8  ;;  %v991_v8 = vlaneseq }
  0x44   :  { %934 = vmatpush1.bf16.msra.mxu1 %v1258_v9  ;;  %894 = vmatprep.subr.bf16.mxu0 %v1263_v10 }
  0x45   :  { %935 = vmatprep.subr.bf16.mxu1 %v1266_v11  ;;  %924 = vmatprep.mubr.bf16.mxu0 %v1512_v47  ;;  %v1320_v47 = vld [vmem:[%s1788_s1 + $0x3ac] ss:$16 sps:$4 sm:$0xff]   ;;  %v992_v9 = vshrl.u32 %v991_v8, 7  ;;  %v989_v11 = vld [vmem:[%s1790_s2] sm:$0xf] }
  0x46   :  { %965 = vmatprep.mubr.bf16.mxu1 %v1026_v51  ;;  %v1326_v51 = vld [vmem:[%s1788_s1 + $0x38c] ss:$16 sps:$4 sm:$0xff]  }
  0x47   :  { %895 = vmatpush1.bf16.msra.mxu0 %v1261_v12  ;;  %v993_v10 = vsub.s32 0, %v992_v9  ;;  %v997_v12 = vsub.s32 1, %v992_v9 }
  0x48   :  { %936 = vmatpush1.bf16.msra.mxu1 %v1264_v13  ;;  %896 = vmatprep.subr.bf16.mxu0 %v1269_v14 }
  0x49   :  { %937 = vmatprep.subr.bf16.mxu1 %v1272_v15  ;;  %v994_v13 = vrot.slane %v989_v11, %v993_v10 }
  0x4b   :  { %897 = vmatpush1.bf16.msra.mxu0 %v1267_v16 }
  0x4c   :  { %938 = vmatpush1.bf16.msra.mxu1 %v1270_v17  ;;  %898 = vmatprep.subr.bf16.mxu0 %v1275_v18  ;;  %v998_v17 = vrot.slane %v989_v11, %v997_v12 }
  0x4d   :  { %939 = vmatprep.subr.bf16.mxu1 %v1278_v19 }
  0x4f   :  { %899 = vmatpush1.bf16.msra.mxu0 %v1273_v20 }
  0x50   :  { %940 = vmatpush1.bf16.msra.mxu1 %v1276_v21  ;;  %900 = vmatprep.subr.bf16.mxu0 %v1281_v22 }
  0x51   :  { %941 = vmatprep.subr.bf16.mxu1 %v1284_v23 }
  0x53   :  { %901 = vmatpush1.bf16.msra.mxu0 %v1279_v24 }
  0x54   :  { %942 = vmatpush1.bf16.msra.mxu1 %v1282_v25  ;;  %902 = vmatprep.subr.bf16.mxu0 %v1287_v26  ;;  %v1001_v25 = vsub.s32 2, %v992_v9  ;;  %v1005_v26 = vsub.s32 3, %v992_v9 }
  0x55   :  { %943 = vmatprep.subr.bf16.mxu1 %v1290_v27 }
  0x56   :  { %v1002_v27 = vrot.slane %v989_v11, %v1001_v25 }
  0x57   :  { %903 = vmatpush1.bf16.msra.mxu0 %v1285_v28 }
  0x58   :  { %944 = vmatpush1.bf16.msra.mxu1 %v1288_v29  ;;  %904 = vmatprep.subr.bf16.mxu0 %v1293_v30 }
  0x59   :  { %945 = vmatprep.subr.bf16.mxu1 %v1296_v31  ;;  %v1006_v31 = vrot.slane %v989_v11, %v1005_v26 }
  0x5b   :  { %905 = vmatpush1.bf16.msra.mxu0 %v1291_v32 }
  0x5c   :  { %946 = vmatpush1.bf16.msra.mxu1 %v1294_v33  ;;  %906 = vmatprep.subr.bf16.mxu0 %v1299_v34 }
  0x5d   :  { %947 = vmatprep.subr.bf16.mxu1 %v1302_v35 }
  0x5f   :  { %907 = vmatpush1.bf16.msra.mxu0 %v1297_v36 }
  0x60   :  { %948 = vmatpush1.bf16.msra.mxu1 %v1300_v37  ;;  %908 = vmatprep.subr.bf16.mxu0 %v1305_v38 }
  0x61   :  { %949 = vmatprep.subr.bf16.mxu1 %v1308_v39 }
  0x63   :  { %909 = vmatpush2.bf16.msra.mxu0 %v1303_v40 }
  0x64   :  { %950 = vmatpush2.bf16.msra.mxu1 %v1306_v41  ;;  %910 = vmatprep.subr.bf16.mxu0 %v1311_v42 }
  0x65   :  { %951 = vmatprep.subr.bf16.mxu1 %v1314_v43 }
  0x67   :  { %911 = vmatpush2.bf16.msra.mxu0 %v1309_v44 }
  0x68   :  { %952 = vmatpush2.bf16.msra.mxu1 %v1312_v45  ;;  %912 = vmatprep.subr.bf16.mxu0 %v1317_v46 }
  0x69   :  { %953 = vmatprep.subr.bf16.mxu1 %v1320_v47 }
  0x6b   :  { %913 = vmatpush2.bf16.msra.mxu0 %v1315_v48 }
  0x6c   :  { %954 = vmatpush2.bf16.msra.mxu1 %v1318_v49  ;;  %914 = vmatprep.subr.bf16.mxu0 %v1323_v50 }
  0x6d   :  { %955 = vmatprep.subr.bf16.mxu1 %v1326_v51 }
  0x6f   :  { %915 = vmatpush2.bf16.msra.mxu0 %v1321_v52 }
  0x70   :  { %956 = vmatpush2.bf16.msra.mxu1 %v1324_v53  ;;  %916 = vmatprep.subr.bf16.mxu0 %v1329_v54 }
  0x71   :  { %957 = vmatprep.subr.bf16.mxu1 %v1332_v55 }
  0x73   :  { %917 = vmatpush2.bf16.msra.mxu0 %v1327_v56 }
  0x74   :  { %958 = vmatpush2.bf16.msra.mxu1 %v1330_v57  ;;  %918 = vmatprep.subr.bf16.mxu0 %v1335_v58 }
  0x75   :  { %959 = vmatprep.subr.bf16.mxu1 %v1338_v59 }
  0x77   :  { %919 = vmatpush2.bf16.msra.mxu0 %v1333_v60 }
  0x78   :  { %960 = vmatpush2.bf16.msra.mxu1 %v1336_v61  ;;  %920 = vmatprep.subr.bf16.mxu0 %v1341_v62 }
  0x79   :  { %961 = vmatprep.subr.bf16.mxu1 %v1344_v63 }
  0x7b   :  { %921 = vmatpush2.bf16.msra.mxu0 %v1339_v0 }
  0x7c   :  { %962 = vmatpush2.bf16.msra.mxu1 %v1342_v1  ;;  %922 = vmatprep.subr.bf16.mxu0 %v1347_v2 }
  0x7d   :  { %963 = vmatprep.subr.bf16.mxu1 %v1350_v3 }
  0x7f   :  { %923 = vmatpush2.bf16.msra.mxu0 %v1345_v4 }
  0x80   :  { %964 = vmatpush2.bf16.msra.mxu1 %v1348_v5 }
  0x82   :  { %925 = vmatmul.mubr.bf16.vlgmr.msra.gmra.mxu0 %v1578_v6 }
  0x83   :  { %966 = vmatmul.mubr.bf16.vlgmr.msra.gmra.mxu1 %v1580_v7 }
 0x102   :  { %v844_v14 = vpop.f32.mrf.mxu0 }
 0x103   :  { %v885_v15 = vpop.f32.mrf.mxu1 }
 0x104   :  { %v886_v16 = vadd.f32 %v885_v15, %v844_v14  ;;  %v846_v18 = vpop.f32.mrf.mxu0 }
 0x105   :  { %v887_v19 = vpop.f32.mrf.mxu1 }
 0x106   :  { %v1011_v20 = vadd.f32 %v994_v13, %v886_v16  ;;  %v888_v21 = vadd.f32 %v887_v19, %v846_v18  ;;  %v848_v6 = vpop.f32.mrf.mxu0 }
 0x107   :  { %v889_v22 = vpop.f32.mrf.mxu1 }
 0x108   :  { %1015 = vst [vmem:[%s1791_s3] sm:$0xff] %v1011_v20  ;;  %v1012_v7 = vadd.f32 %v998_v17, %v888_v21  ;;  %v849_v23 = vpop.f32.mrf.mxu0 }
 0x109   :  { %v890_v24 = vpop.f32.mrf.mxu1 }
 0x10a   :  { %1016 = vst [vmem:[%s1791_s3 + $0x8] sm:$0xff] %v1012_v7 }
 0x142   :  { %v926_v28 = vpop.f32.mrf.mxu0 }
 0x143   :  { %v967_v29 = vpop.f32.mrf.mxu1 }
 0x144   :  { %v968_v30 = vadd.f32 %v967_v29, %v926_v28  ;;  %v928_v32 = vpop.f32.mrf.mxu0 }
 0x145   :  { %v969_v33 = vpop.f32.mrf.mxu1 }
 0x146   :  { %v1013_v34 = vadd.f32 %v1002_v27, %v968_v30  ;;  %v970_v35 = vadd.f32 %v969_v33, %v928_v32  ;;  %v930_v36 = vpop.f32.mrf.mxu0 }
 0x147   :  { %v971_v37 = vpop.f32.mrf.mxu1 }
 0x148   :  { %1017 = vst [vmem:[%s1791_s3 + $0x10] sm:$0xff] %v1013_v34  ;;  %v1014_v38 = vadd.f32 %v1006_v31, %v970_v35  ;;  %v931_v39 = vpop.f32.mrf.mxu0 }
 0x149   :  { %v972_v40 = vpop.f32.mrf.mxu1 }
 0x14a   :  { %1018 = vst [vmem:[%s1791_s3 + $0x18] sm:$0xff] %v1014_v38 }

// kernel: forward.38
= control target key start
LH: loop header
LB: loop body
LE: loop exit
PB: predicated region body
PF: predicated region fallthrough
CT: control target
= control target key end

     0   :  { %s3486_s1 = inlined_call_operand.vmem [shape: bf16[1024,512], index: 1, kind: input, shape index: {}]   ;;  %s3487_s0 = inlined_call_operand.vmem [shape: bf16[8,1024], index: 0, kind: input, shape index: {}]   ;;  %s3488_s2 = inlined_call_operand.vmem [shape: f32[1,512], index: 2, kind: input, shape index: {}]   ;;  %s3489_s3 = inlined_call_operand.vmem [shape: f32[8,512], index: 3, kind: output, shape index: {}]  }
   0x1   :  { %v2235_v0 = vld [vmem:[%s3486_s1 + $0xe4] ss:$16 sps:$4 sm:$0xff]   ;;  %v2239_v2 = vld [vmem:[%s3486_s1 + $0xe0] ss:$16 sps:$4 sm:$0xff]   ;;  %v27_v48 = vld [vmem:[%s3487_s0 + $0x8] sm:$0xff] }
   0x2   :  { %v2237_v1 = vld [vmem:[%s3486_s1 + $0x2e4] ss:$16 sps:$4 sm:$0xff]   ;;  %1594 = vmatprep.subr.bf16.mxu0 %v2235_v0  ;;  %v2240_v3 = vld [vmem:[%s3486_s1 + $0x2e0] ss:$16 sps:$4 sm:$0xff]   ;;  %v2799_v51 = vcombine.high %v27_v48, %v27_v48 }
   0x3   :  { %1635 = vmatprep.subr.bf16.mxu1 %v2237_v1  ;;  %v2241_v4 = vld [vmem:[%s3486_s1 + $0xc4] ss:$16 sps:$4 sm:$0xff]   ;;  %1595 = vmatpush1.bf16.msra.mxu0 %v2239_v2  ;;  %v2245_v6 = vld [vmem:[%s3486_s1 + $0xc0] ss:$16 sps:$4 sm:$0xff]  }
   0x4   :  { %1636 = vmatpush1.bf16.msra.mxu1 %v2240_v3  ;;  %v2243_v5 = vld [vmem:[%s3486_s1 + $0x2c4] ss:$16 sps:$4 sm:$0xff]   ;;  %1596 = vmatprep.subr.bf16.mxu0 %v2241_v4  ;;  %v2246_v7 = vld [vmem:[%s3486_s1 + $0x2c0] ss:$16 sps:$4 sm:$0xff]  }
   0x5   :  { %1637 = vmatprep.subr.bf16.mxu1 %v2243_v5  ;;  %v2247_v8 = vld [vmem:[%s3486_s1 + $0xa4] ss:$16 sps:$4 sm:$0xff]   ;;  %v2251_v10 = vld [vmem:[%s3486_s1 + $0xa0] ss:$16 sps:$4 sm:$0xff]   ;;  %1667 = vmatprep.mubr.bf16.mxu1 %v2799_v51 }
   0x6   :  { %v2249_v9 = vld [vmem:[%s3486_s1 + $0x2a4] ss:$16 sps:$4 sm:$0xff]   ;;  %v2252_v11 = vld [vmem:[%s3486_s1 + $0x2a0] ss:$16 sps:$4 sm:$0xff]  }
   0x7   :  { %1597 = vmatpush1.bf16.msra.mxu0 %v2245_v6  ;;  %v2253_v12 = vld [vmem:[%s3486_s1 + $0x84] ss:$16 sps:$4 sm:$0xff]   ;;  %v2257_v14 = vld [vmem:[%s3486_s1 + $0x80] ss:$16 sps:$4 sm:$0xff]  }
   0x8   :  { %1638 = vmatpush1.bf16.msra.mxu1 %v2246_v7  ;;  %1598 = vmatprep.subr.bf16.mxu0 %v2247_v8  ;;  %v2255_v13 = vld [vmem:[%s3486_s1 + $0x284] ss:$16 sps:$4 sm:$0xff]   ;;  %v2258_v15 = vld [vmem:[%s3486_s1 + $0x280] ss:$16 sps:$4 sm:$0xff]   ;;  %v2859_v7 = vcombine.low %v27_v48, %v27_v48 }
   0x9   :  { %1639 = vmatprep.subr.bf16.mxu1 %v2249_v9  ;;  %v2259_v16 = vld [vmem:[%s3486_s1 + $0x64] ss:$16 sps:$4 sm:$0xff]   ;;  %v2263_v18 = vld [vmem:[%s3486_s1 + $0x60] ss:$16 sps:$4 sm:$0xff]  }
   0xa   :  { %v2261_v17 = vld [vmem:[%s3486_s1 + $0x264] ss:$16 sps:$4 sm:$0xff]   ;;  %v2264_v19 = vld [vmem:[%s3486_s1 + $0x260] ss:$16 sps:$4 sm:$0xff]  }
   0xb   :  { %1599 = vmatpush1.bf16.msra.mxu0 %v2251_v10  ;;  %v2265_v20 = vld [vmem:[%s3486_s1 + $0x44] ss:$16 sps:$4 sm:$0xff]   ;;  %v2269_v22 = vld [vmem:[%s3486_s1 + $0x40] ss:$16 sps:$4 sm:$0xff]  }
   0xc   :  { %1640 = vmatpush1.bf16.msra.mxu1 %v2252_v11  ;;  %1600 = vmatprep.subr.bf16.mxu0 %v2253_v12  ;;  %v2267_v21 = vld [vmem:[%s3486_s1 + $0x244] ss:$16 sps:$4 sm:$0xff]   ;;  %v2270_v23 = vld [vmem:[%s3486_s1 + $0x240] ss:$16 sps:$4 sm:$0xff]  }
   0xd   :  { %1641 = vmatprep.subr.bf16.mxu1 %v2255_v13  ;;  %v2271_v24 = vld [vmem:[%s3486_s1 + $0x24] ss:$16 sps:$4 sm:$0xff]   ;;  %v2275_v26 = vld [vmem:[%s3486_s1 + $0x20] ss:$16 sps:$4 sm:$0xff]  }
   0xe   :  { %v2273_v25 = vld [vmem:[%s3486_s1 + $0x224] ss:$16 sps:$4 sm:$0xff]   ;;  %v2276_v27 = vld [vmem:[%s3486_s1 + $0x220] ss:$16 sps:$4 sm:$0xff]  }
   0xf   :  { %1601 = vmatpush1.bf16.msra.mxu0 %v2257_v14  ;;  %v2277_v28 = vld [vmem:[%s3486_s1 + $0x4] ss:$16 sps:$4 sm:$0xff]   ;;  %v2281_v30 = vld [vmem:[%s3486_s1] ss:$16 sps:$4 sm:$0xff]  }
  0x10   :  { %1642 = vmatpush1.bf16.msra.mxu1 %v2258_v15  ;;  %1602 = vmatprep.subr.bf16.mxu0 %v2259_v16  ;;  %v2279_v29 = vld [vmem:[%s3486_s1 + $0x204] ss:$16 sps:$4 sm:$0xff]   ;;  %v2282_v31 = vld [vmem:[%s3486_s1 + $0x200] ss:$16 sps:$4 sm:$0xff]  }
  0x11   :  { %1643 = vmatprep.subr.bf16.mxu1 %v2261_v17  ;;  %v2283_v32 = vld [vmem:[%s3486_s1 + $0x1e4] ss:$16 sps:$4 sm:$0xff]   ;;  %v2287_v34 = vld [vmem:[%s3486_s1 + $0x1e0] ss:$16 sps:$4 sm:$0xff]  }
  0x12   :  { %v2285_v33 = vld [vmem:[%s3486_s1 + $0x3e4] ss:$16 sps:$4 sm:$0xff]   ;;  %v2288_v35 = vld [vmem:[%s3486_s1 + $0x3e0] ss:$16 sps:$4 sm:$0xff]  }
  0x13   :  { %1603 = vmatpush1.bf16.msra.mxu0 %v2263_v18  ;;  %v2289_v36 = vld [vmem:[%s3486_s1 + $0x1c4] ss:$16 sps:$4 sm:$0xff]   ;;  %v2293_v38 = vld [vmem:[%s3486_s1 + $0x1c0] ss:$16 sps:$4 sm:$0xff]  }
  0x14   :  { %1644 = vmatpush1.bf16.msra.mxu1 %v2264_v19  ;;  %1604 = vmatprep.subr.bf16.mxu0 %v2265_v20  ;;  %v2291_v37 = vld [vmem:[%s3486_s1 + $0x3c4] ss:$16 sps:$4 sm:$0xff]   ;;  %v2294_v39 = vld [vmem:[%s3486_s1 + $0x3c0] ss:$16 sps:$4 sm:$0xff]  }
  0x15   :  { %1645 = vmatprep.subr.bf16.mxu1 %v2267_v21  ;;  %v2295_v40 = vld [vmem:[%s3486_s1 + $0x1a4] ss:$16 sps:$4 sm:$0xff]   ;;  %v2299_v42 = vld [vmem:[%s3486_s1 + $0x1a0] ss:$16 sps:$4 sm:$0xff]  }
  0x16   :  { %v2297_v41 = vld [vmem:[%s3486_s1 + $0x3a4] ss:$16 sps:$4 sm:$0xff]   ;;  %v2300_v43 = vld [vmem:[%s3486_s1 + $0x3a0] ss:$16 sps:$4 sm:$0xff]  }
  0x17   :  { %1605 = vmatpush1.bf16.msra.mxu0 %v2269_v22  ;;  %v2301_v44 = vld [vmem:[%s3486_s1 + $0x184] ss:$16 sps:$4 sm:$0xff]   ;;  %v2305_v49 = vld [vmem:[%s3486_s1 + $0x180] ss:$16 sps:$4 sm:$0xff]  }
  0x18   :  { %1646 = vmatpush1.bf16.msra.mxu1 %v2270_v23  ;;  %1606 = vmatprep.subr.bf16.mxu0 %v2271_v24  ;;  %v2303_v45 = vld [vmem:[%s3486_s1 + $0x384] ss:$16 sps:$4 sm:$0xff]   ;;  %v2306_v50 = vld [vmem:[%s3486_s1 + $0x380] ss:$16 sps:$4 sm:$0xff]  }
  0x19   :  { %1647 = vmatprep.subr.bf16.mxu1 %v2273_v25  ;;  %v26_v46 = vld [vmem:[%s3487_s0] sm:$0xff] }
  0x1a   :  { %v2788_v47 = vcombine.high %v26_v46, %v26_v46  ;;  %v2307_v52 = vld [vmem:[%s3486_s1 + $0x164] ss:$16 sps:$4 sm:$0xff]   ;;  %v2311_v54 = vld [vmem:[%s3486_s1 + $0x160] ss:$16 sps:$4 sm:$0xff]   ;;  %v2857_v6 = vcombine.low %v26_v46, %v26_v46 }
  0x1b   :  { %1607 = vmatpush1.bf16.msra.mxu0 %v2275_v26  ;;  %v2309_v53 = vld [vmem:[%s3486_s1 + $0x364] ss:$16 sps:$4 sm:$0xff]   ;;  %v2312_v55 = vld [vmem:[%s3486_s1 + $0x360] ss:$16 sps:$4 sm:$0xff]  }
  0x1c   :  { %1648 = vmatpush1.bf16.msra.mxu1 %v2276_v27  ;;  %1608 = vmatprep.subr.bf16.mxu0 %v2277_v28  ;;  %v2313_v56 = vld [vmem:[%s3486_s1 + $0x144] ss:$16 sps:$4 sm:$0xff]   ;;  %v2317_v58 = vld [vmem:[%s3486_s1 + $0x140] ss:$16 sps:$4 sm:$0xff]  }
  0x1d   :  { %1649 = vmatprep.subr.bf16.mxu1 %v2279_v29  ;;  %1626 = vmatprep.mubr.bf16.mxu0 %v2788_v47  ;;  %v2315_v57 = vld [vmem:[%s3486_s1 + $0x344] ss:$16 sps:$4 sm:$0xff]   ;;  %v2318_v59 = vld [vmem:[%s3486_s1 + $0x340] ss:$16 sps:$4 sm:$0xff]  }
  0x1e   :  { %v2319_v60 = vld [vmem:[%s3486_s1 + $0x124] ss:$16 sps:$4 sm:$0xff]   ;;  %v2323_v62 = vld [vmem:[%s3486_s1 + $0x120] ss:$16 sps:$4 sm:$0xff]  }
  0x1f   :  { %1609 = vmatpush1.bf16.msra.mxu0 %v2281_v30  ;;  %v2321_v61 = vld [vmem:[%s3486_s1 + $0x324] ss:$16 sps:$4 sm:$0xff]   ;;  %v2324_v63 = vld [vmem:[%s3486_s1 + $0x320] ss:$16 sps:$4 sm:$0xff]  }
  0x20   :  { %1650 = vmatpush1.bf16.msra.mxu1 %v2282_v31  ;;  %1610 = vmatprep.subr.bf16.mxu0 %v2283_v32  ;;  %v2325_v0 = vld [vmem:[%s3486_s1 + $0x104] ss:$16 sps:$4 sm:$0xff]   ;;  %v2329_v2 = vld [vmem:[%s3486_s1 + $0x100] ss:$16 sps:$4 sm:$0xff]  }
  0x21   :  { %1651 = vmatprep.subr.bf16.mxu1 %v2285_v33  ;;  %v2327_v1 = vld [vmem:[%s3486_s1 + $0x304] ss:$16 sps:$4 sm:$0xff]   ;;  %v2330_v3 = vld [vmem:[%s3486_s1 + $0x300] ss:$16 sps:$4 sm:$0xff]   ;;  %v2943_v33 = vld [vmem:[%s3487_s0 + $0x18] sm:$0xff] }
  0x22   :  { %v2337_v4 = vld [vmem:[%s3486_s1 + $0x4e4] ss:$16 sps:$4 sm:$0xff]   ;;  %v2335_v8 = vld [vmem:[%s3486_s1 + $0x4e0] ss:$16 sps:$4 sm:$0xff]  }
  0x23   :  { %1611 = vmatpush2.bf16.msra.mxu0 %v2287_v34  ;;  %v2340_v5 = vld [vmem:[%s3486_s1 + $0x6e4] ss:$16 sps:$4 sm:$0xff]   ;;  %v2338_v9 = vld [vmem:[%s3486_s1 + $0x6e0] ss:$16 sps:$4 sm:$0xff]  }
  0x24   :  { %1652 = vmatpush2.bf16.msra.mxu1 %v2288_v35  ;;  %1612 = vmatprep.subr.bf16.mxu0 %v2289_v36  ;;  %v2343_v10 = vld [vmem:[%s3486_s1 + $0x4c4] ss:$16 sps:$4 sm:$0xff]   ;;  %v2341_v12 = vld [vmem:[%s3486_s1 + $0x4c0] ss:$16 sps:$4 sm:$0xff]  }
  0x25   :  { %1653 = vmatprep.subr.bf16.mxu1 %v2291_v37  ;;  %v2346_v11 = vld [vmem:[%s3486_s1 + $0x6c4] ss:$16 sps:$4 sm:$0xff]   ;;  %v2344_v13 = vld [vmem:[%s3486_s1 + $0x6c0] ss:$16 sps:$4 sm:$0xff]   ;;  %v2957_v37 = vcombine.high %v2943_v33, %v2943_v33 }
  0x26   :  { %v2349_v14 = vld [vmem:[%s3486_s1 + $0x4a4] ss:$16 sps:$4 sm:$0xff]   ;;  %v2347_v16 = vld [vmem:[%s3486_s1 + $0x4a0] ss:$16 sps:$4 sm:$0xff]  }
  0x27   :  { %1613 = vmatpush2.bf16.msra.mxu0 %v2293_v38  ;;  %v2352_v15 = vld [vmem:[%s3486_s1 + $0x6a4] ss:$16 sps:$4 sm:$0xff]   ;;  %v2350_v17 = vld [vmem:[%s3486_s1 + $0x6a0] ss:$16 sps:$4 sm:$0xff]  }
  0x28   :  { %1654 = vmatpush2.bf16.msra.mxu1 %v2294_v39  ;;  %1614 = vmatprep.subr.bf16.mxu0 %v2295_v40  ;;  %v2355_v18 = vld [vmem:[%s3486_s1 + $0x484] ss:$16 sps:$4 sm:$0xff]   ;;  %v2353_v20 = vld [vmem:[%s3486_s1 + $0x480] ss:$16 sps:$4 sm:$0xff]  }
  0x29   :  { %1655 = vmatprep.subr.bf16.mxu1 %v2297_v41  ;;  %v2358_v19 = vld [vmem:[%s3486_s1 + $0x684] ss:$16 sps:$4 sm:$0xff]   ;;  %v2356_v21 = vld [vmem:[%s3486_s1 + $0x680] ss:$16 sps:$4 sm:$0xff]  }
  0x2a   :  { %v2361_v22 = vld [vmem:[%s3486_s1 + $0x464] ss:$16 sps:$4 sm:$0xff]   ;;  %v2359_v24 = vld [vmem:[%s3486_s1 + $0x460] ss:$16 sps:$4 sm:$0xff]  }
  0x2b   :  { %1615 = vmatpush2.bf16.msra.mxu0 %v2299_v42  ;;  %v2364_v23 = vld [vmem:[%s3486_s1 + $0x664] ss:$16 sps:$4 sm:$0xff]   ;;  %v2362_v25 = vld [vmem:[%s3486_s1 + $0x660] ss:$16 sps:$4 sm:$0xff]  }
  0x2c   :  { %1656 = vmatpush2.bf16.msra.mxu1 %v2300_v43  ;;  %1616 = vmatprep.subr.bf16.mxu0 %v2301_v44  ;;  %v2367_v26 = vld [vmem:[%s3486_s1 + $0x444] ss:$16 sps:$4 sm:$0xff]   ;;  %v2365_v28 = vld [vmem:[%s3486_s1 + $0x440] ss:$16 sps:$4 sm:$0xff]  }
  0x2d   :  { %1657 = vmatprep.subr.bf16.mxu1 %v2303_v45  ;;  %v2370_v27 = vld [vmem:[%s3486_s1 + $0x644] ss:$16 sps:$4 sm:$0xff]   ;;  %v2368_v29 = vld [vmem:[%s3486_s1 + $0x640] ss:$16 sps:$4 sm:$0xff]  }
  0x2e   :  { %v2373_v30 = vld [vmem:[%s3486_s1 + $0x424] ss:$16 sps:$4 sm:$0xff]   ;;  %v2371_v34 = vld [vmem:[%s3486_s1 + $0x420] ss:$16 sps:$4 sm:$0xff]  }
  0x2f   :  { %1617 = vmatpush2.bf16.msra.mxu0 %v2305_v49  ;;  %v2376_v31 = vld [vmem:[%s3486_s1 + $0x624] ss:$16 sps:$4 sm:$0xff]   ;;  %v2374_v35 = vld [vmem:[%s3486_s1 + $0x620] ss:$16 sps:$4 sm:$0xff]  }
  0x30   :  { %1658 = vmatpush2.bf16.msra.mxu1 %v2306_v50  ;;  %1618 = vmatprep.subr.bf16.mxu0 %v2307_v52  ;;  %v2938_v32 = vld [vmem:[%s3487_s0 + $0x10] sm:$0xff] }
  0x31   :  { %1659 = vmatprep.subr.bf16.mxu1 %v2309_v53  ;;  %v2953_v36 = vcombine.high %v2938_v32, %v2938_v32  ;;  %v2379_v38 = vld [vmem:[%s3486_s1 + $0x404] ss:$16 sps:$4 sm:$0xff]   ;;  %v2377_v40 = vld [vmem:[%s3486_s1 + $0x400] ss:$16 sps:$4 sm:$0xff]  }
  0x32   :  { %v2382_v39 = vld [vmem:[%s3486_s1 + $0x604] ss:$16 sps:$4 sm:$0xff]   ;;  %v2380_v41 = vld [vmem:[%s3486_s1 + $0x600] ss:$16 sps:$4 sm:$0xff]  }
  0x33   :  { %1619 = vmatpush2.bf16.msra.mxu0 %v2311_v54  ;;  %v2385_v42 = vld [vmem:[%s3486_s1 + $0x5e4] ss:$16 sps:$4 sm:$0xff]   ;;  %v2383_v44 = vld [vmem:[%s3486_s1 + $0x5e0] ss:$16 sps:$4 sm:$0xff]  }
  0x34   :  { %1660 = vmatpush2.bf16.msra.mxu1 %v2312_v55  ;;  %1620 = vmatprep.subr.bf16.mxu0 %v2313_v56  ;;  %v2388_v43 = vld [vmem:[%s3486_s1 + $0x7e4] ss:$16 sps:$4 sm:$0xff]   ;;  %v2386_v45 = vld [vmem:[%s3486_s1 + $0x7e0] ss:$16 sps:$4 sm:$0xff]  }
  0x35   :  { %1661 = vmatprep.subr.bf16.mxu1 %v2315_v57  ;;  %v2391_v46 = vld [vmem:[%s3486_s1 + $0x5c4] ss:$16 sps:$4 sm:$0xff]   ;;  %v2389_v49 = vld [vmem:[%s3486_s1 + $0x5c0] ss:$16 sps:$4 sm:$0xff]  }
  0x36   :  { %v2394_v48 = vld [vmem:[%s3486_s1 + $0x7c4] ss:$16 sps:$4 sm:$0xff]   ;;  %v2392_v50 = vld [vmem:[%s3486_s1 + $0x7c0] ss:$16 sps:$4 sm:$0xff]  }
  0x37   :  { %1621 = vmatpush2.bf16.msra.mxu0 %v2317_v58  ;;  %v2397_v52 = vld [vmem:[%s3486_s1 + $0x5a4] ss:$16 sps:$4 sm:$0xff]   ;;  %v2395_v54 = vld [vmem:[%s3486_s1 + $0x5a0] ss:$16 sps:$4 sm:$0xff]  }
  0x38   :  { %1662 = vmatpush2.bf16.msra.mxu1 %v2318_v59  ;;  %1622 = vmatprep.subr.bf16.mxu0 %v2319_v60  ;;  %v2400_v53 = vld [vmem:[%s3486_s1 + $0x7a4] ss:$16 sps:$4 sm:$0xff]   ;;  %v2398_v55 = vld [vmem:[%s3486_s1 + $0x7a0] ss:$16 sps:$4 sm:$0xff]  }
  0x39   :  { %1663 = vmatprep.subr.bf16.mxu1 %v2321_v61  ;;  %v2403_v56 = vld [vmem:[%s3486_s1 + $0x584] ss:$16 sps:$4 sm:$0xff]   ;;  %v2401_v58 = vld [vmem:[%s3486_s1 + $0x580] ss:$16 sps:$4 sm:$0xff]  }
  0x3a   :  { %v2406_v57 = vld [vmem:[%s3486_s1 + $0x784] ss:$16 sps:$4 sm:$0xff]   ;;  %v2404_v59 = vld [vmem:[%s3486_s1 + $0x780] ss:$16 sps:$4 sm:$0xff]  }
  0x3b   :  { %1623 = vmatpush2.bf16.msra.mxu0 %v2323_v62  ;;  %v2409_v60 = vld [vmem:[%s3486_s1 + $0x564] ss:$16 sps:$4 sm:$0xff]   ;;  %v2407_v62 = vld [vmem:[%s3486_s1 + $0x560] ss:$16 sps:$4 sm:$0xff]  }
  0x3c   :  { %1664 = vmatpush2.bf16.msra.mxu1 %v2324_v63  ;;  %1624 = vmatprep.subr.bf16.mxu0 %v2325_v0  ;;  %v2412_v61 = vld [vmem:[%s3486_s1 + $0x764] ss:$16 sps:$4 sm:$0xff]   ;;  %v2410_v63 = vld [vmem:[%s3486_s1 + $0x760] ss:$16 sps:$4 sm:$0xff]  }
  0x3d   :  { %1665 = vmatprep.subr.bf16.mxu1 %v2327_v1  ;;  %v2415_v0 = vld [vmem:[%s3486_s1 + $0x544] ss:$16 sps:$4 sm:$0xff]  }
  0x3e   :  { %v2418_v1 = vld [vmem:[%s3486_s1 + $0x744] ss:$16 sps:$4 sm:$0xff]  }
  0x3f   :  { %1625 = vmatpush2.bf16.msra.mxu0 %v2329_v2  ;;  %v2413_v2 = vld [vmem:[%s3486_s1 + $0x540] ss:$16 sps:$4 sm:$0xff]  }
  0x40   :  { %1666 = vmatpush2.bf16.msra.mxu1 %v2330_v3  ;;  %1676 = vmatprep.subr.bf16.mxu0 %v2337_v4  ;;  %v2416_v3 = vld [vmem:[%s3486_s1 + $0x740] ss:$16 sps:$4 sm:$0xff]   ;;  %v2421_v4 = vld [vmem:[%s3486_s1 + $0x524] ss:$16 sps:$4 sm:$0xff]  }
  0x41   :  { %1717 = vmatprep.subr.bf16.mxu1 %v2340_v5  ;;  %v2424_v5 = vld [vmem:[%s3486_s1 + $0x724] ss:$16 sps:$4 sm:$0xff]  }
  0x42   :  { %1627 = vmatmul.mubr.bf16.vlgmr.msra.gmra.mxu0 %v2857_v6 }
  0x43   :  { %1668 = vmatmul.mubr.bf16.vlgmr.msra.gmra.mxu1 %v2859_v7  ;;  %1677 = vmatpush1.bf16.msra.mxu0 %v2335_v8  ;;  %v2419_v8 = vld [vmem:[%s3486_s1 + $0x520] ss:$16 sps:$4 sm:$0xff]  }
  0x44   :  { %1718 = vmatpush1.bf16.msra.mxu1 %v2338_v9  ;;  %1678 = vmatprep.subr.bf16.mxu0 %v2343_v10  ;;  %v2422_v9 = vld [vmem:[%s3486_s1 + $0x720] ss:$16 sps:$4 sm:$0xff]   ;;  %v2427_v10 = vld [vmem:[%s3486_s1 + $0x504] ss:$16 sps:$4 sm:$0xff]  }
  0x45   :  { %1719 = vmatprep.subr.bf16.mxu1 %v2346_v11  ;;  %1708 = vmatprep.mubr.bf16.mxu0 %v2953_v36  ;;  %v2430_v11 = vld [vmem:[%s3486_s1 + $0x704] ss:$16 sps:$4 sm:$0xff]  }
  0x46   :  { %1749 = vmatprep.mubr.bf16.mxu1 %v2957_v37 }
  0x47   :  { %1679 = vmatpush1.bf16.msra.mxu0 %v2341_v12  ;;  %v2425_v12 = vld [vmem:[%s3486_s1 + $0x500] ss:$16 sps:$4 sm:$0xff]  }
  0x48   :  { %1720 = vmatpush1.bf16.msra.mxu1 %v2344_v13  ;;  %1680 = vmatprep.subr.bf16.mxu0 %v2349_v14  ;;  %v2428_v13 = vld [vmem:[%s3486_s1 + $0x700] ss:$16 sps:$4 sm:$0xff]   ;;  %v2437_v14 = vld [vmem:[%s3486_s1 + $0xec] ss:$16 sps:$4 sm:$0xff]  }
  0x49   :  { %1721 = vmatprep.subr.bf16.mxu1 %v2352_v15  ;;  %v2440_v15 = vld [vmem:[%s3486_s1 + $0x2ec] ss:$16 sps:$4 sm:$0xff]  }
  0x4b   :  { %1681 = vmatpush1.bf16.msra.mxu0 %v2347_v16  ;;  %v3077_v16 = vcombine.low %v2938_v32, %v2938_v32  ;;  %v2459_v32 = vld [vmem:[%s3486_s1 + $0x68] ss:$16 sps:$4 sm:$0xff]  }
  0x4c   :  { %1722 = vmatpush1.bf16.msra.mxu1 %v2350_v17  ;;  %1682 = vmatprep.subr.bf16.mxu0 %v2355_v18  ;;  %v3081_v17 = vcombine.low %v2943_v33, %v2943_v33  ;;  %v2435_v18 = vld [vmem:[%s3486_s1 + $0xe8] ss:$16 sps:$4 sm:$0xff]  }
  0x4d   :  { %1723 = vmatprep.subr.bf16.mxu1 %v2358_v19  ;;  %v2438_v19 = vld [vmem:[%s3486_s1 + $0x2e8] ss:$16 sps:$4 sm:$0xff]  }
  0x4e   :  { %v2462_v33 = vld [vmem:[%s3486_s1 + $0x268] ss:$16 sps:$4 sm:$0xff]  }
  0x4f   :  { %1683 = vmatpush1.bf16.msra.mxu0 %v2353_v20  ;;  %v2443_v20 = vld [vmem:[%s3486_s1 + $0xcc] ss:$16 sps:$4 sm:$0xff]  }
  0x50   :  { %1724 = vmatpush1.bf16.msra.mxu1 %v2356_v21  ;;  %1684 = vmatprep.subr.bf16.mxu0 %v2361_v22  ;;  %v2446_v21 = vld [vmem:[%s3486_s1 + $0x2cc] ss:$16 sps:$4 sm:$0xff]   ;;  %v2441_v22 = vld [vmem:[%s3486_s1 + $0xc8] ss:$16 sps:$4 sm:$0xff]  }
  0x51   :  { %1725 = vmatprep.subr.bf16.mxu1 %v2364_v23  ;;  %v2444_v23 = vld [vmem:[%s3486_s1 + $0x2c8] ss:$16 sps:$4 sm:$0xff]  }
  0x53   :  { %1685 = vmatpush1.bf16.msra.mxu0 %v2359_v24  ;;  %v2449_v24 = vld [vmem:[%s3486_s1 + $0xac] ss:$16 sps:$4 sm:$0xff]  }
  0x54   :  { %1726 = vmatpush1.bf16.msra.mxu1 %v2362_v25  ;;  %1686 = vmatprep.subr.bf16.mxu0 %v2367_v26  ;;  %v2452_v25 = vld [vmem:[%s3486_s1 + $0x2ac] ss:$16 sps:$4 sm:$0xff]   ;;  %v2447_v26 = vld [vmem:[%s3486_s1 + $0xa8] ss:$16 sps:$4 sm:$0xff]  }
  0x55   :  { %1727 = vmatprep.subr.bf16.mxu1 %v2370_v27  ;;  %v2450_v27 = vld [vmem:[%s3486_s1 + $0x2a8] ss:$16 sps:$4 sm:$0xff]  }
  0x57   :  { %1687 = vmatpush1.bf16.msra.mxu0 %v2365_v28  ;;  %v2455_v28 = vld [vmem:[%s3486_s1 + $0x8c] ss:$16 sps:$4 sm:$0xff]  }
  0x58   :  { %1728 = vmatpush1.bf16.msra.mxu1 %v2368_v29  ;;  %1688 = vmatprep.subr.bf16.mxu0 %v2373_v30  ;;  %v2456_v29 = vld [vmem:[%s3486_s1 + $0x288] ss:$16 sps:$4 sm:$0xff]   ;;  %v2461_v30 = vld [vmem:[%s3486_s1 + $0x6c] ss:$16 sps:$4 sm:$0xff]  }
  0x59   :  { %1729 = vmatprep.subr.bf16.mxu1 %v2376_v31  ;;  %v2464_v31 = vld [vmem:[%s3486_s1 + $0x26c] ss:$16 sps:$4 sm:$0xff]  }
  0x5b   :  { %1689 = vmatpush1.bf16.msra.mxu0 %v2371_v34  ;;  %v2467_v34 = vld [vmem:[%s3486_s1 + $0x4c] ss:$16 sps:$4 sm:$0xff]  }
  0x5c   :  { %1730 = vmatpush1.bf16.msra.mxu1 %v2374_v35  ;;  %1690 = vmatprep.subr.bf16.mxu0 %v2379_v38  ;;  %v2470_v35 = vld [vmem:[%s3486_s1 + $0x24c] ss:$16 sps:$4 sm:$0xff]   ;;  %v2465_v38 = vld [vmem:[%s3486_s1 + $0x48] ss:$16 sps:$4 sm:$0xff]  }
  0x5d   :  { %1731 = vmatprep.subr.bf16.mxu1 %v2382_v39  ;;  %v2468_v39 = vld [vmem:[%s3486_s1 + $0x248] ss:$16 sps:$4 sm:$0xff]  }
  0x5f   :  { %1691 = vmatpush1.bf16.msra.mxu0 %v2377_v40  ;;  %v2473_v40 = vld [vmem:[%s3486_s1 + $0x2c] ss:$16 sps:$4 sm:$0xff]  }
  0x60   :  { %1732 = vmatpush1.bf16.msra.mxu1 %v2380_v41  ;;  %1692 = vmatprep.subr.bf16.mxu0 %v2385_v42  ;;  %v2476_v41 = vld [vmem:[%s3486_s1 + $0x22c] ss:$16 sps:$4 sm:$0xff]   ;;  %v2471_v42 = vld [vmem:[%s3486_s1 + $0x28] ss:$16 sps:$4 sm:$0xff]  }
  0x61   :  { %1733 = vmatprep.subr.bf16.mxu1 %v2388_v43  ;;  %v2474_v43 = vld [vmem:[%s3486_s1 + $0x228] ss:$16 sps:$4 sm:$0xff]  }
  0x63   :  { %1693 = vmatpush2.bf16.msra.mxu0 %v2383_v44  ;;  %v2479_v44 = vld [vmem:[%s3486_s1 + $0xc] ss:$16 sps:$4 sm:$0xff]  }
  0x64   :  { %1734 = vmatpush2.bf16.msra.mxu1 %v2386_v45  ;;  %1694 = vmatprep.subr.bf16.mxu0 %v2391_v46  ;;  %v2482_v45 = vld [vmem:[%s3486_s1 + $0x20c] ss:$16 sps:$4 sm:$0xff]   ;;  %v2477_v46 = vld [vmem:[%s3486_s1 + $0x8] ss:$16 sps:$4 sm:$0xff]  }
  0x65   :  { %1735 = vmatprep.subr.bf16.mxu1 %v2394_v48  ;;  %v2480_v48 = vld [vmem:[%s3486_s1 + $0x208] ss:$16 sps:$4 sm:$0xff]  }
  0x67   :  { %1695 = vmatpush2.bf16.msra.mxu0 %v2389_v49  ;;  %v2485_v49 = vld [vmem:[%s3486_s1 + $0x1ec] ss:$16 sps:$4 sm:$0xff]  }
  0x68   :  { %1736 = vmatpush2.bf16.msra.mxu1 %v2392_v50  ;;  %1696 = vmatprep.subr.bf16.mxu0 %v2397_v52  ;;  %v2488_v50 = vld [vmem:[%s3486_s1 + $0x3ec] ss:$16 sps:$4 sm:$0xff]   ;;  %v2483_v52 = vld [vmem:[%s3486_s1 + $0x1e8] ss:$16 sps:$4 sm:$0xff]  }
  0x69   :  { %1737 = vmatprep.subr.bf16.mxu1 %v2400_v53  ;;  %v2486_v53 = vld [vmem:[%s3486_s1 + $0x3e8] ss:$16 sps:$4 sm:$0xff]  }
  0x6b   :  { %1697 = vmatpush2.bf16.msra.mxu0 %v2395_v54  ;;  %v2491_v54 = vld [vmem:[%s3486_s1 + $0x1cc] ss:$16 sps:$4 sm:$0xff]  }
  0x6c   :  { %1738 = vmatpush2.bf16.msra.mxu1 %v2398_v55  ;;  %1698 = vmatprep.subr.bf16.mxu0 %v2403_v56  ;;  %v2494_v55 = vld [vmem:[%s3486_s1 + $0x3cc] ss:$16 sps:$4 sm:$0xff]   ;;  %v2489_v56 = vld [vmem:[%s3486_s1 + $0x1c8] ss:$16 sps:$4 sm:$0xff]  }
  0x6d   :  { %1739 = vmatprep.subr.bf16.mxu1 %v2406_v57  ;;  %v2492_v57 = vld [vmem:[%s3486_s1 + $0x3c8] ss:$16 sps:$4 sm:$0xff]  }
  0x6f   :  { %1699 = vmatpush2.bf16.msra.mxu0 %v2401_v58  ;;  %v2497_v58 = vld [vmem:[%s3486_s1 + $0x1ac] ss:$16 sps:$4 sm:$0xff]  }
  0x70   :  { %1740 = vmatpush2.bf16.msra.mxu1 %v2404_v59  ;;  %1700 = vmatprep.subr.bf16.mxu0 %v2409_v60  ;;  %v2500_v59 = vld [vmem:[%s3486_s1 + $0x3ac] ss:$16 sps:$4 sm:$0xff]   ;;  %v2495_v60 = vld [vmem:[%s3486_s1 + $0x1a8] ss:$16 sps:$4 sm:$0xff]  }
  0x71   :  { %1741 = vmatprep.subr.bf16.mxu1 %v2412_v61  ;;  %v2498_v61 = vld [vmem:[%s3486_s1 + $0x3a8] ss:$16 sps:$4 sm:$0xff]  }
  0x73   :  { %1701 = vmatpush2.bf16.msra.mxu0 %v2407_v62  ;;  %v2503_v62 = vld [vmem:[%s3486_s1 + $0x18c] ss:$16 sps:$4 sm:$0xff]  }
  0x74   :  { %1742 = vmatpush2.bf16.msra.mxu1 %v2410_v63  ;;  %1702 = vmatprep.subr.bf16.mxu0 %v2415_v0  ;;  %v2506_v63 = vld [vmem:[%s3486_s1 + $0x38c] ss:$16 sps:$4 sm:$0xff]   ;;  %v2501_v0 = vld [vmem:[%s3486_s1 + $0x188] ss:$16 sps:$4 sm:$0xff]  }
  0x75   :  { %1743 = vmatprep.subr.bf16.mxu1 %v2418_v1  ;;  %v2504_v1 = vld [vmem:[%s3486_s1 + $0x388] ss:$16 sps:$4 sm:$0xff]  }
  0x77   :  { %1703 = vmatpush2.bf16.msra.mxu0 %v2413_v2  ;;  %v2509_v2 = vld [vmem:[%s3486_s1 + $0x16c] ss:$16 sps:$4 sm:$0xff]  }
  0x78   :  { %1744 = vmatpush2.bf16.msra.mxu1 %v2416_v3  ;;  %1704 = vmatprep.subr.bf16.mxu0 %v2421_v4  ;;  %v2512_v3 = vld [vmem:[%s3486_s1 + $0x36c] ss:$16 sps:$4 sm:$0xff]   ;;  %v2507_v4 = vld [vmem:[%s3486_s1 + $0x168] ss:$16 sps:$4 sm:$0xff]  }
  0x79   :  { %1745 = vmatprep.subr.bf16.mxu1 %v2424_v5  ;;  %v2510_v5 = vld [vmem:[%s3486_s1 + $0x368] ss:$16 sps:$4 sm:$0xff]  }
  0x7b   :  { %1705 = vmatpush2.bf16.msra.mxu0 %v2419_v8  ;;  %v2515_v8 = vld [vmem:[%s3486_s1 + $0x14c] ss:$16 sps:$4 sm:$0xff]  }
  0x7c   :  { %1746 = vmatpush2.bf16.msra.mxu1 %v2422_v9  ;;  %1706 = vmatprep.subr.bf16.mxu0 %v2427_v10  ;;  %v2518_v9 = vld [vmem:[%s3486_s1 + $0x34c] ss:$16 sps:$4 sm:$0xff]   ;;  %v2513_v10 = vld [vmem:[%s3486_s1 + $0x148] ss:$16 sps:$4 sm:$0xff]  }
  0x7d   :  { %1747 = vmatprep.subr.bf16.mxu1 %v2430_v11  ;;  %v2516_v11 = vld [vmem:[%s3486_s1 + $0x348] ss:$16 sps:$4 sm:$0xff]  }
  0x7f   :  { %1707 = vmatpush2.bf16.msra.mxu0 %v2425_v12  ;;  %v2521_v12 = vld [vmem:[%s3486_s1 + $0x12c] ss:$16 sps:$4 sm:$0xff]  }
  0x80   :  { %1748 = vmatpush2.bf16.msra.mxu1 %v2428_v13  ;;  %1758 = vmatprep.subr.bf16.mxu0 %v2437_v14  ;;  %v2524_v13 = vld [vmem:[%s3486_s1 + $0x32c] ss:$16 sps:$4 sm:$0xff]   ;;  %v2519_v14 = vld [vmem:[%s3486_s1 + $0x128] ss:$16 sps:$4 sm:$0xff]  }
  0x81   :  { %1799 = vmatprep.subr.bf16.mxu1 %v2440_v15  ;;  %v2522_v15 = vld [vmem:[%s3486_s1 + $0x328] ss:$16 sps:$4 sm:$0xff]  }
  0x82   :  { %1709 = vmatmul.mubr.bf16.vlgmr.msra.gmra.mxu0 %v3077_v16 }
  0x83   :  { %1750 = vmatmul.mubr.bf16.vlgmr.msra.gmra.mxu1 %v3081_v17  ;;  %1759 = vmatpush1.bf16.msra.mxu0 %v2435_v18  ;;  %v2527_v18 = vld [vmem:[%s3486_s1 + $0x10c] ss:$16 sps:$4 sm:$0xff]  }
  0x84   :  { %1800 = vmatpush1.bf16.msra.mxu1 %v2438_v19  ;;  %1760 = vmatprep.subr.bf16.mxu0 %v2443_v20  ;;  %v2530_v19 = vld [vmem:[%s3486_s1 + $0x30c] ss:$16 sps:$4 sm:$0xff]   ;;  %v2525_v20 = vld [vmem:[%s3486_s1 + $0x108] ss:$16 sps:$4 sm:$0xff]  }
  0x85   :  { %1801 = vmatprep.subr.bf16.mxu1 %v2446_v21  ;;  %1790 = vmatprep.mubr.bf16.mxu0 %v2788_v47  ;;  %v2458_v47 = vld [vmem:[%s3486_s1 + $0x28c] ss:$16 sps:$4 sm:$0xff]   ;;  %v2528_v21 = vld [vmem:[%s3486_s1 + $0x308] ss:$16 sps:$4 sm:$0xff]  }
  0x86   :  { %1831 = vmatprep.mubr.bf16.mxu1 %v2799_v51  ;;  %v2453_v51 = vld [vmem:[%s3486_s1 + $0x88] ss:$16 sps:$4 sm:$0xff]  }
  0x87   :  { %1761 = vmatpush1.bf16.msra.mxu0 %v2441_v22  ;;  %v2533_v22 = vld [vmem:[%s3486_s1 + $0x4ec] ss:$16 sps:$4 sm:$0xff]  }
  0x88   :  { %1802 = vmatpush1.bf16.msra.mxu1 %v2444_v23  ;;  %1762 = vmatprep.subr.bf16.mxu0 %v2449_v24  ;;  %v2536_v23 = vld [vmem:[%s3486_s1 + $0x6ec] ss:$16 sps:$4 sm:$0xff]   ;;  %v2531_v24 = vld [vmem:[%s3486_s1 + $0x4e8] ss:$16 sps:$4 sm:$0xff]  }
  0x89   :  { %1803 = vmatprep.subr.bf16.mxu1 %v2452_v25  ;;  %v2534_v25 = vld [vmem:[%s3486_s1 + $0x6e8] ss:$16 sps:$4 sm:$0xff]  }
  0x8b   :  { %1763 = vmatpush1.bf16.msra.mxu0 %v2447_v26  ;;  %v2539_v26 = vld [vmem:[%s3486_s1 + $0x4cc] ss:$16 sps:$4 sm:$0xff]  }
  0x8c   :  { %1804 = vmatpush1.bf16.msra.mxu1 %v2450_v27  ;;  %1764 = vmatprep.subr.bf16.mxu0 %v2455_v28  ;;  %v2542_v27 = vld [vmem:[%s3486_s1 + $0x6cc] ss:$16 sps:$4 sm:$0xff]   ;;  %v2537_v28 = vld [vmem:[%s3486_s1 + $0x4c8] ss:$16 sps:$4 sm:$0xff]  }
  0x8d   :  { %1805 = vmatprep.subr.bf16.mxu1 %v2458_v47  ;;  %v2540_v47 = vld [vmem:[%s3486_s1 + $0x6c8] ss:$16 sps:$4 sm:$0xff]  }
  0x8f   :  { %1765 = vmatpush1.bf16.msra.mxu0 %v2453_v51  ;;  %v2545_v51 = vld [vmem:[%s3486_s1 + $0x4ac] ss:$16 sps:$4 sm:$0xff]  }
  0x90   :  { %1806 = vmatpush1.bf16.msra.mxu1 %v2456_v29  ;;  %1766 = vmatprep.subr.bf16.mxu0 %v2461_v30  ;;  %v2546_v29 = vld [vmem:[%s3486_s1 + $0x6a8] ss:$16 sps:$4 sm:$0xff]   ;;  %v2551_v30 = vld [vmem:[%s3486_s1 + $0x48c] ss:$16 sps:$4 sm:$0xff]  }
  0x91   :  { %1807 = vmatprep.subr.bf16.mxu1 %v2464_v31  ;;  %v2552_v31 = vld [vmem:[%s3486_s1 + $0x688] ss:$16 sps:$4 sm:$0xff]  }
  0x93   :  { %1767 = vmatpush1.bf16.msra.mxu0 %v2459_v32  ;;  %v2557_v32 = vld [vmem:[%s3486_s1 + $0x46c] ss:$16 sps:$4 sm:$0xff]  }
  0x94   :  { %1808 = vmatpush1.bf16.msra.mxu1 %v2462_v33  ;;  %1768 = vmatprep.subr.bf16.mxu0 %v2467_v34  ;;  %v2560_v33 = vld [vmem:[%s3486_s1 + $0x66c] ss:$16 sps:$4 sm:$0xff]   ;;  %v2555_v34 = vld [vmem:[%s3486_s1 + $0x468] ss:$16 sps:$4 sm:$0xff]  }
  0x95   :  { %1809 = vmatprep.subr.bf16.mxu1 %v2470_v35  ;;  %v2558_v35 = vld [vmem:[%s3486_s1 + $0x668] ss:$16 sps:$4 sm:$0xff]  }
  0x97   :  { %1769 = vmatpush1.bf16.msra.mxu0 %v2465_v38  ;;  %v2563_v38 = vld [vmem:[%s3486_s1 + $0x44c] ss:$16 sps:$4 sm:$0xff]  }
  0x98   :  { %1810 = vmatpush1.bf16.msra.mxu1 %v2468_v39  ;;  %1770 = vmatprep.subr.bf16.mxu0 %v2473_v40  ;;  %v2566_v39 = vld [vmem:[%s3486_s1 + $0x64c] ss:$16 sps:$4 sm:$0xff]   ;;  %v2561_v40 = vld [vmem:[%s3486_s1 + $0x448] ss:$16 sps:$4 sm:$0xff]  }
  0x99   :  { %1811 = vmatprep.subr.bf16.mxu1 %v2476_v41  ;;  %v2564_v41 = vld [vmem:[%s3486_s1 + $0x648] ss:$16 sps:$4 sm:$0xff]  }
  0x9b   :  { %1771 = vmatpush1.bf16.msra.mxu0 %v2471_v42  ;;  %v2569_v42 = vld [vmem:[%s3486_s1 + $0x42c] ss:$16 sps:$4 sm:$0xff]  }
  0x9c   :  { %1812 = vmatpush1.bf16.msra.mxu1 %v2474_v43  ;;  %1772 = vmatprep.subr.bf16.mxu0 %v2479_v44  ;;  %v2572_v43 = vld [vmem:[%s3486_s1 + $0x62c] ss:$16 sps:$4 sm:$0xff]   ;;  %v2567_v44 = vld [vmem:[%s3486_s1 + $0x428] ss:$16 sps:$4 sm:$0xff]  }
  0x9d   :  { %1813 = vmatprep.subr.bf16.mxu1 %v2482_v45  ;;  %v2570_v45 = vld [vmem:[%s3486_s1 + $0x628] ss:$16 sps:$4 sm:$0xff]  }
  0x9f   :  { %1773 = vmatpush1.bf16.msra.mxu0 %v2477_v46  ;;  %v2575_v46 = vld [vmem:[%s3486_s1 + $0x40c] ss:$16 sps:$4 sm:$0xff]  }
  0xa0   :  { %1814 = vmatpush1.bf16.msra.mxu1 %v2480_v48  ;;  %1774 = vmatprep.subr.bf16.mxu0 %v2485_v49  ;;  %v2578_v48 = vld [vmem:[%s3486_s1 + $0x60c] ss:$16 sps:$4 sm:$0xff]   ;;  %v2573_v49 = vld [vmem:[%s3486_s1 + $0x408] ss:$16 sps:$4 sm:$0xff]  }
  0xa1   :  { %1815 = vmatprep.subr.bf16.mxu1 %v2488_v50  ;;  %v2576_v50 = vld [vmem:[%s3486_s1 + $0x608] ss:$16 sps:$4 sm:$0xff]  }
  0xa3   :  { %1775 = vmatpush2.bf16.msra.mxu0 %v2483_v52  ;;  %v2581_v52 = vld [vmem:[%s3486_s1 + $0x5ec] ss:$16 sps:$4 sm:$0xff]  }
  0xa4   :  { %1816 = vmatpush2.bf16.msra.mxu1 %v2486_v53  ;;  %1776 = vmatprep.subr.bf16.mxu0 %v2491_v54  ;;  %v2584_v53 = vld [vmem:[%s3486_s1 + $0x7ec] ss:$16 sps:$4 sm:$0xff]   ;;  %v2579_v54 = vld [vmem:[%s3486_s1 + $0x5e8] ss:$16 sps:$4 sm:$0xff]  }
  0xa5   :  { %1817 = vmatprep.subr.bf16.mxu1 %v2494_v55  ;;  %v2582_v55 = vld [vmem:[%s3486_s1 + $0x7e8] ss:$16 sps:$4 sm:$0xff]  }
  0xa7   :  { %1777 = vmatpush2.bf16.msra.mxu0 %v2489_v56  ;;  %v2587_v56 = vld [vmem:[%s3486_s1 + $0x5cc] ss:$16 sps:$4 sm:$0xff]  }
  0xa8   :  { %1818 = vmatpush2.bf16.msra.mxu1 %v2492_v57  ;;  %1778 = vmatprep.subr.bf16.mxu0 %v2497_v58  ;;  %v2590_v57 = vld [vmem:[%s3486_s1 + $0x7cc] ss:$16 sps:$4 sm:$0xff]   ;;  %v2585_v58 = vld [vmem:[%s3486_s1 + $0x5c8] ss:$16 sps:$4 sm:$0xff]  }
  0xa9   :  { %1819 = vmatprep.subr.bf16.mxu1 %v2500_v59  ;;  %v2588_v59 = vld [vmem:[%s3486_s1 + $0x7c8] ss:$16 sps:$4 sm:$0xff]  }
  0xab   :  { %1779 = vmatpush2.bf16.msra.mxu0 %v2495_v60  ;;  %v2593_v60 = vld [vmem:[%s3486_s1 + $0x5ac] ss:$16 sps:$4 sm:$0xff]  }
  0xac   :  { %1820 = vmatpush2.bf16.msra.mxu1 %v2498_v61  ;;  %1780 = vmatprep.subr.bf16.mxu0 %v2503_v62  ;;  %v2596_v61 = vld [vmem:[%s3486_s1 + $0x7ac] ss:$16 sps:$4 sm:$0xff]   ;;  %v2591_v62 = vld [vmem:[%s3486_s1 + $0x5a8] ss:$16 sps:$4 sm:$0xff]  }
  0xad   :  { %1821 = vmatprep.subr.bf16.mxu1 %v2506_v63  ;;  %v2594_v63 = vld [vmem:[%s3486_s1 + $0x7a8] ss:$16 sps:$4 sm:$0xff]  }
  0xaf   :  { %1781 = vmatpush2.bf16.msra.mxu0 %v2501_v0  ;;  %v2599_v0 = vld [vmem:[%s3486_s1 + $0x58c] ss:$16 sps:$4 sm:$0xff]  }
  0xb0   :  { %1822 = vmatpush2.bf16.msra.mxu1 %v2504_v1  ;;  %1782 = vmatprep.subr.bf16.mxu0 %v2509_v2  ;;  %v2602_v1 = vld [vmem:[%s3486_s1 + $0x78c] ss:$16 sps:$4 sm:$0xff]   ;;  %v2597_v2 = vld [vmem:[%s3486_s1 + $0x588] ss:$16 sps:$4 sm:$0xff]  }
  0xb1   :  { %1823 = vmatprep.subr.bf16.mxu1 %v2512_v3  ;;  %v2600_v3 = vld [vmem:[%s3486_s1 + $0x788] ss:$16 sps:$4 sm:$0xff]  }
  0xb3   :  { %1783 = vmatpush2.bf16.msra.mxu0 %v2507_v4  ;;  %v2605_v4 = vld [vmem:[%s3486_s1 + $0x56c] ss:$16 sps:$4 sm:$0xff]  }
  0xb4   :  { %1824 = vmatpush2.bf16.msra.mxu1 %v2510_v5  ;;  %1784 = vmatprep.subr.bf16.mxu0 %v2515_v8  ;;  %v2608_v5 = vld [vmem:[%s3486_s1 + $0x76c] ss:$16 sps:$4 sm:$0xff]   ;;  %v2603_v8 = vld [vmem:[%s3486_s1 + $0x568] ss:$16 sps:$4 sm:$0xff]  }
  0xb5   :  { %1825 = vmatprep.subr.bf16.mxu1 %v2518_v9  ;;  %v2606_v9 = vld [vmem:[%s3486_s1 + $0x768] ss:$16 sps:$4 sm:$0xff]  }
  0xb7   :  { %1785 = vmatpush2.bf16.msra.mxu0 %v2513_v10  ;;  %v2611_v10 = vld [vmem:[%s3486_s1 + $0x54c] ss:$16 sps:$4 sm:$0xff]  }
  0xb8   :  { %1826 = vmatpush2.bf16.msra.mxu1 %v2516_v11  ;;  %1786 = vmatprep.subr.bf16.mxu0 %v2521_v12  ;;  %v2614_v11 = vld [vmem:[%s3486_s1 + $0x74c] ss:$16 sps:$4 sm:$0xff]   ;;  %v2609_v12 = vld [vmem:[%s3486_s1 + $0x548] ss:$16 sps:$4 sm:$0xff]  }
  0xb9   :  { %1827 = vmatprep.subr.bf16.mxu1 %v2524_v13  ;;  %v2612_v13 = vld [vmem:[%s3486_s1 + $0x748] ss:$16 sps:$4 sm:$0xff]  }
  0xbb   :  { %1787 = vmatpush2.bf16.msra.mxu0 %v2519_v14  ;;  %v2617_v14 = vld [vmem:[%s3486_s1 + $0x52c] ss:$16 sps:$4 sm:$0xff]  }
  0xbc   :  { %1828 = vmatpush2.bf16.msra.mxu1 %v2522_v15  ;;  %1788 = vmatprep.subr.bf16.mxu0 %v2527_v18  ;;  %v2620_v15 = vld [vmem:[%s3486_s1 + $0x72c] ss:$16 sps:$4 sm:$0xff]   ;;  %v2615_v18 = vld [vmem:[%s3486_s1 + $0x528] ss:$16 sps:$4 sm:$0xff]  }
  0xbd   :  { %1829 = vmatprep.subr.bf16.mxu1 %v2530_v19  ;;  %v2618_v19 = vld [vmem:[%s3486_s1 + $0x728] ss:$16 sps:$4 sm:$0xff]  }
  0xbf   :  { %1789 = vmatpush2.bf16.msra.mxu0 %v2525_v20  ;;  %v2623_v20 = vld [vmem:[%s3486_s1 + $0x50c] ss:$16 sps:$4 sm:$0xff]  }
  0xc0   :  { %1830 = vmatpush2.bf16.msra.mxu1 %v2528_v21  ;;  %1840 = vmatprep.subr.bf16.mxu0 %v2533_v22  ;;  %v2626_v21 = vld [vmem:[%s3486_s1 + $0x70c] ss:$16 sps:$4 sm:$0xff]   ;;  %v2621_v22 = vld [vmem:[%s3486_s1 + $0x508] ss:$16 sps:$4 sm:$0xff]  }
  0xc1   :  { %1881 = vmatprep.subr.bf16.mxu1 %v2536_v23  ;;  %v2624_v23 = vld [vmem:[%s3486_s1 + $0x708] ss:$16 sps:$4 sm:$0xff]  }
  0xc2   :  { %1791 = vmatmul.mubr.bf16.vlgmr.msra.gmra.mxu0 %v2857_v6  ;;  %v2548_v6 = vld [vmem:[%s3486_s1 + $0x6ac] ss:$16 sps:$4 sm:$0xff]  }
  0xc3   :  { %1832 = vmatmul.mubr.bf16.vlgmr.msra.gmra.mxu1 %v2859_v7  ;;  %1841 = vmatpush1.bf16.msra.mxu0 %v2531_v24  ;;  %v2543_v7 = vld [vmem:[%s3486_s1 + $0x4a8] ss:$16 sps:$4 sm:$0xff]  }
  0xc4   :  { %1882 = vmatpush1.bf16.msra.mxu1 %v2534_v25  ;;  %1842 = vmatprep.subr.bf16.mxu0 %v2539_v26 }
  0xc5   :  { %1883 = vmatprep.subr.bf16.mxu1 %v2542_v27  ;;  %1872 = vmatprep.mubr.bf16.mxu0 %v2953_v36  ;;  %v2554_v36 = vld [vmem:[%s3486_s1 + $0x68c] ss:$16 sps:$4 sm:$0xff]  }
  0xc6   :  { %1913 = vmatprep.mubr.bf16.mxu1 %v2957_v37  ;;  %v2549_v37 = vld [vmem:[%s3486_s1 + $0x488] ss:$16 sps:$4 sm:$0xff]  }
  0xc7   :  { %1843 = vmatpush1.bf16.msra.mxu0 %v2537_v28 }
  0xc8   :  { %1884 = vmatpush1.bf16.msra.mxu1 %v2540_v47  ;;  %1844 = vmatprep.subr.bf16.mxu0 %v2545_v51 }
  0xc9   :  { %1885 = vmatprep.subr.bf16.mxu1 %v2548_v6 }
  0xcb   :  { %1845 = vmatpush1.bf16.msra.mxu0 %v2543_v7  ;;  %v1939_v7 = vlaneseq }
  0xcc   :  { %1886 = vmatpush1.bf16.msra.mxu1 %v2546_v29  ;;  %1846 = vmatprep.subr.bf16.mxu0 %v2551_v30 }
  0xcd   :  { %1887 = vmatprep.subr.bf16.mxu1 %v2554_v36  ;;  %v1940_v29 = vshrl.u32 %v1939_v7, 7  ;;  %v1937_v36 = vld [vmem:[%s3488_s2] sm:$0xf] }
  0xcf   :  { %1847 = vmatpush1.bf16.msra.mxu0 %v2549_v37  ;;  %v1941_v30 = vsub.s32 0, %v1940_v29 }
  0xd0   :  { %1888 = vmatpush1.bf16.msra.mxu1 %v2552_v31  ;;  %1848 = vmatprep.subr.bf16.mxu0 %v2557_v32  ;;  %v1945_v31 = vsub.s32 1, %v1940_v29 }
  0xd1   :  { %1889 = vmatprep.subr.bf16.mxu1 %v2560_v33 }
  0xd3   :  { %1849 = vmatpush1.bf16.msra.mxu0 %v2555_v34 }
  0xd4   :  { %1890 = vmatpush1.bf16.msra.mxu1 %v2558_v35  ;;  %1850 = vmatprep.subr.bf16.mxu0 %v2563_v38 }
  0xd5   :  { %1891 = vmatprep.subr.bf16.mxu1 %v2566_v39 }
  0xd7   :  { %1851 = vmatpush1.bf16.msra.mxu0 %v2561_v40 }
  0xd8   :  { %1892 = vmatpush1.bf16.msra.mxu1 %v2564_v41  ;;  %1852 = vmatprep.subr.bf16.mxu0 %v2569_v42  ;;  %v1946_v41 = vrot.slane %v1937_v36, %v1945_v31 }
  0xd9   :  { %1893 = vmatprep.subr.bf16.mxu1 %v2572_v43 }
  0xdb   :  { %1853 = vmatpush1.bf16.msra.mxu0 %v2567_v44 }
  0xdc   :  { %1894 = vmatpush1.bf16.msra.mxu1 %v2570_v45  ;;  %1854 = vmatprep.subr.bf16.mxu0 %v2575_v46 }
  0xdd   :  { %1895 = vmatprep.subr.bf16.mxu1 %v2578_v48 }
  0xdf   :  { %1855 = vmatpush1.bf16.msra.mxu0 %v2573_v49 }
  0xe0   :  { %1896 = vmatpush1.bf16.msra.mxu1 %v2576_v50  ;;  %1856 = vmatprep.subr.bf16.mxu0 %v2581_v52 }
  0xe1   :  { %1897 = vmatprep.subr.bf16.mxu1 %v2584_v53 }
  0xe3   :  { %1857 = vmatpush2.bf16.msra.mxu0 %v2579_v54 }
  0xe4   :  { %1898 = vmatpush2.bf16.msra.mxu1 %v2582_v55  ;;  %1858 = vmatprep.subr.bf16.mxu0 %v2587_v56 }
  0xe5   :  { %1899 = vmatprep.subr.bf16.mxu1 %v2590_v57 }
  0xe7   :  { %1859 = vmatpush2.bf16.msra.mxu0 %v2585_v58 }
  0xe8   :  { %1900 = vmatpush2.bf16.msra.mxu1 %v2588_v59  ;;  %1860 = vmatprep.subr.bf16.mxu0 %v2593_v60  ;;  %v1949_v59 = vsub.s32 2, %v1940_v29 }
  0xe9   :  { %1901 = vmatprep.subr.bf16.mxu1 %v2596_v61  ;;  %v1953_v61 = vsub.s32 3, %v1940_v29 }
  0xeb   :  { %1861 = vmatpush2.bf16.msra.mxu0 %v2591_v62 }
  0xec   :  { %1902 = vmatpush2.bf16.msra.mxu1 %v2594_v63  ;;  %1862 = vmatprep.subr.bf16.mxu0 %v2599_v0 }
  0xed   :  { %1903 = vmatprep.subr.bf16.mxu1 %v2602_v1 }
  0xef   :  { %1863 = vmatpush2.bf16.msra.mxu0 %v2597_v2  ;;  %v1950_v2 = vrot.slane %v1937_v36, %v1949_v59 }
  0xf0   :  { %1904 = vmatpush2.bf16.msra.mxu1 %v2600_v3  ;;  %1864 = vmatprep.subr.bf16.mxu0 %v2605_v4 }
  0xf1   :  { %1905 = vmatprep.subr.bf16.mxu1 %v2608_v5 }
  0xf3   :  { %1865 = vmatpush2.bf16.msra.mxu0 %v2603_v8 }
  0xf4   :  { %1906 = vmatpush2.bf16.msra.mxu1 %v2606_v9  ;;  %1866 = vmatprep.subr.bf16.mxu0 %v2611_v10  ;;  %v1954_v9 = vrot.slane %v1937_v36, %v1953_v61 }
  0xf5   :  { %1907 = vmatprep.subr.bf16.mxu1 %v2614_v11 }
  0xf7   :  { %1867 = vmatpush2.bf16.msra.mxu0 %v2609_v12 }
  0xf8   :  { %1908 = vmatpush2.bf16.msra.mxu1 %v2612_v13  ;;  %1868 = vmatprep.subr.bf16.mxu0 %v2617_v14 }
  0xf9   :  { %1909 = vmatprep.subr.bf16.mxu1 %v2620_v15 }
  0xfb   :  { %1869 = vmatpush2.bf16.msra.mxu0 %v2615_v18 }
  0xfc   :  { %1910 = vmatpush2.bf16.msra.mxu1 %v2618_v19  ;;  %1870 = vmatprep.subr.bf16.mxu0 %v2623_v20 }
  0xfd   :  { %1911 = vmatprep.subr.bf16.mxu1 %v2626_v21 }
  0xff   :  { %1871 = vmatpush2.bf16.msra.mxu0 %v2621_v22 }
 0x100   :  { %1912 = vmatpush2.bf16.msra.mxu1 %v2624_v23 }
 0x102   :  { %v1628_v24 = vpop.f32.mrf.mxu0  ;;  %1873 = vmatmul.mubr.bf16.vlgmr.msra.gmra.mxu0 %v3077_v16 }
 0x103   :  { %v1669_v25 = vpop.f32.mrf.mxu1  ;;  %1914 = vmatmul.mubr.bf16.vlgmr.msra.gmra.mxu1 %v3081_v17  ;;  %v1942_v17 = vrot.slane %v1937_v36, %v1941_v30 }
 0x104   :  { %v1630_v26 = vpop.f32.mrf.mxu0  ;;  %v1670_v37 = vadd.f32 %v1669_v25, %v1628_v24 }
 0x105   :  { %v1671_v27 = vpop.f32.mrf.mxu1 }
 0x106   :  { %v1632_v28 = vpop.f32.mrf.mxu0  ;;  %v1672_v16 = vadd.f32 %v1671_v27, %v1630_v26 }
 0x107   :  { %v1673_v47 = vpop.f32.mrf.mxu1 }
 0x108   :  { %v1633_v51 = vpop.f32.mrf.mxu0 }
 0x109   :  { %v1674_v6 = vpop.f32.mrf.mxu1 }
 0x142   :  { %v1710_v32 = vpop.f32.mrf.mxu0 }
 0x143   :  { %v1751_v33 = vpop.f32.mrf.mxu1  ;;  %v1711_v34 = vadd.f32 %v1710_v32, %v1670_v37 }
 0x144   :  { %v1712_v35 = vpop.f32.mrf.mxu0 }
 0x145   :  { %v1753_v38 = vpop.f32.mrf.mxu1  ;;  %v1752_v39 = vadd.f32 %v1751_v33, %v1711_v34  ;;  %v1713_v40 = vadd.f32 %v1712_v35, %v1672_v16 }
 0x146   :  { %v1714_v42 = vpop.f32.mrf.mxu0 }
 0x147   :  { %v1755_v43 = vpop.f32.mrf.mxu1  ;;  %v1959_v44 = vadd.f32 %v1942_v17, %v1752_v39  ;;  %v1754_v45 = vadd.f32 %v1753_v38, %v1713_v40 }
 0x148   :  { %v1715_v46 = vpop.f32.mrf.mxu0 }
 0x149   :  { %v1756_v48 = vpop.f32.mrf.mxu1  ;;  %1963 = vst [vmem:[%s3489_s3] sm:$0xff] %v1959_v44  ;;  %v1960_v49 = vadd.f32 %v1946_v41, %v1754_v45 }
 0x14b   :  { %1964 = vst [vmem:[%s3489_s3 + $0x8] sm:$0xff] %v1960_v49 }
 0x182   :  { %v1792_v50 = vpop.f32.mrf.mxu0 }
 0x183   :  { %v1833_v52 = vpop.f32.mrf.mxu1 }
 0x184   :  { %v1794_v53 = vpop.f32.mrf.mxu0  ;;  %v1834_v60 = vadd.f32 %v1833_v52, %v1792_v50 }
 0x185   :  { %v1835_v54 = vpop.f32.mrf.mxu1 }
 0x186   :  { %v1796_v55 = vpop.f32.mrf.mxu0  ;;  %v1836_v0 = vadd.f32 %v1835_v54, %v1794_v53 }
 0x187   :  { %v1837_v56 = vpop.f32.mrf.mxu1 }
 0x188   :  { %v1797_v57 = vpop.f32.mrf.mxu0 }
 0x189   :  { %v1838_v58 = vpop.f32.mrf.mxu1 }
 0x1c2   :  { %v1874_v62 = vpop.f32.mrf.mxu0 }
 0x1c3   :  { %v1915_v63 = vpop.f32.mrf.mxu1  ;;  %v1875_v1 = vadd.f32 %v1874_v62, %v1834_v60 }
 0x1c4   :  { %v1876_v3 = vpop.f32.mrf.mxu0 }
 0x1c5   :  { %v1917_v4 = vpop.f32.mrf.mxu1  ;;  %v1916_v5 = vadd.f32 %v1915_v63, %v1875_v1  ;;  %v1877_v8 = vadd.f32 %v1876_v3, %v1836_v0 }
 0x1c6   :  { %v1878_v10 = vpop.f32.mrf.mxu0 }
 0x1c7   :  { %v1919_v11 = vpop.f32.mrf.mxu1  ;;  %v1961_v12 = vadd.f32 %v1950_v2, %v1916_v5  ;;  %v1918_v13 = vadd.f32 %v1917_v4, %v1877_v8 }
 0x1c8   :  { %v1879_v14 = vpop.f32.mrf.mxu0 }
 0x1c9   :  { %v1920_v15 = vpop.f32.mrf.mxu1  ;;  %1965 = vst [vmem:[%s3489_s3 + $0x10] sm:$0xff] %v1961_v12  ;;  %v1962_v18 = vadd.f32 %v1954_v9, %v1918_v13 }
 0x1cb   :  { %1966 = vst [vmem:[%s3489_s3 + $0x18] sm:$0xff] %v1962_v18 }

// kernel: forward.57
= control target key start
LH: loop header
LB: loop body
LE: loop exit
PB: predicated region body
PF: predicated region fallthrough
CT: control target
= control target key end

     0   :  { %s4378_s15 = smov 0   ;;  %s4380_s16 = smov 0   ;;  %s5327_s0 = inlined_call_operand.vmem [shape: bf16[2,24576], index: 0, kind: input, shape index: {}]   ;;  %s5328_s1 = inlined_call_operand.vmem [shape: bf16[24576,512], index: 1, kind: input, shape index: {}]   ;;  %s5329_s2 = inlined_call_operand.vmem [shape: f32[1,512], index: 2, kind: input, shape index: {}]   ;;  %s5330_s3 = inlined_call_operand.vmem [shape: f32[1,512], index: 3, kind: input, shape index: {}]   ;;  %s5331_s4 = inlined_call_operand.vmem [shape: f32[2,512], index: 4, kind: output, shape index: {}]  }
   0x1   :  { %s4382_s17 = smov 0   ;;  %s4384_s18 = smov 0  }
   0x2   :  { %s4386_s19 = smov 0   ;;  %s4388_s20 = smov 0  }
   0x3   :  { %s4390_s21 = smov 0  }
   0x4 LB: > { %s23_s22 = sadd.s32 1, %s4340_s19  ;;  %s26_s23 = sadd.s32 1, %s4344_s20  ;;  %s4348_s21 = sphi %s4390_s21, %s14_s21   ;;  %s4344_s20 = sphi %s4388_s20, %s5337_s20   ;;  %s4340_s19 = sphi %s4386_s19, %s5336_s19   ;;  %s4336_s18 = sphi %s4384_s18, %s5335_s18   ;;  %s4332_s17 = sphi %s4382_s17, %s5334_s17   ;;  %s4328_s16 = sphi %s4380_s16, %s5333_s16   ;;  %s4324_s15 = sphi %s4378_s15, %s5332_s15  }
   0x5   : > { %p24_p0 = scmp.ge.s32.totalorder %s23_s22, 12  ;;  %p68_p1 = scmp.ne.s32.totalorder %s4328_s16, %s4324_s15 }
   0x6   : > { %p69_p2 = scmp.eq.s32.totalorder %s4348_s21, 0  ;;  %s61_s27 = sadd.s32 1, %s4328_s16 }
   0x7   : > { %s5339_s22 = smov (%p24_p0, %s23_s22), 0  ;;  %s5341_s23 = smov (!%p24_p0, %s26_s23), %s4344_s20 }
   0x8   : > { %p70_p3 = por %p69_p2, %p68_p1  ;;  %p28_p4 = scmp.ge.s32.totalorder %s5341_s23, 2 }
   0x9   : > { %s56_s24 = ssub.s32 %s4340_s19, %s5339_s22  ;;  %p3571_p6 = scmp.ge.s32.totalorder %s4348_s21, 24 }
   0xa   : > { %s5343_s23 = smov (%p28_p4, %s5341_s23), 0 }
   0xb   : > { %s57_s25 = ssub.s32 %s4344_s20, %s5343_s23  ;;  %172 = sbr.rel (%p3571_p6) target bundleno = 151 (0x97), region = 16 }
   0xc   : > { %s58_s26 = sor.u32 %s57_s25, %s56_s24 }
   0xd   : > { %p59_p5 = scmp.eq.s32.totalorder %s58_s26, 0 }
   0xf   : > { %s4429_s28 = scalar_select %p59_p5, %s4328_s16, %s61_s27  }
  0x10   : > { %183 = sbr.rel (!%p70_p3) target bundleno = 151 (0x97), region = 24  ;;  %s185_s29 = sand.u32 (%p70_p3), 1, %s4328_s16  }
  0x11   : > { %s3574_s30 = sshll.u32 (%p70_p3), %s4344_s20, 1  ;;  %s3572_s5 = sshll.u32 (%p70_p3), %s185_s29, 11 }
  0x12   : > { %s3844_s6 = sshll.u32 (%p70_p3), %s4340_s19, 10  ;;  %s4443_s12 = scalar_lea.vmem (%p70_p3), [#allocation3], %s3572_s5 }
  0x13   : > { %s191_s7 = sadd.s32 (%p70_p3), %s3844_s6, %s3574_s30 }
  0x14   : > { %s3576_s8 = sshll.u32 (%p70_p3), %s191_s7, 2 }
  0x15   : > { %s4438_s11 = scalar_lea.vmem %s5328_s1, %s3576_s8 }
  0x16   : > { %v732_v0 = vld [vmem:[%s4438_s11] sm:$0xff]  ;;  %v734_v1 = vld [vmem:[%s4438_s11 + $0x10] sm:$0xff] }
  0x17   : > { %v736_v2 = vld [vmem:[%s4438_s11 + $0x20] sm:$0xff]  ;;  %733 = vst [vmem:[%s4443_s12] sm:$0xff] %v732_v0  ;;  %735 = vst [vmem:[%s4443_s12 + $0x8] sm:$0xff] %v734_v1  ;;  %v738_v3 = vld [vmem:[%s4438_s11 + $0x30] sm:$0xff] }
  0x18   : > { %737 = vst [vmem:[%s4443_s12 + $0x10] sm:$0xff] %v736_v2  ;;  %v740_v4 = vld [vmem:[%s4438_s11 + $0x40] sm:$0xff]  ;;  %v742_v5 = vld [vmem:[%s4438_s11 + $0x50] sm:$0xff]  ;;  %739 = vst [vmem:[%s4443_s12 + $0x18] sm:$0xff] %v738_v3 }
  0x19   : > { %741 = vst [vmem:[%s4443_s12 + $0x20] sm:$0xff] %v740_v4  ;;  %743 = vst [vmem:[%s4443_s12 + $0x28] sm:$0xff] %v742_v5  ;;  %v744_v6 = vld [vmem:[%s4438_s11 + $0x60] sm:$0xff]  ;;  %v746_v7 = vld [vmem:[%s4438_s11 + $0x70] sm:$0xff] }
  0x1a   : > { %v748_v8 = vld [vmem:[%s4438_s11 + $0x80] sm:$0xff]  ;;  %745 = vst [vmem:[%s4443_s12 + $0x30] sm:$0xff] %v744_v6  ;;  %747 = vst [vmem:[%s4443_s12 + $0x38] sm:$0xff] %v746_v7  ;;  %v750_v9 = vld [vmem:[%s4438_s11 + $0x90] sm:$0xff] }
  0x1b   : > { %749 = vst [vmem:[%s4443_s12 + $0x40] sm:$0xff] %v748_v8  ;;  %v752_v10 = vld [vmem:[%s4438_s11 + $0xa0] sm:$0xff]  ;;  %v754_v11 = vld [vmem:[%s4438_s11 + $0xb0] sm:$0xff]  ;;  %751 = vst [vmem:[%s4443_s12 + $0x48] sm:$0xff] %v750_v9 }
  0x1c   : > { %753 = vst [vmem:[%s4443_s12 + $0x50] sm:$0xff] %v752_v10  ;;  %755 = vst [vmem:[%s4443_s12 + $0x58] sm:$0xff] %v754_v11  ;;  %v756_v12 = vld [vmem:[%s4438_s11 + $0xc0] sm:$0xff]  ;;  %v758_v13 = vld [vmem:[%s4438_s11 + $0xd0] sm:$0xff] }
  0x1d   : > { %v760_v14 = vld [vmem:[%s4438_s11 + $0xe0] sm:$0xff]  ;;  %757 = vst [vmem:[%s4443_s12 + $0x60] sm:$0xff] %v756_v12  ;;  %759 = vst [vmem:[%s4443_s12 + $0x68] sm:$0xff] %v758_v13  ;;  %v762_v15 = vld [vmem:[%s4438_s11 + $0xf0] sm:$0xff] }
  0x1e   : > { %761 = vst [vmem:[%s4443_s12 + $0x70] sm:$0xff] %v760_v14  ;;  %v764_v16 = vld [vmem:[%s4438_s11 + $0x100] sm:$0xff]  ;;  %v766_v17 = vld [vmem:[%s4438_s11 + $0x110] sm:$0xff]  ;;  %763 = vst [vmem:[%s4443_s12 + $0x78] sm:$0xff] %v762_v15 }
  0x1f   : > { %765 = vst [vmem:[%s4443_s12 + $0x80] sm:$0xff] %v764_v16  ;;  %767 = vst [vmem:[%s4443_s12 + $0x88] sm:$0xff] %v766_v17  ;;  %v768_v18 = vld [vmem:[%s4438_s11 + $0x120] sm:$0xff]  ;;  %v770_v19 = vld [vmem:[%s4438_s11 + $0x130] sm:$0xff] }
  0x20   : > { %v772_v20 = vld [vmem:[%s4438_s11 + $0x140] sm:$0xff]  ;;  %769 = vst [vmem:[%s4443_s12 + $0x90] sm:$0xff] %v768_v18  ;;  %771 = vst [vmem:[%s4443_s12 + $0x98] sm:$0xff] %v770_v19  ;;  %v774_v21 = vld [vmem:[%s4438_s11 + $0x150] sm:$0xff] }
  0x21   : > { %773 = vst [vmem:[%s4443_s12 + $0xa0] sm:$0xff] %v772_v20  ;;  %v776_v22 = vld [vmem:[%s4438_s11 + $0x160] sm:$0xff]  ;;  %v778_v23 = vld [vmem:[%s4438_s11 + $0x170] sm:$0xff]  ;;  %775 = vst [vmem:[%s4443_s12 + $0xa8] sm:$0xff] %v774_v21 }
  0x22   : > { %777 = vst [vmem:[%s4443_s12 + $0xb0] sm:$0xff] %v776_v22  ;;  %779 = vst [vmem:[%s4443_s12 + $0xb8] sm:$0xff] %v778_v23  ;;  %v780_v24 = vld [vmem:[%s4438_s11 + $0x180] sm:$0xff]  ;;  %v782_v25 = vld [vmem:[%s4438_s11 + $0x190] sm:$0xff] }
  0x23   : > { %v784_v26 = vld [vmem:[%s4438_s11 + $0x1a0] sm:$0xff]  ;;  %781 = vst [vmem:[%s4443_s12 + $0xc0] sm:$0xff] %v780_v24  ;;  %783 = vst [vmem:[%s4443_s12 + $0xc8] sm:$0xff] %v782_v25  ;;  %v786_v27 = vld [vmem:[%s4438_s11 + $0x1b0] sm:$0xff] }
  0x24   : > { %785 = vst [vmem:[%s4443_s12 + $0xd0] sm:$0xff] %v784_v26  ;;  %v788_v28 = vld [vmem:[%s4438_s11 + $0x1c0] sm:$0xff]  ;;  %v790_v29 = vld [vmem:[%s4438_s11 + $0x1d0] sm:$0xff]  ;;  %787 = vst [vmem:[%s4443_s12 + $0xd8] sm:$0xff] %v786_v27 }
  0x25   : > { %789 = vst [vmem:[%s4443_s12 + $0xe0] sm:$0xff] %v788_v28  ;;  %791 = vst [vmem:[%s4443_s12 + $0xe8] sm:$0xff] %v790_v29  ;;  %v792_v30 = vld [vmem:[%s4438_s11 + $0x1e0] sm:$0xff]  ;;  %v794_v31 = vld [vmem:[%s4438_s11 + $0x1f0] sm:$0xff] }
  0x26   : > { %v796_v32 = vld [vmem:[%s4438_s11 + $0x200] sm:$0xff]  ;;  %793 = vst [vmem:[%s4443_s12 + $0xf0] sm:$0xff] %v792_v30  ;;  %795 = vst [vmem:[%s4443_s12 + $0xf8] sm:$0xff] %v794_v31  ;;  %v798_v33 = vld [vmem:[%s4438_s11 + $0x210] sm:$0xff] }
  0x27   : > { %797 = vst [vmem:[%s4443_s12 + $0x100] sm:$0xff] %v796_v32  ;;  %v800_v34 = vld [vmem:[%s4438_s11 + $0x220] sm:$0xff]  ;;  %v802_v35 = vld [vmem:[%s4438_s11 + $0x230] sm:$0xff]  ;;  %799 = vst [vmem:[%s4443_s12 + $0x108] sm:$0xff] %v798_v33 }
  0x28   : > { %801 = vst [vmem:[%s4443_s12 + $0x110] sm:$0xff] %v800_v34  ;;  %803 = vst [vmem:[%s4443_s12 + $0x118] sm:$0xff] %v802_v35  ;;  %v804_v36 = vld [vmem:[%s4438_s11 + $0x240] sm:$0xff]  ;;  %v806_v37 = vld [vmem:[%s4438_s11 + $0x250] sm:$0xff] }
  0x29   : > { %v808_v38 = vld [vmem:[%s4438_s11 + $0x260] sm:$0xff]  ;;  %805 = vst [vmem:[%s4443_s12 + $0x120] sm:$0xff] %v804_v36  ;;  %807 = vst [vmem:[%s4443_s12 + $0x128] sm:$0xff] %v806_v37  ;;  %v810_v39 = vld [vmem:[%s4438_s11 + $0x270] sm:$0xff] }
  0x2a   : > { %809 = vst [vmem:[%s4443_s12 + $0x130] sm:$0xff] %v808_v38  ;;  %v812_v40 = vld [vmem:[%s4438_s11 + $0x280] sm:$0xff]  ;;  %v814_v41 = vld [vmem:[%s4438_s11 + $0x290] sm:$0xff]  ;;  %811 = vst [vmem:[%s4443_s12 + $0x138] sm:$0xff] %v810_v39 }
  0x2b   : > { %813 = vst [vmem:[%s4443_s12 + $0x140] sm:$0xff] %v812_v40  ;;  %815 = vst [vmem:[%s4443_s12 + $0x148] sm:$0xff] %v814_v41  ;;  %v816_v42 = vld [vmem:[%s4438_s11 + $0x2a0] sm:$0xff]  ;;  %v818_v43 = vld [vmem:[%s4438_s11 + $0x2b0] sm:$0xff] }
  0x2c   : > { %v820_v44 = vld [vmem:[%s4438_s11 + $0x2c0] sm:$0xff]  ;;  %817 = vst [vmem:[%s4443_s12 + $0x150] sm:$0xff] %v816_v42  ;;  %819 = vst [vmem:[%s4443_s12 + $0x158] sm:$0xff] %v818_v43  ;;  %v822_v45 = vld [vmem:[%s4438_s11 + $0x2d0] sm:$0xff] }
  0x2d   : > { %821 = vst [vmem:[%s4443_s12 + $0x160] sm:$0xff] %v820_v44  ;;  %v824_v46 = vld [vmem:[%s4438_s11 + $0x2e0] sm:$0xff]  ;;  %v826_v47 = vld [vmem:[%s4438_s11 + $0x2f0] sm:$0xff]  ;;  %823 = vst [vmem:[%s4443_s12 + $0x168] sm:$0xff] %v822_v45 }
  0x2e   : > { %825 = vst [vmem:[%s4443_s12 + $0x170] sm:$0xff] %v824_v46  ;;  %827 = vst [vmem:[%s4443_s12 + $0x178] sm:$0xff] %v826_v47  ;;  %v828_v48 = vld [vmem:[%s4438_s11 + $0x300] sm:$0xff]  ;;  %v830_v49 = vld [vmem:[%s4438_s11 + $0x310] sm:$0xff] }
  0x2f   : > { %v832_v50 = vld [vmem:[%s4438_s11 + $0x320] sm:$0xff]  ;;  %829 = vst [vmem:[%s4443_s12 + $0x180] sm:$0xff] %v828_v48  ;;  %831 = vst [vmem:[%s4443_s12 + $0x188] sm:$0xff] %v830_v49  ;;  %v834_v51 = vld [vmem:[%s4438_s11 + $0x330] sm:$0xff] }
  0x30   : > { %833 = vst [vmem:[%s4443_s12 + $0x190] sm:$0xff] %v832_v50  ;;  %v836_v52 = vld [vmem:[%s4438_s11 + $0x340] sm:$0xff]  ;;  %v838_v53 = vld [vmem:[%s4438_s11 + $0x350] sm:$0xff]  ;;  %835 = vst [vmem:[%s4443_s12 + $0x198] sm:$0xff] %v834_v51 }
  0x31   : > { %837 = vst [vmem:[%s4443_s12 + $0x1a0] sm:$0xff] %v836_v52  ;;  %839 = vst [vmem:[%s4443_s12 + $0x1a8] sm:$0xff] %v838_v53  ;;  %v840_v54 = vld [vmem:[%s4438_s11 + $0x360] sm:$0xff]  ;;  %v842_v55 = vld [vmem:[%s4438_s11 + $0x370] sm:$0xff] }
  0x32   : > { %v844_v56 = vld [vmem:[%s4438_s11 + $0x380] sm:$0xff]  ;;  %841 = vst [vmem:[%s4443_s12 + $0x1b0] sm:$0xff] %v840_v54  ;;  %843 = vst [vmem:[%s4443_s12 + $0x1b8] sm:$0xff] %v842_v55  ;;  %v846_v57 = vld [vmem:[%s4438_s11 + $0x390] sm:$0xff] }
  0x33   : > { %845 = vst [vmem:[%s4443_s12 + $0x1c0] sm:$0xff] %v844_v56  ;;  %v848_v58 = vld [vmem:[%s4438_s11 + $0x3a0] sm:$0xff]  ;;  %v850_v59 = vld [vmem:[%s4438_s11 + $0x3b0] sm:$0xff]  ;;  %847 = vst [vmem:[%s4443_s12 + $0x1c8] sm:$0xff] %v846_v57 }
  0x34   : > { %849 = vst [vmem:[%s4443_s12 + $0x1d0] sm:$0xff] %v848_v58  ;;  %851 = vst [vmem:[%s4443_s12 + $0x1d8] sm:$0xff] %v850_v59  ;;  %v852_v60 = vld [vmem:[%s4438_s11 + $0x3c0] sm:$0xff]  ;;  %v854_v61 = vld [vmem:[%s4438_s11 + $0x3d0] sm:$0xff] }
  0x35   : > { %v856_v62 = vld [vmem:[%s4438_s11 + $0x3e0] sm:$0xff]  ;;  %853 = vst [vmem:[%s4443_s12 + $0x1e0] sm:$0xff] %v852_v60  ;;  %855 = vst [vmem:[%s4443_s12 + $0x1e8] sm:$0xff] %v854_v61  ;;  %v858_v63 = vld [vmem:[%s4438_s11 + $0x3f0] sm:$0xff] }
  0x36   : > { %857 = vst [vmem:[%s4443_s12 + $0x1f0] sm:$0xff] %v856_v62  ;;  %v860_v0 = vld [vmem:[%s4438_s11 + $0x400] sm:$0xff]  ;;  %v862_v1 = vld [vmem:[%s4438_s11 + $0x410] sm:$0xff]  ;;  %859 = vst [vmem:[%s4443_s12 + $0x1f8] sm:$0xff] %v858_v63 }
  0x37   : > { %861 = vst [vmem:[%s4443_s12 + $0x200] sm:$0xff] %v860_v0  ;;  %863 = vst [vmem:[%s4443_s12 + $0x208] sm:$0xff] %v862_v1  ;;  %v864_v2 = vld [vmem:[%s4438_s11 + $0x420] sm:$0xff]  ;;  %v866_v3 = vld [vmem:[%s4438_s11 + $0x430] sm:$0xff] }
  0x38   : > { %v868_v4 = vld [vmem:[%s4438_s11 + $0x440] sm:$0xff]  ;;  %865 = vst [vmem:[%s4443_s12 + $0x210] sm:$0xff] %v864_v2  ;;  %867 = vst [vmem:[%s4443_s12 + $0x218] sm:$0xff] %v866_v3  ;;  %v870_v5 = vld [vmem:[%s4438_s11 + $0x450] sm:$0xff] }
  0x39   : > { %869 = vst [vmem:[%s4443_s12 + $0x220] sm:$0xff] %v868_v4  ;;  %v872_v6 = vld [vmem:[%s4438_s11 + $0x460] sm:$0xff]  ;;  %v874_v7 = vld [vmem:[%s4438_s11 + $0x470] sm:$0xff]  ;;  %871 = vst [vmem:[%s4443_s12 + $0x228] sm:$0xff] %v870_v5 }
  0x3a   : > { %873 = vst [vmem:[%s4443_s12 + $0x230] sm:$0xff] %v872_v6  ;;  %875 = vst [vmem:[%s4443_s12 + $0x238] sm:$0xff] %v874_v7  ;;  %v876_v8 = vld [vmem:[%s4438_s11 + $0x480] sm:$0xff]  ;;  %v878_v9 = vld [vmem:[%s4438_s11 + $0x490] sm:$0xff] }
  0x3b   : > { %v880_v10 = vld [vmem:[%s4438_s11 + $0x4a0] sm:$0xff]  ;;  %877 = vst [vmem:[%s4443_s12 + $0x240] sm:$0xff] %v876_v8  ;;  %879 = vst [vmem:[%s4443_s12 + $0x248] sm:$0xff] %v878_v9  ;;  %v882_v11 = vld [vmem:[%s4438_s11 + $0x4b0] sm:$0xff] }
  0x3c   : > { %881 = vst [vmem:[%s4443_s12 + $0x250] sm:$0xff] %v880_v10  ;;  %v884_v12 = vld [vmem:[%s4438_s11 + $0x4c0] sm:$0xff]  ;;  %v886_v13 = vld [vmem:[%s4438_s11 + $0x4d0] sm:$0xff]  ;;  %883 = vst [vmem:[%s4443_s12 + $0x258] sm:$0xff] %v882_v11 }
  0x3d   : > { %885 = vst [vmem:[%s4443_s12 + $0x260] sm:$0xff] %v884_v12  ;;  %887 = vst [vmem:[%s4443_s12 + $0x268] sm:$0xff] %v886_v13  ;;  %v888_v14 = vld [vmem:[%s4438_s11 + $0x4e0] sm:$0xff]  ;;  %v890_v15 = vld [vmem:[%s4438_s11 + $0x4f0] sm:$0xff] }
  0x3e   : > { %v892_v16 = vld [vmem:[%s4438_s11 + $0x500] sm:$0xff]  ;;  %889 = vst [vmem:[%s4443_s12 + $0x270] sm:$0xff] %v888_v14  ;;  %891 = vst [vmem:[%s4443_s12 + $0x278] sm:$0xff] %v890_v15  ;;  %v894_v17 = vld [vmem:[%s4438_s11 + $0x510] sm:$0xff] }
  0x3f   : > { %893 = vst [vmem:[%s4443_s12 + $0x280] sm:$0xff] %v892_v16  ;;  %v896_v18 = vld [vmem:[%s4438_s11 + $0x520] sm:$0xff]  ;;  %v898_v19 = vld [vmem:[%s4438_s11 + $0x530] sm:$0xff]  ;;  %895 = vst [vmem:[%s4443_s12 + $0x288] sm:$0xff] %v894_v17 }
  0x40   : > { %897 = vst [vmem:[%s4443_s12 + $0x290] sm:$0xff] %v896_v18  ;;  %899 = vst [vmem:[%s4443_s12 + $0x298] sm:$0xff] %v898_v19  ;;  %v900_v20 = vld [vmem:[%s4438_s11 + $0x540] sm:$0xff]  ;;  %v902_v21 = vld [vmem:[%s4438_s11 + $0x550] sm:$0xff] }
  0x41   : > { %v904_v22 = vld [vmem:[%s4438_s11 + $0x560] sm:$0xff]  ;;  %901 = vst [vmem:[%s4443_s12 + $0x2a0] sm:$0xff] %v900_v20  ;;  %903 = vst [vmem:[%s4443_s12 + $0x2a8] sm:$0xff] %v902_v21  ;;  %v906_v23 = vld [vmem:[%s4438_s11 + $0x570] sm:$0xff] }
  0x42   : > { %905 = vst [vmem:[%s4443_s12 + $0x2b0] sm:$0xff] %v904_v22  ;;  %v908_v24 = vld [vmem:[%s4438_s11 + $0x580] sm:$0xff]  ;;  %v910_v25 = vld [vmem:[%s4438_s11 + $0x590] sm:$0xff]  ;;  %907 = vst [vmem:[%s4443_s12 + $0x2b8] sm:$0xff] %v906_v23 }
  0x43   : > { %909 = vst [vmem:[%s4443_s12 + $0x2c0] sm:$0xff] %v908_v24  ;;  %911 = vst [vmem:[%s4443_s12 + $0x2c8] sm:$0xff] %v910_v25  ;;  %v912_v26 = vld [vmem:[%s4438_s11 + $0x5a0] sm:$0xff]  ;;  %v914_v27 = vld [vmem:[%s4438_s11 + $0x5b0] sm:$0xff] }
  0x44   : > { %v916_v28 = vld [vmem:[%s4438_s11 + $0x5c0] sm:$0xff]  ;;  %913 = vst [vmem:[%s4443_s12 + $0x2d0] sm:$0xff] %v912_v26  ;;  %915 = vst [vmem:[%s4443_s12 + $0x2d8] sm:$0xff] %v914_v27  ;;  %v918_v29 = vld [vmem:[%s4438_s11 + $0x5d0] sm:$0xff] }
  0x45   : > { %917 = vst [vmem:[%s4443_s12 + $0x2e0] sm:$0xff] %v916_v28  ;;  %v920_v30 = vld [vmem:[%s4438_s11 + $0x5e0] sm:$0xff]  ;;  %v922_v31 = vld [vmem:[%s4438_s11 + $0x5f0] sm:$0xff]  ;;  %919 = vst [vmem:[%s4443_s12 + $0x2e8] sm:$0xff] %v918_v29 }
  0x46   : > { %921 = vst [vmem:[%s4443_s12 + $0x2f0] sm:$0xff] %v920_v30  ;;  %923 = vst [vmem:[%s4443_s12 + $0x2f8] sm:$0xff] %v922_v31  ;;  %v924_v32 = vld [vmem:[%s4438_s11 + $0x600] sm:$0xff]  ;;  %v926_v33 = vld [vmem:[%s4438_s11 + $0x610] sm:$0xff] }
  0x47   : > { %v928_v34 = vld [vmem:[%s4438_s11 + $0x620] sm:$0xff]  ;;  %925 = vst [vmem:[%s4443_s12 + $0x300] sm:$0xff] %v924_v32  ;;  %927 = vst [vmem:[%s4443_s12 + $0x308] sm:$0xff] %v926_v33  ;;  %v930_v35 = vld [vmem:[%s4438_s11 + $0x630] sm:$0xff] }
  0x48   : > { %929 = vst [vmem:[%s4443_s12 + $0x310] sm:$0xff] %v928_v34  ;;  %v932_v36 = vld [vmem:[%s4438_s11 + $0x640] sm:$0xff]  ;;  %v934_v37 = vld [vmem:[%s4438_s11 + $0x650] sm:$0xff]  ;;  %931 = vst [vmem:[%s4443_s12 + $0x318] sm:$0xff] %v930_v35 }
  0x49   : > { %933 = vst [vmem:[%s4443_s12 + $0x320] sm:$0xff] %v932_v36  ;;  %935 = vst [vmem:[%s4443_s12 + $0x328] sm:$0xff] %v934_v37  ;;  %v936_v38 = vld [vmem:[%s4438_s11 + $0x660] sm:$0xff]  ;;  %v938_v39 = vld [vmem:[%s4438_s11 + $0x670] sm:$0xff] }
  0x4a   : > { %v940_v40 = vld [vmem:[%s4438_s11 + $0x680] sm:$0xff]  ;;  %937 = vst [vmem:[%s4443_s12 + $0x330] sm:$0xff] %v936_v38  ;;  %939 = vst [vmem:[%s4443_s12 + $0x338] sm:$0xff] %v938_v39  ;;  %v942_v41 = vld [vmem:[%s4438_s11 + $0x690] sm:$0xff] }
  0x4b   : > { %941 = vst [vmem:[%s4443_s12 + $0x340] sm:$0xff] %v940_v40  ;;  %v944_v42 = vld [vmem:[%s4438_s11 + $0x6a0] sm:$0xff]  ;;  %v946_v43 = vld [vmem:[%s4438_s11 + $0x6b0] sm:$0xff]  ;;  %943 = vst [vmem:[%s4443_s12 + $0x348] sm:$0xff] %v942_v41 }
  0x4c   : > { %945 = vst [vmem:[%s4443_s12 + $0x350] sm:$0xff] %v944_v42  ;;  %947 = vst [vmem:[%s4443_s12 + $0x358] sm:$0xff] %v946_v43  ;;  %v948_v44 = vld [vmem:[%s4438_s11 + $0x6c0] sm:$0xff]  ;;  %v950_v45 = vld [vmem:[%s4438_s11 + $0x6d0] sm:$0xff] }
  0x4d   : > { %v952_v46 = vld [vmem:[%s4438_s11 + $0x6e0] sm:$0xff]  ;;  %949 = vst [vmem:[%s4443_s12 + $0x360] sm:$0xff] %v948_v44  ;;  %951 = vst [vmem:[%s4443_s12 + $0x368] sm:$0xff] %v950_v45  ;;  %v954_v47 = vld [vmem:[%s4438_s11 + $0x6f0] sm:$0xff] }
  0x4e   : > { %953 = vst [vmem:[%s4443_s12 + $0x370] sm:$0xff] %v952_v46  ;;  %v956_v48 = vld [vmem:[%s4438_s11 + $0x700] sm:$0xff]  ;;  %v958_v49 = vld [vmem:[%s4438_s11 + $0x710] sm:$0xff]  ;;  %955 = vst [vmem:[%s4443_s12 + $0x378] sm:$0xff] %v954_v47 }
  0x4f   : > { %957 = vst [vmem:[%s4443_s12 + $0x380] sm:$0xff] %v956_v48  ;;  %959 = vst [vmem:[%s4443_s12 + $0x388] sm:$0xff] %v958_v49  ;;  %v960_v50 = vld [vmem:[%s4438_s11 + $0x720] sm:$0xff]  ;;  %v962_v51 = vld [vmem:[%s4438_s11 + $0x730] sm:$0xff] }
  0x50   : > { %v964_v52 = vld [vmem:[%s4438_s11 + $0x740] sm:$0xff]  ;;  %961 = vst [vmem:[%s4443_s12 + $0x390] sm:$0xff] %v960_v50  ;;  %963 = vst [vmem:[%s4443_s12 + $0x398] sm:$0xff] %v962_v51  ;;  %v966_v53 = vld [vmem:[%s4438_s11 + $0x750] sm:$0xff] }
  0x51   : > { %965 = vst [vmem:[%s4443_s12 + $0x3a0] sm:$0xff] %v964_v52  ;;  %v968_v54 = vld [vmem:[%s4438_s11 + $0x760] sm:$0xff]  ;;  %v970_v55 = vld [vmem:[%s4438_s11 + $0x770] sm:$0xff]  ;;  %967 = vst [vmem:[%s4443_s12 + $0x3a8] sm:$0xff] %v966_v53 }
  0x52   : > { %969 = vst [vmem:[%s4443_s12 + $0x3b0] sm:$0xff] %v968_v54  ;;  %971 = vst [vmem:[%s4443_s12 + $0x3b8] sm:$0xff] %v970_v55  ;;  %v972_v56 = vld [vmem:[%s4438_s11 + $0x780] sm:$0xff]  ;;  %v974_v57 = vld [vmem:[%s4438_s11 + $0x790] sm:$0xff] }
  0x53   : > { %v976_v58 = vld [vmem:[%s4438_s11 + $0x7a0] sm:$0xff]  ;;  %973 = vst [vmem:[%s4443_s12 + $0x3c0] sm:$0xff] %v972_v56  ;;  %975 = vst [vmem:[%s4443_s12 + $0x3c8] sm:$0xff] %v974_v57  ;;  %v978_v59 = vld [vmem:[%s4438_s11 + $0x7b0] sm:$0xff] }
  0x54   : > { %977 = vst [vmem:[%s4443_s12 + $0x3d0] sm:$0xff] %v976_v58  ;;  %v980_v60 = vld [vmem:[%s4438_s11 + $0x7c0] sm:$0xff]  ;;  %v982_v61 = vld [vmem:[%s4438_s11 + $0x7d0] sm:$0xff]  ;;  %979 = vst [vmem:[%s4443_s12 + $0x3d8] sm:$0xff] %v978_v59 }
  0x55   : > { %981 = vst [vmem:[%s4443_s12 + $0x3e0] sm:$0xff] %v980_v60  ;;  %983 = vst [vmem:[%s4443_s12 + $0x3e8] sm:$0xff] %v982_v61  ;;  %v984_v62 = vld [vmem:[%s4438_s11 + $0x7e0] sm:$0xff]  ;;  %v986_v63 = vld [vmem:[%s4438_s11 + $0x7f0] sm:$0xff] }
  0x56   : > { %v988_v0 = vld [vmem:[%s4438_s11 + $0x800] sm:$0xff]  ;;  %985 = vst [vmem:[%s4443_s12 + $0x3f0] sm:$0xff] %v984_v62  ;;  %987 = vst [vmem:[%s4443_s12 + $0x3f8] sm:$0xff] %v986_v63  ;;  %v990_v1 = vld [vmem:[%s4438_s11 + $0x810] sm:$0xff] }
  0x57   : > { %989 = vst [vmem:[%s4443_s12 + $0x400] sm:$0xff] %v988_v0  ;;  %v992_v2 = vld [vmem:[%s4438_s11 + $0x820] sm:$0xff]  ;;  %v994_v3 = vld [vmem:[%s4438_s11 + $0x830] sm:$0xff]  ;;  %991 = vst [vmem:[%s4443_s12 + $0x408] sm:$0xff] %v990_v1 }
  0x58   : > { %993 = vst [vmem:[%s4443_s12 + $0x410] sm:$0xff] %v992_v2  ;;  %995 = vst [vmem:[%s4443_s12 + $0x418] sm:$0xff] %v994_v3  ;;  %v996_v4 = vld [vmem:[%s4438_s11 + $0x840] sm:$0xff]  ;;  %v998_v5 = vld [vmem:[%s4438_s11 + $0x850] sm:$0xff] }
  0x59   : > { %v1000_v6 = vld [vmem:[%s4438_s11 + $0x860] sm:$0xff]  ;;  %997 = vst [vmem:[%s4443_s12 + $0x420] sm:$0xff] %v996_v4  ;;  %999 = vst [vmem:[%s4443_s12 + $0x428] sm:$0xff] %v998_v5  ;;  %v1002_v7 = vld [vmem:[%s4438_s11 + $0x870] sm:$0xff] }
  0x5a   : > { %1001 = vst [vmem:[%s4443_s12 + $0x430] sm:$0xff] %v1000_v6  ;;  %v1004_v8 = vld [vmem:[%s4438_s11 + $0x880] sm:$0xff]  ;;  %v1006_v9 = vld [vmem:[%s4438_s11 + $0x890] sm:$0xff]  ;;  %1003 = vst [vmem:[%s4443_s12 + $0x438] sm:$0xff] %v1002_v7 }
  0x5b   : > { %1005 = vst [vmem:[%s4443_s12 + $0x440] sm:$0xff] %v1004_v8  ;;  %1007 = vst [vmem:[%s4443_s12 + $0x448] sm:$0xff] %v1006_v9  ;;  %v1008_v10 = vld [vmem:[%s4438_s11 + $0x8a0] sm:$0xff]  ;;  %v1010_v11 = vld [vmem:[%s4438_s11 + $0x8b0] sm:$0xff] }
  0x5c   : > { %v1012_v12 = vld [vmem:[%s4438_s11 + $0x8c0] sm:$0xff]  ;;  %1009 = vst [vmem:[%s4443_s12 + $0x450] sm:$0xff] %v1008_v10  ;;  %1011 = vst [vmem:[%s4443_s12 + $0x458] sm:$0xff] %v1010_v11  ;;  %v1014_v13 = vld [vmem:[%s4438_s11 + $0x8d0] sm:$0xff] }
  0x5d   : > { %1013 = vst [vmem:[%s4443_s12 + $0x460] sm:$0xff] %v1012_v12  ;;  %v1016_v14 = vld [vmem:[%s4438_s11 + $0x8e0] sm:$0xff]  ;;  %v1018_v15 = vld [vmem:[%s4438_s11 + $0x8f0] sm:$0xff]  ;;  %1015 = vst [vmem:[%s4443_s12 + $0x468] sm:$0xff] %v1014_v13 }
  0x5e   : > { %1017 = vst [vmem:[%s4443_s12 + $0x470] sm:$0xff] %v1016_v14  ;;  %1019 = vst [vmem:[%s4443_s12 + $0x478] sm:$0xff] %v1018_v15  ;;  %v1020_v16 = vld [vmem:[%s4438_s11 + $0x900] sm:$0xff]  ;;  %v1022_v17 = vld [vmem:[%s4438_s11 + $0x910] sm:$0xff] }
  0x5f   : > { %v1024_v18 = vld [vmem:[%s4438_s11 + $0x920] sm:$0xff]  ;;  %1021 = vst [vmem:[%s4443_s12 + $0x480] sm:$0xff] %v1020_v16  ;;  %1023 = vst [vmem:[%s4443_s12 + $0x488] sm:$0xff] %v1022_v17  ;;  %v1026_v19 = vld [vmem:[%s4438_s11 + $0x930] sm:$0xff] }
  0x60   : > { %1025 = vst [vmem:[%s4443_s12 + $0x490] sm:$0xff] %v1024_v18  ;;  %v1028_v20 = vld [vmem:[%s4438_s11 + $0x940] sm:$0xff]  ;;  %v1030_v21 = vld [vmem:[%s4438_s11 + $0x950] sm:$0xff]  ;;  %1027 = vst [vmem:[%s4443_s12 + $0x498] sm:$0xff] %v1026_v19 }
  0x61   : > { %1029 = vst [vmem:[%s4443_s12 + $0x4a0] sm:$0xff] %v1028_v20  ;;  %1031 = vst [vmem:[%s4443_s12 + $0x4a8] sm:$0xff] %v1030_v21  ;;  %v1032_v22 = vld [vmem:[%s4438_s11 + $0x960] sm:$0xff]  ;;  %v1034_v23 = vld [vmem:[%s4438_s11 + $0x970] sm:$0xff] }
  0x62   : > { %v1036_v24 = vld [vmem:[%s4438_s11 + $0x980] sm:$0xff]  ;;  %1033 = vst [vmem:[%s4443_s12 + $0x4b0] sm:$0xff] %v1032_v22  ;;  %1035 = vst [vmem:[%s4443_s12 + $0x4b8] sm:$0xff] %v1034_v23  ;;  %v1038_v25 = vld [vmem:[%s4438_s11 + $0x990] sm:$0xff] }
  0x63   : > { %1037 = vst [vmem:[%s4443_s12 + $0x4c0] sm:$0xff] %v1036_v24  ;;  %v1040_v26 = vld [vmem:[%s4438_s11 + $0x9a0] sm:$0xff]  ;;  %v1042_v27 = vld [vmem:[%s4438_s11 + $0x9b0] sm:$0xff]  ;;  %1039 = vst [vmem:[%s4443_s12 + $0x4c8] sm:$0xff] %v1038_v25 }
  0x64   : > { %1041 = vst [vmem:[%s4443_s12 + $0x4d0] sm:$0xff] %v1040_v26  ;;  %1043 = vst [vmem:[%s4443_s12 + $0x4d8] sm:$0xff] %v1042_v27  ;;  %v1044_v28 = vld [vmem:[%s4438_s11 + $0x9c0] sm:$0xff]  ;;  %v1046_v29 = vld [vmem:[%s4438_s11 + $0x9d0] sm:$0xff] }
  0x65   : > { %v1048_v30 = vld [vmem:[%s4438_s11 + $0x9e0] sm:$0xff]  ;;  %1045 = vst [vmem:[%s4443_s12 + $0x4e0] sm:$0xff] %v1044_v28  ;;  %1047 = vst [vmem:[%s4443_s12 + $0x4e8] sm:$0xff] %v1046_v29  ;;  %v1050_v31 = vld [vmem:[%s4438_s11 + $0x9f0] sm:$0xff] }
  0x66   : > { %1049 = vst [vmem:[%s4443_s12 + $0x4f0] sm:$0xff] %v1048_v30  ;;  %v1052_v32 = vld [vmem:[%s4438_s11 + $0xa00] sm:$0xff]  ;;  %v1054_v33 = vld [vmem:[%s4438_s11 + $0xa10] sm:$0xff]  ;;  %1051 = vst [vmem:[%s4443_s12 + $0x4f8] sm:$0xff] %v1050_v31 }
  0x67   : > { %1053 = vst [vmem:[%s4443_s12 + $0x500] sm:$0xff] %v1052_v32  ;;  %1055 = vst [vmem:[%s4443_s12 + $0x508] sm:$0xff] %v1054_v33  ;;  %v1056_v34 = vld [vmem:[%s4438_s11 + $0xa20] sm:$0xff]  ;;  %v1058_v35 = vld [vmem:[%s4438_s11 + $0xa30] sm:$0xff] }
  0x68   : > { %v1060_v36 = vld [vmem:[%s4438_s11 + $0xa40] sm:$0xff]  ;;  %1057 = vst [vmem:[%s4443_s12 + $0x510] sm:$0xff] %v1056_v34  ;;  %1059 = vst [vmem:[%s4443_s12 + $0x518] sm:$0xff] %v1058_v35  ;;  %v1062_v37 = vld [vmem:[%s4438_s11 + $0xa50] sm:$0xff] }
  0x69   : > { %1061 = vst [vmem:[%s4443_s12 + $0x520] sm:$0xff] %v1060_v36  ;;  %v1064_v38 = vld [vmem:[%s4438_s11 + $0xa60] sm:$0xff]  ;;  %v1066_v39 = vld [vmem:[%s4438_s11 + $0xa70] sm:$0xff]  ;;  %1063 = vst [vmem:[%s4443_s12 + $0x528] sm:$0xff] %v1062_v37 }
  0x6a   : > { %1065 = vst [vmem:[%s4443_s12 + $0x530] sm:$0xff] %v1064_v38  ;;  %1067 = vst [vmem:[%s4443_s12 + $0x538] sm:$0xff] %v1066_v39  ;;  %v1068_v40 = vld [vmem:[%s4438_s11 + $0xa80] sm:$0xff]  ;;  %v1070_v41 = vld [vmem:[%s4438_s11 + $0xa90] sm:$0xff] }
  0x6b   : > { %v1072_v42 = vld [vmem:[%s4438_s11 + $0xaa0] sm:$0xff]  ;;  %1069 = vst [vmem:[%s4443_s12 + $0x540] sm:$0xff] %v1068_v40  ;;  %1071 = vst [vmem:[%s4443_s12 + $0x548] sm:$0xff] %v1070_v41  ;;  %v1074_v43 = vld [vmem:[%s4438_s11 + $0xab0] sm:$0xff] }
  0x6c   : > { %1073 = vst [vmem:[%s4443_s12 + $0x550] sm:$0xff] %v1072_v42  ;;  %v1076_v44 = vld [vmem:[%s4438_s11 + $0xac0] sm:$0xff]  ;;  %v1078_v45 = vld [vmem:[%s4438_s11 + $0xad0] sm:$0xff]  ;;  %1075 = vst [vmem:[%s4443_s12 + $0x558] sm:$0xff] %v1074_v43 }
  0x6d   : > { %1077 = vst [vmem:[%s4443_s12 + $0x560] sm:$0xff] %v1076_v44  ;;  %1079 = vst [vmem:[%s4443_s12 + $0x568] sm:$0xff] %v1078_v45  ;;  %v1080_v46 = vld [vmem:[%s4438_s11 + $0xae0] sm:$0xff]  ;;  %v1082_v47 = vld [vmem:[%s4438_s11 + $0xaf0] sm:$0xff] }
  0x6e   : > { %v1084_v48 = vld [vmem:[%s4438_s11 + $0xb00] sm:$0xff]  ;;  %1081 = vst [vmem:[%s4443_s12 + $0x570] sm:$0xff] %v1080_v46  ;;  %1083 = vst [vmem:[%s4443_s12 + $0x578] sm:$0xff] %v1082_v47  ;;  %v1086_v49 = vld [vmem:[%s4438_s11 + $0xb10] sm:$0xff] }
  0x6f   : > { %1085 = vst [vmem:[%s4443_s12 + $0x580] sm:$0xff] %v1084_v48  ;;  %v1088_v50 = vld [vmem:[%s4438_s11 + $0xb20] sm:$0xff]  ;;  %v1090_v51 = vld [vmem:[%s4438_s11 + $0xb30] sm:$0xff]  ;;  %1087 = vst [vmem:[%s4443_s12 + $0x588] sm:$0xff] %v1086_v49 }
  0x70   : > { %1089 = vst [vmem:[%s4443_s12 + $0x590] sm:$0xff] %v1088_v50  ;;  %1091 = vst [vmem:[%s4443_s12 + $0x598] sm:$0xff] %v1090_v51  ;;  %v1092_v52 = vld [vmem:[%s4438_s11 + $0xb40] sm:$0xff]  ;;  %v1094_v53 = vld [vmem:[%s4438_s11 + $0xb50] sm:$0xff] }
  0x71   : > { %v1096_v54 = vld [vmem:[%s4438_s11 + $0xb60] sm:$0xff]  ;;  %1093 = vst [vmem:[%s4443_s12 + $0x5a0] sm:$0xff] %v1092_v52  ;;  %1095 = vst [vmem:[%s4443_s12 + $0x5a8] sm:$0xff] %v1094_v53  ;;  %v1098_v55 = vld [vmem:[%s4438_s11 + $0xb70] sm:$0xff] }
  0x72   : > { %1097 = vst [vmem:[%s4443_s12 + $0x5b0] sm:$0xff] %v1096_v54  ;;  %v1100_v56 = vld [vmem:[%s4438_s11 + $0xb80] sm:$0xff]  ;;  %v1102_v57 = vld [vmem:[%s4438_s11 + $0xb90] sm:$0xff]  ;;  %1099 = vst [vmem:[%s4443_s12 + $0x5b8] sm:$0xff] %v1098_v55 }
  0x73   : > { %1101 = vst [vmem:[%s4443_s12 + $0x5c0] sm:$0xff] %v1100_v56  ;;  %1103 = vst [vmem:[%s4443_s12 + $0x5c8] sm:$0xff] %v1102_v57  ;;  %v1104_v58 = vld [vmem:[%s4438_s11 + $0xba0] sm:$0xff]  ;;  %v1106_v59 = vld [vmem:[%s4438_s11 + $0xbb0] sm:$0xff] }
  0x74   : > { %v1108_v60 = vld [vmem:[%s4438_s11 + $0xbc0] sm:$0xff]  ;;  %1105 = vst [vmem:[%s4443_s12 + $0x5d0] sm:$0xff] %v1104_v58  ;;  %1107 = vst [vmem:[%s4443_s12 + $0x5d8] sm:$0xff] %v1106_v59  ;;  %v1110_v61 = vld [vmem:[%s4438_s11 + $0xbd0] sm:$0xff] }
  0x75   : > { %1109 = vst [vmem:[%s4443_s12 + $0x5e0] sm:$0xff] %v1108_v60  ;;  %v1112_v62 = vld [vmem:[%s4438_s11 + $0xbe0] sm:$0xff]  ;;  %v1114_v63 = vld [vmem:[%s4438_s11 + $0xbf0] sm:$0xff]  ;;  %1111 = vst [vmem:[%s4443_s12 + $0x5e8] sm:$0xff] %v1110_v61 }
  0x76   : > { %1113 = vst [vmem:[%s4443_s12 + $0x5f0] sm:$0xff] %v1112_v62  ;;  %1115 = vst [vmem:[%s4443_s12 + $0x5f8] sm:$0xff] %v1114_v63  ;;  %v1116_v0 = vld [vmem:[%s4438_s11 + $0xc00] sm:$0xff]  ;;  %v1118_v1 = vld [vmem:[%s4438_s11 + $0xc10] sm:$0xff] }
  0x77   : > { %v1120_v2 = vld [vmem:[%s4438_s11 + $0xc20] sm:$0xff]  ;;  %1117 = vst [vmem:[%s4443_s12 + $0x600] sm:$0xff] %v1116_v0  ;;  %1119 = vst [vmem:[%s4443_s12 + $0x608] sm:$0xff] %v1118_v1  ;;  %v1122_v3 = vld [vmem:[%s4438_s11 + $0xc30] sm:$0xff] }
  0x78   : > { %1121 = vst [vmem:[%s4443_s12 + $0x610] sm:$0xff] %v1120_v2  ;;  %v1124_v4 = vld [vmem:[%s4438_s11 + $0xc40] sm:$0xff]  ;;  %v1126_v5 = vld [vmem:[%s4438_s11 + $0xc50] sm:$0xff]  ;;  %1123 = vst [vmem:[%s4443_s12 + $0x618] sm:$0xff] %v1122_v3 }
  0x79   : > { %1125 = vst [vmem:[%s4443_s12 + $0x620] sm:$0xff] %v1124_v4  ;;  %1127 = vst [vmem:[%s4443_s12 + $0x628] sm:$0xff] %v1126_v5  ;;  %v1128_v6 = vld [vmem:[%s4438_s11 + $0xc60] sm:$0xff]  ;;  %v1130_v7 = vld [vmem:[%s4438_s11 + $0xc70] sm:$0xff] }
  0x7a   : > { %v1132_v8 = vld [vmem:[%s4438_s11 + $0xc80] sm:$0xff]  ;;  %1129 = vst [vmem:[%s4443_s12 + $0x630] sm:$0xff] %v1128_v6  ;;  %1131 = vst [vmem:[%s4443_s12 + $0x638] sm:$0xff] %v1130_v7  ;;  %v1134_v9 = vld [vmem:[%s4438_s11 + $0xc90] sm:$0xff] }
  0x7b   : > { %1133 = vst [vmem:[%s4443_s12 + $0x640] sm:$0xff] %v1132_v8  ;;  %v1136_v10 = vld [vmem:[%s4438_s11 + $0xca0] sm:$0xff]  ;;  %v1138_v11 = vld [vmem:[%s4438_s11 + $0xcb0] sm:$0xff]  ;;  %1135 = vst [vmem:[%s4443_s12 + $0x648] sm:$0xff] %v1134_v9 }
  0x7c   : > { %1137 = vst [vmem:[%s4443_s12 + $0x650] sm:$0xff] %v1136_v10  ;;  %1139 = vst [vmem:[%s4443_s12 + $0x658] sm:$0xff] %v1138_v11  ;;  %v1140_v12 = vld [vmem:[%s4438_s11 + $0xcc0] sm:$0xff]  ;;  %v1142_v13 = vld [vmem:[%s4438_s11 + $0xcd0] sm:$0xff] }
  0x7d   : > { %v1144_v14 = vld [vmem:[%s4438_s11 + $0xce0] sm:$0xff]  ;;  %1141 = vst [vmem:[%s4443_s12 + $0x660] sm:$0xff] %v1140_v12  ;;  %1143 = vst [vmem:[%s4443_s12 + $0x668] sm:$0xff] %v1142_v13  ;;  %v1146_v15 = vld [vmem:[%s4438_s11 + $0xcf0] sm:$0xff] }
  0x7e   : > { %1145 = vst [vmem:[%s4443_s12 + $0x670] sm:$0xff] %v1144_v14  ;;  %v1148_v16 = vld [vmem:[%s4438_s11 + $0xd00] sm:$0xff]  ;;  %v1150_v17 = vld [vmem:[%s4438_s11 + $0xd10] sm:$0xff]  ;;  %1147 = vst [vmem:[%s4443_s12 + $0x678] sm:$0xff] %v1146_v15 }
  0x7f   : > { %1149 = vst [vmem:[%s4443_s12 + $0x680] sm:$0xff] %v1148_v16  ;;  %1151 = vst [vmem:[%s4443_s12 + $0x688] sm:$0xff] %v1150_v17  ;;  %v1152_v18 = vld [vmem:[%s4438_s11 + $0xd20] sm:$0xff]  ;;  %v1154_v19 = vld [vmem:[%s4438_s11 + $0xd30] sm:$0xff] }
  0x80   : > { %v1156_v20 = vld [vmem:[%s4438_s11 + $0xd40] sm:$0xff]  ;;  %1153 = vst [vmem:[%s4443_s12 + $0x690] sm:$0xff] %v1152_v18  ;;  %1155 = vst [vmem:[%s4443_s12 + $0x698] sm:$0xff] %v1154_v19  ;;  %v1158_v21 = vld [vmem:[%s4438_s11 + $0xd50] sm:$0xff] }
  0x81   : > { %1157 = vst [vmem:[%s4443_s12 + $0x6a0] sm:$0xff] %v1156_v20  ;;  %v1160_v22 = vld [vmem:[%s4438_s11 + $0xd60] sm:$0xff]  ;;  %v1162_v23 = vld [vmem:[%s4438_s11 + $0xd70] sm:$0xff]  ;;  %1159 = vst [vmem:[%s4443_s12 + $0x6a8] sm:$0xff] %v1158_v21 }
  0x82   : > { %1161 = vst [vmem:[%s4443_s12 + $0x6b0] sm:$0xff] %v1160_v22  ;;  %1163 = vst [vmem:[%s4443_s12 + $0x6b8] sm:$0xff] %v1162_v23  ;;  %v1164_v24 = vld [vmem:[%s4438_s11 + $0xd80] sm:$0xff]  ;;  %v1166_v25 = vld [vmem:[%s4438_s11 + $0xd90] sm:$0xff] }
  0x83   : > { %v1168_v26 = vld [vmem:[%s4438_s11 + $0xda0] sm:$0xff]  ;;  %1165 = vst [vmem:[%s4443_s12 + $0x6c0] sm:$0xff] %v1164_v24  ;;  %1167 = vst [vmem:[%s4443_s12 + $0x6c8] sm:$0xff] %v1166_v25  ;;  %v1170_v27 = vld [vmem:[%s4438_s11 + $0xdb0] sm:$0xff] }
  0x84   : > { %1169 = vst [vmem:[%s4443_s12 + $0x6d0] sm:$0xff] %v1168_v26  ;;  %v1172_v28 = vld [vmem:[%s4438_s11 + $0xdc0] sm:$0xff]  ;;  %v1174_v29 = vld [vmem:[%s4438_s11 + $0xdd0] sm:$0xff]  ;;  %1171 = vst [vmem:[%s4443_s12 + $0x6d8] sm:$0xff] %v1170_v27 }
  0x85   : > { %1173 = vst [vmem:[%s4443_s12 + $0x6e0] sm:$0xff] %v1172_v28  ;;  %1175 = vst [vmem:[%s4443_s12 + $0x6e8] sm:$0xff] %v1174_v29  ;;  %v1176_v30 = vld [vmem:[%s4438_s11 + $0xde0] sm:$0xff]  ;;  %v1178_v31 = vld [vmem:[%s4438_s11 + $0xdf0] sm:$0xff] }
  0x86   : > { %v1180_v32 = vld [vmem:[%s4438_s11 + $0xe00] sm:$0xff]  ;;  %1177 = vst [vmem:[%s4443_s12 + $0x6f0] sm:$0xff] %v1176_v30  ;;  %1179 = vst [vmem:[%s4443_s12 + $0x6f8] sm:$0xff] %v1178_v31  ;;  %v1182_v33 = vld [vmem:[%s4438_s11 + $0xe10] sm:$0xff] }
  0x87   : > { %1181 = vst [vmem:[%s4443_s12 + $0x700] sm:$0xff] %v1180_v32  ;;  %v1184_v34 = vld [vmem:[%s4438_s11 + $0xe20] sm:$0xff]  ;;  %v1186_v35 = vld [vmem:[%s4438_s11 + $0xe30] sm:$0xff]  ;;  %1183 = vst [vmem:[%s4443_s12 + $0x708] sm:$0xff] %v1182_v33 }
  0x88   : > { %1185 = vst [vmem:[%s4443_s12 + $0x710] sm:$0xff] %v1184_v34  ;;  %1187 = vst [vmem:[%s4443_s12 + $0x718] sm:$0xff] %v1186_v35  ;;  %v1188_v36 = vld [vmem:[%s4438_s11 + $0xe40] sm:$0xff]  ;;  %v1190_v37 = vld [vmem:[%s4438_s11 + $0xe50] sm:$0xff] }
  0x89   : > { %v1192_v38 = vld [vmem:[%s4438_s11 + $0xe60] sm:$0xff]  ;;  %1189 = vst [vmem:[%s4443_s12 + $0x720] sm:$0xff] %v1188_v36  ;;  %1191 = vst [vmem:[%s4443_s12 + $0x728] sm:$0xff] %v1190_v37  ;;  %v1194_v39 = vld [vmem:[%s4438_s11 + $0xe70] sm:$0xff] }
  0x8a   : > { %1193 = vst [vmem:[%s4443_s12 + $0x730] sm:$0xff] %v1192_v38  ;;  %v1196_v40 = vld [vmem:[%s4438_s11 + $0xe80] sm:$0xff]  ;;  %v1198_v41 = vld [vmem:[%s4438_s11 + $0xe90] sm:$0xff]  ;;  %1195 = vst [vmem:[%s4443_s12 + $0x738] sm:$0xff] %v1194_v39 }
  0x8b   : > { %1197 = vst [vmem:[%s4443_s12 + $0x740] sm:$0xff] %v1196_v40  ;;  %1199 = vst [vmem:[%s4443_s12 + $0x748] sm:$0xff] %v1198_v41  ;;  %v1200_v42 = vld [vmem:[%s4438_s11 + $0xea0] sm:$0xff]  ;;  %v1202_v43 = vld [vmem:[%s4438_s11 + $0xeb0] sm:$0xff] }
  0x8c   : > { %v1204_v44 = vld [vmem:[%s4438_s11 + $0xec0] sm:$0xff]  ;;  %1201 = vst [vmem:[%s4443_s12 + $0x750] sm:$0xff] %v1200_v42  ;;  %1203 = vst [vmem:[%s4443_s12 + $0x758] sm:$0xff] %v1202_v43  ;;  %v1206_v45 = vld [vmem:[%s4438_s11 + $0xed0] sm:$0xff] }
  0x8d   : > { %1205 = vst [vmem:[%s4443_s12 + $0x760] sm:$0xff] %v1204_v44  ;;  %v1208_v46 = vld [vmem:[%s4438_s11 + $0xee0] sm:$0xff]  ;;  %v1210_v47 = vld [vmem:[%s4438_s11 + $0xef0] sm:$0xff]  ;;  %1207 = vst [vmem:[%s4443_s12 + $0x768] sm:$0xff] %v1206_v45 }
  0x8e   : > { %1209 = vst [vmem:[%s4443_s12 + $0x770] sm:$0xff] %v1208_v46  ;;  %1211 = vst [vmem:[%s4443_s12 + $0x778] sm:$0xff] %v1210_v47  ;;  %v1212_v48 = vld [vmem:[%s4438_s11 + $0xf00] sm:$0xff]  ;;  %v1214_v49 = vld [vmem:[%s4438_s11 + $0xf10] sm:$0xff] }
  0x8f   : > { %v1216_v50 = vld [vmem:[%s4438_s11 + $0xf20] sm:$0xff]  ;;  %1213 = vst [vmem:[%s4443_s12 + $0x780] sm:$0xff] %v1212_v48  ;;  %1215 = vst [vmem:[%s4443_s12 + $0x788] sm:$0xff] %v1214_v49  ;;  %v1218_v51 = vld [vmem:[%s4438_s11 + $0xf30] sm:$0xff] }
  0x90   : > { %1217 = vst [vmem:[%s4443_s12 + $0x790] sm:$0xff] %v1216_v50  ;;  %v1220_v52 = vld [vmem:[%s4438_s11 + $0xf40] sm:$0xff]  ;;  %v1222_v53 = vld [vmem:[%s4438_s11 + $0xf50] sm:$0xff]  ;;  %1219 = vst [vmem:[%s4443_s12 + $0x798] sm:$0xff] %v1218_v51 }
  0x91   : > { %1221 = vst [vmem:[%s4443_s12 + $0x7a0] sm:$0xff] %v1220_v52  ;;  %1223 = vst [vmem:[%s4443_s12 + $0x7a8] sm:$0xff] %v1222_v53  ;;  %v1224_v54 = vld [vmem:[%s4438_s11 + $0xf60] sm:$0xff]  ;;  %v1226_v55 = vld [vmem:[%s4438_s11 + $0xf70] sm:$0xff] }
  0x92   : > { %v1228_v56 = vld [vmem:[%s4438_s11 + $0xf80] sm:$0xff]  ;;  %1225 = vst [vmem:[%s4443_s12 + $0x7b0] sm:$0xff] %v1224_v54  ;;  %1227 = vst [vmem:[%s4443_s12 + $0x7b8] sm:$0xff] %v1226_v55  ;;  %v1230_v57 = vld [vmem:[%s4438_s11 + $0xf90] sm:$0xff] }
  0x93   : > { %1229 = vst [vmem:[%s4443_s12 + $0x7c0] sm:$0xff] %v1228_v56  ;;  %v1232_v58 = vld [vmem:[%s4438_s11 + $0xfa0] sm:$0xff]  ;;  %v1234_v59 = vld [vmem:[%s4438_s11 + $0xfb0] sm:$0xff]  ;;  %1231 = vst [vmem:[%s4443_s12 + $0x7c8] sm:$0xff] %v1230_v57 }
  0x94   : > { %1233 = vst [vmem:[%s4443_s12 + $0x7d0] sm:$0xff] %v1232_v58  ;;  %1235 = vst [vmem:[%s4443_s12 + $0x7d8] sm:$0xff] %v1234_v59  ;;  %v1236_v60 = vld [vmem:[%s4438_s11 + $0xfc0] sm:$0xff]  ;;  %v1238_v61 = vld [vmem:[%s4438_s11 + $0xfd0] sm:$0xff] }
  0x95   : > { %v1240_v62 = vld [vmem:[%s4438_s11 + $0xfe0] sm:$0xff]  ;;  %1237 = vst [vmem:[%s4443_s12 + $0x7e0] sm:$0xff] %v1236_v60  ;;  %1239 = vst [vmem:[%s4443_s12 + $0x7e8] sm:$0xff] %v1238_v61  ;;  %v1242_v63 = vld [vmem:[%s4438_s11 + $0xff0] sm:$0xff] }
  0x96   : > { %1241 = vst [vmem:[%s4443_s12 + $0x7f0] sm:$0xff] %v1240_v62  ;;  %1243 = vst [vmem:[%s4443_s12 + $0x7f8] sm:$0xff] %v1242_v63 }
  0x97 PF: > { %p3577_p7 = scmp.ge.s32.totalorder %s4348_s21, 1  ;;  %p1264_p8 = scmp.lt.s32.totalorder %s4348_s21, 25 }
  0x99   : > { %p1265_p9 = pnand %p3577_p7, %p1264_p8 }
  0x9a   : > { %s1271_s13 = sand.u32 (!%p1265_p9), 1, %s4324_s15   ;;  %s3579_s14 = sshll.u32 (!%p1265_p9), %s4332_s17, 4 }
  0x9b   : > { %1268 = sbr.rel (%p1265_p9) target bundleno = 715 (0x2cb), region = 70  ;;  %s3578_s24 = sshll.u32 (!%p1265_p9), %s1271_s13, 11 }
  0x9c   : > { %p1309_p10 = scmp.lt.s32.totalorder (!%p1265_p9), %s3579_s14, 191  ;;  %s3580_s25 = sshll.u32 (!%p1265_p9), %s4336_s18, 1 }
  0x9d   : > { %p1316_p11 = scmp.lt.s32.totalorder (!%p1265_p9), %s3580_s25, 3  ;;  %s4980_s12 = scalar_lea.vmem (!%p1265_p9), [#allocation3], %s3578_s24 }
  0x9e   : > { %p3584_p12 = scmp.ne.s32.totalorder (!%p1265_p9), %s4332_s17, 0 }
  0xa0   : > { %s5345_s14 = smov (!%p1309_p10, %s3579_s14), 191  ;;  %s5347_s25 = smov (!%p1316_p11, %s3580_s25), 3 }
  0xa1   : > { %s4962_s29 = scalar_lea.vmem %s5327_s0, %s5345_s14  ;;  %s1318_s15 = scalar_lea.vmem %s5329_s2, %s5347_s25 }
  0xa2   : > { %s1323_s18 = scalar_lea.vmem %s5330_s3, %s5347_s25  ;;  %s3583_s8 = sshll.u32 %s5347_s25, 1 }
  0xa3   : > { %s4978_s11 = scalar_lea.vmem %s5331_s4, %s3583_s8  ;;  %1334 = sbr.rel (%p3584_p12) target bundleno = 170 (0xaa), region = 78 }
  0xa8   : > { %v4350_v0 = vmov 0.0  }
  0xa9   : > { %1335 = vst [vmem:[#allocation2] sm:$0xf] %v4350_v0 }
  0xaa PF: > { %v3904_v1 = vld [vmem:[%s4980_s12 + $0x74] ss:$8 sps:$4 sm:$0xff]   ;;  %v3908_v3 = vld [vmem:[%s4980_s12 + $0x70] ss:$8 sps:$4 sm:$0xff]   ;;  %v3910_v5 = vld [vmem:[%s4980_s12 + $0x64] ss:$8 sps:$4 sm:$0xff]   ;;  %v1601_v39 = vlaneseq }
  0xab   : > { %v3906_v2 = vld [vmem:[%s4980_s12 + $0x174] ss:$8 sps:$4 sm:$0xff]   ;;  %2991 = vmatprep.subr.bf16.mxu0 %v3904_v1  ;;  %v3909_v4 = vld [vmem:[%s4980_s12 + $0x170] ss:$8 sps:$4 sm:$0xff]   ;;  %v3912_v6 = vld [vmem:[%s4980_s12 + $0x164] ss:$8 sps:$4 sm:$0xff]  }
  0xac   : > { %3032 = vmatprep.subr.bf16.mxu1 %v3906_v2  ;;  %2992 = vmatpush1.bf16.msra.mxu0 %v3908_v3  ;;  %v3914_v7 = vld [vmem:[%s4980_s12 + $0x60] ss:$8 sps:$4 sm:$0xff]   ;;  %v3916_v9 = vld [vmem:[%s4980_s12 + $0x54] ss:$8 sps:$4 sm:$0xff]   ;;  %v3920_v11 = vld [vmem:[%s4980_s12 + $0x50] ss:$8 sps:$4 sm:$0xff]  }
  0xad   : > { %3033 = vmatpush1.bf16.msra.mxu1 %v3909_v4  ;;  %2993 = vmatprep.subr.bf16.mxu0 %v3910_v5  ;;  %v3915_v8 = vld [vmem:[%s4980_s12 + $0x160] ss:$8 sps:$4 sm:$0xff]   ;;  %v3918_v10 = vld [vmem:[%s4980_s12 + $0x154] ss:$8 sps:$4 sm:$0xff]   ;;  %v3921_v12 = vld [vmem:[%s4980_s12 + $0x150] ss:$8 sps:$4 sm:$0xff]  }
  0xae   : > { %3034 = vmatprep.subr.bf16.mxu1 %v3912_v6  ;;  %v3922_v13 = vld [vmem:[%s4980_s12 + $0x44] ss:$8 sps:$4 sm:$0xff]   ;;  %v3926_v15 = vld [vmem:[%s4980_s12 + $0x40] ss:$8 sps:$4 sm:$0xff]   ;;  %v3928_v17 = vld [vmem:[%s4980_s12 + $0x34] ss:$8 sps:$4 sm:$0xff]  }
  0xaf   : > { %v3924_v14 = vld [vmem:[%s4980_s12 + $0x144] ss:$8 sps:$4 sm:$0xff]   ;;  %v3927_v16 = vld [vmem:[%s4980_s12 + $0x140] ss:$8 sps:$4 sm:$0xff]   ;;  %v3930_v18 = vld [vmem:[%s4980_s12 + $0x134] ss:$8 sps:$4 sm:$0xff]  }
  0xb0   : > { %2994 = vmatpush1.bf16.msra.mxu0 %v3914_v7  ;;  %v3932_v19 = vld [vmem:[%s4980_s12 + $0x30] ss:$8 sps:$4 sm:$0xff]   ;;  %v3934_v21 = vld [vmem:[%s4980_s12 + $0x24] ss:$8 sps:$4 sm:$0xff]   ;;  %v3938_v23 = vld [vmem:[%s4980_s12 + $0x20] ss:$8 sps:$4 sm:$0xff]  }
  0xb1   : > { %3035 = vmatpush1.bf16.msra.mxu1 %v3915_v8  ;;  %2995 = vmatprep.subr.bf16.mxu0 %v3916_v9  ;;  %v3933_v20 = vld [vmem:[%s4980_s12 + $0x130] ss:$8 sps:$4 sm:$0xff]   ;;  %v3936_v22 = vld [vmem:[%s4980_s12 + $0x124] ss:$8 sps:$4 sm:$0xff]   ;;  %v3939_v24 = vld [vmem:[%s4980_s12 + $0x120] ss:$8 sps:$4 sm:$0xff]  }
  0xb2   : > { %3036 = vmatprep.subr.bf16.mxu1 %v3918_v10  ;;  %v3940_v25 = vld [vmem:[%s4980_s12 + $0x14] ss:$8 sps:$4 sm:$0xff]   ;;  %v3944_v27 = vld [vmem:[%s4980_s12 + $0x10] ss:$8 sps:$4 sm:$0xff]   ;;  %v3946_v29 = vld [vmem:[%s4980_s12 + $0x4] ss:$8 sps:$4 sm:$0xff]  }
  0xb3   : > { %v3942_v26 = vld [vmem:[%s4980_s12 + $0x114] ss:$8 sps:$4 sm:$0xff]   ;;  %v3945_v28 = vld [vmem:[%s4980_s12 + $0x110] ss:$8 sps:$4 sm:$0xff]   ;;  %v3948_v30 = vld [vmem:[%s4980_s12 + $0x104] ss:$8 sps:$4 sm:$0xff]  }
  0xb4   : > { %2996 = vmatpush1.bf16.msra.mxu0 %v3920_v11  ;;  %v3950_v31 = vld [vmem:[%s4980_s12] ss:$8 sps:$4 sm:$0xff]   ;;  %v3952_v33 = vld [vmem:[%s4980_s12 + $0xf4] ss:$8 sps:$4 sm:$0xff]   ;;  %v3956_v35 = vld [vmem:[%s4980_s12 + $0xf0] ss:$8 sps:$4 sm:$0xff]  }
  0xb5   : > { %3037 = vmatpush1.bf16.msra.mxu1 %v3921_v12  ;;  %2997 = vmatprep.subr.bf16.mxu0 %v3922_v13  ;;  %v3951_v32 = vld [vmem:[%s4980_s12 + $0x100] ss:$8 sps:$4 sm:$0xff]   ;;  %v3954_v34 = vld [vmem:[%s4980_s12 + $0x1f4] ss:$8 sps:$4 sm:$0xff]   ;;  %v3957_v36 = vld [vmem:[%s4980_s12 + $0x1f0] ss:$8 sps:$4 sm:$0xff]  }
  0xb6   : > { %3038 = vmatprep.subr.bf16.mxu1 %v3924_v14  ;;  %v4351_v37 = vmov 1966171168   ;;  %v3958_v40 = vld [vmem:[%s4980_s12 + $0xe4] ss:$8 sps:$4 sm:$0xff]   ;;  %v3962_v42 = vld [vmem:[%s4980_s12 + $0xe0] ss:$8 sps:$4 sm:$0xff]  }
  0xb7   : > { %v1599_v38 = vunpack.c.l.s4 %v4351_v37  ;;  %v3960_v41 = vld [vmem:[%s4980_s12 + $0x1e4] ss:$8 sps:$4 sm:$0xff]   ;;  %v5022_v44 = vshrl.u32 %v1601_v39, 7  ;;  %v3963_v45 = vld [vmem:[%s4980_s12 + $0x1e0] ss:$8 sps:$4 sm:$0xff]   ;;  %p3841_p13 = scmp.ne.s32.totalorder %s4332_s17, 11 }
  0xb8   : > { %2998 = vmatpush1.bf16.msra.mxu0 %v3926_v15  ;;  %v3964_v46 = vld [vmem:[%s4980_s12 + $0xd4] ss:$8 sps:$4 sm:$0xff]   ;;  %v3968_v48 = vld [vmem:[%s4980_s12 + $0xd0] ss:$8 sps:$4 sm:$0xff]   ;;  %v3970_v51 = vld [vmem:[%s4980_s12 + $0xc4] ss:$8 sps:$4 sm:$0xff]  }
  0xb9   : > { %3039 = vmatpush1.bf16.msra.mxu1 %v3927_v16  ;;  %2999 = vmatprep.subr.bf16.mxu0 %v3928_v17  ;;  %v1600_v43 = vunpack.c.0.s8 %v1599_v38  ;;  %v3966_v47 = vld [vmem:[%s4980_s12 + $0x1d4] ss:$8 sps:$4 sm:$0xff]   ;;  %v3969_v49 = vld [vmem:[%s4980_s12 + $0x1d0] ss:$8 sps:$4 sm:$0xff]   ;;  %v3972_v52 = vld [vmem:[%s4980_s12 + $0x1c4] ss:$8 sps:$4 sm:$0xff]  }
  0xba   : > { %3040 = vmatprep.subr.bf16.mxu1 %v3930_v18  ;;  %v1337_v53 = vld [vmem:[%s4962_s29] sm:$0xff]  ;;  %v3980_v60 = vld [vmem:[%s4980_s12 + $0xb0] ss:$8 sps:$4 sm:$0xff]   ;;  %v3982_v63 = vld [vmem:[%s4980_s12 + $0xa4] ss:$8 sps:$4 sm:$0xff]  }
  0xbb   : > { %v5030_v50 = vsub.s32 %v1600_v43, %v5022_v44  ;;  %v3974_v54 = vld [vmem:[%s4980_s12 + $0xc0] ss:$8 sps:$4 sm:$0xff]   ;;  %v3976_v57 = vld [vmem:[%s4980_s12 + $0xb4] ss:$8 sps:$4 sm:$0xff]   ;;  %v3981_v62 = vld [vmem:[%s4980_s12 + $0x1b0] ss:$8 sps:$4 sm:$0xff]   ;;  %v1597_v2 = vcombine.high %v1337_v53, %v1337_v53 }
  0xbc   : > { %3000 = vmatpush1.bf16.msra.mxu0 %v3932_v19  ;;  %v3975_v56 = vld [vmem:[%s4980_s12 + $0x1c0] ss:$8 sps:$4 sm:$0xff]   ;;  %v3978_v58 = vld [vmem:[%s4980_s12 + $0x1b4] ss:$8 sps:$4 sm:$0xff]   ;;  %v3984_v0 = vld [vmem:[%s4980_s12 + $0x1a4] ss:$8 sps:$4 sm:$0xff]  }
  0xbd   : > { %3041 = vmatpush1.bf16.msra.mxu1 %v3933_v20  ;;  %3001 = vmatprep.subr.bf16.mxu0 %v3934_v21  ;;  %v1604_v55 = vrot.slane %v1337_v53, %v5030_v50  ;;  %v3986_v3 = vld [vmem:[%s4980_s12 + $0xa0] ss:$8 sps:$4 sm:$0xff]   ;;  %v3988_v5 = vld [vmem:[%s4980_s12 + $0x94] ss:$8 sps:$4 sm:$0xff]   ;;  %v5050_v7 = vrot.slane %v1597_v2, %v5030_v50  ;;  %v3992_v8 = vld [vmem:[%s4980_s12 + $0x90] ss:$8 sps:$4 sm:$0xff]  }
  0xbe   : > { %3042 = vmatprep.subr.bf16.mxu1 %v3936_v22  ;;  %v3987_v4 = vld [vmem:[%s4980_s12 + $0x1a0] ss:$8 sps:$4 sm:$0xff]   ;;  %v3990_v6 = vld [vmem:[%s4980_s12 + $0x194] ss:$8 sps:$4 sm:$0xff]   ;;  %v3993_v9 = vld [vmem:[%s4980_s12 + $0x190] ss:$8 sps:$4 sm:$0xff]  }
  0xbf   : > { %v1612_v59 = vcombine.high %v1604_v55, %v1604_v55  ;;  %v3994_v10 = vld [vmem:[%s4980_s12 + $0x84] ss:$8 sps:$4 sm:$0xff]   ;;  %v1613_v12 = vcombine.high %v5050_v7, %v5050_v7  ;;  %v3998_v13 = vld [vmem:[%s4980_s12 + $0x80] ss:$8 sps:$4 sm:$0xff]   ;;  %v1620_v14 = vrot.slane %v1604_v55, %v5030_v50  ;;  %v4003_v16 = vld [vmem:[%s4980_s12 + $0x274] ss:$8 sps:$4 sm:$0xff]  }
  0xc0   : > { %3002 = vmatpush1.bf16.msra.mxu0 %v3938_v23  ;;  %v3996_v11 = vld [vmem:[%s4980_s12 + $0x184] ss:$8 sps:$4 sm:$0xff]   ;;  %v3999_v15 = vld [vmem:[%s4980_s12 + $0x180] ss:$8 sps:$4 sm:$0xff]   ;;  %v4006_v17 = vld [vmem:[%s4980_s12 + $0x374] ss:$8 sps:$4 sm:$0xff]  }
  0xc1   : > { %3043 = vmatpush1.bf16.msra.mxu1 %v3939_v24  ;;  %3003 = vmatprep.subr.bf16.mxu0 %v3940_v25  ;;  %v1634_v61 = vrot.slane %v1612_v59, %v5030_v50  ;;  %v1641_v18 = vrot.slane %v1613_v12, %v5030_v50  ;;  %v1642_v19 = vcombine.high %v1620_v14, %v1620_v14  ;;  %v4001_v20 = vld [vmem:[%s4980_s12 + $0x270] ss:$8 sps:$4 sm:$0xff]   ;;  %v4009_v22 = vld [vmem:[%s4980_s12 + $0x264] ss:$8 sps:$4 sm:$0xff]   ;;  %v4007_v25 = vld [vmem:[%s4980_s12 + $0x260] ss:$8 sps:$4 sm:$0xff]  }
  0xc2   : > { %3044 = vmatprep.subr.bf16.mxu1 %v3942_v26  ;;  %v4004_v21 = vld [vmem:[%s4980_s12 + $0x370] ss:$8 sps:$4 sm:$0xff]   ;;  %v4012_v23 = vld [vmem:[%s4980_s12 + $0x364] ss:$8 sps:$4 sm:$0xff]   ;;  %v4010_v26 = vld [vmem:[%s4980_s12 + $0x360] ss:$8 sps:$4 sm:$0xff]  }
  0xc3   : > { %v1644_v1 = vcombine.high %v1634_v61, %v1634_v61  ;;  %3023 = vmatprep.mubr.bf16.mxu0 %v1634_v61  ;;  %v1645_v24 = vcombine.high %v1641_v18, %v1641_v18  ;;  %v4025_v37 = vld [vmem:[%s4980_s12 + $0x230] ss:$8 sps:$4 sm:$0xff]   ;;  %v4033_v39 = vld [vmem:[%s4980_s12 + $0x224] ss:$8 sps:$4 sm:$0xff]   ;;  %v4039_v43 = vld [vmem:[%s4980_s12 + $0x214] ss:$8 sps:$4 sm:$0xff]  }
  0xc4   : > { %3004 = vmatpush1.bf16.msra.mxu0 %v3944_v27  ;;  %v4015_v27 = vld [vmem:[%s4980_s12 + $0x254] ss:$8 sps:$4 sm:$0xff]   ;;  %v4028_v38 = vld [vmem:[%s4980_s12 + $0x330] ss:$8 sps:$4 sm:$0xff]   ;;  %v4055_v59 = vld [vmem:[%s4980_s12 + $0x2e0] ss:$8 sps:$4 sm:$0xff]  }
  0xc5   : > { %3045 = vmatpush1.bf16.msra.mxu1 %v3945_v28  ;;  %3005 = vmatprep.subr.bf16.mxu0 %v3946_v29  ;;  %v4018_v28 = vld [vmem:[%s4980_s12 + $0x354] ss:$8 sps:$4 sm:$0xff]   ;;  %v4013_v29 = vld [vmem:[%s4980_s12 + $0x250] ss:$8 sps:$4 sm:$0xff]   ;;  %v4072_v2 = vld [vmem:[%s4980_s12 + $0x3c4] ss:$8 sps:$4 sm:$0xff]  }
  0xc6   : > { %3046 = vmatprep.subr.bf16.mxu1 %v3948_v30  ;;  %3064 = vmatprep.mubr.bf16.mxu1 %v1644_v1  ;;  %v4016_v30 = vld [vmem:[%s4980_s12 + $0x350] ss:$8 sps:$4 sm:$0xff]   ;;  %v4051_v53 = vld [vmem:[%s4980_s12 + $0x2f4] ss:$8 sps:$4 sm:$0xff]   ;;  %v4069_v1 = vld [vmem:[%s4980_s12 + $0x2c4] ss:$8 sps:$4 sm:$0xff]  }
  0xc7   : > { %v4049_v55 = vld [vmem:[%s4980_s12 + $0x2f0] ss:$8 sps:$4 sm:$0xff]   ;;  %v4063_v61 = vld [vmem:[%s4980_s12 + $0x2d4] ss:$8 sps:$4 sm:$0xff]   ;;  %v4079_v12 = vld [vmem:[%s4980_s12 + $0x2a0] ss:$8 sps:$4 sm:$0xff]  }
  0xc8   : > { %3006 = vmatpush1.bf16.msra.mxu0 %v3950_v31  ;;  %v4021_v31 = vld [vmem:[%s4980_s12 + $0x244] ss:$8 sps:$4 sm:$0xff]  }
  0xc9   : > { %3047 = vmatpush1.bf16.msra.mxu1 %v3951_v32  ;;  %3007 = vmatprep.subr.bf16.mxu0 %v3952_v33  ;;  %v4024_v32 = vld [vmem:[%s4980_s12 + $0x344] ss:$8 sps:$4 sm:$0xff]   ;;  %v4019_v33 = vld [vmem:[%s4980_s12 + $0x240] ss:$8 sps:$4 sm:$0xff]  }
  0xca   : > { %3048 = vmatprep.subr.bf16.mxu1 %v3954_v34  ;;  %v4022_v34 = vld [vmem:[%s4980_s12 + $0x340] ss:$8 sps:$4 sm:$0xff]  }
  0xcc   : > { %3008 = vmatpush2.bf16.msra.mxu0 %v3956_v35  ;;  %v4027_v35 = vld [vmem:[%s4980_s12 + $0x234] ss:$8 sps:$4 sm:$0xff]  }
  0xcd   : > { %3049 = vmatpush2.bf16.msra.mxu1 %v3957_v36  ;;  %3009 = vmatprep.subr.bf16.mxu0 %v3958_v40  ;;  %v4030_v36 = vld [vmem:[%s4980_s12 + $0x334] ss:$8 sps:$4 sm:$0xff]   ;;  %v4036_v40 = vld [vmem:[%s4980_s12 + $0x324] ss:$8 sps:$4 sm:$0xff]  }
  0xce   : > { %3050 = vmatprep.subr.bf16.mxu1 %v3960_v41  ;;  %v4031_v41 = vld [vmem:[%s4980_s12 + $0x220] ss:$8 sps:$4 sm:$0xff]  }
  0xd0   : > { %3010 = vmatpush2.bf16.msra.mxu0 %v3962_v42  ;;  %v4034_v42 = vld [vmem:[%s4980_s12 + $0x320] ss:$8 sps:$4 sm:$0xff]  }
  0xd1   : > { %3051 = vmatpush2.bf16.msra.mxu1 %v3963_v45  ;;  %3011 = vmatprep.subr.bf16.mxu0 %v3964_v46  ;;  %v4042_v45 = vld [vmem:[%s4980_s12 + $0x314] ss:$8 sps:$4 sm:$0xff]   ;;  %v4037_v46 = vld [vmem:[%s4980_s12 + $0x210] ss:$8 sps:$4 sm:$0xff]  }
  0xd2   : > { %3052 = vmatprep.subr.bf16.mxu1 %v3966_v47  ;;  %v4040_v47 = vld [vmem:[%s4980_s12 + $0x310] ss:$8 sps:$4 sm:$0xff]  }
  0xd4   : > { %3012 = vmatpush2.bf16.msra.mxu0 %v3968_v48  ;;  %v4045_v48 = vld [vmem:[%s4980_s12 + $0x204] ss:$8 sps:$4 sm:$0xff]  }
  0xd5   : > { %3053 = vmatpush2.bf16.msra.mxu1 %v3969_v49  ;;  %3013 = vmatprep.subr.bf16.mxu0 %v3970_v51  ;;  %v4048_v49 = vld [vmem:[%s4980_s12 + $0x304] ss:$8 sps:$4 sm:$0xff]   ;;  %v4043_v51 = vld [vmem:[%s4980_s12 + $0x200] ss:$8 sps:$4 sm:$0xff]  }
  0xd6   : > { %3054 = vmatprep.subr.bf16.mxu1 %v3972_v52  ;;  %v4046_v52 = vld [vmem:[%s4980_s12 + $0x300] ss:$8 sps:$4 sm:$0xff]  }
  0xd8   : > { %3014 = vmatpush2.bf16.msra.mxu0 %v3974_v54  ;;  %v4054_v54 = vld [vmem:[%s4980_s12 + $0x3f4] ss:$8 sps:$4 sm:$0xff]  }
  0xd9   : > { %3055 = vmatpush2.bf16.msra.mxu1 %v3975_v56  ;;  %3015 = vmatprep.subr.bf16.mxu0 %v3976_v57  ;;  %v4052_v56 = vld [vmem:[%s4980_s12 + $0x3f0] ss:$8 sps:$4 sm:$0xff]   ;;  %v4057_v57 = vld [vmem:[%s4980_s12 + $0x2e4] ss:$8 sps:$4 sm:$0xff]  }
  0xda   : > { %3056 = vmatprep.subr.bf16.mxu1 %v3978_v58  ;;  %v4060_v58 = vld [vmem:[%s4980_s12 + $0x3e4] ss:$8 sps:$4 sm:$0xff]  }
  0xdc   : > { %3016 = vmatpush2.bf16.msra.mxu0 %v3980_v60  ;;  %v4058_v60 = vld [vmem:[%s4980_s12 + $0x3e0] ss:$8 sps:$4 sm:$0xff]  }
  0xdd   : > { %3057 = vmatpush2.bf16.msra.mxu1 %v3981_v62  ;;  %3017 = vmatprep.subr.bf16.mxu0 %v3982_v63  ;;  %v4066_v62 = vld [vmem:[%s4980_s12 + $0x3d4] ss:$8 sps:$4 sm:$0xff]   ;;  %v4061_v63 = vld [vmem:[%s4980_s12 + $0x2d0] ss:$8 sps:$4 sm:$0xff]  }
  0xde   : > { %3058 = vmatprep.subr.bf16.mxu1 %v3984_v0  ;;  %v4064_v0 = vld [vmem:[%s4980_s12 + $0x3d0] ss:$8 sps:$4 sm:$0xff]  }
  0xe0   : > { %3018 = vmatpush2.bf16.msra.mxu0 %v3986_v3  ;;  %v4067_v3 = vld [vmem:[%s4980_s12 + $0x2c0] ss:$8 sps:$4 sm:$0xff]  }
  0xe1   : > { %3059 = vmatpush2.bf16.msra.mxu1 %v3987_v4  ;;  %3019 = vmatprep.subr.bf16.mxu0 %v3988_v5  ;;  %v4070_v4 = vld [vmem:[%s4980_s12 + $0x3c0] ss:$8 sps:$4 sm:$0xff]   ;;  %v4075_v5 = vld [vmem:[%s4980_s12 + $0x2b4] ss:$8 sps:$4 sm:$0xff]  }
  0xe2   : > { %3060 = vmatprep.subr.bf16.mxu1 %v3990_v6  ;;  %v4078_v6 = vld [vmem:[%s4980_s12 + $0x3b4] ss:$8 sps:$4 sm:$0xff]  }
  0xe4   : > { %3020 = vmatpush2.bf16.msra.mxu0 %v3992_v8  ;;  %v4073_v8 = vld [vmem:[%s4980_s12 + $0x2b0] ss:$8 sps:$4 sm:$0xff]  }
  0xe5   : > { %3061 = vmatpush2.bf16.msra.mxu1 %v3993_v9  ;;  %3021 = vmatprep.subr.bf16.mxu0 %v3994_v10  ;;  %v4076_v9 = vld [vmem:[%s4980_s12 + $0x3b0] ss:$8 sps:$4 sm:$0xff]   ;;  %v4081_v10 = vld [vmem:[%s4980_s12 + $0x2a4] ss:$8 sps:$4 sm:$0xff]  }
  0xe6   : > { %3062 = vmatprep.subr.bf16.mxu1 %v3996_v11  ;;  %v4084_v11 = vld [vmem:[%s4980_s12 + $0x3a4] ss:$8 sps:$4 sm:$0xff]  }
  0xe8   : > { %3022 = vmatpush2.bf16.msra.mxu0 %v3998_v13  ;;  %v4082_v13 = vld [vmem:[%s4980_s12 + $0x3a0] ss:$8 sps:$4 sm:$0xff]  }
  0xe9   : > { %3063 = vmatpush2.bf16.msra.mxu1 %v3999_v15  ;;  %3073 = vmatprep.subr.bf16.mxu0 %v4003_v16  ;;  %v4090_v15 = vld [vmem:[%s4980_s12 + $0x394] ss:$8 sps:$4 sm:$0xff]   ;;  %v4085_v16 = vld [vmem:[%s4980_s12 + $0x290] ss:$8 sps:$4 sm:$0xff]  }
  0xea   : > { %3114 = vmatprep.subr.bf16.mxu1 %v4006_v17  ;;  %v4088_v17 = vld [vmem:[%s4980_s12 + $0x390] ss:$8 sps:$4 sm:$0xff]  }
  0xeb   : > { %3024 = vmatmul.mubr.bf16.vlgmr.msra.gmra.mxu0 %v1620_v14  ;;  %v4087_v14 = vld [vmem:[%s4980_s12 + $0x294] ss:$8 sps:$4 sm:$0xff]  }
  0xec   : > { %3065 = vmatmul.mubr.bf16.vlgmr.msra.gmra.mxu1 %v1642_v19  ;;  %3074 = vmatpush1.bf16.msra.mxu0 %v4001_v20  ;;  %v4096_v19 = vld [vmem:[%s4980_s12 + $0x384] ss:$8 sps:$4 sm:$0xff]   ;;  %v4091_v20 = vld [vmem:[%s4980_s12 + $0x280] ss:$8 sps:$4 sm:$0xff]  }
  0xed   : > { %3115 = vmatpush1.bf16.msra.mxu1 %v4004_v21  ;;  %3075 = vmatprep.subr.bf16.mxu0 %v4009_v22  ;;  %v1627_v21 = vrot.slane %v5050_v7, %v5030_v50  ;;  %v4094_v22 = vld [vmem:[%s4980_s12 + $0x380] ss:$8 sps:$4 sm:$0xff]   ;;  %v4105_v7 = vld [vmem:[%s4980_s12 + $0x464] ss:$8 sps:$4 sm:$0xff]  }
  0xee   : > { %3116 = vmatprep.subr.bf16.mxu1 %v4012_v23  ;;  %3105 = vmatprep.mubr.bf16.mxu0 %v1641_v18  ;;  %v4093_v18 = vld [vmem:[%s4980_s12 + $0x284] ss:$8 sps:$4 sm:$0xff]   ;;  %v4099_v23 = vld [vmem:[%s4980_s12 + $0x474] ss:$8 sps:$4 sm:$0xff]  }
  0xef   : > { %3146 = vmatprep.mubr.bf16.mxu1 %v1645_v24  ;;  %v4102_v24 = vld [vmem:[%s4980_s12 + $0x574] ss:$8 sps:$4 sm:$0xff]  }
  0xf0   : > { %3076 = vmatpush1.bf16.msra.mxu0 %v4007_v25  ;;  %v1643_v25 = vcombine.high %v1627_v21, %v1627_v21 }
  0xf1   : > { %3117 = vmatpush1.bf16.msra.mxu1 %v4010_v26  ;;  %3077 = vmatprep.subr.bf16.mxu0 %v4015_v27  ;;  %v4097_v26 = vld [vmem:[%s4980_s12 + $0x470] ss:$8 sps:$4 sm:$0xff]  }
  0xf2   : > { %3118 = vmatprep.subr.bf16.mxu1 %v4018_v28  ;;  %v4100_v27 = vld [vmem:[%s4980_s12 + $0x570] ss:$8 sps:$4 sm:$0xff]   ;;  %v5133_v28 = vld [vmem:[%s4962_s29 + $0x8] sm:$0xff] }
  0xf4   : > { %3078 = vmatpush1.bf16.msra.mxu0 %v4013_v29  ;;  %v4108_v29 = vld [vmem:[%s4980_s12 + $0x564] ss:$8 sps:$4 sm:$0xff]  }
  0xf5   : > { %3119 = vmatpush1.bf16.msra.mxu1 %v4016_v30  ;;  %3079 = vmatprep.subr.bf16.mxu0 %v4021_v31  ;;  %v5139_v30 = vrot.slane %v5133_v28, %v5030_v50 }
  0xf6   : > { %3120 = vmatprep.subr.bf16.mxu1 %v4024_v32  ;;  %v4103_v32 = vld [vmem:[%s4980_s12 + $0x460] ss:$8 sps:$4 sm:$0xff]  }
  0xf7   : > { %v1661_v31 = vcombine.high %v5139_v30, %v5139_v30 }
  0xf8   : > { %3080 = vmatpush1.bf16.msra.mxu0 %v4019_v33  ;;  %v4106_v33 = vld [vmem:[%s4980_s12 + $0x560] ss:$8 sps:$4 sm:$0xff]  }
  0xf9   : > { %3121 = vmatpush1.bf16.msra.mxu1 %v4022_v34  ;;  %3081 = vmatprep.subr.bf16.mxu0 %v4027_v35  ;;  %v4111_v34 = vld [vmem:[%s4980_s12 + $0x454] ss:$8 sps:$4 sm:$0xff]  }
  0xfa   : > { %3122 = vmatprep.subr.bf16.mxu1 %v4030_v36  ;;  %v4114_v35 = vld [vmem:[%s4980_s12 + $0x554] ss:$8 sps:$4 sm:$0xff]   ;;  %v1683_v36 = vrot.slane %v1661_v31, %v5030_v50 }
  0xfc   : > { %3082 = vmatpush1.bf16.msra.mxu0 %v4025_v37  ;;  %v1693_v37 = vcombine.high %v1683_v36, %v1683_v36 }
  0xfd   : > { %3123 = vmatpush1.bf16.msra.mxu1 %v4028_v38  ;;  %3083 = vmatprep.subr.bf16.mxu0 %v4033_v39  ;;  %v4109_v38 = vld [vmem:[%s4980_s12 + $0x450] ss:$8 sps:$4 sm:$0xff]  }
  0xfe   : > { %3124 = vmatprep.subr.bf16.mxu1 %v4036_v40  ;;  %v4112_v39 = vld [vmem:[%s4980_s12 + $0x550] ss:$8 sps:$4 sm:$0xff]   ;;  %v4117_v40 = vld [vmem:[%s4980_s12 + $0x444] ss:$8 sps:$4 sm:$0xff]  }
 0x100   : > { %3084 = vmatpush1.bf16.msra.mxu0 %v4031_v41  ;;  %v4120_v41 = vld [vmem:[%s4980_s12 + $0x544] ss:$8 sps:$4 sm:$0xff]  }
 0x101   : > { %3125 = vmatpush1.bf16.msra.mxu1 %v4034_v42  ;;  %3085 = vmatprep.subr.bf16.mxu0 %v4039_v43  ;;  %v4115_v42 = vld [vmem:[%s4980_s12 + $0x440] ss:$8 sps:$4 sm:$0xff]  }
 0x102   : > { %3126 = vmatprep.subr.bf16.mxu1 %v4042_v45  ;;  %v4118_v43 = vld [vmem:[%s4980_s12 + $0x540] ss:$8 sps:$4 sm:$0xff]   ;;  %v4123_v45 = vld [vmem:[%s4980_s12 + $0x434] ss:$8 sps:$4 sm:$0xff]  }
 0x104   : > { %3086 = vmatpush1.bf16.msra.mxu0 %v4037_v46  ;;  %v4126_v46 = vld [vmem:[%s4980_s12 + $0x534] ss:$8 sps:$4 sm:$0xff]  }
 0x105   : > { %3127 = vmatpush1.bf16.msra.mxu1 %v4040_v47  ;;  %3087 = vmatprep.subr.bf16.mxu0 %v4045_v48  ;;  %v4121_v47 = vld [vmem:[%s4980_s12 + $0x430] ss:$8 sps:$4 sm:$0xff]  }
 0x106   : > { %3128 = vmatprep.subr.bf16.mxu1 %v4048_v49  ;;  %v4124_v48 = vld [vmem:[%s4980_s12 + $0x530] ss:$8 sps:$4 sm:$0xff]   ;;  %v4129_v49 = vld [vmem:[%s4980_s12 + $0x424] ss:$8 sps:$4 sm:$0xff]  }
 0x108   : > { %3088 = vmatpush1.bf16.msra.mxu0 %v4043_v51  ;;  %v4132_v51 = vld [vmem:[%s4980_s12 + $0x524] ss:$8 sps:$4 sm:$0xff]  }
 0x109   : > { %3129 = vmatpush1.bf16.msra.mxu1 %v4046_v52  ;;  %3089 = vmatprep.subr.bf16.mxu0 %v4051_v53  ;;  %v4127_v52 = vld [vmem:[%s4980_s12 + $0x420] ss:$8 sps:$4 sm:$0xff]  }
 0x10a   : > { %3130 = vmatprep.subr.bf16.mxu1 %v4054_v54  ;;  %v4130_v53 = vld [vmem:[%s4980_s12 + $0x520] ss:$8 sps:$4 sm:$0xff]   ;;  %v4135_v54 = vld [vmem:[%s4980_s12 + $0x414] ss:$8 sps:$4 sm:$0xff]  }
 0x10c   : > { %3090 = vmatpush2.bf16.msra.mxu0 %v4049_v55  ;;  %v4138_v55 = vld [vmem:[%s4980_s12 + $0x514] ss:$8 sps:$4 sm:$0xff]  }
 0x10d   : > { %3131 = vmatpush2.bf16.msra.mxu1 %v4052_v56  ;;  %3091 = vmatprep.subr.bf16.mxu0 %v4057_v57  ;;  %v4133_v56 = vld [vmem:[%s4980_s12 + $0x410] ss:$8 sps:$4 sm:$0xff]  }
 0x10e   : > { %3132 = vmatprep.subr.bf16.mxu1 %v4060_v58  ;;  %v4136_v57 = vld [vmem:[%s4980_s12 + $0x510] ss:$8 sps:$4 sm:$0xff]   ;;  %v4141_v58 = vld [vmem:[%s4980_s12 + $0x404] ss:$8 sps:$4 sm:$0xff]  }
 0x110   : > { %3092 = vmatpush2.bf16.msra.mxu0 %v4055_v59  ;;  %v4144_v59 = vld [vmem:[%s4980_s12 + $0x504] ss:$8 sps:$4 sm:$0xff]  }
 0x111   : > { %3133 = vmatpush2.bf16.msra.mxu1 %v4058_v60  ;;  %3093 = vmatprep.subr.bf16.mxu0 %v4063_v61  ;;  %v4139_v60 = vld [vmem:[%s4980_s12 + $0x400] ss:$8 sps:$4 sm:$0xff]  }
 0x112   : > { %3134 = vmatprep.subr.bf16.mxu1 %v4066_v62  ;;  %v4142_v61 = vld [vmem:[%s4980_s12 + $0x500] ss:$8 sps:$4 sm:$0xff]   ;;  %v4147_v62 = vld [vmem:[%s4980_s12 + $0x4f4] ss:$8 sps:$4 sm:$0xff]  }
 0x114   : > { %3094 = vmatpush2.bf16.msra.mxu0 %v4061_v63  ;;  %v4150_v63 = vld [vmem:[%s4980_s12 + $0x5f4] ss:$8 sps:$4 sm:$0xff]  }
 0x115   : > { %3135 = vmatpush2.bf16.msra.mxu1 %v4064_v0  ;;  %3095 = vmatprep.subr.bf16.mxu0 %v4069_v1  ;;  %v4145_v0 = vld [vmem:[%s4980_s12 + $0x4f0] ss:$8 sps:$4 sm:$0xff]  }
 0x116   : > { %3136 = vmatprep.subr.bf16.mxu1 %v4072_v2  ;;  %v4148_v1 = vld [vmem:[%s4980_s12 + $0x5f0] ss:$8 sps:$4 sm:$0xff]   ;;  %v4153_v2 = vld [vmem:[%s4980_s12 + $0x4e4] ss:$8 sps:$4 sm:$0xff]  }
 0x118   : > { %3096 = vmatpush2.bf16.msra.mxu0 %v4067_v3  ;;  %v4156_v3 = vld [vmem:[%s4980_s12 + $0x5e4] ss:$8 sps:$4 sm:$0xff]  }
 0x119   : > { %3137 = vmatpush2.bf16.msra.mxu1 %v4070_v4  ;;  %3097 = vmatprep.subr.bf16.mxu0 %v4075_v5  ;;  %v4151_v4 = vld [vmem:[%s4980_s12 + $0x4e0] ss:$8 sps:$4 sm:$0xff]  }
 0x11a   : > { %3138 = vmatprep.subr.bf16.mxu1 %v4078_v6  ;;  %v4154_v5 = vld [vmem:[%s4980_s12 + $0x5e0] ss:$8 sps:$4 sm:$0xff]   ;;  %v4159_v6 = vld [vmem:[%s4980_s12 + $0x4d4] ss:$8 sps:$4 sm:$0xff]  }
 0x11c   : > { %3098 = vmatpush2.bf16.msra.mxu0 %v4073_v8  ;;  %v4162_v8 = vld [vmem:[%s4980_s12 + $0x5d4] ss:$8 sps:$4 sm:$0xff]  }
 0x11d   : > { %3139 = vmatpush2.bf16.msra.mxu1 %v4076_v9  ;;  %3099 = vmatprep.subr.bf16.mxu0 %v4081_v10  ;;  %v4157_v9 = vld [vmem:[%s4980_s12 + $0x4d0] ss:$8 sps:$4 sm:$0xff]  }
 0x11e   : > { %3140 = vmatprep.subr.bf16.mxu1 %v4084_v11  ;;  %v4160_v10 = vld [vmem:[%s4980_s12 + $0x5d0] ss:$8 sps:$4 sm:$0xff]   ;;  %v4165_v11 = vld [vmem:[%s4980_s12 + $0x4c4] ss:$8 sps:$4 sm:$0xff]  }
 0x120   : > { %3100 = vmatpush2.bf16.msra.mxu0 %v4079_v12  ;;  %v4168_v12 = vld [vmem:[%s4980_s12 + $0x5c4] ss:$8 sps:$4 sm:$0xff]  }
 0x121   : > { %3141 = vmatpush2.bf16.msra.mxu1 %v4082_v13  ;;  %3101 = vmatprep.subr.bf16.mxu0 %v4087_v14  ;;  %v4163_v13 = vld [vmem:[%s4980_s12 + $0x4c0] ss:$8 sps:$4 sm:$0xff]  }
 0x122   : > { %3142 = vmatprep.subr.bf16.mxu1 %v4090_v15  ;;  %v4166_v14 = vld [vmem:[%s4980_s12 + $0x5c0] ss:$8 sps:$4 sm:$0xff]   ;;  %v4171_v15 = vld [vmem:[%s4980_s12 + $0x4b4] ss:$8 sps:$4 sm:$0xff]  }
 0x124   : > { %3102 = vmatpush2.bf16.msra.mxu0 %v4085_v16  ;;  %v4174_v16 = vld [vmem:[%s4980_s12 + $0x5b4] ss:$8 sps:$4 sm:$0xff]  }
 0x125   : > { %3143 = vmatpush2.bf16.msra.mxu1 %v4088_v17  ;;  %3103 = vmatprep.subr.bf16.mxu0 %v4093_v18  ;;  %v4169_v17 = vld [vmem:[%s4980_s12 + $0x4b0] ss:$8 sps:$4 sm:$0xff]  }
 0x126   : > { %3144 = vmatprep.subr.bf16.mxu1 %v4096_v19  ;;  %v4172_v18 = vld [vmem:[%s4980_s12 + $0x5b0] ss:$8 sps:$4 sm:$0xff]   ;;  %v4177_v19 = vld [vmem:[%s4980_s12 + $0x4a4] ss:$8 sps:$4 sm:$0xff]  }
 0x128   : > { %3104 = vmatpush2.bf16.msra.mxu0 %v4091_v20  ;;  %v4180_v20 = vld [vmem:[%s4980_s12 + $0x5a4] ss:$8 sps:$4 sm:$0xff]  }
 0x129   : > { %3145 = vmatpush2.bf16.msra.mxu1 %v4094_v22  ;;  %3155 = vmatprep.subr.bf16.mxu0 %v4099_v23  ;;  %v4175_v22 = vld [vmem:[%s4980_s12 + $0x4a0] ss:$8 sps:$4 sm:$0xff]  }
 0x12a   : > { %3196 = vmatprep.subr.bf16.mxu1 %v4102_v24  ;;  %v4178_v23 = vld [vmem:[%s4980_s12 + $0x5a0] ss:$8 sps:$4 sm:$0xff]   ;;  %v4183_v24 = vld [vmem:[%s4980_s12 + $0x494] ss:$8 sps:$4 sm:$0xff]  }
 0x12b   : > { %3106 = vmatmul.mubr.bf16.vlgmr.msra.gmra.mxu0 %v1627_v21  ;;  %v1646_v21 = vcombine.high %v5133_v28, %v5133_v28  ;;  %v4184_v28 = vld [vmem:[%s4980_s12 + $0x590] ss:$8 sps:$4 sm:$0xff]  }
 0x12c   : > { %3147 = vmatmul.mubr.bf16.vlgmr.msra.gmra.mxu1 %v1643_v25  ;;  %3156 = vmatpush1.bf16.msra.mxu0 %v4097_v26  ;;  %v4186_v25 = vld [vmem:[%s4980_s12 + $0x594] ss:$8 sps:$4 sm:$0xff]  }
 0x12d   : > { %3197 = vmatpush1.bf16.msra.mxu1 %v4100_v27  ;;  %3157 = vmatprep.subr.bf16.mxu0 %v4105_v7  ;;  %v5199_v26 = vrot.slane %v1646_v21, %v5030_v50  ;;  %v4181_v27 = vld [vmem:[%s4980_s12 + $0x490] ss:$8 sps:$4 sm:$0xff]   ;;  %v4189_v7 = vld [vmem:[%s4980_s12 + $0x484] ss:$8 sps:$4 sm:$0xff]  }
 0x12e   : > { %3198 = vmatprep.subr.bf16.mxu1 %v4108_v29  ;;  %3187 = vmatprep.mubr.bf16.mxu0 %v1683_v36  ;;  %v4192_v29 = vld [vmem:[%s4980_s12 + $0x584] ss:$8 sps:$4 sm:$0xff]   ;;  %v4198_v36 = vld [vmem:[%s4980_s12 + $0x774] ss:$8 sps:$4 sm:$0xff]  }
 0x12f   : > { %3228 = vmatprep.mubr.bf16.mxu1 %v1693_v37  ;;  %v1662_v31 = vcombine.high %v5199_v26, %v5199_v26  ;;  %v4264_v21 = vld [vmem:[%s4980_s12 + $0x7c4] ss:$8 sps:$4 sm:$0xff]  }
 0x130   : > { %3158 = vmatpush1.bf16.msra.mxu0 %v4103_v32  ;;  %v1669_v32 = vrot.slane %v5139_v30, %v5030_v50  ;;  %v4196_v30 = vld [vmem:[%s4980_s12 + $0x770] ss:$8 sps:$4 sm:$0xff]  }
 0x131   : > { %3199 = vmatpush1.bf16.msra.mxu1 %v4106_v33  ;;  %3159 = vmatprep.subr.bf16.mxu0 %v4111_v34  ;;  %v4187_v33 = vld [vmem:[%s4980_s12 + $0x480] ss:$8 sps:$4 sm:$0xff]   ;;  %v1690_v37 = vrot.slane %v1662_v31, %v5030_v50 }
 0x132   : > { %3200 = vmatprep.subr.bf16.mxu1 %v4114_v35  ;;  %v4190_v34 = vld [vmem:[%s4980_s12 + $0x580] ss:$8 sps:$4 sm:$0xff]   ;;  %v4195_v35 = vld [vmem:[%s4980_s12 + $0x674] ss:$8 sps:$4 sm:$0xff]  }
 0x133   : > { %v4271_v31 = vld [vmem:[%s4980_s12 + $0x6a0] ss:$8 sps:$4 sm:$0xff]  }
 0x134   : > { %3160 = vmatpush1.bf16.msra.mxu0 %v4109_v38  ;;  %v1691_v38 = vcombine.high %v1669_v32, %v1669_v32 }
 0x135   : > { %3201 = vmatpush1.bf16.msra.mxu1 %v4112_v39  ;;  %3161 = vmatprep.subr.bf16.mxu0 %v4117_v40  ;;  %v4193_v39 = vld [vmem:[%s4980_s12 + $0x670] ss:$8 sps:$4 sm:$0xff]   ;;  %v4201_v40 = vld [vmem:[%s4980_s12 + $0x664] ss:$8 sps:$4 sm:$0xff]  }
 0x136   : > { %3202 = vmatprep.subr.bf16.mxu1 %v4120_v41  ;;  %v4204_v41 = vld [vmem:[%s4980_s12 + $0x764] ss:$8 sps:$4 sm:$0xff]  }
 0x138   : > { %3162 = vmatpush1.bf16.msra.mxu0 %v4115_v42  ;;  %v1694_v42 = vcombine.high %v1690_v37, %v1690_v37 }
 0x139   : > { %3203 = vmatpush1.bf16.msra.mxu1 %v4118_v43  ;;  %3163 = vmatprep.subr.bf16.mxu0 %v4123_v45  ;;  %v4199_v43 = vld [vmem:[%s4980_s12 + $0x660] ss:$8 sps:$4 sm:$0xff]  }
 0x13a   : > { %3204 = vmatprep.subr.bf16.mxu1 %v4126_v46  ;;  %v4202_v45 = vld [vmem:[%s4980_s12 + $0x760] ss:$8 sps:$4 sm:$0xff]   ;;  %v4207_v46 = vld [vmem:[%s4980_s12 + $0x654] ss:$8 sps:$4 sm:$0xff]  }
 0x13c   : > { %3164 = vmatpush1.bf16.msra.mxu0 %v4121_v47  ;;  %v4210_v47 = vld [vmem:[%s4980_s12 + $0x754] ss:$8 sps:$4 sm:$0xff]  }
 0x13d   : > { %3205 = vmatpush1.bf16.msra.mxu1 %v4124_v48  ;;  %3165 = vmatprep.subr.bf16.mxu0 %v4129_v49  ;;  %v4205_v48 = vld [vmem:[%s4980_s12 + $0x650] ss:$8 sps:$4 sm:$0xff]  }
 0x13e   : > { %3206 = vmatprep.subr.bf16.mxu1 %v4132_v51  ;;  %v4208_v49 = vld [vmem:[%s4980_s12 + $0x750] ss:$8 sps:$4 sm:$0xff]   ;;  %v4213_v51 = vld [vmem:[%s4980_s12 + $0x644] ss:$8 sps:$4 sm:$0xff]  }
 0x140   : > { %3166 = vmatpush1.bf16.msra.mxu0 %v4127_v52  ;;  %v4216_v52 = vld [vmem:[%s4980_s12 + $0x744] ss:$8 sps:$4 sm:$0xff]  }
 0x141   : > { %3207 = vmatpush1.bf16.msra.mxu1 %v4130_v53  ;;  %3167 = vmatprep.subr.bf16.mxu0 %v4135_v54  ;;  %v4211_v53 = vld [vmem:[%s4980_s12 + $0x640] ss:$8 sps:$4 sm:$0xff]  }
 0x142   : > { %3208 = vmatprep.subr.bf16.mxu1 %v4138_v55  ;;  %v4214_v54 = vld [vmem:[%s4980_s12 + $0x740] ss:$8 sps:$4 sm:$0xff]   ;;  %v4219_v55 = vld [vmem:[%s4980_s12 + $0x634] ss:$8 sps:$4 sm:$0xff]  }
 0x144   : > { %3168 = vmatpush1.bf16.msra.mxu0 %v4133_v56  ;;  %v4222_v56 = vld [vmem:[%s4980_s12 + $0x734] ss:$8 sps:$4 sm:$0xff]  }
 0x145   : > { %3209 = vmatpush1.bf16.msra.mxu1 %v4136_v57  ;;  %3169 = vmatprep.subr.bf16.mxu0 %v4141_v58  ;;  %v4217_v57 = vld [vmem:[%s4980_s12 + $0x630] ss:$8 sps:$4 sm:$0xff]  }
 0x146   : > { %3210 = vmatprep.subr.bf16.mxu1 %v4144_v59  ;;  %v4220_v58 = vld [vmem:[%s4980_s12 + $0x730] ss:$8 sps:$4 sm:$0xff]   ;;  %v4225_v59 = vld [vmem:[%s4980_s12 + $0x624] ss:$8 sps:$4 sm:$0xff]  }
 0x148   : > { %3170 = vmatpush1.bf16.msra.mxu0 %v4139_v60  ;;  %v4228_v60 = vld [vmem:[%s4980_s12 + $0x724] ss:$8 sps:$4 sm:$0xff]  }
 0x149   : > { %3211 = vmatpush1.bf16.msra.mxu1 %v4142_v61  ;;  %3171 = vmatprep.subr.bf16.mxu0 %v4147_v62  ;;  %v4223_v61 = vld [vmem:[%s4980_s12 + $0x620] ss:$8 sps:$4 sm:$0xff]  }
 0x14a   : > { %3212 = vmatprep.subr.bf16.mxu1 %v4150_v63  ;;  %v4226_v62 = vld [vmem:[%s4980_s12 + $0x720] ss:$8 sps:$4 sm:$0xff]   ;;  %v4231_v63 = vld [vmem:[%s4980_s12 + $0x614] ss:$8 sps:$4 sm:$0xff]  }
 0x14c   : > { %3172 = vmatpush2.bf16.msra.mxu0 %v4145_v0  ;;  %v4234_v0 = vld [vmem:[%s4980_s12 + $0x714] ss:$8 sps:$4 sm:$0xff]  }
 0x14d   : > { %3213 = vmatpush2.bf16.msra.mxu1 %v4148_v1  ;;  %3173 = vmatprep.subr.bf16.mxu0 %v4153_v2  ;;  %v4229_v1 = vld [vmem:[%s4980_s12 + $0x610] ss:$8 sps:$4 sm:$0xff]  }
 0x14e   : > { %3214 = vmatprep.subr.bf16.mxu1 %v4156_v3  ;;  %v4232_v2 = vld [vmem:[%s4980_s12 + $0x710] ss:$8 sps:$4 sm:$0xff]   ;;  %v4237_v3 = vld [vmem:[%s4980_s12 + $0x604] ss:$8 sps:$4 sm:$0xff]  }
 0x150   : > { %3174 = vmatpush2.bf16.msra.mxu0 %v4151_v4  ;;  %v4240_v4 = vld [vmem:[%s4980_s12 + $0x704] ss:$8 sps:$4 sm:$0xff]  }
 0x151   : > { %3215 = vmatpush2.bf16.msra.mxu1 %v4154_v5  ;;  %3175 = vmatprep.subr.bf16.mxu0 %v4159_v6  ;;  %v4235_v5 = vld [vmem:[%s4980_s12 + $0x600] ss:$8 sps:$4 sm:$0xff]  }
 0x152   : > { %3216 = vmatprep.subr.bf16.mxu1 %v4162_v8  ;;  %v4238_v6 = vld [vmem:[%s4980_s12 + $0x700] ss:$8 sps:$4 sm:$0xff]   ;;  %v4243_v8 = vld [vmem:[%s4980_s12 + $0x6f4] ss:$8 sps:$4 sm:$0xff]  }
 0x154   : > { %3176 = vmatpush2.bf16.msra.mxu0 %v4157_v9  ;;  %v4246_v9 = vld [vmem:[%s4980_s12 + $0x7f4] ss:$8 sps:$4 sm:$0xff]  }
 0x155   : > { %3217 = vmatpush2.bf16.msra.mxu1 %v4160_v10  ;;  %3177 = vmatprep.subr.bf16.mxu0 %v4165_v11  ;;  %v4241_v10 = vld [vmem:[%s4980_s12 + $0x6f0] ss:$8 sps:$4 sm:$0xff]  }
 0x156   : > { %3218 = vmatprep.subr.bf16.mxu1 %v4168_v12  ;;  %v4244_v11 = vld [vmem:[%s4980_s12 + $0x7f0] ss:$8 sps:$4 sm:$0xff]   ;;  %v4249_v12 = vld [vmem:[%s4980_s12 + $0x6e4] ss:$8 sps:$4 sm:$0xff]  }
 0x158   : > { %3178 = vmatpush2.bf16.msra.mxu0 %v4163_v13  ;;  %v4252_v13 = vld [vmem:[%s4980_s12 + $0x7e4] ss:$8 sps:$4 sm:$0xff]  }
 0x159   : > { %3219 = vmatpush2.bf16.msra.mxu1 %v4166_v14  ;;  %3179 = vmatprep.subr.bf16.mxu0 %v4171_v15  ;;  %v4247_v14 = vld [vmem:[%s4980_s12 + $0x6e0] ss:$8 sps:$4 sm:$0xff]  }
 0x15a   : > { %3220 = vmatprep.subr.bf16.mxu1 %v4174_v16  ;;  %v4250_v15 = vld [vmem:[%s4980_s12 + $0x7e0] ss:$8 sps:$4 sm:$0xff]   ;;  %v4255_v16 = vld [vmem:[%s4980_s12 + $0x6d4] ss:$8 sps:$4 sm:$0xff]  }
 0x15c   : > { %3180 = vmatpush2.bf16.msra.mxu0 %v4169_v17  ;;  %v4258_v17 = vld [vmem:[%s4980_s12 + $0x7d4] ss:$8 sps:$4 sm:$0xff]  }
 0x15d   : > { %3221 = vmatpush2.bf16.msra.mxu1 %v4172_v18  ;;  %3181 = vmatprep.subr.bf16.mxu0 %v4177_v19  ;;  %v4253_v18 = vld [vmem:[%s4980_s12 + $0x6d0] ss:$8 sps:$4 sm:$0xff]  }
 0x15e   : > { %3222 = vmatprep.subr.bf16.mxu1 %v4180_v20  ;;  %v4256_v19 = vld [vmem:[%s4980_s12 + $0x7d0] ss:$8 sps:$4 sm:$0xff]   ;;  %v4261_v20 = vld [vmem:[%s4980_s12 + $0x6c4] ss:$8 sps:$4 sm:$0xff]  }
 0x160   : > { %3182 = vmatpush2.bf16.msra.mxu0 %v4175_v22  ;;  %v4259_v22 = vld [vmem:[%s4980_s12 + $0x6c0] ss:$8 sps:$4 sm:$0xff]  }
 0x161   : > { %3223 = vmatpush2.bf16.msra.mxu1 %v4178_v23  ;;  %3183 = vmatprep.subr.bf16.mxu0 %v4183_v24  ;;  %v4262_v23 = vld [vmem:[%s4980_s12 + $0x7c0] ss:$8 sps:$4 sm:$0xff]   ;;  %v4267_v24 = vld [vmem:[%s4980_s12 + $0x6b4] ss:$8 sps:$4 sm:$0xff]  }
 0x162   : > { %3224 = vmatprep.subr.bf16.mxu1 %v4186_v25  ;;  %v4270_v25 = vld [vmem:[%s4980_s12 + $0x7b4] ss:$8 sps:$4 sm:$0xff]  }
 0x164   : > { %3184 = vmatpush2.bf16.msra.mxu0 %v4181_v27  ;;  %v4265_v27 = vld [vmem:[%s4980_s12 + $0x6b0] ss:$8 sps:$4 sm:$0xff]  }
 0x165   : > { %3225 = vmatpush2.bf16.msra.mxu1 %v4184_v28  ;;  %3185 = vmatprep.subr.bf16.mxu0 %v4189_v7  ;;  %v4268_v28 = vld [vmem:[%s4980_s12 + $0x7b0] ss:$8 sps:$4 sm:$0xff]   ;;  %v4273_v7 = vld [vmem:[%s4980_s12 + $0x6a4] ss:$8 sps:$4 sm:$0xff]  }
 0x166   : > { %3226 = vmatprep.subr.bf16.mxu1 %v4192_v29  ;;  %v4276_v29 = vld [vmem:[%s4980_s12 + $0x7a4] ss:$8 sps:$4 sm:$0xff]  }
 0x168   : > { %3186 = vmatpush2.bf16.msra.mxu0 %v4187_v33  ;;  %v4279_v33 = vld [vmem:[%s4980_s12 + $0x694] ss:$8 sps:$4 sm:$0xff]  }
 0x169   : > { %3227 = vmatpush2.bf16.msra.mxu1 %v4190_v34  ;;  %3237 = vmatprep.subr.bf16.mxu0 %v4195_v35  ;;  %v4282_v34 = vld [vmem:[%s4980_s12 + $0x794] ss:$8 sps:$4 sm:$0xff]   ;;  %v4277_v35 = vld [vmem:[%s4980_s12 + $0x690] ss:$8 sps:$4 sm:$0xff]  }
 0x16a   : > { %3278 = vmatprep.subr.bf16.mxu1 %v4198_v36  ;;  %v4280_v36 = vld [vmem:[%s4980_s12 + $0x790] ss:$8 sps:$4 sm:$0xff]  }
 0x16b   : > { %3188 = vmatmul.mubr.bf16.vlgmr.msra.gmra.mxu0 %v1669_v32  ;;  %v4274_v32 = vld [vmem:[%s4980_s12 + $0x7a0] ss:$8 sps:$4 sm:$0xff]  }
 0x16c   : > { %3229 = vmatmul.mubr.bf16.vlgmr.msra.gmra.mxu1 %v1691_v38  ;;  %3238 = vmatpush1.bf16.msra.mxu0 %v4193_v39  ;;  %v4288_v38 = vld [vmem:[%s4980_s12 + $0x784] ss:$8 sps:$4 sm:$0xff]   ;;  %v1676_v39 = vrot.slane %v5199_v26, %v5030_v50 }
 0x16d   : > { %3279 = vmatpush1.bf16.msra.mxu1 %v4196_v30  ;;  %3239 = vmatprep.subr.bf16.mxu0 %v4201_v40  ;;  %v4283_v30 = vld [vmem:[%s4980_s12 + $0x680] ss:$8 sps:$4 sm:$0xff]  }
 0x16e   : > { %3280 = vmatprep.subr.bf16.mxu1 %v4204_v41  ;;  %3269 = vmatprep.mubr.bf16.mxu0 %v1690_v37  ;;  %v4285_v37 = vld [vmem:[%s4980_s12 + $0x684] ss:$8 sps:$4 sm:$0xff]   ;;  %v4286_v40 = vld [vmem:[%s4980_s12 + $0x780] ss:$8 sps:$4 sm:$0xff]   ;;  %v1692_v41 = vcombine.high %v1676_v39, %v1676_v39 }
 0x16f   : > { %3310 = vmatprep.mubr.bf16.mxu1 %v1694_v42 }
 0x170   : > { %3240 = vmatpush1.bf16.msra.mxu0 %v4199_v43 }
 0x171   : > { %3281 = vmatpush1.bf16.msra.mxu1 %v4202_v45  ;;  %3241 = vmatprep.subr.bf16.mxu0 %v4207_v46 }
 0x172   : > { %3282 = vmatprep.subr.bf16.mxu1 %v4210_v47 }
 0x174   : > { %3242 = vmatpush1.bf16.msra.mxu0 %v4205_v48 }
 0x175   : > { %3283 = vmatpush1.bf16.msra.mxu1 %v4208_v49  ;;  %3243 = vmatprep.subr.bf16.mxu0 %v4213_v51 }
 0x176   : > { %3284 = vmatprep.subr.bf16.mxu1 %v4216_v52 }
 0x178   : > { %3244 = vmatpush1.bf16.msra.mxu0 %v4211_v53 }
 0x179   : > { %3285 = vmatpush1.bf16.msra.mxu1 %v4214_v54  ;;  %3245 = vmatprep.subr.bf16.mxu0 %v4219_v55 }
 0x17a   : > { %3286 = vmatprep.subr.bf16.mxu1 %v4222_v56 }
 0x17c   : > { %3246 = vmatpush1.bf16.msra.mxu0 %v4217_v57 }
 0x17d   : > { %3287 = vmatpush1.bf16.msra.mxu1 %v4220_v58  ;;  %3247 = vmatprep.subr.bf16.mxu0 %v4225_v59 }
 0x17e   : > { %3288 = vmatprep.subr.bf16.mxu1 %v4228_v60 }
 0x180   : > { %3248 = vmatpush1.bf16.msra.mxu0 %v4223_v61 }
 0x181   : > { %3289 = vmatpush1.bf16.msra.mxu1 %v4226_v62  ;;  %3249 = vmatprep.subr.bf16.mxu0 %v4231_v63 }
 0x182   : > { %3290 = vmatprep.subr.bf16.mxu1 %v4234_v0 }
 0x184   : > { %3250 = vmatpush1.bf16.msra.mxu0 %v4229_v1 }
 0x185   : > { %3291 = vmatpush1.bf16.msra.mxu1 %v4232_v2  ;;  %3251 = vmatprep.subr.bf16.mxu0 %v4237_v3 }
 0x186   : > { %3292 = vmatprep.subr.bf16.mxu1 %v4240_v4 }
 0x188   : > { %3252 = vmatpush1.bf16.msra.mxu0 %v4235_v5 }
 0x189   : > { %3293 = vmatpush1.bf16.msra.mxu1 %v4238_v6  ;;  %3253 = vmatprep.subr.bf16.mxu0 %v4243_v8 }
 0x18a   : > { %3294 = vmatprep.subr.bf16.mxu1 %v4246_v9 }
 0x18c   : > { %3254 = vmatpush2.bf16.msra.mxu0 %v4241_v10 }
 0x18d   : > { %3295 = vmatpush2.bf16.msra.mxu1 %v4244_v11  ;;  %3255 = vmatprep.subr.bf16.mxu0 %v4249_v12  ;;  %v4352_v12 = vmov 1983009808  }
 0x18e   : > { %3296 = vmatprep.subr.bf16.mxu1 %v4252_v13  ;;  %v3323_v13 = vunpack.c.l.s4 %v4352_v12 }
 0x190   : > { %3256 = vmatpush2.bf16.msra.mxu0 %v4247_v14 }
 0x191   : > { %3297 = vmatpush2.bf16.msra.mxu1 %v4250_v15  ;;  %3257 = vmatprep.subr.bf16.mxu0 %v4255_v16 }
 0x192   : > { %3298 = vmatprep.subr.bf16.mxu1 %v4258_v17 }
 0x194   : > { %3258 = vmatpush2.bf16.msra.mxu0 %v4253_v18  ;;  %v3324_v18 = vunpack.c.0.s8 %v3323_v13 }
 0x195   : > { %3299 = vmatpush2.bf16.msra.mxu1 %v4256_v19  ;;  %3259 = vmatprep.subr.bf16.mxu0 %v4261_v20 }
 0x196   : > { %3300 = vmatprep.subr.bf16.mxu1 %v4264_v21 }
 0x198   : > { %3260 = vmatpush2.bf16.msra.mxu0 %v4259_v22 }
 0x199   : > { %3301 = vmatpush2.bf16.msra.mxu1 %v4262_v23  ;;  %3261 = vmatprep.subr.bf16.mxu0 %v4267_v24 }
 0x19a   : > { %3302 = vmatprep.subr.bf16.mxu1 %v4270_v25 }
 0x19c   : > { %3262 = vmatpush2.bf16.msra.mxu0 %v4265_v27  ;;  %v5279_v27 = vsub.s32 %v3324_v18, %v5022_v44 }
 0x19d   : > { %3303 = vmatpush2.bf16.msra.mxu1 %v4268_v28  ;;  %3263 = vmatprep.subr.bf16.mxu0 %v4273_v7 }
 0x19e   : > { %3304 = vmatprep.subr.bf16.mxu1 %v4276_v29 }
 0x1a0   : > { %3264 = vmatpush2.bf16.msra.mxu0 %v4271_v31  ;;  %v1336_v31 = vld [vmem:[#allocation2] sm:$0xf] }
 0x1a1   : > { %3305 = vmatpush2.bf16.msra.mxu1 %v4274_v32  ;;  %3265 = vmatprep.subr.bf16.mxu0 %v4279_v33 }
 0x1a2   : > { %3306 = vmatprep.subr.bf16.mxu1 %v4282_v34 }
 0x1a4   : > { %3266 = vmatpush2.bf16.msra.mxu0 %v4277_v35 }
 0x1a5   : > { %3307 = vmatpush2.bf16.msra.mxu1 %v4280_v36  ;;  %3267 = vmatprep.subr.bf16.mxu0 %v4285_v37 }
 0x1a6   : > { %3308 = vmatprep.subr.bf16.mxu1 %v4288_v38 }
 0x1a8   : > { %3268 = vmatpush2.bf16.msra.mxu0 %v4283_v30 }
 0x1a9   : > { %3309 = vmatpush2.bf16.msra.mxu1 %v4286_v40 }
 0x1ab   : > { %v3025_v42 = vpop.f32.mrf.mxu0  ;;  %3270 = vmatmul.mubr.bf16.vlgmr.msra.gmra.mxu0 %v1676_v39 }
 0x1ac   : > { %v3066_v43 = vpop.f32.mrf.mxu1  ;;  %3311 = vmatmul.mubr.bf16.vlgmr.msra.gmra.mxu1 %v1692_v41 }
 0x1ad   : > { %v3067_v45 = vadd.f32 %v3066_v43, %v3025_v42  ;;  %v3027_v46 = vpop.f32.mrf.mxu0 }
 0x1ae   : > { %v3068_v47 = vpop.f32.mrf.mxu1 }
 0x1af   : > { %v3069_v48 = vadd.f32 %v3068_v47, %v3027_v46  ;;  %v3029_v49 = vpop.f32.mrf.mxu0 }
 0x1b0   : > { %v3070_v51 = vpop.f32.mrf.mxu1 }
 0x1b1   : > { %v3030_v50 = vpop.f32.mrf.mxu0 }
 0x1b2   : > { %v3071_v26 = vpop.f32.mrf.mxu1 }
 0x1eb   : > { %v3107_v52 = vpop.f32.mrf.mxu0 }
 0x1ec   : > { %v3148_v53 = vpop.f32.mrf.mxu1  ;;  %v3108_v54 = vadd.f32 %v3107_v52, %v3067_v45 }
 0x1ed   : > { %v3109_v55 = vpop.f32.mrf.mxu0 }
 0x1ee   : > { %v3150_v56 = vpop.f32.mrf.mxu1  ;;  %v3149_v57 = vadd.f32 %v3148_v53, %v3108_v54  ;;  %v3110_v58 = vadd.f32 %v3109_v55, %v3069_v48 }
 0x1ef   : > { %v3111_v59 = vpop.f32.mrf.mxu0 }
 0x1f0   : > { %v3152_v60 = vpop.f32.mrf.mxu1  ;;  %v3151_v61 = vadd.f32 %v3150_v56, %v3110_v58 }
 0x1f1   : > { %v3112_v62 = vpop.f32.mrf.mxu0 }
 0x1f2   : > { %v3153_v63 = vpop.f32.mrf.mxu1 }
 0x22b   : > { %v3189_v0 = vpop.f32.mrf.mxu0 }
 0x22c   : > { %v3230_v1 = vpop.f32.mrf.mxu1  ;;  %v3190_v2 = vadd.f32 %v3189_v0, %v3149_v57 }
 0x22d   : > { %v3191_v3 = vpop.f32.mrf.mxu0 }
 0x22e   : > { %v3232_v4 = vpop.f32.mrf.mxu1  ;;  %v3231_v5 = vadd.f32 %v3230_v1, %v3190_v2  ;;  %v3192_v11 = vadd.f32 %v3191_v3, %v3151_v61 }
 0x22f   : > { %v3193_v6 = vpop.f32.mrf.mxu0 }
 0x230   : > { %v3234_v8 = vpop.f32.mrf.mxu1  ;;  %v3233_v16 = vadd.f32 %v3232_v4, %v3192_v11 }
 0x231   : > { %v3194_v9 = vpop.f32.mrf.mxu0 }
 0x232   : > { %v3235_v10 = vpop.f32.mrf.mxu1 }
 0x26b   : > { %v3271_v14 = vpop.f32.mrf.mxu0 }
 0x26c   : > { %v3312_v15 = vpop.f32.mrf.mxu1  ;;  %v3272_v17 = vadd.f32 %v3271_v14, %v3231_v5 }
 0x26d   : > { %v3273_v19 = vpop.f32.mrf.mxu0 }
 0x26e   : > { %v3314_v20 = vpop.f32.mrf.mxu1  ;;  %v3274_v21 = vadd.f32 %v3273_v19, %v3233_v16  ;;  %v3313_v24 = vadd.f32 %v3312_v15, %v3272_v17 }
 0x26f   : > { %v3275_v22 = vpop.f32.mrf.mxu0 }
 0x270   : > { %v3316_v23 = vpop.f32.mrf.mxu1  ;;  %v3315_v25 = vadd.f32 %v3314_v20, %v3274_v21 }
 0x271   : > { %v3276_v28 = vpop.f32.mrf.mxu0 }
 0x272   : > { %v3317_v7 = vpop.f32.mrf.mxu1  ;;  %v3321_v29 = vcombine.low %v3313_v24, %v3315_v25 }
 0x274   : > { %v3328_v32 = vrot.slane %v3321_v29, %v5279_v27  ;;  %3335 = sbr.rel (%p3841_p13) target bundleno = 715 (0x2cb), region = 82 }
 0x276   : > { %v3330_v33 = vadd.f32 %v3328_v32, %v1336_v31 }
 0x278   : > { %3331 = vst [vmem:[#allocation2] sm:$0xf] %v3330_v33 }
 0x279   : > { %vm3348_vm0 = vcmask 1041408   ;;  %v3426_v13 = vsub.s32 0, %v5022_v44  ;;  %v3430_v14 = vsub.s32 1, %v5022_v44  ;;  %v3422_v15 = vld [vmem:[%s1318_s15] sm:$0x3] }
 0x27a   : > { %v3442_v16 = vld [vmem:[%s1323_s18] sm:$0x3] }
 0x27b   : > { %v3427_v17 = vrot.slane %v3422_v15, %v3426_v13  ;;  %v3431_v18 = vrot.slane %v3422_v15, %v3430_v14  ;;  %v3447_v19 = vrot.slane %v3442_v16, %v3426_v13  ;;  %v3451_v20 = vrot.slane %v3442_v16, %v3430_v14 }
 0x27d   : > { %v3432_v22 = vcombine.low %v3427_v17, %v3431_v18  ;;  %v3452_v44 = vcombine.low %v3447_v19, %v3451_v20 }
 0x27f   : > { %v3336_v34 = vld [vmem:[#allocation2] sm:$0xf]  ;;  %v3439_v28 = vrot.slane %v3432_v22, %v5279_v27  ;;  %v3459_v29 = vrot.slane %v3452_v44, %v5279_v27 }
 0x280   : > { %v3344_v35 = vrot.slane %v3336_v34, %v5279_v27 }
 0x282   : > { %v3345_v36 = vcombine.high %v3344_v35, %v3344_v35  ;;  %v3349_v37 = vsel %vm3348_vm0, %v3344_v35, 0.0 }
 0x283   : > { %v3350_v38 = vrot.slane %v3349_v37, 4 }
 0x284   : > { %v3356_v39 = vsel %vm3348_vm0, %v3345_v36, 0.0 }
 0x285   : > { %v3351_v30 = vadd.f32 %v3350_v38, %v3349_v37  ;;  %v3357_v40 = vrot.slane %v3356_v39, 4 }
 0x287   : > { %v3352_v41 = vrot.slane %v3351_v30, 2  ;;  %v3358_v42 = vadd.f32 %v3357_v40, %v3356_v39 }
 0x289   : > { %v3353_v43 = vadd.f32 %v3352_v41, %v3351_v30  ;;  %v3359_v45 = vrot.slane %v3358_v42, 2 }
 0x28b   : > { %v3354_v46 = vrot.slane %v3353_v43, 1  ;;  %v3360_v47 = vadd.f32 %v3359_v45, %v3358_v42 }
 0x28d   : > { %v3355_v48 = vadd.f32 %v3354_v46, %v3353_v43  ;;  %v3361_v49 = vrot.slane %v3360_v47, 1 }
 0x28f   : > { %v3362_v51 = vadd.f32 %v3361_v49, %v3360_v47  ;;  %v3364_v50 = vmul.f32 0.5, %v3355_v48 }
 0x291   : > { %v3365_v26 = vmul.f32 0.5, %v3362_v51 }
 0x293   : > { %v3368_v52 = vcombine.low %v3364_v50, %v3365_v26 }
 0x295   : > { %v3375_v53 = vrot.slane %v3368_v52, %v5279_v27 }
 0x297   : > { %v3377_v54 = vsub.f32 %v3336_v34, %v3375_v53 }
 0x299   : > { %v3378_v55 = vmul.f32 %v3377_v54, %v3377_v54 }
 0x29b   : > { %v3386_v56 = vrot.slane %v3378_v55, %v5279_v27 }
 0x29d   : > { %v3387_v57 = vcombine.high %v3386_v56, %v3386_v56  ;;  %v3390_v58 = vsel %vm3348_vm0, %v3386_v56, 0.0 }
 0x29e   : > { %v3391_v59 = vrot.slane %v3390_v58, 4 }
 0x29f   : > { %v3397_v60 = vsel %vm3348_vm0, %v3387_v57, 0.0 }
 0x2a0   : > { %v3392_v61 = vadd.f32 %v3391_v59, %v3390_v58  ;;  %v3398_v62 = vrot.slane %v3397_v60, 4 }
 0x2a2   : > { %v3393_v63 = vrot.slane %v3392_v61, 2  ;;  %v3399_v0 = vadd.f32 %v3398_v62, %v3397_v60 }
 0x2a4   : > { %v3394_v1 = vadd.f32 %v3393_v63, %v3392_v61  ;;  %v3400_v2 = vrot.slane %v3399_v0, 2 }
 0x2a6   : > { %v3395_v3 = vrot.slane %v3394_v1, 1  ;;  %v3401_v4 = vadd.f32 %v3400_v2, %v3399_v0 }
 0x2a8   : > { %v3396_v5 = vadd.f32 %v3395_v3, %v3394_v1  ;;  %v3402_v6 = vrot.slane %v3401_v4, 1 }
 0x2aa   : > { %v3403_v8 = vadd.f32 %v3402_v6, %v3401_v4  ;;  %v3404_v9 = vmul.f32 0.5, %v3396_v5 }
 0x2ac   : > { %v3405_v10 = vmul.f32 0.5, %v3403_v8  ;;  %v3406_v11 = vadd.f32 1e-05, %v3404_v9 }
 0x2ae   : > { %v3407_v12 = vadd.f32 1e-05, %v3405_v10  ;;  %4290 = vrsqrt.f32 %v3406_v11 }
 0x2b0   : > { %4292 = vrsqrt.f32 %v3407_v12 }
 0x2bb   : > { %v4291_v21 = vpop.eup %4290 }
 0x2bd   : > { %v4293_v23 = vpop.eup %4292 }
 0x2be   : > { %v3412_v24 = vcombine.low %v4291_v21, %v4293_v23 }
 0x2c0   : > { %v3419_v25 = vrot.slane %v3412_v24, %v5279_v27 }
 0x2c2   : > { %v3421_v7 = vmul.f32 %v3419_v25, %v3377_v54 }
 0x2c4   : > { %v3441_v31 = vmul.f32 %v3439_v28, %v3421_v7 }
 0x2c6   : > { %v3461_v32 = vadd.f32 %v3459_v29, %v3441_v31 }
 0x2c8   : > { %v3462_v33 = vmax.f32 %v3461_v32, 0.0 }
 0x2ca   : > { %3463 = vst [vmem:[%s4978_s11] sm:$0xf] %v3462_v33 }
 0x2cb PF: > { %s14_s21 = sadd.s32 1, %s4348_s21   ;;  %s5332_s15 = smov %s4328_s16 }
 0x2cc   : > { %p11_p0 = scmp.ge.s32.totalorder %s14_s21, 26   ;;  %s5333_s16 = smov %s4429_s28 }
 0x2cd   : > { %s5334_s17 = smov %s4340_s19  ;;  %s5335_s18 = smov %s4344_s20 }
 0x2ce   : > { %s5336_s19 = smov %s5339_s22  ;;  %s5337_s20 = smov %s5343_s23 }
 0x2cf   :  { %13 = sbr.rel (!%p11_p0) target bundleno = 4 (0x4), region = 126 }

// kernel: forward.59
= control target key start
LH: loop header
LB: loop body
LE: loop exit
PB: predicated region body
PF: predicated region fallthrough
CT: control target
= control target key end

     0   :  { %v100_v30 = vlaneseq  ;;  %v554_v34 = vmov 1966171168   ;;  %s685_s0 = inlined_call_operand.vmem [shape: bf16[2,512], index: 0, kind: input, shape index: {}]   ;;  %s686_s1 = inlined_call_operand.vmem [shape: bf16[512,30], index: 1, kind: input, shape index: {}]   ;;  %s687_s2 = inlined_call_operand.vmem [shape: f32[1,30], index: 2, kind: input, shape index: {}]   ;;  %s688_s3 = inlined_call_operand.hbm [shape: f32[2,30], index: 3, kind: output, shape index: {}]  }
   0x1   :  { %v500_v0 = vld [vmem:[%s686_s1 + $0x78] sm:$0xff]   ;;  %v504_v4 = vld [vmem:[%s686_s1 + $0x70] sm:$0xff]   ;;  %v508_v8 = vld [vmem:[%s686_s1 + $0x68] sm:$0xff]   ;;  %v98_v35 = vunpack.c.l.s4 %v554_v34 }
   0x2   :  { %v501_v1 = vld [vmem:[%s686_s1 + $0xf8] sm:$0xff]   ;;  %453 = vmatprep.subr.bf16.mxu0 %v500_v0  ;;  %v505_v5 = vld [vmem:[%s686_s1 + $0xf0] sm:$0xff]   ;;  %v509_v9 = vld [vmem:[%s686_s1 + $0xe8] sm:$0xff]   ;;  %v101_v36 = vshrl.u32 %v100_v30, 7 }
   0x3   :  { %v502_v2 = vld [vmem:[%s686_s1 + $0x38] sm:$0xff]   ;;  %475 = vmatprep.subr.bf16.mxu1 %v501_v1  ;;  %v506_v6 = vld [vmem:[%s686_s1 + $0x30] sm:$0xff]   ;;  %v510_v10 = vld [vmem:[%s686_s1 + $0x28] sm:$0xff]  }
   0x4   :  { %v503_v3 = vld [vmem:[%s686_s1 + $0xb8] sm:$0xff]   ;;  %454 = vmatpush3.bf16.msra.mxu0 %v502_v2  ;;  %v507_v7 = vld [vmem:[%s686_s1 + $0xb0] sm:$0xff]   ;;  %v511_v11 = vld [vmem:[%s686_s1 + $0xa8] sm:$0xff]  }
   0x5   :  { %476 = vmatpush3.bf16.msra.mxu1 %v503_v3  ;;  %455 = vmatprep.subr.bf16.mxu0 %v504_v4  ;;  %v512_v12 = vld [vmem:[%s686_s1 + $0x60] sm:$0xff]   ;;  %v516_v16 = vld [vmem:[%s686_s1 + $0x58] sm:$0xff]   ;;  %v520_v20 = vld [vmem:[%s686_s1 + $0x50] sm:$0xff]  }
   0x6   :  { %477 = vmatprep.subr.bf16.mxu1 %v505_v5  ;;  %v513_v13 = vld [vmem:[%s686_s1 + $0xe0] sm:$0xff]   ;;  %v517_v17 = vld [vmem:[%s686_s1 + $0xd8] sm:$0xff]   ;;  %v521_v21 = vld [vmem:[%s686_s1 + $0xd0] sm:$0xff]  }
   0x7   :  { %v514_v14 = vld [vmem:[%s686_s1 + $0x20] sm:$0xff]   ;;  %v518_v18 = vld [vmem:[%s686_s1 + $0x18] sm:$0xff]   ;;  %v522_v22 = vld [vmem:[%s686_s1 + $0x10] sm:$0xff]  }
   0x8   :  { %456 = vmatpush3.bf16.msra.mxu0 %v506_v6  ;;  %v515_v15 = vld [vmem:[%s686_s1 + $0xa0] sm:$0xff]   ;;  %v519_v19 = vld [vmem:[%s686_s1 + $0x98] sm:$0xff]   ;;  %v523_v23 = vld [vmem:[%s686_s1 + $0x90] sm:$0xff]  }
   0x9   :  { %478 = vmatpush3.bf16.msra.mxu1 %v507_v7  ;;  %457 = vmatprep.subr.bf16.mxu0 %v508_v8  ;;  %v524_v24 = vld [vmem:[%s686_s1 + $0x48] sm:$0xff]   ;;  %v528_v28 = vld [vmem:[%s686_s1 + $0x40] sm:$0xff]  }
   0xa   :  { %479 = vmatprep.subr.bf16.mxu1 %v509_v9  ;;  %v525_v25 = vld [vmem:[%s686_s1 + $0xc8] sm:$0xff]   ;;  %v529_v29 = vld [vmem:[%s686_s1 + $0xc0] sm:$0xff]  }
   0xb   :  { %v526_v26 = vld [vmem:[%s686_s1 + $0x8] sm:$0xff]   ;;  %v530_v31 = vld [vmem:[%s686_s1] sm:$0xff]  }
   0xc   :  { %458 = vmatpush3.bf16.msra.mxu0 %v510_v10  ;;  %v527_v27 = vld [vmem:[%s686_s1 + $0x88] sm:$0xff]   ;;  %v531_v32 = vld [vmem:[%s686_s1 + $0x80] sm:$0xff]  }
   0xd   :  { %480 = vmatpush3.bf16.msra.mxu1 %v511_v11  ;;  %459 = vmatprep.subr.bf16.mxu0 %v512_v12  ;;  %v419_v33 = vld.sshfl [vmem:[%s685_s0] sm:$0x33 pattern:$0x75316420] }
   0xe   :  { %481 = vmatprep.subr.bf16.mxu1 %v513_v13 }
  0x10   :  { %460 = vmatpush3.bf16.msra.mxu0 %v514_v14 }
  0x11   :  { %482 = vmatpush3.bf16.msra.mxu1 %v515_v15  ;;  %461 = vmatprep.subr.bf16.mxu0 %v516_v16 }
  0x12   :  { %483 = vmatprep.subr.bf16.mxu1 %v517_v17 }
  0x14   :  { %462 = vmatpush3.bf16.msra.mxu0 %v518_v18 }
  0x15   :  { %484 = vmatpush3.bf16.msra.mxu1 %v519_v19  ;;  %463 = vmatprep.subr.bf16.mxu0 %v520_v20 }
  0x16   :  { %485 = vmatprep.subr.bf16.mxu1 %v521_v21 }
  0x18   :  { %464 = vmatpush3.bf16.msra.mxu0 %v522_v22 }
  0x19   :  { %486 = vmatpush3.bf16.msra.mxu1 %v523_v23  ;;  %465 = vmatprep.subr.bf16.mxu0 %v524_v24 }
  0x1a   :  { %487 = vmatprep.subr.bf16.mxu1 %v525_v25 }
  0x1c   :  { %466 = vmatpush3.bf16.msra.mxu0 %v526_v26 }
  0x1d   :  { %488 = vmatpush3.bf16.msra.mxu1 %v527_v27  ;;  %467 = vmatprep.subr.bf16.mxu0 %v528_v28 }
  0x1e   :  { %489 = vmatprep.subr.bf16.mxu1 %v529_v29 }
  0x20   :  { %468 = vmatpush3.bf16.msra.mxu0 %v530_v31 }
  0x21   :  { %490 = vmatpush3.bf16.msra.mxu1 %v531_v32 }
  0x22   :  { %8 = vsyncpa [#allocation4], 0  ;;  %v96_v37 = vcombine.high %v419_v33, %v419_v33  ;;  %v99_v38 = vunpack.c.0.s8 %v98_v35  ;;  %vm20_vm0 = vcmask 238592   ;;  %v555_v44 = vmov 0.0   ;;  %v452_v58 = vld [vmem:[%s687_s2] ss:$0 sm:$0xff] }
  0x23   :  { %21 = vst.msk [vmem:[#allocation2] sm:$0x3] %vm20_vm0, %v555_v44  ;;  %s556_s24 = smov [#allocation3]  }
  0x24   :  { %v102_v39 = vsub.s32 %v99_v38, %v101_v36  ;;  %s411_s25 = sshll.u32 %s556_s24, 4  ;;  %s412_s25 = int_to_ptr.vmem [resolvable:$true] %s411_s25 }
  0x25   :  { %s532_s26 = scalar_lea.vmem %s412_s25, 32  ;;  %p537_p1 = scmp.lt.s32.totalorder %s412_s25, %s412_s25 }
  0x26   :  { %v110_v40 = vrot.slane %v96_v37, %v102_v39  ;;  %v103_v41 = vrot.slane %v419_v33, %v102_v39  ;;  %p533_p0 = scmp.ne.s32.totalorder %s412_s25, %s532_s26  ;;  %p538_p2 = scmp.lt.s32.totalorder %s532_s26, %s532_s26 }
  0x28   :  { %341 = vmatprep.mubr.bf16.mxu0 %v110_v40  ;;  %v112_v42 = vcombine.high %v110_v40, %v110_v40  ;;  %v111_v43 = vcombine.high %v103_v41, %v103_v41  ;;  %p539_p3 = por %p538_p2, %p537_p1 }
  0x29   :  { %342 = vmatmul.mubr.bf16.vlgmr.msra.gmra.mxu0 %v103_v41 }
  0x2a   :  { %381 = vmatprep.mubr.bf16.mxu1 %v112_v42  ;;  %v22_v54 = vld [vmem:[#allocation2] sm:$0x3]  ;;  %p540_p4 = pnand %p539_p3, %p533_p0 }
  0x2b   :  { %382 = vmatmul.mubr.bf16.vlgmr.msra.gmra.mxu1 %v111_v43 }
  0xe9   :  { %v469_v45 = vpop.f32.mrf.mxu0 }
  0xeb   :  { %v491_v46 = vpop.f32.mrf.mxu1  ;;  %v470_v47 = vpop.f32.mrf.mxu0 }
  0xec   :  { %v471_v48 = vadd.f32 %v470_v47, %v469_v45 }
  0xed   :  { %v492_v49 = vpop.f32.mrf.mxu1  ;;  %v472_v50 = vpop.f32.mrf.mxu0 }
  0xee   :  { %v493_v51 = vadd.f32 %v492_v49, %v491_v46 }
  0xef   :  { %v494_v52 = vpop.f32.mrf.mxu1  ;;  %v473_v53 = vpop.f32.mrf.mxu0 }
  0xf0   :  { %v384_v55 = vadd.f32 %v493_v51, %v471_v48 }
  0xf1   :  { %v495_v56 = vpop.f32.mrf.mxu1 }
  0xf2   :  { %v389_v57 = vadd.f32 %v384_v55, %v22_v54 }
  0xf4   :  { %391 = vst.msk [vmem:[#allocation2] sm:$0x3] %vm20_vm0, %v389_v57 }
  0xfb   :  { %v395_v59 = vld [vmem:[#allocation2] sm:$0x3] }
  0xfc   :  { %v403_v60 = vadd.f32 %v452_v58, %v395_v59 }
  0xfe   :  { %404 = vst.msk [vmem:[#allocation3] sm:$0x3] %vm20_vm0, %v403_v60 }
  0xff   :  { %543 = shalt.err (!%p540_p4)
}
 0x100   :  { %414 = dma.vmem_to_hbm [thread:$0]  %s412_s25, 32, %s688_s3, [#allocation4]  }
 0x101   :  { %552 = dma.done.wait [#allocation4], 32  }
 0x102   :  { %553 = vsyncadd [#allocation4], 4294967264 }
 0x103   :  { %418 = vsyncpa [#allocation4], 1 }

// kernel: forward.58
= control target key start
LH: loop header
LB: loop body
LE: loop exit
PB: predicated region body
PF: predicated region fallthrough
CT: control target
= control target key end

     0   :  { %s5680_s12 = smov 0   ;;  %s5682_s13 = smov 0   ;;  %s6392_s0 = inlined_call_operand.vmem [shape: bf16[2,8192], index: 0, kind: input, shape index: {}]   ;;  %s6393_s1 = inlined_call_operand.vmem [shape: bf16[8192,512], index: 1, kind: input, shape index: {}]   ;;  %s6394_s2 = inlined_call_operand.vmem [shape: f32[1,512], index: 2, kind: input, shape index: {}]   ;;  %s6395_s3 = inlined_call_operand.vmem [shape: f32[2,512], index: 3, kind: output, shape index: {}]  }
   0x1   :  { %s5684_s14 = smov 0  }
   0x2 LB: > { %s25_s15 = sadd.s32 1, %s5651_s13  ;;  %p4312_p0 = scmp.ge.s32.totalorder %s5655_s14, 1  ;;  %s5655_s14 = sphi %s5684_s14, %s13_s14   ;;  %s5651_s13 = sphi %s5682_s13, %s6397_s13   ;;  %s5647_s12 = sphi %s5680_s12, %s6396_s12  }
   0x3   : > { %p26_p1 = scmp.ge.s32.totalorder %s25_s15, 4  ;;  %p193_p2 = scmp.lt.s32.totalorder %s5655_s14, 5 }
   0x5   : > { %s6399_s15 = smov (%p26_p1, %s25_s15), 0  ;;  %p194_p3 = pnand %p4312_p0, %p193_p2 }
   0x6   : > { %s4313_s16 = sshll.u32 (!%p194_p3), %s5647_s12, 4  ;;  %s4314_s17 = sshll.u32 (!%p194_p3), %s5647_s12, 8 }
   0x7   : > { %197 = sbr.rel (%p194_p3) target bundleno = 757 (0x2f5), region = 32  ;;  %p241_p4 = scmp.lt.s32.totalorder (!%p194_p3), %s4313_s16, 63 }
   0x8   : > { %p249_p5 = scmp.lt.s32.totalorder (!%p194_p3), %s4314_s17, 1023  ;;  %p4317_p6 = scmp.ne.s32.totalorder (!%p194_p3), %s5647_s12, 0 }
   0xc   : > { %s6401_s16 = smov (!%p241_p4, %s4313_s16), 63  ;;  %s6403_s17 = smov (!%p249_p5, %s4314_s17), 1023 }
   0xd   : > { %s5705_s20 = scalar_lea.vmem %s6392_s0, %s6401_s16  ;;  %s4835_s21 = sshll.u32 %s6403_s17, 4 }
   0xe   : > { %s5710_s24 = scalar_lea.vmem %s6393_s1, %s4835_s21  ;;  %277 = sbr.rel (%p4317_p6) target bundleno = 21 (0x15), region = 36 }
  0x13   : > { %v5657_v0 = vmov 0.0  }
  0x14   : > { %278 = vst [vmem:[#allocation2] sm:$0xff] %v5657_v0 }
  0x15 PF: > { %v4863_v1 = vld [vmem:[%s5710_s24 + $0xe4] ss:$16 sps:$4 sm:$0xff]   ;;  %v4867_v3 = vld [vmem:[%s5710_s24 + $0xe0] ss:$16 sps:$4 sm:$0xff]   ;;  %v5658_v37 = vmov 1966171168   ;;  %v800_v39 = vlaneseq }
  0x16   : > { %v4865_v2 = vld [vmem:[%s5710_s24 + $0x2e4] ss:$16 sps:$4 sm:$0xff]   ;;  %3470 = vmatprep.subr.bf16.mxu0 %v4863_v1  ;;  %v4868_v4 = vld [vmem:[%s5710_s24 + $0x2e0] ss:$16 sps:$4 sm:$0xff]   ;;  %v798_v38 = vunpack.c.l.s4 %v5658_v37  ;;  %p4830_p7 = scmp.ne.s32.totalorder %s5647_s12, 3 }
  0x17   : > { %3511 = vmatprep.subr.bf16.mxu1 %v4865_v2  ;;  %v4869_v5 = vld [vmem:[%s5710_s24 + $0xc4] ss:$16 sps:$4 sm:$0xff]   ;;  %3471 = vmatpush1.bf16.msra.mxu0 %v4867_v3  ;;  %v4873_v7 = vld [vmem:[%s5710_s24 + $0xc0] ss:$16 sps:$4 sm:$0xff]   ;;  %v5752_v44 = vshrl.u32 %v800_v39, 7 }
  0x18   : > { %3512 = vmatpush1.bf16.msra.mxu1 %v4868_v4  ;;  %v4871_v6 = vld [vmem:[%s5710_s24 + $0x2c4] ss:$16 sps:$4 sm:$0xff]   ;;  %3472 = vmatprep.subr.bf16.mxu0 %v4869_v5  ;;  %v4874_v8 = vld [vmem:[%s5710_s24 + $0x2c0] ss:$16 sps:$4 sm:$0xff]   ;;  %v799_v43 = vunpack.c.0.s8 %v798_v38 }
  0x19   : > { %3513 = vmatprep.subr.bf16.mxu1 %v4871_v6  ;;  %v4875_v9 = vld [vmem:[%s5710_s24 + $0xa4] ss:$16 sps:$4 sm:$0xff]   ;;  %v4879_v11 = vld [vmem:[%s5710_s24 + $0xa0] ss:$16 sps:$4 sm:$0xff]  }
  0x1a   : > { %v4877_v10 = vld [vmem:[%s5710_s24 + $0x2a4] ss:$16 sps:$4 sm:$0xff]   ;;  %v4880_v12 = vld [vmem:[%s5710_s24 + $0x2a0] ss:$16 sps:$4 sm:$0xff]   ;;  %v5760_v50 = vsub.s32 %v799_v43, %v5752_v44 }
  0x1b   : > { %3473 = vmatpush1.bf16.msra.mxu0 %v4873_v7  ;;  %v4881_v13 = vld [vmem:[%s5710_s24 + $0x84] ss:$16 sps:$4 sm:$0xff]   ;;  %v4885_v15 = vld [vmem:[%s5710_s24 + $0x80] ss:$16 sps:$4 sm:$0xff]  }
  0x1c   : > { %3514 = vmatpush1.bf16.msra.mxu1 %v4874_v8  ;;  %3474 = vmatprep.subr.bf16.mxu0 %v4875_v9  ;;  %v4883_v14 = vld [vmem:[%s5710_s24 + $0x284] ss:$16 sps:$4 sm:$0xff]   ;;  %v4886_v16 = vld [vmem:[%s5710_s24 + $0x280] ss:$16 sps:$4 sm:$0xff]  }
  0x1d   : > { %3515 = vmatprep.subr.bf16.mxu1 %v4877_v10  ;;  %v4887_v17 = vld [vmem:[%s5710_s24 + $0x64] ss:$16 sps:$4 sm:$0xff]   ;;  %v4891_v19 = vld [vmem:[%s5710_s24 + $0x60] ss:$16 sps:$4 sm:$0xff]  }
  0x1e   : > { %v4889_v18 = vld [vmem:[%s5710_s24 + $0x264] ss:$16 sps:$4 sm:$0xff]   ;;  %v4892_v20 = vld [vmem:[%s5710_s24 + $0x260] ss:$16 sps:$4 sm:$0xff]  }
  0x1f   : > { %3475 = vmatpush1.bf16.msra.mxu0 %v4879_v11  ;;  %v4893_v21 = vld [vmem:[%s5710_s24 + $0x44] ss:$16 sps:$4 sm:$0xff]   ;;  %v4897_v23 = vld [vmem:[%s5710_s24 + $0x40] ss:$16 sps:$4 sm:$0xff]  }
  0x20   : > { %3516 = vmatpush1.bf16.msra.mxu1 %v4880_v12  ;;  %3476 = vmatprep.subr.bf16.mxu0 %v4881_v13  ;;  %v4895_v22 = vld [vmem:[%s5710_s24 + $0x244] ss:$16 sps:$4 sm:$0xff]   ;;  %v4898_v24 = vld [vmem:[%s5710_s24 + $0x240] ss:$16 sps:$4 sm:$0xff]  }
  0x21   : > { %3517 = vmatprep.subr.bf16.mxu1 %v4883_v14  ;;  %v4899_v25 = vld [vmem:[%s5710_s24 + $0x24] ss:$16 sps:$4 sm:$0xff]   ;;  %v4903_v27 = vld [vmem:[%s5710_s24 + $0x20] ss:$16 sps:$4 sm:$0xff]  }
  0x22   : > { %v4901_v26 = vld [vmem:[%s5710_s24 + $0x224] ss:$16 sps:$4 sm:$0xff]   ;;  %v4904_v28 = vld [vmem:[%s5710_s24 + $0x220] ss:$16 sps:$4 sm:$0xff]  }
  0x23   : > { %3477 = vmatpush1.bf16.msra.mxu0 %v4885_v15  ;;  %v4905_v29 = vld [vmem:[%s5710_s24 + $0x4] ss:$16 sps:$4 sm:$0xff]   ;;  %v4909_v31 = vld [vmem:[%s5710_s24] ss:$16 sps:$4 sm:$0xff]  }
  0x24   : > { %3518 = vmatpush1.bf16.msra.mxu1 %v4886_v16  ;;  %3478 = vmatprep.subr.bf16.mxu0 %v4887_v17  ;;  %v4907_v30 = vld [vmem:[%s5710_s24 + $0x204] ss:$16 sps:$4 sm:$0xff]   ;;  %v4910_v32 = vld [vmem:[%s5710_s24 + $0x200] ss:$16 sps:$4 sm:$0xff]  }
  0x25   : > { %3519 = vmatprep.subr.bf16.mxu1 %v4889_v18  ;;  %v4911_v33 = vld [vmem:[%s5710_s24 + $0x1e4] ss:$16 sps:$4 sm:$0xff]   ;;  %v4915_v35 = vld [vmem:[%s5710_s24 + $0x1e0] ss:$16 sps:$4 sm:$0xff]  }
  0x26   : > { %v4913_v34 = vld [vmem:[%s5710_s24 + $0x3e4] ss:$16 sps:$4 sm:$0xff]   ;;  %v4916_v36 = vld [vmem:[%s5710_s24 + $0x3e0] ss:$16 sps:$4 sm:$0xff]  }
  0x27   : > { %3479 = vmatpush1.bf16.msra.mxu0 %v4891_v19  ;;  %v4917_v40 = vld [vmem:[%s5710_s24 + $0x1c4] ss:$16 sps:$4 sm:$0xff]   ;;  %v4921_v42 = vld [vmem:[%s5710_s24 + $0x1c0] ss:$16 sps:$4 sm:$0xff]  }
  0x28   : > { %3520 = vmatpush1.bf16.msra.mxu1 %v4892_v20  ;;  %3480 = vmatprep.subr.bf16.mxu0 %v4893_v21  ;;  %v4919_v41 = vld [vmem:[%s5710_s24 + $0x3c4] ss:$16 sps:$4 sm:$0xff]   ;;  %v4922_v45 = vld [vmem:[%s5710_s24 + $0x3c0] ss:$16 sps:$4 sm:$0xff]  }
  0x29   : > { %3521 = vmatprep.subr.bf16.mxu1 %v4895_v22  ;;  %v4923_v46 = vld [vmem:[%s5710_s24 + $0x1a4] ss:$16 sps:$4 sm:$0xff]   ;;  %v4927_v48 = vld [vmem:[%s5710_s24 + $0x1a0] ss:$16 sps:$4 sm:$0xff]  }
  0x2a   : > { %v4925_v47 = vld [vmem:[%s5710_s24 + $0x3a4] ss:$16 sps:$4 sm:$0xff]   ;;  %v4928_v49 = vld [vmem:[%s5710_s24 + $0x3a0] ss:$16 sps:$4 sm:$0xff]  }
  0x2b   : > { %3481 = vmatpush1.bf16.msra.mxu0 %v4897_v23  ;;  %v4929_v51 = vld [vmem:[%s5710_s24 + $0x184] ss:$16 sps:$4 sm:$0xff]   ;;  %v4933_v54 = vld [vmem:[%s5710_s24 + $0x180] ss:$16 sps:$4 sm:$0xff]  }
  0x2c   : > { %3522 = vmatpush1.bf16.msra.mxu1 %v4898_v24  ;;  %3482 = vmatprep.subr.bf16.mxu0 %v4899_v25  ;;  %v4931_v52 = vld [vmem:[%s5710_s24 + $0x384] ss:$16 sps:$4 sm:$0xff]   ;;  %v4934_v56 = vld [vmem:[%s5710_s24 + $0x380] ss:$16 sps:$4 sm:$0xff]  }
  0x2d   : > { %3523 = vmatprep.subr.bf16.mxu1 %v4901_v26  ;;  %v280_v53 = vld [vmem:[%s5705_s20] sm:$0xff] }
  0x2e   : > { %v803_v55 = vrot.slane %v280_v53, %v5760_v50  ;;  %v4935_v57 = vld [vmem:[%s5710_s24 + $0x164] ss:$16 sps:$4 sm:$0xff]   ;;  %v4939_v60 = vld [vmem:[%s5710_s24 + $0x160] ss:$16 sps:$4 sm:$0xff]   ;;  %v796_v2 = vcombine.high %v280_v53, %v280_v53 }
  0x2f   : > { %3483 = vmatpush1.bf16.msra.mxu0 %v4903_v27  ;;  %v4937_v58 = vld [vmem:[%s5710_s24 + $0x364] ss:$16 sps:$4 sm:$0xff]   ;;  %v4940_v62 = vld [vmem:[%s5710_s24 + $0x360] ss:$16 sps:$4 sm:$0xff]  }
  0x30   : > { %3524 = vmatpush1.bf16.msra.mxu1 %v4904_v28  ;;  %3484 = vmatprep.subr.bf16.mxu0 %v4905_v29  ;;  %v811_v59 = vcombine.high %v803_v55, %v803_v55  ;;  %v4941_v63 = vld [vmem:[%s5710_s24 + $0x144] ss:$16 sps:$4 sm:$0xff]   ;;  %v4945_v3 = vld [vmem:[%s5710_s24 + $0x140] ss:$16 sps:$4 sm:$0xff]   ;;  %v5788_v7 = vrot.slane %v796_v2, %v5760_v50  ;;  %v5798_v14 = vrot.slane %v803_v55, %v5760_v50 }
  0x31   : > { %3525 = vmatprep.subr.bf16.mxu1 %v4907_v30  ;;  %v4943_v0 = vld [vmem:[%s5710_s24 + $0x344] ss:$16 sps:$4 sm:$0xff]   ;;  %v4946_v4 = vld [vmem:[%s5710_s24 + $0x340] ss:$16 sps:$4 sm:$0xff]  }
  0x32   : > { %v5772_v61 = vrot.slane %v811_v59, %v5760_v50  ;;  %v4947_v5 = vld [vmem:[%s5710_s24 + $0x124] ss:$16 sps:$4 sm:$0xff]   ;;  %v4951_v8 = vld [vmem:[%s5710_s24 + $0x120] ss:$16 sps:$4 sm:$0xff]   ;;  %v812_v12 = vcombine.high %v5788_v7, %v5788_v7  ;;  %v5808_v19 = vcombine.high %v5798_v14, %v5798_v14 }
  0x33   : > { %3485 = vmatpush1.bf16.msra.mxu0 %v4909_v31  ;;  %v4949_v6 = vld [vmem:[%s5710_s24 + $0x324] ss:$16 sps:$4 sm:$0xff]   ;;  %v4952_v9 = vld [vmem:[%s5710_s24 + $0x320] ss:$16 sps:$4 sm:$0xff]  }
  0x34   : > { %3526 = vmatpush1.bf16.msra.mxu1 %v4910_v32  ;;  %3486 = vmatprep.subr.bf16.mxu0 %v4911_v33  ;;  %v5779_v1 = vcombine.high %v5772_v61, %v5772_v61  ;;  %v4953_v10 = vld [vmem:[%s5710_s24 + $0x104] ss:$16 sps:$4 sm:$0xff]   ;;  %v4957_v13 = vld [vmem:[%s5710_s24 + $0x100] ss:$16 sps:$4 sm:$0xff]   ;;  %v5804_v18 = vrot.slane %v812_v12, %v5760_v50 }
  0x35   : > { %3527 = vmatprep.subr.bf16.mxu1 %v4913_v34  ;;  %3502 = vmatprep.mubr.bf16.mxu0 %v5772_v61  ;;  %v4955_v11 = vld [vmem:[%s5710_s24 + $0x304] ss:$16 sps:$4 sm:$0xff]   ;;  %v4958_v15 = vld [vmem:[%s5710_s24 + $0x300] ss:$16 sps:$4 sm:$0xff]  }
  0x36   : > { %3543 = vmatprep.mubr.bf16.mxu1 %v5779_v1  ;;  %v4961_v16 = vld [vmem:[%s5710_s24 + $0x4e4] ss:$16 sps:$4 sm:$0xff]   ;;  %v4959_v20 = vld [vmem:[%s5710_s24 + $0x4e0] ss:$16 sps:$4 sm:$0xff]   ;;  %v5816_v24 = vcombine.high %v5804_v18, %v5804_v18 }
  0x37   : > { %3487 = vmatpush2.bf16.msra.mxu0 %v4915_v35  ;;  %v4964_v17 = vld [vmem:[%s5710_s24 + $0x6e4] ss:$16 sps:$4 sm:$0xff]   ;;  %v4962_v21 = vld [vmem:[%s5710_s24 + $0x6e0] ss:$16 sps:$4 sm:$0xff]  }
  0x38   : > { %3528 = vmatpush2.bf16.msra.mxu1 %v4916_v36  ;;  %3488 = vmatprep.subr.bf16.mxu0 %v4917_v40  ;;  %v4967_v22 = vld [vmem:[%s5710_s24 + $0x4c4] ss:$16 sps:$4 sm:$0xff]   ;;  %v4965_v25 = vld [vmem:[%s5710_s24 + $0x4c0] ss:$16 sps:$4 sm:$0xff]  }
  0x39   : > { %3529 = vmatprep.subr.bf16.mxu1 %v4919_v41  ;;  %v4970_v23 = vld [vmem:[%s5710_s24 + $0x6c4] ss:$16 sps:$4 sm:$0xff]   ;;  %v4968_v26 = vld [vmem:[%s5710_s24 + $0x6c0] ss:$16 sps:$4 sm:$0xff]  }
  0x3a   : > { %v4973_v27 = vld [vmem:[%s5710_s24 + $0x4a4] ss:$16 sps:$4 sm:$0xff]   ;;  %v4971_v29 = vld [vmem:[%s5710_s24 + $0x4a0] ss:$16 sps:$4 sm:$0xff]  }
  0x3b   : > { %3489 = vmatpush2.bf16.msra.mxu0 %v4921_v42  ;;  %v4976_v28 = vld [vmem:[%s5710_s24 + $0x6a4] ss:$16 sps:$4 sm:$0xff]   ;;  %v4974_v30 = vld [vmem:[%s5710_s24 + $0x6a0] ss:$16 sps:$4 sm:$0xff]  }
  0x3c   : > { %3530 = vmatpush2.bf16.msra.mxu1 %v4922_v45  ;;  %3490 = vmatprep.subr.bf16.mxu0 %v4923_v46  ;;  %v4979_v31 = vld [vmem:[%s5710_s24 + $0x484] ss:$16 sps:$4 sm:$0xff]   ;;  %v4977_v33 = vld [vmem:[%s5710_s24 + $0x480] ss:$16 sps:$4 sm:$0xff]  }
  0x3d   : > { %3531 = vmatprep.subr.bf16.mxu1 %v4925_v47  ;;  %v4982_v32 = vld [vmem:[%s5710_s24 + $0x684] ss:$16 sps:$4 sm:$0xff]   ;;  %v4980_v34 = vld [vmem:[%s5710_s24 + $0x680] ss:$16 sps:$4 sm:$0xff]  }
  0x3e   : > { %v4985_v35 = vld [vmem:[%s5710_s24 + $0x464] ss:$16 sps:$4 sm:$0xff]   ;;  %v4983_v37 = vld [vmem:[%s5710_s24 + $0x460] ss:$16 sps:$4 sm:$0xff]  }
  0x3f   : > { %3491 = vmatpush2.bf16.msra.mxu0 %v4927_v48  ;;  %v4988_v36 = vld [vmem:[%s5710_s24 + $0x664] ss:$16 sps:$4 sm:$0xff]   ;;  %v4986_v38 = vld [vmem:[%s5710_s24 + $0x660] ss:$16 sps:$4 sm:$0xff]  }
  0x40   : > { %3532 = vmatpush2.bf16.msra.mxu1 %v4928_v49  ;;  %3492 = vmatprep.subr.bf16.mxu0 %v4929_v51  ;;  %v4991_v39 = vld [vmem:[%s5710_s24 + $0x444] ss:$16 sps:$4 sm:$0xff]   ;;  %v4989_v41 = vld [vmem:[%s5710_s24 + $0x440] ss:$16 sps:$4 sm:$0xff]  }
  0x41   : > { %3533 = vmatprep.subr.bf16.mxu1 %v4931_v52  ;;  %v4994_v40 = vld [vmem:[%s5710_s24 + $0x644] ss:$16 sps:$4 sm:$0xff]   ;;  %v4992_v42 = vld [vmem:[%s5710_s24 + $0x640] ss:$16 sps:$4 sm:$0xff]  }
  0x42   : > { %v4997_v43 = vld [vmem:[%s5710_s24 + $0x424] ss:$16 sps:$4 sm:$0xff]   ;;  %v4995_v46 = vld [vmem:[%s5710_s24 + $0x420] ss:$16 sps:$4 sm:$0xff]  }
  0x43   : > { %3493 = vmatpush2.bf16.msra.mxu0 %v4933_v54  ;;  %v5000_v45 = vld [vmem:[%s5710_s24 + $0x624] ss:$16 sps:$4 sm:$0xff]   ;;  %v4998_v47 = vld [vmem:[%s5710_s24 + $0x620] ss:$16 sps:$4 sm:$0xff]  }
  0x44   : > { %3534 = vmatpush2.bf16.msra.mxu1 %v4934_v56  ;;  %3494 = vmatprep.subr.bf16.mxu0 %v4935_v57  ;;  %v5003_v48 = vld [vmem:[%s5710_s24 + $0x404] ss:$16 sps:$4 sm:$0xff]   ;;  %v5001_v51 = vld [vmem:[%s5710_s24 + $0x400] ss:$16 sps:$4 sm:$0xff]  }
  0x45   : > { %3535 = vmatprep.subr.bf16.mxu1 %v4937_v58  ;;  %v5006_v49 = vld [vmem:[%s5710_s24 + $0x604] ss:$16 sps:$4 sm:$0xff]   ;;  %v5004_v52 = vld [vmem:[%s5710_s24 + $0x600] ss:$16 sps:$4 sm:$0xff]  }
  0x46   : > { %v5009_v53 = vld [vmem:[%s5710_s24 + $0x5e4] ss:$16 sps:$4 sm:$0xff]   ;;  %v5007_v55 = vld [vmem:[%s5710_s24 + $0x5e0] ss:$16 sps:$4 sm:$0xff]  }
  0x47   : > { %3495 = vmatpush2.bf16.msra.mxu0 %v4939_v60  ;;  %v5012_v54 = vld [vmem:[%s5710_s24 + $0x7e4] ss:$16 sps:$4 sm:$0xff]   ;;  %v5010_v56 = vld [vmem:[%s5710_s24 + $0x7e0] ss:$16 sps:$4 sm:$0xff]  }
  0x48   : > { %3536 = vmatpush2.bf16.msra.mxu1 %v4940_v62  ;;  %3496 = vmatprep.subr.bf16.mxu0 %v4941_v63  ;;  %v5015_v57 = vld [vmem:[%s5710_s24 + $0x5c4] ss:$16 sps:$4 sm:$0xff]   ;;  %v5013_v59 = vld [vmem:[%s5710_s24 + $0x5c0] ss:$16 sps:$4 sm:$0xff]  }
  0x49   : > { %3537 = vmatprep.subr.bf16.mxu1 %v4943_v0  ;;  %v5018_v58 = vld [vmem:[%s5710_s24 + $0x7c4] ss:$16 sps:$4 sm:$0xff]   ;;  %v5016_v60 = vld [vmem:[%s5710_s24 + $0x7c0] ss:$16 sps:$4 sm:$0xff]  }
  0x4a   : > { %v5021_v62 = vld [vmem:[%s5710_s24 + $0x5a4] ss:$16 sps:$4 sm:$0xff]   ;;  %v5019_v0 = vld [vmem:[%s5710_s24 + $0x5a0] ss:$16 sps:$4 sm:$0xff]  }
  0x4b   : > { %3497 = vmatpush2.bf16.msra.mxu0 %v4945_v3  ;;  %v5024_v63 = vld [vmem:[%s5710_s24 + $0x7a4] ss:$16 sps:$4 sm:$0xff]   ;;  %v5022_v2 = vld [vmem:[%s5710_s24 + $0x7a0] ss:$16 sps:$4 sm:$0xff]  }
  0x4c   : > { %3538 = vmatpush2.bf16.msra.mxu1 %v4946_v4  ;;  %3498 = vmatprep.subr.bf16.mxu0 %v4947_v5  ;;  %v5027_v3 = vld [vmem:[%s5710_s24 + $0x584] ss:$16 sps:$4 sm:$0xff]   ;;  %v5025_v5 = vld [vmem:[%s5710_s24 + $0x580] ss:$16 sps:$4 sm:$0xff]  }
  0x4d   : > { %3539 = vmatprep.subr.bf16.mxu1 %v4949_v6  ;;  %v5030_v4 = vld [vmem:[%s5710_s24 + $0x784] ss:$16 sps:$4 sm:$0xff]   ;;  %v5028_v6 = vld [vmem:[%s5710_s24 + $0x780] ss:$16 sps:$4 sm:$0xff]  }
  0x4e   : > { %v5039_v12 = vld [vmem:[%s5710_s24 + $0x544] ss:$16 sps:$4 sm:$0xff]  }
  0x4f   : > { %3499 = vmatpush2.bf16.msra.mxu0 %v4951_v8  ;;  %v5033_v8 = vld [vmem:[%s5710_s24 + $0x564] ss:$16 sps:$4 sm:$0xff]  }
  0x50   : > { %3540 = vmatpush2.bf16.msra.mxu1 %v4952_v9  ;;  %3500 = vmatprep.subr.bf16.mxu0 %v4953_v10  ;;  %v5036_v9 = vld [vmem:[%s5710_s24 + $0x764] ss:$16 sps:$4 sm:$0xff]   ;;  %v5031_v10 = vld [vmem:[%s5710_s24 + $0x560] ss:$16 sps:$4 sm:$0xff]  }
  0x51   : > { %3541 = vmatprep.subr.bf16.mxu1 %v4955_v11  ;;  %v5034_v11 = vld [vmem:[%s5710_s24 + $0x760] ss:$16 sps:$4 sm:$0xff]  }
  0x53   : > { %3501 = vmatpush2.bf16.msra.mxu0 %v4957_v13  ;;  %v5042_v13 = vld [vmem:[%s5710_s24 + $0x744] ss:$16 sps:$4 sm:$0xff]  }
  0x54   : > { %3542 = vmatpush2.bf16.msra.mxu1 %v4958_v15  ;;  %3552 = vmatprep.subr.bf16.mxu0 %v4961_v16  ;;  %v5037_v15 = vld [vmem:[%s5710_s24 + $0x540] ss:$16 sps:$4 sm:$0xff]  }
  0x55   : > { %3593 = vmatprep.subr.bf16.mxu1 %v4964_v17  ;;  %v5040_v16 = vld [vmem:[%s5710_s24 + $0x740] ss:$16 sps:$4 sm:$0xff]   ;;  %v5045_v17 = vld [vmem:[%s5710_s24 + $0x524] ss:$16 sps:$4 sm:$0xff]  }
  0x56   : > { %3503 = vmatmul.mubr.bf16.vlgmr.msra.gmra.mxu0 %v5798_v14 }
  0x57   : > { %3544 = vmatmul.mubr.bf16.vlgmr.msra.gmra.mxu1 %v5808_v19  ;;  %3553 = vmatpush1.bf16.msra.mxu0 %v4959_v20  ;;  %v5048_v20 = vld [vmem:[%s5710_s24 + $0x724] ss:$16 sps:$4 sm:$0xff]  }
  0x58   : > { %3594 = vmatpush1.bf16.msra.mxu1 %v4962_v21  ;;  %3554 = vmatprep.subr.bf16.mxu0 %v4967_v22  ;;  %v5043_v21 = vld [vmem:[%s5710_s24 + $0x520] ss:$16 sps:$4 sm:$0xff]  }
  0x59   : > { %3595 = vmatprep.subr.bf16.mxu1 %v4970_v23  ;;  %3584 = vmatprep.mubr.bf16.mxu0 %v5804_v18  ;;  %v5046_v22 = vld [vmem:[%s5710_s24 + $0x720] ss:$16 sps:$4 sm:$0xff]   ;;  %v5051_v23 = vld [vmem:[%s5710_s24 + $0x504] ss:$16 sps:$4 sm:$0xff]  }
  0x5a   : > { %3625 = vmatprep.mubr.bf16.mxu1 %v5816_v24 }
  0x5b   : > { %3555 = vmatpush1.bf16.msra.mxu0 %v4965_v25  ;;  %v5054_v25 = vld [vmem:[%s5710_s24 + $0x704] ss:$16 sps:$4 sm:$0xff]  }
  0x5c   : > { %3596 = vmatpush1.bf16.msra.mxu1 %v4968_v26  ;;  %3556 = vmatprep.subr.bf16.mxu0 %v4973_v27  ;;  %v5049_v26 = vld [vmem:[%s5710_s24 + $0x500] ss:$16 sps:$4 sm:$0xff]   ;;  %v5881_v27 = vrot.slane %v5788_v7, %v5760_v50 }
  0x5d   : > { %3597 = vmatprep.subr.bf16.mxu1 %v4976_v28  ;;  %v5052_v28 = vld [vmem:[%s5710_s24 + $0x700] ss:$16 sps:$4 sm:$0xff]  }
  0x5e   : > { %v5059_v7 = vld [vmem:[%s5710_s24 + $0xae0] ss:$16 sps:$4 sm:$0xff]  }
  0x5f   : > { %3557 = vmatpush1.bf16.msra.mxu0 %v4971_v29  ;;  %v5058_v29 = vld [vmem:[%s5710_s24 + $0x8e4] ss:$16 sps:$4 sm:$0xff]  }
  0x60   : > { %3598 = vmatpush1.bf16.msra.mxu1 %v4974_v30  ;;  %3558 = vmatprep.subr.bf16.mxu0 %v4979_v31  ;;  %v5061_v30 = vld [vmem:[%s5710_s24 + $0xae4] ss:$16 sps:$4 sm:$0xff]   ;;  %v5888_v31 = vcombine.high %v5881_v27, %v5881_v27 }
  0x61   : > { %3599 = vmatprep.subr.bf16.mxu1 %v4982_v32  ;;  %v5056_v32 = vld [vmem:[%s5710_s24 + $0x8e0] ss:$16 sps:$4 sm:$0xff]  }
  0x63   : > { %3559 = vmatpush1.bf16.msra.mxu0 %v4977_v33  ;;  %v5893_v33 = vld [vmem:[%s5705_s20 + $0x8] sm:$0xff] }
  0x64   : > { %3600 = vmatpush1.bf16.msra.mxu1 %v4980_v34  ;;  %3560 = vmatprep.subr.bf16.mxu0 %v4985_v35  ;;  %v5064_v34 = vld [vmem:[%s5710_s24 + $0x8c4] ss:$16 sps:$4 sm:$0xff]  }
  0x65   : > { %3601 = vmatprep.subr.bf16.mxu1 %v4988_v36  ;;  %v5067_v35 = vld [vmem:[%s5710_s24 + $0xac4] ss:$16 sps:$4 sm:$0xff]   ;;  %v5899_v36 = vrot.slane %v5893_v33, %v5760_v50 }
  0x67   : > { %3561 = vmatpush1.bf16.msra.mxu0 %v4983_v37  ;;  %v860_v37 = vcombine.high %v5899_v36, %v5899_v36 }
  0x68   : > { %3602 = vmatpush1.bf16.msra.mxu1 %v4986_v38  ;;  %3562 = vmatprep.subr.bf16.mxu0 %v4991_v39  ;;  %v5062_v38 = vld [vmem:[%s5710_s24 + $0x8c0] ss:$16 sps:$4 sm:$0xff]  }
  0x69   : > { %3603 = vmatprep.subr.bf16.mxu1 %v4994_v40  ;;  %v5065_v39 = vld [vmem:[%s5710_s24 + $0xac0] ss:$16 sps:$4 sm:$0xff]   ;;  %v5070_v40 = vld [vmem:[%s5710_s24 + $0x8a4] ss:$16 sps:$4 sm:$0xff]  }
  0x6b   : > { %3563 = vmatpush1.bf16.msra.mxu0 %v4989_v41  ;;  %v5073_v41 = vld [vmem:[%s5710_s24 + $0xaa4] ss:$16 sps:$4 sm:$0xff]  }
  0x6c   : > { %3604 = vmatpush1.bf16.msra.mxu1 %v4992_v42  ;;  %3564 = vmatprep.subr.bf16.mxu0 %v4997_v43  ;;  %v5910_v42 = vrot.slane %v860_v37, %v5760_v50  ;;  %v5134_v37 = vld [vmem:[%s5710_s24 + $0x940] ss:$16 sps:$4 sm:$0xff]  }
  0x6d   : > { %3605 = vmatprep.subr.bf16.mxu1 %v5000_v45  ;;  %v5068_v45 = vld [vmem:[%s5710_s24 + $0x8a0] ss:$16 sps:$4 sm:$0xff]  }
  0x6e   : > { %v5915_v43 = vcombine.high %v5910_v42, %v5910_v42 }
  0x6f   : > { %3565 = vmatpush1.bf16.msra.mxu0 %v4995_v46  ;;  %v5071_v46 = vld [vmem:[%s5710_s24 + $0xaa0] ss:$16 sps:$4 sm:$0xff]  }
  0x70   : > { %3606 = vmatpush1.bf16.msra.mxu1 %v4998_v47  ;;  %3566 = vmatprep.subr.bf16.mxu0 %v5003_v48  ;;  %v5076_v47 = vld [vmem:[%s5710_s24 + $0x884] ss:$16 sps:$4 sm:$0xff]  }
  0x71   : > { %3607 = vmatprep.subr.bf16.mxu1 %v5006_v49  ;;  %v5079_v48 = vld [vmem:[%s5710_s24 + $0xa84] ss:$16 sps:$4 sm:$0xff]   ;;  %v5074_v49 = vld [vmem:[%s5710_s24 + $0x880] ss:$16 sps:$4 sm:$0xff]  }
  0x73   : > { %3567 = vmatpush1.bf16.msra.mxu0 %v5001_v51  ;;  %v5077_v51 = vld [vmem:[%s5710_s24 + $0xa80] ss:$16 sps:$4 sm:$0xff]  }
  0x74   : > { %3608 = vmatpush1.bf16.msra.mxu1 %v5004_v52  ;;  %3568 = vmatprep.subr.bf16.mxu0 %v5009_v53  ;;  %v5082_v52 = vld [vmem:[%s5710_s24 + $0x864] ss:$16 sps:$4 sm:$0xff]  }
  0x75   : > { %3609 = vmatprep.subr.bf16.mxu1 %v5012_v54  ;;  %v5085_v53 = vld [vmem:[%s5710_s24 + $0xa64] ss:$16 sps:$4 sm:$0xff]   ;;  %v5080_v54 = vld [vmem:[%s5710_s24 + $0x860] ss:$16 sps:$4 sm:$0xff]  }
  0x77   : > { %3569 = vmatpush2.bf16.msra.mxu0 %v5007_v55  ;;  %v5083_v55 = vld [vmem:[%s5710_s24 + $0xa60] ss:$16 sps:$4 sm:$0xff]  }
  0x78   : > { %3610 = vmatpush2.bf16.msra.mxu1 %v5010_v56  ;;  %3570 = vmatprep.subr.bf16.mxu0 %v5015_v57  ;;  %v5088_v56 = vld [vmem:[%s5710_s24 + $0x844] ss:$16 sps:$4 sm:$0xff]  }
  0x79   : > { %3611 = vmatprep.subr.bf16.mxu1 %v5018_v58  ;;  %v5091_v57 = vld [vmem:[%s5710_s24 + $0xa44] ss:$16 sps:$4 sm:$0xff]   ;;  %v5086_v58 = vld [vmem:[%s5710_s24 + $0x840] ss:$16 sps:$4 sm:$0xff]  }
  0x7b   : > { %3571 = vmatpush2.bf16.msra.mxu0 %v5013_v59  ;;  %v5089_v59 = vld [vmem:[%s5710_s24 + $0xa40] ss:$16 sps:$4 sm:$0xff]  }
  0x7c   : > { %3612 = vmatpush2.bf16.msra.mxu1 %v5016_v60  ;;  %3572 = vmatprep.subr.bf16.mxu0 %v5021_v62  ;;  %v5094_v60 = vld [vmem:[%s5710_s24 + $0x824] ss:$16 sps:$4 sm:$0xff]  }
  0x7d   : > { %3613 = vmatprep.subr.bf16.mxu1 %v5024_v63  ;;  %v5097_v62 = vld [vmem:[%s5710_s24 + $0xa24] ss:$16 sps:$4 sm:$0xff]   ;;  %v5092_v63 = vld [vmem:[%s5710_s24 + $0x820] ss:$16 sps:$4 sm:$0xff]  }
  0x7f   : > { %3573 = vmatpush2.bf16.msra.mxu0 %v5019_v0  ;;  %v5095_v0 = vld [vmem:[%s5710_s24 + $0xa20] ss:$16 sps:$4 sm:$0xff]  }
  0x80   : > { %3614 = vmatpush2.bf16.msra.mxu1 %v5022_v2  ;;  %3574 = vmatprep.subr.bf16.mxu0 %v5027_v3  ;;  %v5100_v2 = vld [vmem:[%s5710_s24 + $0x804] ss:$16 sps:$4 sm:$0xff]  }
  0x81   : > { %3615 = vmatprep.subr.bf16.mxu1 %v5030_v4  ;;  %v5103_v3 = vld [vmem:[%s5710_s24 + $0xa04] ss:$16 sps:$4 sm:$0xff]   ;;  %v5098_v4 = vld [vmem:[%s5710_s24 + $0x800] ss:$16 sps:$4 sm:$0xff]  }
  0x83   : > { %3575 = vmatpush2.bf16.msra.mxu0 %v5025_v5  ;;  %v5101_v5 = vld [vmem:[%s5710_s24 + $0xa00] ss:$16 sps:$4 sm:$0xff]  }
  0x84   : > { %3616 = vmatpush2.bf16.msra.mxu1 %v5028_v6  ;;  %3576 = vmatprep.subr.bf16.mxu0 %v5033_v8  ;;  %v5106_v6 = vld [vmem:[%s5710_s24 + $0x9e4] ss:$16 sps:$4 sm:$0xff]  }
  0x85   : > { %3617 = vmatprep.subr.bf16.mxu1 %v5036_v9  ;;  %v5109_v8 = vld [vmem:[%s5710_s24 + $0xbe4] ss:$16 sps:$4 sm:$0xff]   ;;  %v5104_v9 = vld [vmem:[%s5710_s24 + $0x9e0] ss:$16 sps:$4 sm:$0xff]  }
  0x87   : > { %3577 = vmatpush2.bf16.msra.mxu0 %v5031_v10  ;;  %v5107_v10 = vld [vmem:[%s5710_s24 + $0xbe0] ss:$16 sps:$4 sm:$0xff]  }
  0x88   : > { %3618 = vmatpush2.bf16.msra.mxu1 %v5034_v11  ;;  %3578 = vmatprep.subr.bf16.mxu0 %v5039_v12  ;;  %v5112_v11 = vld [vmem:[%s5710_s24 + $0x9c4] ss:$16 sps:$4 sm:$0xff]  }
  0x89   : > { %3619 = vmatprep.subr.bf16.mxu1 %v5042_v13  ;;  %v5115_v12 = vld [vmem:[%s5710_s24 + $0xbc4] ss:$16 sps:$4 sm:$0xff]   ;;  %v5110_v13 = vld [vmem:[%s5710_s24 + $0x9c0] ss:$16 sps:$4 sm:$0xff]  }
  0x8b   : > { %3579 = vmatpush2.bf16.msra.mxu0 %v5037_v15  ;;  %v5113_v15 = vld [vmem:[%s5710_s24 + $0xbc0] ss:$16 sps:$4 sm:$0xff]  }
  0x8c   : > { %3620 = vmatpush2.bf16.msra.mxu1 %v5040_v16  ;;  %3580 = vmatprep.subr.bf16.mxu0 %v5045_v17  ;;  %v5118_v16 = vld [vmem:[%s5710_s24 + $0x9a4] ss:$16 sps:$4 sm:$0xff]  }
  0x8d   : > { %3621 = vmatprep.subr.bf16.mxu1 %v5048_v20  ;;  %v5121_v17 = vld [vmem:[%s5710_s24 + $0xba4] ss:$16 sps:$4 sm:$0xff]   ;;  %v5116_v20 = vld [vmem:[%s5710_s24 + $0x9a0] ss:$16 sps:$4 sm:$0xff]  }
  0x8f   : > { %3581 = vmatpush2.bf16.msra.mxu0 %v5043_v21  ;;  %v5119_v21 = vld [vmem:[%s5710_s24 + $0xba0] ss:$16 sps:$4 sm:$0xff]  }
  0x90   : > { %3622 = vmatpush2.bf16.msra.mxu1 %v5046_v22  ;;  %3582 = vmatprep.subr.bf16.mxu0 %v5051_v23  ;;  %v5124_v22 = vld [vmem:[%s5710_s24 + $0x984] ss:$16 sps:$4 sm:$0xff]  }
  0x91   : > { %3623 = vmatprep.subr.bf16.mxu1 %v5054_v25  ;;  %v5127_v23 = vld [vmem:[%s5710_s24 + $0xb84] ss:$16 sps:$4 sm:$0xff]   ;;  %v5122_v25 = vld [vmem:[%s5710_s24 + $0x980] ss:$16 sps:$4 sm:$0xff]  }
  0x93   : > { %3583 = vmatpush2.bf16.msra.mxu0 %v5049_v26  ;;  %v5125_v26 = vld [vmem:[%s5710_s24 + $0xb80] ss:$16 sps:$4 sm:$0xff]  }
  0x94   : > { %3624 = vmatpush2.bf16.msra.mxu1 %v5052_v28  ;;  %3634 = vmatprep.subr.bf16.mxu0 %v5058_v29  ;;  %v5130_v28 = vld [vmem:[%s5710_s24 + $0x964] ss:$16 sps:$4 sm:$0xff]  }
  0x95   : > { %3675 = vmatprep.subr.bf16.mxu1 %v5061_v30  ;;  %v5133_v29 = vld [vmem:[%s5710_s24 + $0xb64] ss:$16 sps:$4 sm:$0xff]   ;;  %v5128_v30 = vld [vmem:[%s5710_s24 + $0x960] ss:$16 sps:$4 sm:$0xff]  }
  0x96   : > { %3585 = vmatmul.mubr.bf16.vlgmr.msra.gmra.mxu0 %v5881_v27 }
  0x97   : > { %3626 = vmatmul.mubr.bf16.vlgmr.msra.gmra.mxu1 %v5888_v31  ;;  %3635 = vmatpush1.bf16.msra.mxu0 %v5056_v32  ;;  %v5131_v32 = vld [vmem:[%s5710_s24 + $0xb60] ss:$16 sps:$4 sm:$0xff]  }
  0x98   : > { %3676 = vmatpush1.bf16.msra.mxu1 %v5059_v7  ;;  %3636 = vmatprep.subr.bf16.mxu0 %v5064_v34  ;;  %v5136_v7 = vld [vmem:[%s5710_s24 + $0x944] ss:$16 sps:$4 sm:$0xff]  }
  0x99   : > { %3677 = vmatprep.subr.bf16.mxu1 %v5067_v35  ;;  %3666 = vmatprep.mubr.bf16.mxu0 %v5910_v42  ;;  %v5139_v34 = vld [vmem:[%s5710_s24 + $0xb44] ss:$16 sps:$4 sm:$0xff]   ;;  %v845_v35 = vcombine.high %v5893_v33, %v5893_v33  ;;  %v5140_v33 = vld [vmem:[%s5710_s24 + $0x920] ss:$16 sps:$4 sm:$0xff]  }
  0x9a   : > { %3707 = vmatprep.mubr.bf16.mxu1 %v5915_v43 }
  0x9b   : > { %3637 = vmatpush1.bf16.msra.mxu0 %v5062_v38  ;;  %v5137_v38 = vld [vmem:[%s5710_s24 + $0xb40] ss:$16 sps:$4 sm:$0xff]  }
  0x9c   : > { %3678 = vmatpush1.bf16.msra.mxu1 %v5065_v39  ;;  %3638 = vmatprep.subr.bf16.mxu0 %v5070_v40  ;;  %v5142_v39 = vld [vmem:[%s5710_s24 + $0x924] ss:$16 sps:$4 sm:$0xff]  }
  0x9d   : > { %3679 = vmatprep.subr.bf16.mxu1 %v5073_v41  ;;  %v5145_v40 = vld [vmem:[%s5710_s24 + $0xb24] ss:$16 sps:$4 sm:$0xff]   ;;  %v5969_v41 = vrot.slane %v845_v35, %v5760_v50  ;;  %v5203_v35 = vld [vmem:[%s5710_s24 + $0xfe0] ss:$16 sps:$4 sm:$0xff]  }
  0x9f   : > { %3639 = vmatpush1.bf16.msra.mxu0 %v5068_v45  ;;  %v5143_v45 = vld [vmem:[%s5710_s24 + $0xb20] ss:$16 sps:$4 sm:$0xff]  }
  0xa0   : > { %3680 = vmatpush1.bf16.msra.mxu1 %v5071_v46  ;;  %3640 = vmatprep.subr.bf16.mxu0 %v5076_v47  ;;  %v5148_v46 = vld [vmem:[%s5710_s24 + $0x904] ss:$16 sps:$4 sm:$0xff]  }
  0xa1   : > { %3681 = vmatprep.subr.bf16.mxu1 %v5079_v48  ;;  %v5151_v47 = vld [vmem:[%s5710_s24 + $0xb04] ss:$16 sps:$4 sm:$0xff]   ;;  %v861_v48 = vcombine.high %v5969_v41, %v5969_v41 }
  0xa3   : > { %3641 = vmatpush1.bf16.msra.mxu0 %v5074_v49  ;;  %v5979_v49 = vrot.slane %v5899_v36, %v5760_v50  ;;  %v5152_v36 = vld [vmem:[%s5710_s24 + $0xce0] ss:$16 sps:$4 sm:$0xff]  }
  0xa4   : > { %3682 = vmatpush1.bf16.msra.mxu1 %v5077_v51  ;;  %3642 = vmatprep.subr.bf16.mxu0 %v5082_v52  ;;  %v5146_v51 = vld [vmem:[%s5710_s24 + $0x900] ss:$16 sps:$4 sm:$0xff]  }
  0xa5   : > { %3683 = vmatprep.subr.bf16.mxu1 %v5085_v53  ;;  %v5149_v52 = vld [vmem:[%s5710_s24 + $0xb00] ss:$16 sps:$4 sm:$0xff]   ;;  %v5154_v53 = vld [vmem:[%s5710_s24 + $0xce4] ss:$16 sps:$4 sm:$0xff]  }
  0xa7   : > { %3643 = vmatpush1.bf16.msra.mxu0 %v5080_v54  ;;  %v5157_v54 = vld [vmem:[%s5710_s24 + $0xee4] ss:$16 sps:$4 sm:$0xff]  }
  0xa8   : > { %3684 = vmatpush1.bf16.msra.mxu1 %v5083_v55  ;;  %3644 = vmatprep.subr.bf16.mxu0 %v5088_v56  ;;  %v5986_v55 = vrot.slane %v861_v48, %v5760_v50  ;;  %v5990_v56 = vcombine.high %v5979_v49, %v5979_v49  ;;  %v5220_v48 = vld [vmem:[%s5710_s24 + $0xd84] ss:$16 sps:$4 sm:$0xff]  }
  0xa9   : > { %3685 = vmatprep.subr.bf16.mxu1 %v5091_v57  ;;  %v5155_v57 = vld [vmem:[%s5710_s24 + $0xee0] ss:$16 sps:$4 sm:$0xff]  }
  0xab   : > { %3645 = vmatpush1.bf16.msra.mxu0 %v5086_v58  ;;  %v5160_v58 = vld [vmem:[%s5710_s24 + $0xcc4] ss:$16 sps:$4 sm:$0xff]  }
  0xac   : > { %3686 = vmatpush1.bf16.msra.mxu1 %v5089_v59  ;;  %3646 = vmatprep.subr.bf16.mxu0 %v5094_v60  ;;  %v5163_v59 = vld [vmem:[%s5710_s24 + $0xec4] ss:$16 sps:$4 sm:$0xff]   ;;  %v5998_v60 = vcombine.high %v5986_v55, %v5986_v55 }
  0xad   : > { %3687 = vmatprep.subr.bf16.mxu1 %v5097_v62  ;;  %v5158_v62 = vld [vmem:[%s5710_s24 + $0xcc0] ss:$16 sps:$4 sm:$0xff]  }
  0xaf   : > { %3647 = vmatpush1.bf16.msra.mxu0 %v5092_v63  ;;  %v5161_v63 = vld [vmem:[%s5710_s24 + $0xec0] ss:$16 sps:$4 sm:$0xff]  }
  0xb0   : > { %3688 = vmatpush1.bf16.msra.mxu1 %v5095_v0  ;;  %3648 = vmatprep.subr.bf16.mxu0 %v5100_v2  ;;  %v5166_v0 = vld [vmem:[%s5710_s24 + $0xca4] ss:$16 sps:$4 sm:$0xff]  }
  0xb1   : > { %3689 = vmatprep.subr.bf16.mxu1 %v5103_v3  ;;  %v5169_v2 = vld [vmem:[%s5710_s24 + $0xea4] ss:$16 sps:$4 sm:$0xff]   ;;  %v5164_v3 = vld [vmem:[%s5710_s24 + $0xca0] ss:$16 sps:$4 sm:$0xff]  }
  0xb3   : > { %3649 = vmatpush1.bf16.msra.mxu0 %v5098_v4  ;;  %v5167_v4 = vld [vmem:[%s5710_s24 + $0xea0] ss:$16 sps:$4 sm:$0xff]  }
  0xb4   : > { %3690 = vmatpush1.bf16.msra.mxu1 %v5101_v5  ;;  %3650 = vmatprep.subr.bf16.mxu0 %v5106_v6  ;;  %v5172_v5 = vld [vmem:[%s5710_s24 + $0xc84] ss:$16 sps:$4 sm:$0xff]  }
  0xb5   : > { %3691 = vmatprep.subr.bf16.mxu1 %v5109_v8  ;;  %v5175_v6 = vld [vmem:[%s5710_s24 + $0xe84] ss:$16 sps:$4 sm:$0xff]   ;;  %v5170_v8 = vld [vmem:[%s5710_s24 + $0xc80] ss:$16 sps:$4 sm:$0xff]  }
  0xb7   : > { %3651 = vmatpush2.bf16.msra.mxu0 %v5104_v9  ;;  %v5173_v9 = vld [vmem:[%s5710_s24 + $0xe80] ss:$16 sps:$4 sm:$0xff]  }
  0xb8   : > { %3692 = vmatpush2.bf16.msra.mxu1 %v5107_v10  ;;  %3652 = vmatprep.subr.bf16.mxu0 %v5112_v11  ;;  %v5178_v10 = vld [vmem:[%s5710_s24 + $0xc64] ss:$16 sps:$4 sm:$0xff]  }
  0xb9   : > { %3693 = vmatprep.subr.bf16.mxu1 %v5115_v12  ;;  %v5181_v11 = vld [vmem:[%s5710_s24 + $0xe64] ss:$16 sps:$4 sm:$0xff]   ;;  %v5176_v12 = vld [vmem:[%s5710_s24 + $0xc60] ss:$16 sps:$4 sm:$0xff]  }
  0xbb   : > { %3653 = vmatpush2.bf16.msra.mxu0 %v5110_v13  ;;  %v5179_v13 = vld [vmem:[%s5710_s24 + $0xe60] ss:$16 sps:$4 sm:$0xff]  }
  0xbc   : > { %3694 = vmatpush2.bf16.msra.mxu1 %v5113_v15  ;;  %3654 = vmatprep.subr.bf16.mxu0 %v5118_v16  ;;  %v5184_v15 = vld [vmem:[%s5710_s24 + $0xc44] ss:$16 sps:$4 sm:$0xff]  }
  0xbd   : > { %3695 = vmatprep.subr.bf16.mxu1 %v5121_v17  ;;  %v5187_v16 = vld [vmem:[%s5710_s24 + $0xe44] ss:$16 sps:$4 sm:$0xff]   ;;  %v5182_v17 = vld [vmem:[%s5710_s24 + $0xc40] ss:$16 sps:$4 sm:$0xff]  }
  0xbf   : > { %3655 = vmatpush2.bf16.msra.mxu0 %v5116_v20  ;;  %v5185_v20 = vld [vmem:[%s5710_s24 + $0xe40] ss:$16 sps:$4 sm:$0xff]  }
  0xc0   : > { %3696 = vmatpush2.bf16.msra.mxu1 %v5119_v21  ;;  %3656 = vmatprep.subr.bf16.mxu0 %v5124_v22  ;;  %v5190_v21 = vld [vmem:[%s5710_s24 + $0xc24] ss:$16 sps:$4 sm:$0xff]  }
  0xc1   : > { %3697 = vmatprep.subr.bf16.mxu1 %v5127_v23  ;;  %v5193_v22 = vld [vmem:[%s5710_s24 + $0xe24] ss:$16 sps:$4 sm:$0xff]   ;;  %v5188_v23 = vld [vmem:[%s5710_s24 + $0xc20] ss:$16 sps:$4 sm:$0xff]  }
  0xc3   : > { %3657 = vmatpush2.bf16.msra.mxu0 %v5122_v25  ;;  %v5191_v25 = vld [vmem:[%s5710_s24 + $0xe20] ss:$16 sps:$4 sm:$0xff]  }
  0xc4   : > { %3698 = vmatpush2.bf16.msra.mxu1 %v5125_v26  ;;  %3658 = vmatprep.subr.bf16.mxu0 %v5130_v28  ;;  %v5196_v26 = vld [vmem:[%s5710_s24 + $0xc04] ss:$16 sps:$4 sm:$0xff]  }
  0xc5   : > { %3699 = vmatprep.subr.bf16.mxu1 %v5133_v29  ;;  %v5199_v28 = vld [vmem:[%s5710_s24 + $0xe04] ss:$16 sps:$4 sm:$0xff]   ;;  %v5194_v29 = vld [vmem:[%s5710_s24 + $0xc00] ss:$16 sps:$4 sm:$0xff]  }
  0xc7   : > { %3659 = vmatpush2.bf16.msra.mxu0 %v5128_v30  ;;  %v5197_v30 = vld [vmem:[%s5710_s24 + $0xe00] ss:$16 sps:$4 sm:$0xff]  }
  0xc8   : > { %3700 = vmatpush2.bf16.msra.mxu1 %v5131_v32  ;;  %3660 = vmatprep.subr.bf16.mxu0 %v5136_v7  ;;  %v5202_v32 = vld [vmem:[%s5710_s24 + $0xde4] ss:$16 sps:$4 sm:$0xff]  }
  0xc9   : > { %3701 = vmatprep.subr.bf16.mxu1 %v5139_v34  ;;  %v5205_v7 = vld [vmem:[%s5710_s24 + $0xfe4] ss:$16 sps:$4 sm:$0xff]   ;;  %v5200_v34 = vld [vmem:[%s5710_s24 + $0xde0] ss:$16 sps:$4 sm:$0xff]  }
  0xcb   : > { %3661 = vmatpush2.bf16.msra.mxu0 %v5134_v37  ;;  %v5208_v37 = vld [vmem:[%s5710_s24 + $0xdc4] ss:$16 sps:$4 sm:$0xff]  }
  0xcc   : > { %3702 = vmatpush2.bf16.msra.mxu1 %v5137_v38  ;;  %3662 = vmatprep.subr.bf16.mxu0 %v5142_v39  ;;  %v5211_v38 = vld [vmem:[%s5710_s24 + $0xfc4] ss:$16 sps:$4 sm:$0xff]   ;;  %v5206_v39 = vld [vmem:[%s5710_s24 + $0xdc0] ss:$16 sps:$4 sm:$0xff]  }
  0xcd   : > { %3703 = vmatprep.subr.bf16.mxu1 %v5145_v40  ;;  %v5209_v40 = vld [vmem:[%s5710_s24 + $0xfc0] ss:$16 sps:$4 sm:$0xff]  }
  0xcf   : > { %3663 = vmatpush2.bf16.msra.mxu0 %v5140_v33  ;;  %v5214_v33 = vld [vmem:[%s5710_s24 + $0xda4] ss:$16 sps:$4 sm:$0xff]  }
  0xd0   : > { %3704 = vmatpush2.bf16.msra.mxu1 %v5143_v45  ;;  %3664 = vmatprep.subr.bf16.mxu0 %v5148_v46  ;;  %v5217_v45 = vld [vmem:[%s5710_s24 + $0xfa4] ss:$16 sps:$4 sm:$0xff]   ;;  %v5212_v46 = vld [vmem:[%s5710_s24 + $0xda0] ss:$16 sps:$4 sm:$0xff]  }
  0xd1   : > { %3705 = vmatprep.subr.bf16.mxu1 %v5151_v47  ;;  %v5215_v47 = vld [vmem:[%s5710_s24 + $0xfa0] ss:$16 sps:$4 sm:$0xff]  }
  0xd3   : > { %3665 = vmatpush2.bf16.msra.mxu0 %v5146_v51  ;;  %v5223_v51 = vld [vmem:[%s5710_s24 + $0xf84] ss:$16 sps:$4 sm:$0xff]  }
  0xd4   : > { %3706 = vmatpush2.bf16.msra.mxu1 %v5149_v52  ;;  %3716 = vmatprep.subr.bf16.mxu0 %v5154_v53  ;;  %v5218_v52 = vld [vmem:[%s5710_s24 + $0xd80] ss:$16 sps:$4 sm:$0xff]  }
  0xd5   : > { %3757 = vmatprep.subr.bf16.mxu1 %v5157_v54  ;;  %v5221_v53 = vld [vmem:[%s5710_s24 + $0xf80] ss:$16 sps:$4 sm:$0xff]   ;;  %v5226_v54 = vld [vmem:[%s5710_s24 + $0xd64] ss:$16 sps:$4 sm:$0xff]  }
  0xd6   : > { %3667 = vmatmul.mubr.bf16.vlgmr.msra.gmra.mxu0 %v5979_v49 }
  0xd7   : > { %3708 = vmatmul.mubr.bf16.vlgmr.msra.gmra.mxu1 %v5990_v56  ;;  %3717 = vmatpush1.bf16.msra.mxu0 %v5152_v36  ;;  %v5229_v36 = vld [vmem:[%s5710_s24 + $0xf64] ss:$16 sps:$4 sm:$0xff]  }
  0xd8   : > { %3758 = vmatpush1.bf16.msra.mxu1 %v5155_v57  ;;  %3718 = vmatprep.subr.bf16.mxu0 %v5160_v58  ;;  %v5224_v57 = vld [vmem:[%s5710_s24 + $0xd60] ss:$16 sps:$4 sm:$0xff]  }
  0xd9   : > { %3759 = vmatprep.subr.bf16.mxu1 %v5163_v59  ;;  %3748 = vmatprep.mubr.bf16.mxu0 %v5986_v55  ;;  %v5227_v58 = vld [vmem:[%s5710_s24 + $0xf60] ss:$16 sps:$4 sm:$0xff]   ;;  %v5232_v59 = vld [vmem:[%s5710_s24 + $0xd44] ss:$16 sps:$4 sm:$0xff]  }
  0xda   : > { %3789 = vmatprep.mubr.bf16.mxu1 %v5998_v60 }
  0xdb   : > { %3719 = vmatpush1.bf16.msra.mxu0 %v5158_v62  ;;  %v5235_v62 = vld [vmem:[%s5710_s24 + $0xf44] ss:$16 sps:$4 sm:$0xff]  }
  0xdc   : > { %3760 = vmatpush1.bf16.msra.mxu1 %v5161_v63  ;;  %3720 = vmatprep.subr.bf16.mxu0 %v5166_v0  ;;  %v5230_v63 = vld [vmem:[%s5710_s24 + $0xd40] ss:$16 sps:$4 sm:$0xff]  }
  0xdd   : > { %3761 = vmatprep.subr.bf16.mxu1 %v5169_v2  ;;  %v5233_v0 = vld [vmem:[%s5710_s24 + $0xf40] ss:$16 sps:$4 sm:$0xff]   ;;  %v5238_v2 = vld [vmem:[%s5710_s24 + $0xd24] ss:$16 sps:$4 sm:$0xff]  }
  0xdf   : > { %3721 = vmatpush1.bf16.msra.mxu0 %v5164_v3  ;;  %v5241_v3 = vld [vmem:[%s5710_s24 + $0xf24] ss:$16 sps:$4 sm:$0xff]  }
  0xe0   : > { %3762 = vmatpush1.bf16.msra.mxu1 %v5167_v4  ;;  %3722 = vmatprep.subr.bf16.mxu0 %v5172_v5  ;;  %v5236_v4 = vld [vmem:[%s5710_s24 + $0xd20] ss:$16 sps:$4 sm:$0xff]  }
  0xe1   : > { %3763 = vmatprep.subr.bf16.mxu1 %v5175_v6  ;;  %v5239_v5 = vld [vmem:[%s5710_s24 + $0xf20] ss:$16 sps:$4 sm:$0xff]   ;;  %v5244_v6 = vld [vmem:[%s5710_s24 + $0xd04] ss:$16 sps:$4 sm:$0xff]  }
  0xe3   : > { %3723 = vmatpush1.bf16.msra.mxu0 %v5170_v8  ;;  %v5247_v8 = vld [vmem:[%s5710_s24 + $0xf04] ss:$16 sps:$4 sm:$0xff]  }
  0xe4   : > { %3764 = vmatpush1.bf16.msra.mxu1 %v5173_v9  ;;  %3724 = vmatprep.subr.bf16.mxu0 %v5178_v10  ;;  %v6062_v9 = vrot.slane %v5969_v41, %v5760_v50  ;;  %v5242_v10 = vld [vmem:[%s5710_s24 + $0xd00] ss:$16 sps:$4 sm:$0xff]   ;;  %v5252_v50 = vld [vmem:[%s5710_s24 + $0x2e8] ss:$16 sps:$4 sm:$0xff]   ;;  %v5257_v41 = vld [vmem:[%s5710_s24 + $0xcc] ss:$16 sps:$4 sm:$0xff]  }
  0xe5   : > { %3765 = vmatprep.subr.bf16.mxu1 %v5181_v11  ;;  %v5245_v11 = vld [vmem:[%s5710_s24 + $0xf00] ss:$16 sps:$4 sm:$0xff]  }
  0xe7   : > { %3725 = vmatpush1.bf16.msra.mxu0 %v5176_v12  ;;  %v5251_v12 = vld [vmem:[%s5710_s24 + $0xec] ss:$16 sps:$4 sm:$0xff]  }
  0xe8   : > { %3766 = vmatpush1.bf16.msra.mxu1 %v5179_v13  ;;  %3726 = vmatprep.subr.bf16.mxu0 %v5184_v15  ;;  %v5254_v13 = vld [vmem:[%s5710_s24 + $0x2ec] ss:$16 sps:$4 sm:$0xff]   ;;  %v6070_v15 = vcombine.high %v6062_v9, %v6062_v9 }
  0xe9   : > { %3767 = vmatprep.subr.bf16.mxu1 %v5187_v16  ;;  %v5249_v16 = vld [vmem:[%s5710_s24 + $0xe8] ss:$16 sps:$4 sm:$0xff]  }
  0xeb   : > { %3727 = vmatpush1.bf16.msra.mxu0 %v5182_v17  ;;  %v5260_v17 = vld [vmem:[%s5710_s24 + $0x2cc] ss:$16 sps:$4 sm:$0xff]  }
  0xec   : > { %3768 = vmatpush1.bf16.msra.mxu1 %v5185_v20  ;;  %3728 = vmatprep.subr.bf16.mxu0 %v5190_v21  ;;  %v5255_v20 = vld [vmem:[%s5710_s24 + $0xc8] ss:$16 sps:$4 sm:$0xff]  }
  0xed   : > { %3769 = vmatprep.subr.bf16.mxu1 %v5193_v22 }
  0xef   : > { %3729 = vmatpush1.bf16.msra.mxu0 %v5188_v23  ;;  %v5258_v23 = vld [vmem:[%s5710_s24 + $0x2c8] ss:$16 sps:$4 sm:$0xff]  }
  0xf0   : > { %3770 = vmatpush1.bf16.msra.mxu1 %v5191_v25  ;;  %3730 = vmatprep.subr.bf16.mxu0 %v5196_v26 }
  0xf1   : > { %3771 = vmatprep.subr.bf16.mxu1 %v5199_v28 }
  0xf3   : > { %3731 = vmatpush1.bf16.msra.mxu0 %v5194_v29  ;;  %v5263_v29 = vld [vmem:[%s5710_s24 + $0xac] ss:$16 sps:$4 sm:$0xff]  }
  0xf4   : > { %3772 = vmatpush1.bf16.msra.mxu1 %v5197_v30  ;;  %3732 = vmatprep.subr.bf16.mxu0 %v5202_v32  ;;  %v5266_v30 = vld [vmem:[%s5710_s24 + $0x2ac] ss:$16 sps:$4 sm:$0xff]  }
  0xf5   : > { %3773 = vmatprep.subr.bf16.mxu1 %v5205_v7  ;;  %v5261_v7 = vld [vmem:[%s5710_s24 + $0xa8] ss:$16 sps:$4 sm:$0xff]  }
  0xf7   : > { %3733 = vmatpush2.bf16.msra.mxu0 %v5200_v34  ;;  %v5264_v34 = vld [vmem:[%s5710_s24 + $0x2a8] ss:$16 sps:$4 sm:$0xff]  }
  0xf8   : > { %3774 = vmatpush2.bf16.msra.mxu1 %v5203_v35  ;;  %3734 = vmatprep.subr.bf16.mxu0 %v5208_v37 }
  0xf9   : > { %3775 = vmatprep.subr.bf16.mxu1 %v5211_v38 }
  0xfb   : > { %3735 = vmatpush2.bf16.msra.mxu0 %v5206_v39 }
  0xfc   : > { %3776 = vmatpush2.bf16.msra.mxu1 %v5209_v40  ;;  %3736 = vmatprep.subr.bf16.mxu0 %v5214_v33  ;;  %v5269_v40 = vld [vmem:[%s5710_s24 + $0x8c] ss:$16 sps:$4 sm:$0xff]  }
  0xfd   : > { %3777 = vmatprep.subr.bf16.mxu1 %v5217_v45  ;;  %v5272_v33 = vld [vmem:[%s5710_s24 + $0x28c] ss:$16 sps:$4 sm:$0xff]  }
  0xfe   : > { %v5275_v45 = vld [vmem:[%s5710_s24 + $0x6c] ss:$16 sps:$4 sm:$0xff]  }
  0xff   : > { %3737 = vmatpush2.bf16.msra.mxu0 %v5212_v46  ;;  %v5278_v46 = vld [vmem:[%s5710_s24 + $0x26c] ss:$16 sps:$4 sm:$0xff]  }
 0x100   : > { %3778 = vmatpush2.bf16.msra.mxu1 %v5215_v47  ;;  %3738 = vmatprep.subr.bf16.mxu0 %v5220_v48  ;;  %v5273_v47 = vld [vmem:[%s5710_s24 + $0x68] ss:$16 sps:$4 sm:$0xff]  }
 0x101   : > { %3779 = vmatprep.subr.bf16.mxu1 %v5223_v51  ;;  %v5276_v48 = vld [vmem:[%s5710_s24 + $0x268] ss:$16 sps:$4 sm:$0xff]   ;;  %v5281_v51 = vld [vmem:[%s5710_s24 + $0x4c] ss:$16 sps:$4 sm:$0xff]  }
 0x103   : > { %3739 = vmatpush2.bf16.msra.mxu0 %v5218_v52  ;;  %v5284_v52 = vld [vmem:[%s5710_s24 + $0x24c] ss:$16 sps:$4 sm:$0xff]  }
 0x104   : > { %3780 = vmatpush2.bf16.msra.mxu1 %v5221_v53  ;;  %3740 = vmatprep.subr.bf16.mxu0 %v5226_v54  ;;  %v5279_v53 = vld [vmem:[%s5710_s24 + $0x48] ss:$16 sps:$4 sm:$0xff]  }
 0x105   : > { %3781 = vmatprep.subr.bf16.mxu1 %v5229_v36  ;;  %v5282_v54 = vld [vmem:[%s5710_s24 + $0x248] ss:$16 sps:$4 sm:$0xff]   ;;  %v5287_v36 = vld [vmem:[%s5710_s24 + $0x2c] ss:$16 sps:$4 sm:$0xff]  }
 0x107   : > { %3741 = vmatpush2.bf16.msra.mxu0 %v5224_v57  ;;  %v5290_v57 = vld [vmem:[%s5710_s24 + $0x22c] ss:$16 sps:$4 sm:$0xff]  }
 0x108   : > { %3782 = vmatpush2.bf16.msra.mxu1 %v5227_v58  ;;  %3742 = vmatprep.subr.bf16.mxu0 %v5232_v59  ;;  %v5285_v58 = vld [vmem:[%s5710_s24 + $0x28] ss:$16 sps:$4 sm:$0xff]  }
 0x109   : > { %3783 = vmatprep.subr.bf16.mxu1 %v5235_v62  ;;  %v5288_v59 = vld [vmem:[%s5710_s24 + $0x228] ss:$16 sps:$4 sm:$0xff]   ;;  %v5293_v62 = vld [vmem:[%s5710_s24 + $0xc] ss:$16 sps:$4 sm:$0xff]  }
 0x10b   : > { %3743 = vmatpush2.bf16.msra.mxu0 %v5230_v63  ;;  %v5296_v63 = vld [vmem:[%s5710_s24 + $0x20c] ss:$16 sps:$4 sm:$0xff]  }
 0x10c   : > { %3784 = vmatpush2.bf16.msra.mxu1 %v5233_v0  ;;  %3744 = vmatprep.subr.bf16.mxu0 %v5238_v2  ;;  %v5291_v0 = vld [vmem:[%s5710_s24 + $0x8] ss:$16 sps:$4 sm:$0xff]  }
 0x10d   : > { %3785 = vmatprep.subr.bf16.mxu1 %v5241_v3  ;;  %v5294_v2 = vld [vmem:[%s5710_s24 + $0x208] ss:$16 sps:$4 sm:$0xff]   ;;  %v5299_v3 = vld [vmem:[%s5710_s24 + $0x1ec] ss:$16 sps:$4 sm:$0xff]  }
 0x10f   : > { %3745 = vmatpush2.bf16.msra.mxu0 %v5236_v4  ;;  %v5302_v4 = vld [vmem:[%s5710_s24 + $0x3ec] ss:$16 sps:$4 sm:$0xff]  }
 0x110   : > { %3786 = vmatpush2.bf16.msra.mxu1 %v5239_v5  ;;  %3746 = vmatprep.subr.bf16.mxu0 %v5244_v6  ;;  %v5297_v5 = vld [vmem:[%s5710_s24 + $0x1e8] ss:$16 sps:$4 sm:$0xff]  }
 0x111   : > { %3787 = vmatprep.subr.bf16.mxu1 %v5247_v8  ;;  %v5300_v6 = vld [vmem:[%s5710_s24 + $0x3e8] ss:$16 sps:$4 sm:$0xff]   ;;  %v5305_v8 = vld [vmem:[%s5710_s24 + $0x1cc] ss:$16 sps:$4 sm:$0xff]  }
 0x113   : > { %3747 = vmatpush2.bf16.msra.mxu0 %v5242_v10  ;;  %v5308_v10 = vld [vmem:[%s5710_s24 + $0x3cc] ss:$16 sps:$4 sm:$0xff]  }
 0x114   : > { %3788 = vmatpush2.bf16.msra.mxu1 %v5245_v11  ;;  %3798 = vmatprep.subr.bf16.mxu0 %v5251_v12  ;;  %v5303_v11 = vld [vmem:[%s5710_s24 + $0x1c8] ss:$16 sps:$4 sm:$0xff]  }
 0x115   : > { %3839 = vmatprep.subr.bf16.mxu1 %v5254_v13  ;;  %v5306_v12 = vld [vmem:[%s5710_s24 + $0x3c8] ss:$16 sps:$4 sm:$0xff]   ;;  %v5311_v13 = vld [vmem:[%s5710_s24 + $0x1ac] ss:$16 sps:$4 sm:$0xff]  }
 0x116   : > { %v3504_v21 = vpop.f32.mrf.mxu0  ;;  %3749 = vmatmul.mubr.bf16.vlgmr.msra.gmra.mxu0 %v6062_v9 }
 0x117   : > { %v3545_v22 = vpop.f32.mrf.mxu1  ;;  %3790 = vmatmul.mubr.bf16.vlgmr.msra.gmra.mxu1 %v6070_v15  ;;  %3799 = vmatpush1.bf16.msra.mxu0 %v5249_v16  ;;  %v5314_v16 = vld [vmem:[%s5710_s24 + $0x3ac] ss:$16 sps:$4 sm:$0xff]  }
 0x118   : > { %v6080_v25 = vadd.f32 %v3545_v22, %v3504_v21  ;;  %3840 = vmatpush1.bf16.msra.mxu1 %v5252_v50  ;;  %v3506_v26 = vpop.f32.mrf.mxu0  ;;  %3800 = vmatprep.subr.bf16.mxu0 %v5257_v41  ;;  %v5309_v50 = vld [vmem:[%s5710_s24 + $0x1a8] ss:$16 sps:$4 sm:$0xff]  }
 0x119   : > { %v3547_v28 = vpop.f32.mrf.mxu1  ;;  %3841 = vmatprep.subr.bf16.mxu1 %v5260_v17  ;;  %3830 = vmatprep.mubr.bf16.mxu0 %v5772_v61  ;;  %v5267_v61 = vld [vmem:[%s5710_s24 + $0x88] ss:$16 sps:$4 sm:$0xff]   ;;  %v5317_v17 = vld [vmem:[%s5710_s24 + $0x18c] ss:$16 sps:$4 sm:$0xff]  }
 0x11a   : > { %v6084_v32 = vadd.f32 %v3547_v28, %v3506_v26  ;;  %3871 = vmatprep.mubr.bf16.mxu1 %v5779_v1  ;;  %v3508_v35 = vpop.f32.mrf.mxu0  ;;  %v5270_v1 = vld [vmem:[%s5710_s24 + $0x288] ss:$16 sps:$4 sm:$0xff]   ;;  %v5326_v26 = vld [vmem:[%s5710_s24 + $0x36c] ss:$16 sps:$4 sm:$0xff]  }
 0x11b   : > { %v3549_v37 = vpop.f32.mrf.mxu1  ;;  %3801 = vmatpush1.bf16.msra.mxu0 %v5255_v20  ;;  %v5312_v41 = vld [vmem:[%s5710_s24 + $0x3a8] ss:$16 sps:$4 sm:$0xff]   ;;  %v5320_v20 = vld [vmem:[%s5710_s24 + $0x38c] ss:$16 sps:$4 sm:$0xff]  }
 0x11c   : > { %3842 = vmatpush1.bf16.msra.mxu1 %v5258_v23  ;;  %v3509_v38 = vpop.f32.mrf.mxu0  ;;  %3802 = vmatprep.subr.bf16.mxu0 %v5263_v29  ;;  %v5315_v21 = vld [vmem:[%s5710_s24 + $0x188] ss:$16 sps:$4 sm:$0xff]   ;;  %v5323_v23 = vld [vmem:[%s5710_s24 + $0x16c] ss:$16 sps:$4 sm:$0xff]  }
 0x11d   : > { %v3550_v39 = vpop.f32.mrf.mxu1  ;;  %3843 = vmatprep.subr.bf16.mxu1 %v5266_v30  ;;  %v5318_v22 = vld [vmem:[%s5710_s24 + $0x388] ss:$16 sps:$4 sm:$0xff]   ;;  %v5329_v30 = vld [vmem:[%s5710_s24 + $0x14c] ss:$16 sps:$4 sm:$0xff]  }
 0x11e   : > { %v5321_v28 = vld [vmem:[%s5710_s24 + $0x168] ss:$16 sps:$4 sm:$0xff]   ;;  %v5335_v37 = vld [vmem:[%s5710_s24 + $0x12c] ss:$16 sps:$4 sm:$0xff]  }
 0x11f   : > { %3803 = vmatpush1.bf16.msra.mxu0 %v5261_v7  ;;  %v5324_v29 = vld [vmem:[%s5710_s24 + $0x368] ss:$16 sps:$4 sm:$0xff]   ;;  %v5332_v7 = vld [vmem:[%s5710_s24 + $0x34c] ss:$16 sps:$4 sm:$0xff]  }
 0x120   : > { %3844 = vmatpush1.bf16.msra.mxu1 %v5264_v34  ;;  %3804 = vmatprep.subr.bf16.mxu0 %v5269_v40  ;;  %v5327_v34 = vld [vmem:[%s5710_s24 + $0x148] ss:$16 sps:$4 sm:$0xff]   ;;  %v5338_v38 = vld [vmem:[%s5710_s24 + $0x32c] ss:$16 sps:$4 sm:$0xff]  }
 0x121   : > { %3845 = vmatprep.subr.bf16.mxu1 %v5272_v33  ;;  %v5330_v35 = vld [vmem:[%s5710_s24 + $0x348] ss:$16 sps:$4 sm:$0xff]   ;;  %v5341_v33 = vld [vmem:[%s5710_s24 + $0x10c] ss:$16 sps:$4 sm:$0xff]  }
 0x122   : > { %v5333_v39 = vld [vmem:[%s5710_s24 + $0x128] ss:$16 sps:$4 sm:$0xff]  }
 0x123   : > { %3805 = vmatpush1.bf16.msra.mxu0 %v5267_v61  ;;  %v5336_v40 = vld [vmem:[%s5710_s24 + $0x328] ss:$16 sps:$4 sm:$0xff]   ;;  %v5344_v61 = vld [vmem:[%s5710_s24 + $0x30c] ss:$16 sps:$4 sm:$0xff]  }
 0x124   : > { %3846 = vmatpush1.bf16.msra.mxu1 %v5270_v1  ;;  %3806 = vmatprep.subr.bf16.mxu0 %v5275_v45  ;;  %v5339_v1 = vld [vmem:[%s5710_s24 + $0x108] ss:$16 sps:$4 sm:$0xff]  }
 0x125   : > { %3847 = vmatprep.subr.bf16.mxu1 %v5278_v46  ;;  %v5342_v45 = vld [vmem:[%s5710_s24 + $0x308] ss:$16 sps:$4 sm:$0xff]   ;;  %v5347_v46 = vld [vmem:[%s5710_s24 + $0x4ec] ss:$16 sps:$4 sm:$0xff]  }
 0x127   : > { %3807 = vmatpush1.bf16.msra.mxu0 %v5273_v47  ;;  %v5350_v47 = vld [vmem:[%s5710_s24 + $0x6ec] ss:$16 sps:$4 sm:$0xff]  }
 0x128   : > { %3848 = vmatpush1.bf16.msra.mxu1 %v5276_v48  ;;  %3808 = vmatprep.subr.bf16.mxu0 %v5281_v51  ;;  %v5345_v48 = vld [vmem:[%s5710_s24 + $0x4e8] ss:$16 sps:$4 sm:$0xff]  }
 0x129   : > { %3849 = vmatprep.subr.bf16.mxu1 %v5284_v52  ;;  %v5348_v51 = vld [vmem:[%s5710_s24 + $0x6e8] ss:$16 sps:$4 sm:$0xff]   ;;  %v5353_v52 = vld [vmem:[%s5710_s24 + $0x4cc] ss:$16 sps:$4 sm:$0xff]  }
 0x12b   : > { %3809 = vmatpush1.bf16.msra.mxu0 %v5279_v53  ;;  %v5356_v53 = vld [vmem:[%s5710_s24 + $0x6cc] ss:$16 sps:$4 sm:$0xff]  }
 0x12c   : > { %3850 = vmatpush1.bf16.msra.mxu1 %v5282_v54  ;;  %3810 = vmatprep.subr.bf16.mxu0 %v5287_v36 }
 0x12d   : > { %3851 = vmatprep.subr.bf16.mxu1 %v5290_v57 }
 0x12f   : > { %3811 = vmatpush1.bf16.msra.mxu0 %v5285_v58  ;;  %v5351_v58 = vld [vmem:[%s5710_s24 + $0x4c8] ss:$16 sps:$4 sm:$0xff]  }
 0x130   : > { %3852 = vmatpush1.bf16.msra.mxu1 %v5288_v59  ;;  %3812 = vmatprep.subr.bf16.mxu0 %v5293_v62  ;;  %v5354_v59 = vld [vmem:[%s5710_s24 + $0x6c8] ss:$16 sps:$4 sm:$0xff]  }
 0x131   : > { %3853 = vmatprep.subr.bf16.mxu1 %v5296_v63 }
 0x133   : > { %3813 = vmatpush1.bf16.msra.mxu0 %v5291_v0  ;;  %v5359_v0 = vld [vmem:[%s5710_s24 + $0x4ac] ss:$16 sps:$4 sm:$0xff]  }
 0x134   : > { %3854 = vmatpush1.bf16.msra.mxu1 %v5294_v2  ;;  %3814 = vmatprep.subr.bf16.mxu0 %v5299_v3  ;;  %v5362_v2 = vld [vmem:[%s5710_s24 + $0x6ac] ss:$16 sps:$4 sm:$0xff]  }
 0x135   : > { %3855 = vmatprep.subr.bf16.mxu1 %v5302_v4 }
 0x137   : > { %3815 = vmatpush2.bf16.msra.mxu0 %v5297_v5  ;;  %v5357_v5 = vld [vmem:[%s5710_s24 + $0x4a8] ss:$16 sps:$4 sm:$0xff]  }
 0x138   : > { %3856 = vmatpush2.bf16.msra.mxu1 %v5300_v6  ;;  %3816 = vmatprep.subr.bf16.mxu0 %v5305_v8  ;;  %v5360_v6 = vld [vmem:[%s5710_s24 + $0x6a8] ss:$16 sps:$4 sm:$0xff]  }
 0x139   : > { %3857 = vmatprep.subr.bf16.mxu1 %v5308_v10 }
 0x13b   : > { %3817 = vmatpush2.bf16.msra.mxu0 %v5303_v11  ;;  %v5366_v11 = vld [vmem:[%s5710_s24 + $0x688] ss:$16 sps:$4 sm:$0xff]  }
 0x13c   : > { %3858 = vmatpush2.bf16.msra.mxu1 %v5306_v12  ;;  %3818 = vmatprep.subr.bf16.mxu0 %v5311_v13  ;;  %v5371_v12 = vld [vmem:[%s5710_s24 + $0x46c] ss:$16 sps:$4 sm:$0xff]  }
 0x13d   : > { %3859 = vmatprep.subr.bf16.mxu1 %v5314_v16  ;;  %v5374_v13 = vld [vmem:[%s5710_s24 + $0x66c] ss:$16 sps:$4 sm:$0xff]   ;;  %v5369_v16 = vld [vmem:[%s5710_s24 + $0x468] ss:$16 sps:$4 sm:$0xff]  }
 0x13f   : > { %3819 = vmatpush2.bf16.msra.mxu0 %v5309_v50  ;;  %v5372_v50 = vld [vmem:[%s5710_s24 + $0x668] ss:$16 sps:$4 sm:$0xff]  }
 0x140   : > { %3860 = vmatpush2.bf16.msra.mxu1 %v5312_v41  ;;  %3820 = vmatprep.subr.bf16.mxu0 %v5317_v17  ;;  %v5377_v41 = vld [vmem:[%s5710_s24 + $0x44c] ss:$16 sps:$4 sm:$0xff]  }
 0x141   : > { %3861 = vmatprep.subr.bf16.mxu1 %v5320_v20  ;;  %v5380_v17 = vld [vmem:[%s5710_s24 + $0x64c] ss:$16 sps:$4 sm:$0xff]   ;;  %v5375_v20 = vld [vmem:[%s5710_s24 + $0x448] ss:$16 sps:$4 sm:$0xff]  }
 0x143   : > { %3821 = vmatpush2.bf16.msra.mxu0 %v5315_v21  ;;  %v5378_v21 = vld [vmem:[%s5710_s24 + $0x648] ss:$16 sps:$4 sm:$0xff]  }
 0x144   : > { %3862 = vmatpush2.bf16.msra.mxu1 %v5318_v22  ;;  %3822 = vmatprep.subr.bf16.mxu0 %v5323_v23  ;;  %v5383_v22 = vld [vmem:[%s5710_s24 + $0x42c] ss:$16 sps:$4 sm:$0xff]  }
 0x145   : > { %3863 = vmatprep.subr.bf16.mxu1 %v5326_v26  ;;  %v5386_v23 = vld [vmem:[%s5710_s24 + $0x62c] ss:$16 sps:$4 sm:$0xff]   ;;  %v5381_v26 = vld [vmem:[%s5710_s24 + $0x428] ss:$16 sps:$4 sm:$0xff]  }
 0x147   : > { %3823 = vmatpush2.bf16.msra.mxu0 %v5321_v28  ;;  %v5384_v28 = vld [vmem:[%s5710_s24 + $0x628] ss:$16 sps:$4 sm:$0xff]  }
 0x148   : > { %3864 = vmatpush2.bf16.msra.mxu1 %v5324_v29  ;;  %3824 = vmatprep.subr.bf16.mxu0 %v5329_v30  ;;  %v5389_v29 = vld [vmem:[%s5710_s24 + $0x40c] ss:$16 sps:$4 sm:$0xff]  }
 0x149   : > { %3865 = vmatprep.subr.bf16.mxu1 %v5332_v7  ;;  %v5392_v30 = vld [vmem:[%s5710_s24 + $0x60c] ss:$16 sps:$4 sm:$0xff]   ;;  %v5387_v7 = vld [vmem:[%s5710_s24 + $0x408] ss:$16 sps:$4 sm:$0xff]  }
 0x14b   : > { %3825 = vmatpush2.bf16.msra.mxu0 %v5327_v34  ;;  %v5390_v34 = vld [vmem:[%s5710_s24 + $0x608] ss:$16 sps:$4 sm:$0xff]  }
 0x14c   : > { %3866 = vmatpush2.bf16.msra.mxu1 %v5330_v35  ;;  %3826 = vmatprep.subr.bf16.mxu0 %v5335_v37  ;;  %v5395_v35 = vld [vmem:[%s5710_s24 + $0x5ec] ss:$16 sps:$4 sm:$0xff]  }
 0x14d   : > { %3867 = vmatprep.subr.bf16.mxu1 %v5338_v38  ;;  %v5398_v37 = vld [vmem:[%s5710_s24 + $0x7ec] ss:$16 sps:$4 sm:$0xff]   ;;  %v5393_v38 = vld [vmem:[%s5710_s24 + $0x5e8] ss:$16 sps:$4 sm:$0xff]  }
 0x14f   : > { %3827 = vmatpush2.bf16.msra.mxu0 %v5333_v39  ;;  %v5396_v39 = vld [vmem:[%s5710_s24 + $0x7e8] ss:$16 sps:$4 sm:$0xff]  }
 0x150   : > { %3868 = vmatpush2.bf16.msra.mxu1 %v5336_v40  ;;  %3828 = vmatprep.subr.bf16.mxu0 %v5341_v33  ;;  %v5401_v40 = vld [vmem:[%s5710_s24 + $0x5cc] ss:$16 sps:$4 sm:$0xff]  }
 0x151   : > { %3869 = vmatprep.subr.bf16.mxu1 %v5344_v61  ;;  %v5404_v33 = vld [vmem:[%s5710_s24 + $0x7cc] ss:$16 sps:$4 sm:$0xff]   ;;  %v5399_v61 = vld [vmem:[%s5710_s24 + $0x5c8] ss:$16 sps:$4 sm:$0xff]  }
 0x153   : > { %3829 = vmatpush2.bf16.msra.mxu0 %v5339_v1  ;;  %v5402_v1 = vld [vmem:[%s5710_s24 + $0x7c8] ss:$16 sps:$4 sm:$0xff]  }
 0x154   : > { %3870 = vmatpush2.bf16.msra.mxu1 %v5342_v45  ;;  %3880 = vmatprep.subr.bf16.mxu0 %v5347_v46  ;;  %v5407_v45 = vld [vmem:[%s5710_s24 + $0x5ac] ss:$16 sps:$4 sm:$0xff]  }
 0x155   : > { %3921 = vmatprep.subr.bf16.mxu1 %v5350_v47  ;;  %v5410_v46 = vld [vmem:[%s5710_s24 + $0x7ac] ss:$16 sps:$4 sm:$0xff]   ;;  %v5405_v47 = vld [vmem:[%s5710_s24 + $0x5a8] ss:$16 sps:$4 sm:$0xff]  }
 0x156   : > { %v3586_v54 = vpop.f32.mrf.mxu0  ;;  %3831 = vmatmul.mubr.bf16.vlgmr.msra.gmra.mxu0 %v5798_v14 }
 0x157   : > { %v3627_v36 = vpop.f32.mrf.mxu1  ;;  %3872 = vmatmul.mubr.bf16.vlgmr.msra.gmra.mxu1 %v5808_v19  ;;  %v3587_v57 = vadd.f32 %v3586_v54, %v6080_v25  ;;  %3881 = vmatpush1.bf16.msra.mxu0 %v5345_v48  ;;  %v5408_v48 = vld [vmem:[%s5710_s24 + $0x7a8] ss:$16 sps:$4 sm:$0xff]  }
 0x158   : > { %3922 = vmatpush1.bf16.msra.mxu1 %v5348_v51  ;;  %v3588_v62 = vpop.f32.mrf.mxu0  ;;  %3882 = vmatprep.subr.bf16.mxu0 %v5353_v52  ;;  %v5413_v51 = vld [vmem:[%s5710_s24 + $0x58c] ss:$16 sps:$4 sm:$0xff]   ;;  %v5414_v54 = vld [vmem:[%s5710_s24 + $0x788] ss:$16 sps:$4 sm:$0xff]  }
 0x159   : > { %v3629_v63 = vpop.f32.mrf.mxu1  ;;  %3923 = vmatprep.subr.bf16.mxu1 %v5356_v53  ;;  %v6155_v3 = vadd.f32 %v3627_v36, %v3587_v57  ;;  %v3589_v14 = vadd.f32 %v3588_v62, %v6084_v32  ;;  %3912 = vmatprep.mubr.bf16.mxu0 %v5804_v18  ;;  %v5365_v18 = vld [vmem:[%s5710_s24 + $0x48c] ss:$16 sps:$4 sm:$0xff]   ;;  %v5363_v32 = vld [vmem:[%s5710_s24 + $0x488] ss:$16 sps:$4 sm:$0xff]  }
 0x15a   : > { %3953 = vmatprep.mubr.bf16.mxu1 %v5816_v24  ;;  %v3590_v19 = vpop.f32.mrf.mxu0  ;;  %v5368_v24 = vld [vmem:[%s5710_s24 + $0x68c] ss:$16 sps:$4 sm:$0xff]   ;;  %v5411_v53 = vld [vmem:[%s5710_s24 + $0x588] ss:$16 sps:$4 sm:$0xff]  }
 0x15b   : > { %v3631_v25 = vpop.f32.mrf.mxu1  ;;  %v6160_v4 = vadd.f32 %v3629_v63, %v3589_v14  ;;  %3883 = vmatpush1.bf16.msra.mxu0 %v5351_v58  ;;  %v5416_v52 = vld [vmem:[%s5710_s24 + $0x78c] ss:$16 sps:$4 sm:$0xff]   ;;  %v5417_v58 = vld [vmem:[%s5710_s24 + $0x568] ss:$16 sps:$4 sm:$0xff]  }
 0x15c   : > { %3924 = vmatpush1.bf16.msra.mxu1 %v5354_v59  ;;  %v3591_v8 = vpop.f32.mrf.mxu0  ;;  %3884 = vmatprep.subr.bf16.mxu0 %v5359_v0  ;;  %v5419_v36 = vld [vmem:[%s5710_s24 + $0x56c] ss:$16 sps:$4 sm:$0xff]   ;;  %v5420_v59 = vld [vmem:[%s5710_s24 + $0x768] ss:$16 sps:$4 sm:$0xff]  }
 0x15d   : > { %v3632_v10 = vpop.f32.mrf.mxu1  ;;  %3925 = vmatprep.subr.bf16.mxu1 %v5362_v2  ;;  %v5422_v57 = vld [vmem:[%s5710_s24 + $0x76c] ss:$16 sps:$4 sm:$0xff]   ;;  %v5423_v0 = vld [vmem:[%s5710_s24 + $0x548] ss:$16 sps:$4 sm:$0xff]  }
 0x15e   : > { %v5425_v62 = vld [vmem:[%s5710_s24 + $0x54c] ss:$16 sps:$4 sm:$0xff]   ;;  %v5426_v2 = vld [vmem:[%s5710_s24 + $0x748] ss:$16 sps:$4 sm:$0xff]  }
 0x15f   : > { %3885 = vmatpush1.bf16.msra.mxu0 %v5357_v5  ;;  %v5428_v63 = vld [vmem:[%s5710_s24 + $0x74c] ss:$16 sps:$4 sm:$0xff]   ;;  %v5429_v25 = vld [vmem:[%s5710_s24 + $0x528] ss:$16 sps:$4 sm:$0xff]  }
 0x160   : > { %3926 = vmatpush1.bf16.msra.mxu1 %v5360_v6  ;;  %3886 = vmatprep.subr.bf16.mxu0 %v5365_v18  ;;  %v5431_v14 = vld [vmem:[%s5710_s24 + $0x52c] ss:$16 sps:$4 sm:$0xff]   ;;  %v5432_v5 = vld [vmem:[%s5710_s24 + $0x728] ss:$16 sps:$4 sm:$0xff]  }
 0x161   : > { %3927 = vmatprep.subr.bf16.mxu1 %v5368_v24  ;;  %v5434_v19 = vld [vmem:[%s5710_s24 + $0x72c] ss:$16 sps:$4 sm:$0xff]   ;;  %v5435_v10 = vld [vmem:[%s5710_s24 + $0x508] ss:$16 sps:$4 sm:$0xff]  }
 0x162   : > { %v5437_v6 = vld [vmem:[%s5710_s24 + $0x50c] ss:$16 sps:$4 sm:$0xff]   ;;  %v5438_v18 = vld [vmem:[%s5710_s24 + $0x708] ss:$16 sps:$4 sm:$0xff]  }
 0x163   : > { %3887 = vmatpush1.bf16.msra.mxu0 %v5363_v32  ;;  %v5440_v8 = vld [vmem:[%s5710_s24 + $0x70c] ss:$16 sps:$4 sm:$0xff]  }
 0x164   : > { %3928 = vmatpush1.bf16.msra.mxu1 %v5366_v11  ;;  %3888 = vmatprep.subr.bf16.mxu0 %v5371_v12  ;;  %v5443_v24 = vld [vmem:[%s5710_s24 + $0x8ec] ss:$16 sps:$4 sm:$0xff]   ;;  %v5441_v11 = vld [vmem:[%s5710_s24 + $0x8e8] ss:$16 sps:$4 sm:$0xff]  }
 0x165   : > { %3929 = vmatprep.subr.bf16.mxu1 %v5374_v13  ;;  %v5446_v32 = vld [vmem:[%s5710_s24 + $0xaec] ss:$16 sps:$4 sm:$0xff]   ;;  %v5444_v12 = vld [vmem:[%s5710_s24 + $0xae8] ss:$16 sps:$4 sm:$0xff]  }
 0x166   : > { %v5449_v13 = vld [vmem:[%s5710_s24 + $0x8cc] ss:$16 sps:$4 sm:$0xff]  }
 0x167   : > { %3889 = vmatpush1.bf16.msra.mxu0 %v5369_v16  ;;  %v5452_v16 = vld [vmem:[%s5710_s24 + $0xacc] ss:$16 sps:$4 sm:$0xff]  }
 0x168   : > { %3930 = vmatpush1.bf16.msra.mxu1 %v5372_v50  ;;  %3890 = vmatprep.subr.bf16.mxu0 %v5377_v41 }
 0x169   : > { %3931 = vmatprep.subr.bf16.mxu1 %v5380_v17 }
 0x16b   : > { %3891 = vmatpush1.bf16.msra.mxu0 %v5375_v20  ;;  %v5447_v20 = vld [vmem:[%s5710_s24 + $0x8c8] ss:$16 sps:$4 sm:$0xff]  }
 0x16c   : > { %3932 = vmatpush1.bf16.msra.mxu1 %v5378_v21  ;;  %3892 = vmatprep.subr.bf16.mxu0 %v5383_v22  ;;  %v5450_v21 = vld [vmem:[%s5710_s24 + $0xac8] ss:$16 sps:$4 sm:$0xff]  }
 0x16d   : > { %3933 = vmatprep.subr.bf16.mxu1 %v5386_v23 }
 0x16f   : > { %3893 = vmatpush1.bf16.msra.mxu0 %v5381_v26  ;;  %v5455_v26 = vld [vmem:[%s5710_s24 + $0x8ac] ss:$16 sps:$4 sm:$0xff]  }
 0x170   : > { %3934 = vmatpush1.bf16.msra.mxu1 %v5384_v28  ;;  %3894 = vmatprep.subr.bf16.mxu0 %v5389_v29  ;;  %v5458_v28 = vld [vmem:[%s5710_s24 + $0xaac] ss:$16 sps:$4 sm:$0xff]  }
 0x171   : > { %3935 = vmatprep.subr.bf16.mxu1 %v5392_v30 }
 0x173   : > { %3895 = vmatpush1.bf16.msra.mxu0 %v5387_v7  ;;  %v5453_v7 = vld [vmem:[%s5710_s24 + $0x8a8] ss:$16 sps:$4 sm:$0xff]  }
 0x174   : > { %3936 = vmatpush1.bf16.msra.mxu1 %v5390_v34  ;;  %3896 = vmatprep.subr.bf16.mxu0 %v5395_v35  ;;  %v5456_v34 = vld [vmem:[%s5710_s24 + $0xaa8] ss:$16 sps:$4 sm:$0xff]  }
 0x175   : > { %3937 = vmatprep.subr.bf16.mxu1 %v5398_v37 }
 0x177   : > { %3897 = vmatpush2.bf16.msra.mxu0 %v5393_v38  ;;  %v5462_v38 = vld [vmem:[%s5710_s24 + $0xa88] ss:$16 sps:$4 sm:$0xff]  }
 0x178   : > { %3938 = vmatpush2.bf16.msra.mxu1 %v5396_v39  ;;  %3898 = vmatprep.subr.bf16.mxu0 %v5401_v40  ;;  %v5467_v39 = vld [vmem:[%s5710_s24 + $0x86c] ss:$16 sps:$4 sm:$0xff]  }
 0x179   : > { %3939 = vmatprep.subr.bf16.mxu1 %v5404_v33  ;;  %v5470_v40 = vld [vmem:[%s5710_s24 + $0xa6c] ss:$16 sps:$4 sm:$0xff]   ;;  %v5465_v33 = vld [vmem:[%s5710_s24 + $0x868] ss:$16 sps:$4 sm:$0xff]  }
 0x17b   : > { %3899 = vmatpush2.bf16.msra.mxu0 %v5399_v61  ;;  %v5468_v61 = vld [vmem:[%s5710_s24 + $0xa68] ss:$16 sps:$4 sm:$0xff]  }
 0x17c   : > { %3940 = vmatpush2.bf16.msra.mxu1 %v5402_v1  ;;  %3900 = vmatprep.subr.bf16.mxu0 %v5407_v45  ;;  %v5473_v1 = vld [vmem:[%s5710_s24 + $0x84c] ss:$16 sps:$4 sm:$0xff]  }
 0x17d   : > { %3941 = vmatprep.subr.bf16.mxu1 %v5410_v46  ;;  %v5476_v45 = vld [vmem:[%s5710_s24 + $0xa4c] ss:$16 sps:$4 sm:$0xff]   ;;  %v5471_v46 = vld [vmem:[%s5710_s24 + $0x848] ss:$16 sps:$4 sm:$0xff]  }
 0x17f   : > { %3901 = vmatpush2.bf16.msra.mxu0 %v5405_v47  ;;  %v5474_v47 = vld [vmem:[%s5710_s24 + $0xa48] ss:$16 sps:$4 sm:$0xff]  }
 0x180   : > { %3942 = vmatpush2.bf16.msra.mxu1 %v5408_v48  ;;  %3902 = vmatprep.subr.bf16.mxu0 %v5413_v51  ;;  %v5479_v48 = vld [vmem:[%s5710_s24 + $0x82c] ss:$16 sps:$4 sm:$0xff]  }
 0x181   : > { %3943 = vmatprep.subr.bf16.mxu1 %v5416_v52  ;;  %v5482_v51 = vld [vmem:[%s5710_s24 + $0xa2c] ss:$16 sps:$4 sm:$0xff]   ;;  %v5477_v52 = vld [vmem:[%s5710_s24 + $0x828] ss:$16 sps:$4 sm:$0xff]  }
 0x183   : > { %3903 = vmatpush2.bf16.msra.mxu0 %v5411_v53  ;;  %v5480_v53 = vld [vmem:[%s5710_s24 + $0xa28] ss:$16 sps:$4 sm:$0xff]  }
 0x184   : > { %3944 = vmatpush2.bf16.msra.mxu1 %v5414_v54  ;;  %3904 = vmatprep.subr.bf16.mxu0 %v5419_v36  ;;  %v5485_v54 = vld [vmem:[%s5710_s24 + $0x80c] ss:$16 sps:$4 sm:$0xff]  }
 0x185   : > { %3945 = vmatprep.subr.bf16.mxu1 %v5422_v57  ;;  %v5488_v36 = vld [vmem:[%s5710_s24 + $0xa0c] ss:$16 sps:$4 sm:$0xff]   ;;  %v5483_v57 = vld [vmem:[%s5710_s24 + $0x808] ss:$16 sps:$4 sm:$0xff]  }
 0x187   : > { %3905 = vmatpush2.bf16.msra.mxu0 %v5417_v58  ;;  %v5486_v58 = vld [vmem:[%s5710_s24 + $0xa08] ss:$16 sps:$4 sm:$0xff]  }
 0x188   : > { %3946 = vmatpush2.bf16.msra.mxu1 %v5420_v59  ;;  %3906 = vmatprep.subr.bf16.mxu0 %v5425_v62  ;;  %v5491_v59 = vld [vmem:[%s5710_s24 + $0x9ec] ss:$16 sps:$4 sm:$0xff]  }
 0x189   : > { %3947 = vmatprep.subr.bf16.mxu1 %v5428_v63  ;;  %v5494_v62 = vld [vmem:[%s5710_s24 + $0xbec] ss:$16 sps:$4 sm:$0xff]   ;;  %v5489_v63 = vld [vmem:[%s5710_s24 + $0x9e8] ss:$16 sps:$4 sm:$0xff]  }
 0x18b   : > { %3907 = vmatpush2.bf16.msra.mxu0 %v5423_v0  ;;  %v5492_v0 = vld [vmem:[%s5710_s24 + $0xbe8] ss:$16 sps:$4 sm:$0xff]  }
 0x18c   : > { %3948 = vmatpush2.bf16.msra.mxu1 %v5426_v2  ;;  %3908 = vmatprep.subr.bf16.mxu0 %v5431_v14  ;;  %v5497_v2 = vld [vmem:[%s5710_s24 + $0x9cc] ss:$16 sps:$4 sm:$0xff]  }
 0x18d   : > { %3949 = vmatprep.subr.bf16.mxu1 %v5434_v19  ;;  %v5500_v14 = vld [vmem:[%s5710_s24 + $0xbcc] ss:$16 sps:$4 sm:$0xff]   ;;  %v5495_v19 = vld [vmem:[%s5710_s24 + $0x9c8] ss:$16 sps:$4 sm:$0xff]  }
 0x18f   : > { %3909 = vmatpush2.bf16.msra.mxu0 %v5429_v25  ;;  %v5498_v25 = vld [vmem:[%s5710_s24 + $0xbc8] ss:$16 sps:$4 sm:$0xff]  }
 0x190   : > { %3950 = vmatpush2.bf16.msra.mxu1 %v5432_v5  ;;  %3910 = vmatprep.subr.bf16.mxu0 %v5437_v6  ;;  %v5503_v5 = vld [vmem:[%s5710_s24 + $0x9ac] ss:$16 sps:$4 sm:$0xff]  }
 0x191   : > { %3951 = vmatprep.subr.bf16.mxu1 %v5440_v8  ;;  %v5506_v6 = vld [vmem:[%s5710_s24 + $0xbac] ss:$16 sps:$4 sm:$0xff]   ;;  %v5501_v8 = vld [vmem:[%s5710_s24 + $0x9a8] ss:$16 sps:$4 sm:$0xff]  }
 0x193   : > { %3911 = vmatpush2.bf16.msra.mxu0 %v5435_v10  ;;  %v5504_v10 = vld [vmem:[%s5710_s24 + $0xba8] ss:$16 sps:$4 sm:$0xff]  }
 0x194   : > { %3952 = vmatpush2.bf16.msra.mxu1 %v5438_v18  ;;  %3962 = vmatprep.subr.bf16.mxu0 %v5443_v24  ;;  %v5509_v18 = vld [vmem:[%s5710_s24 + $0x98c] ss:$16 sps:$4 sm:$0xff]  }
 0x195   : > { %4003 = vmatprep.subr.bf16.mxu1 %v5446_v32  ;;  %v5512_v24 = vld [vmem:[%s5710_s24 + $0xb8c] ss:$16 sps:$4 sm:$0xff]   ;;  %v5507_v32 = vld [vmem:[%s5710_s24 + $0x988] ss:$16 sps:$4 sm:$0xff]  }
 0x196   : > { %v3668_v50 = vpop.f32.mrf.mxu0  ;;  %3913 = vmatmul.mubr.bf16.vlgmr.msra.gmra.mxu0 %v5881_v27 }
 0x197   : > { %v3709_v41 = vpop.f32.mrf.mxu1  ;;  %3954 = vmatmul.mubr.bf16.vlgmr.msra.gmra.mxu1 %v5888_v31  ;;  %v3669_v17 = vadd.f32 %v3668_v50, %v6155_v3  ;;  %3963 = vmatpush1.bf16.msra.mxu0 %v5441_v11  ;;  %v5510_v11 = vld [vmem:[%s5710_s24 + $0xb88] ss:$16 sps:$4 sm:$0xff]  }
 0x198   : > { %4004 = vmatpush1.bf16.msra.mxu1 %v5444_v12  ;;  %v3670_v22 = vpop.f32.mrf.mxu0  ;;  %3964 = vmatprep.subr.bf16.mxu0 %v5449_v13  ;;  %v5515_v12 = vld [vmem:[%s5710_s24 + $0x96c] ss:$16 sps:$4 sm:$0xff]   ;;  %v5516_v50 = vld [vmem:[%s5710_s24 + $0xb68] ss:$16 sps:$4 sm:$0xff]  }
 0x199   : > { %v3711_v23 = vpop.f32.mrf.mxu1  ;;  %4005 = vmatprep.subr.bf16.mxu1 %v5452_v16  ;;  %v6229_v29 = vadd.f32 %v3709_v41, %v3669_v17  ;;  %v3671_v27 = vadd.f32 %v3670_v22, %v6160_v4  ;;  %3994 = vmatprep.mubr.bf16.mxu0 %v5910_v42  ;;  %v5461_v42 = vld [vmem:[%s5710_s24 + $0x88c] ss:$16 sps:$4 sm:$0xff]   ;;  %v5459_v4 = vld [vmem:[%s5710_s24 + $0x888] ss:$16 sps:$4 sm:$0xff]  }
 0x19a   : > { %4035 = vmatprep.mubr.bf16.mxu1 %v5915_v43  ;;  %v3672_v31 = vpop.f32.mrf.mxu0  ;;  %v5464_v43 = vld [vmem:[%s5710_s24 + $0xa8c] ss:$16 sps:$4 sm:$0xff]   ;;  %v5513_v16 = vld [vmem:[%s5710_s24 + $0x968] ss:$16 sps:$4 sm:$0xff]  }
 0x19b   : > { %v3713_v3 = vpop.f32.mrf.mxu1  ;;  %v6234_v30 = vadd.f32 %v3711_v23, %v3671_v27  ;;  %3965 = vmatpush1.bf16.msra.mxu0 %v5447_v20  ;;  %v5518_v13 = vld [vmem:[%s5710_s24 + $0xb6c] ss:$16 sps:$4 sm:$0xff]   ;;  %v5519_v20 = vld [vmem:[%s5710_s24 + $0x948] ss:$16 sps:$4 sm:$0xff]  }
 0x19c   : > { %4006 = vmatpush1.bf16.msra.mxu1 %v5450_v21  ;;  %v3673_v35 = vpop.f32.mrf.mxu0  ;;  %3966 = vmatprep.subr.bf16.mxu0 %v5455_v26  ;;  %v5521_v41 = vld [vmem:[%s5710_s24 + $0x94c] ss:$16 sps:$4 sm:$0xff]   ;;  %v5522_v21 = vld [vmem:[%s5710_s24 + $0xb48] ss:$16 sps:$4 sm:$0xff]  }
 0x19d   : > { %v3714_v37 = vpop.f32.mrf.mxu1  ;;  %4007 = vmatprep.subr.bf16.mxu1 %v5458_v28  ;;  %v5524_v17 = vld [vmem:[%s5710_s24 + $0xb4c] ss:$16 sps:$4 sm:$0xff]   ;;  %v5525_v26 = vld [vmem:[%s5710_s24 + $0x928] ss:$16 sps:$4 sm:$0xff]  }
 0x19e   : > { %v5527_v22 = vld [vmem:[%s5710_s24 + $0x92c] ss:$16 sps:$4 sm:$0xff]   ;;  %v5528_v28 = vld [vmem:[%s5710_s24 + $0xb28] ss:$16 sps:$4 sm:$0xff]  }
 0x19f   : > { %3967 = vmatpush1.bf16.msra.mxu0 %v5453_v7  ;;  %v5530_v23 = vld [vmem:[%s5710_s24 + $0xb2c] ss:$16 sps:$4 sm:$0xff]   ;;  %v5531_v3 = vld [vmem:[%s5710_s24 + $0x908] ss:$16 sps:$4 sm:$0xff]  }
 0x1a0   : > { %4008 = vmatpush1.bf16.msra.mxu1 %v5456_v34  ;;  %3968 = vmatprep.subr.bf16.mxu0 %v5461_v42  ;;  %v5533_v27 = vld [vmem:[%s5710_s24 + $0x90c] ss:$16 sps:$4 sm:$0xff]   ;;  %v5534_v7 = vld [vmem:[%s5710_s24 + $0xb08] ss:$16 sps:$4 sm:$0xff]  }
 0x1a1   : > { %4009 = vmatprep.subr.bf16.mxu1 %v5464_v43  ;;  %v5536_v31 = vld [vmem:[%s5710_s24 + $0xb0c] ss:$16 sps:$4 sm:$0xff]   ;;  %v5537_v37 = vld [vmem:[%s5710_s24 + $0xce8] ss:$16 sps:$4 sm:$0xff]  }
 0x1a2   : > { %v5539_v34 = vld [vmem:[%s5710_s24 + $0xcec] ss:$16 sps:$4 sm:$0xff]   ;;  %v5540_v42 = vld [vmem:[%s5710_s24 + $0xee8] ss:$16 sps:$4 sm:$0xff]  }
 0x1a3   : > { %3969 = vmatpush1.bf16.msra.mxu0 %v5459_v4  ;;  %v5542_v35 = vld [vmem:[%s5710_s24 + $0xeec] ss:$16 sps:$4 sm:$0xff]  }
 0x1a4   : > { %4010 = vmatpush1.bf16.msra.mxu1 %v5462_v38  ;;  %3970 = vmatprep.subr.bf16.mxu0 %v5467_v39  ;;  %v5545_v43 = vld [vmem:[%s5710_s24 + $0xccc] ss:$16 sps:$4 sm:$0xff]  }
 0x1a5   : > { %4011 = vmatprep.subr.bf16.mxu1 %v5470_v40  ;;  %v5548_v4 = vld [vmem:[%s5710_s24 + $0xecc] ss:$16 sps:$4 sm:$0xff]  }
 0x1a7   : > { %3971 = vmatpush1.bf16.msra.mxu0 %v5465_v33  ;;  %v5543_v33 = vld [vmem:[%s5710_s24 + $0xcc8] ss:$16 sps:$4 sm:$0xff]  }
 0x1a8   : > { %4012 = vmatpush1.bf16.msra.mxu1 %v5468_v61  ;;  %3972 = vmatprep.subr.bf16.mxu0 %v5473_v1  ;;  %v5546_v61 = vld [vmem:[%s5710_s24 + $0xec8] ss:$16 sps:$4 sm:$0xff]  }
 0x1a9   : > { %4013 = vmatprep.subr.bf16.mxu1 %v5476_v45 }
 0x1ab   : > { %3973 = vmatpush1.bf16.msra.mxu0 %v5471_v46  ;;  %v5551_v46 = vld [vmem:[%s5710_s24 + $0xcac] ss:$16 sps:$4 sm:$0xff]  }
 0x1ac   : > { %4014 = vmatpush1.bf16.msra.mxu1 %v5474_v47  ;;  %3974 = vmatprep.subr.bf16.mxu0 %v5479_v48  ;;  %v5554_v47 = vld [vmem:[%s5710_s24 + $0xeac] ss:$16 sps:$4 sm:$0xff]  }
 0x1ad   : > { %4015 = vmatprep.subr.bf16.mxu1 %v5482_v51 }
 0x1af   : > { %3975 = vmatpush1.bf16.msra.mxu0 %v5477_v52  ;;  %v5549_v52 = vld [vmem:[%s5710_s24 + $0xca8] ss:$16 sps:$4 sm:$0xff]  }
 0x1b0   : > { %4016 = vmatpush1.bf16.msra.mxu1 %v5480_v53  ;;  %3976 = vmatprep.subr.bf16.mxu0 %v5485_v54  ;;  %v5552_v53 = vld [vmem:[%s5710_s24 + $0xea8] ss:$16 sps:$4 sm:$0xff]  }
 0x1b1   : > { %4017 = vmatprep.subr.bf16.mxu1 %v5488_v36 }
 0x1b3   : > { %3977 = vmatpush1.bf16.msra.mxu0 %v5483_v57  ;;  %v5555_v57 = vld [vmem:[%s5710_s24 + $0xc88] ss:$16 sps:$4 sm:$0xff]  }
 0x1b4   : > { %4018 = vmatpush1.bf16.msra.mxu1 %v5486_v58  ;;  %3978 = vmatprep.subr.bf16.mxu0 %v5491_v59  ;;  %v5558_v58 = vld [vmem:[%s5710_s24 + $0xe88] ss:$16 sps:$4 sm:$0xff]   ;;  %v5563_v59 = vld [vmem:[%s5710_s24 + $0xc6c] ss:$16 sps:$4 sm:$0xff]  }
 0x1b5   : > { %4019 = vmatprep.subr.bf16.mxu1 %v5494_v62  ;;  %v5566_v62 = vld [vmem:[%s5710_s24 + $0xe6c] ss:$16 sps:$4 sm:$0xff]  }
 0x1b7   : > { %3979 = vmatpush2.bf16.msra.mxu0 %v5489_v63  ;;  %v5561_v63 = vld [vmem:[%s5710_s24 + $0xc68] ss:$16 sps:$4 sm:$0xff]  }
 0x1b8   : > { %4020 = vmatpush2.bf16.msra.mxu1 %v5492_v0  ;;  %3980 = vmatprep.subr.bf16.mxu0 %v5497_v2  ;;  %v5564_v0 = vld [vmem:[%s5710_s24 + $0xe68] ss:$16 sps:$4 sm:$0xff]   ;;  %v5569_v2 = vld [vmem:[%s5710_s24 + $0xc4c] ss:$16 sps:$4 sm:$0xff]  }
 0x1b9   : > { %4021 = vmatprep.subr.bf16.mxu1 %v5500_v14  ;;  %v5572_v14 = vld [vmem:[%s5710_s24 + $0xe4c] ss:$16 sps:$4 sm:$0xff]  }
 0x1bb   : > { %3981 = vmatpush2.bf16.msra.mxu0 %v5495_v19  ;;  %v5567_v19 = vld [vmem:[%s5710_s24 + $0xc48] ss:$16 sps:$4 sm:$0xff]  }
 0x1bc   : > { %4022 = vmatpush2.bf16.msra.mxu1 %v5498_v25  ;;  %3982 = vmatprep.subr.bf16.mxu0 %v5503_v5  ;;  %v5570_v25 = vld [vmem:[%s5710_s24 + $0xe48] ss:$16 sps:$4 sm:$0xff]   ;;  %v5575_v5 = vld [vmem:[%s5710_s24 + $0xc2c] ss:$16 sps:$4 sm:$0xff]  }
 0x1bd   : > { %4023 = vmatprep.subr.bf16.mxu1 %v5506_v6  ;;  %v5578_v6 = vld [vmem:[%s5710_s24 + $0xe2c] ss:$16 sps:$4 sm:$0xff]  }
 0x1bf   : > { %3983 = vmatpush2.bf16.msra.mxu0 %v5501_v8  ;;  %v5573_v8 = vld [vmem:[%s5710_s24 + $0xc28] ss:$16 sps:$4 sm:$0xff]  }
 0x1c0   : > { %4024 = vmatpush2.bf16.msra.mxu1 %v5504_v10  ;;  %3984 = vmatprep.subr.bf16.mxu0 %v5509_v18  ;;  %v5576_v10 = vld [vmem:[%s5710_s24 + $0xe28] ss:$16 sps:$4 sm:$0xff]   ;;  %v5581_v18 = vld [vmem:[%s5710_s24 + $0xc0c] ss:$16 sps:$4 sm:$0xff]  }
 0x1c1   : > { %4025 = vmatprep.subr.bf16.mxu1 %v5512_v24  ;;  %v5584_v24 = vld [vmem:[%s5710_s24 + $0xe0c] ss:$16 sps:$4 sm:$0xff]  }
 0x1c3   : > { %3985 = vmatpush2.bf16.msra.mxu0 %v5507_v32  ;;  %v5579_v32 = vld [vmem:[%s5710_s24 + $0xc08] ss:$16 sps:$4 sm:$0xff]  }
 0x1c4   : > { %4026 = vmatpush2.bf16.msra.mxu1 %v5510_v11  ;;  %3986 = vmatprep.subr.bf16.mxu0 %v5515_v12  ;;  %v5582_v11 = vld [vmem:[%s5710_s24 + $0xe08] ss:$16 sps:$4 sm:$0xff]   ;;  %v5587_v12 = vld [vmem:[%s5710_s24 + $0xdec] ss:$16 sps:$4 sm:$0xff]  }
 0x1c5   : > { %4027 = vmatprep.subr.bf16.mxu1 %v5518_v13  ;;  %v5590_v13 = vld [vmem:[%s5710_s24 + $0xfec] ss:$16 sps:$4 sm:$0xff]  }
 0x1c7   : > { %3987 = vmatpush2.bf16.msra.mxu0 %v5513_v16  ;;  %v5585_v16 = vld [vmem:[%s5710_s24 + $0xde8] ss:$16 sps:$4 sm:$0xff]  }
 0x1c8   : > { %4028 = vmatpush2.bf16.msra.mxu1 %v5516_v50  ;;  %3988 = vmatprep.subr.bf16.mxu0 %v5521_v41  ;;  %v5588_v50 = vld [vmem:[%s5710_s24 + $0xfe8] ss:$16 sps:$4 sm:$0xff]   ;;  %v5593_v41 = vld [vmem:[%s5710_s24 + $0xdcc] ss:$16 sps:$4 sm:$0xff]  }
 0x1c9   : > { %4029 = vmatprep.subr.bf16.mxu1 %v5524_v17  ;;  %v5596_v17 = vld [vmem:[%s5710_s24 + $0xfcc] ss:$16 sps:$4 sm:$0xff]  }
 0x1cb   : > { %3989 = vmatpush2.bf16.msra.mxu0 %v5519_v20  ;;  %v5591_v20 = vld [vmem:[%s5710_s24 + $0xdc8] ss:$16 sps:$4 sm:$0xff]  }
 0x1cc   : > { %4030 = vmatpush2.bf16.msra.mxu1 %v5522_v21  ;;  %3990 = vmatprep.subr.bf16.mxu0 %v5527_v22  ;;  %v5594_v21 = vld [vmem:[%s5710_s24 + $0xfc8] ss:$16 sps:$4 sm:$0xff]   ;;  %v5599_v22 = vld [vmem:[%s5710_s24 + $0xdac] ss:$16 sps:$4 sm:$0xff]  }
 0x1cd   : > { %4031 = vmatprep.subr.bf16.mxu1 %v5530_v23  ;;  %v5602_v23 = vld [vmem:[%s5710_s24 + $0xfac] ss:$16 sps:$4 sm:$0xff]  }
 0x1cf   : > { %3991 = vmatpush2.bf16.msra.mxu0 %v5525_v26  ;;  %v5597_v26 = vld [vmem:[%s5710_s24 + $0xda8] ss:$16 sps:$4 sm:$0xff]  }
 0x1d0   : > { %4032 = vmatpush2.bf16.msra.mxu1 %v5528_v28  ;;  %3992 = vmatprep.subr.bf16.mxu0 %v5533_v27  ;;  %v5600_v28 = vld [vmem:[%s5710_s24 + $0xfa8] ss:$16 sps:$4 sm:$0xff]   ;;  %v5605_v27 = vld [vmem:[%s5710_s24 + $0xd8c] ss:$16 sps:$4 sm:$0xff]  }
 0x1d1   : > { %4033 = vmatprep.subr.bf16.mxu1 %v5536_v31  ;;  %v5608_v31 = vld [vmem:[%s5710_s24 + $0xf8c] ss:$16 sps:$4 sm:$0xff]  }
 0x1d3   : > { %3993 = vmatpush2.bf16.msra.mxu0 %v5531_v3  ;;  %v5603_v3 = vld [vmem:[%s5710_s24 + $0xd88] ss:$16 sps:$4 sm:$0xff]  }
 0x1d4   : > { %4034 = vmatpush2.bf16.msra.mxu1 %v5534_v7  ;;  %4044 = vmatprep.subr.bf16.mxu0 %v5539_v34  ;;  %v5606_v7 = vld [vmem:[%s5710_s24 + $0xf88] ss:$16 sps:$4 sm:$0xff]   ;;  %v5611_v34 = vld [vmem:[%s5710_s24 + $0xd6c] ss:$16 sps:$4 sm:$0xff]  }
 0x1d5   : > { %4085 = vmatprep.subr.bf16.mxu1 %v5542_v35  ;;  %v5614_v35 = vld [vmem:[%s5710_s24 + $0xf6c] ss:$16 sps:$4 sm:$0xff]  }
 0x1d6   : > { %v3750_v38 = vpop.f32.mrf.mxu0  ;;  %3995 = vmatmul.mubr.bf16.vlgmr.msra.gmra.mxu0 %v5979_v49 }
 0x1d7   : > { %v3791_v39 = vpop.f32.mrf.mxu1  ;;  %4036 = vmatmul.mubr.bf16.vlgmr.msra.gmra.mxu1 %v5990_v56  ;;  %v3751_v40 = vadd.f32 %v3750_v38, %v6229_v29  ;;  %4045 = vmatpush1.bf16.msra.mxu0 %v5537_v37  ;;  %v5609_v37 = vld [vmem:[%s5710_s24 + $0xd68] ss:$16 sps:$4 sm:$0xff]  }
 0x1d8   : > { %4086 = vmatpush1.bf16.msra.mxu1 %v5540_v42  ;;  %v3752_v1 = vpop.f32.mrf.mxu0  ;;  %4046 = vmatprep.subr.bf16.mxu0 %v5545_v43  ;;  %v5612_v42 = vld [vmem:[%s5710_s24 + $0xf68] ss:$16 sps:$4 sm:$0xff]   ;;  %v5617_v43 = vld [vmem:[%s5710_s24 + $0xd4c] ss:$16 sps:$4 sm:$0xff]  }
 0x1d9   : > { %v3793_v45 = vpop.f32.mrf.mxu1  ;;  %4087 = vmatprep.subr.bf16.mxu1 %v5548_v4  ;;  %v6303_v48 = vadd.f32 %v3791_v39, %v3751_v40  ;;  %v3753_v49 = vadd.f32 %v3752_v1, %v6234_v30  ;;  %4076 = vmatprep.mubr.bf16.mxu0 %v5986_v55  ;;  %v5557_v55 = vld [vmem:[%s5710_s24 + $0xc8c] ss:$16 sps:$4 sm:$0xff]   ;;  %v5615_v38 = vld [vmem:[%s5710_s24 + $0xd48] ss:$16 sps:$4 sm:$0xff]  }
 0x1da   : > { %4117 = vmatprep.mubr.bf16.mxu1 %v5998_v60  ;;  %v3754_v56 = vpop.f32.mrf.mxu0  ;;  %v5560_v60 = vld [vmem:[%s5710_s24 + $0xe8c] ss:$16 sps:$4 sm:$0xff]   ;;  %v5618_v39 = vld [vmem:[%s5710_s24 + $0xf48] ss:$16 sps:$4 sm:$0xff]  }
 0x1db   : > { %v3795_v29 = vpop.f32.mrf.mxu1  ;;  %v6308_v51 = vadd.f32 %v3793_v45, %v3753_v49  ;;  %4047 = vmatpush1.bf16.msra.mxu0 %v5543_v33  ;;  %v5620_v4 = vld [vmem:[%s5710_s24 + $0xf4c] ss:$16 sps:$4 sm:$0xff]   ;;  %v5624_v1 = vld [vmem:[%s5710_s24 + $0xf28] ss:$16 sps:$4 sm:$0xff]  }
 0x1dc   : > { %4088 = vmatpush1.bf16.msra.mxu1 %v5546_v61  ;;  %v3755_v54 = vpop.f32.mrf.mxu0  ;;  %4048 = vmatprep.subr.bf16.mxu0 %v5551_v46  ;;  %v5623_v40 = vld [vmem:[%s5710_s24 + $0xd2c] ss:$16 sps:$4 sm:$0xff]   ;;  %v5621_v61 = vld [vmem:[%s5710_s24 + $0xd28] ss:$16 sps:$4 sm:$0xff]  }
 0x1dd   : > { %v3796_v36 = vpop.f32.mrf.mxu1  ;;  %4089 = vmatprep.subr.bf16.mxu1 %v5554_v47  ;;  %v4130_v30 = vcombine.low %v6303_v48, %v6308_v51  ;;  %v5626_v33 = vld [vmem:[%s5710_s24 + $0xf2c] ss:$16 sps:$4 sm:$0xff]   ;;  %v5627_v47 = vld [vmem:[%s5710_s24 + $0xd08] ss:$16 sps:$4 sm:$0xff]  }
 0x1de   : > { %v5629_v45 = vld [vmem:[%s5710_s24 + $0xd0c] ss:$16 sps:$4 sm:$0xff]   ;;  %v5630_v49 = vld [vmem:[%s5710_s24 + $0xf08] ss:$16 sps:$4 sm:$0xff]  }
 0x1df   : > { %4049 = vmatpush1.bf16.msra.mxu0 %v5549_v52  ;;  %v5632_v46 = vld [vmem:[%s5710_s24 + $0xf0c] ss:$16 sps:$4 sm:$0xff]  }
 0x1e0   : > { %4090 = vmatpush1.bf16.msra.mxu1 %v5552_v53  ;;  %4050 = vmatprep.subr.bf16.mxu0 %v5557_v55 }
 0x1e1   : > { %4091 = vmatprep.subr.bf16.mxu1 %v5560_v60 }
 0x1e3   : > { %4051 = vmatpush1.bf16.msra.mxu0 %v5555_v57 }
 0x1e4   : > { %4092 = vmatpush1.bf16.msra.mxu1 %v5558_v58  ;;  %4052 = vmatprep.subr.bf16.mxu0 %v5563_v59 }
 0x1e5   : > { %4093 = vmatprep.subr.bf16.mxu1 %v5566_v62 }
 0x1e7   : > { %4053 = vmatpush1.bf16.msra.mxu0 %v5561_v63 }
 0x1e8   : > { %4094 = vmatpush1.bf16.msra.mxu1 %v5564_v0  ;;  %4054 = vmatprep.subr.bf16.mxu0 %v5569_v2 }
 0x1e9   : > { %4095 = vmatprep.subr.bf16.mxu1 %v5572_v14 }
 0x1eb   : > { %4055 = vmatpush1.bf16.msra.mxu0 %v5567_v19 }
 0x1ec   : > { %4096 = vmatpush1.bf16.msra.mxu1 %v5570_v25  ;;  %4056 = vmatprep.subr.bf16.mxu0 %v5575_v5 }
 0x1ed   : > { %4097 = vmatprep.subr.bf16.mxu1 %v5578_v6 }
 0x1ef   : > { %4057 = vmatpush1.bf16.msra.mxu0 %v5573_v8 }
 0x1f0   : > { %4098 = vmatpush1.bf16.msra.mxu1 %v5576_v10  ;;  %4058 = vmatprep.subr.bf16.mxu0 %v5581_v18 }
 0x1f1   : > { %4099 = vmatprep.subr.bf16.mxu1 %v5584_v24 }
 0x1f3   : > { %4059 = vmatpush1.bf16.msra.mxu0 %v5579_v32 }
 0x1f4   : > { %4100 = vmatpush1.bf16.msra.mxu1 %v5582_v11  ;;  %4060 = vmatprep.subr.bf16.mxu0 %v5587_v12 }
 0x1f5   : > { %4101 = vmatprep.subr.bf16.mxu1 %v5590_v13 }
 0x1f7   : > { %4061 = vmatpush2.bf16.msra.mxu0 %v5585_v16 }
 0x1f8   : > { %4102 = vmatpush2.bf16.msra.mxu1 %v5588_v50  ;;  %4062 = vmatprep.subr.bf16.mxu0 %v5593_v41  ;;  %v5659_v41 = vmov 1983009808  }
 0x1f9   : > { %4103 = vmatprep.subr.bf16.mxu1 %v5596_v17  ;;  %v4133_v17 = vunpack.c.l.s4 %v5659_v41 }
 0x1fb   : > { %4063 = vmatpush2.bf16.msra.mxu0 %v5591_v20 }
 0x1fc   : > { %4104 = vmatpush2.bf16.msra.mxu1 %v5594_v21  ;;  %4064 = vmatprep.subr.bf16.mxu0 %v5599_v22 }
 0x1fd   : > { %4105 = vmatprep.subr.bf16.mxu1 %v5602_v23  ;;  %v4134_v23 = vunpack.c.0.s8 %v4133_v17 }
 0x1ff   : > { %4065 = vmatpush2.bf16.msra.mxu0 %v5597_v26 }
 0x200   : > { %4106 = vmatpush2.bf16.msra.mxu1 %v5600_v28  ;;  %4066 = vmatprep.subr.bf16.mxu0 %v5605_v27 }
 0x201   : > { %4107 = vmatprep.subr.bf16.mxu1 %v5608_v31 }
 0x203   : > { %4067 = vmatpush2.bf16.msra.mxu0 %v5603_v3 }
 0x204   : > { %4108 = vmatpush2.bf16.msra.mxu1 %v5606_v7  ;;  %4068 = vmatprep.subr.bf16.mxu0 %v5611_v34 }
 0x205   : > { %4109 = vmatprep.subr.bf16.mxu1 %v5614_v35  ;;  %v4137_v35 = vsub.s32 %v4134_v23, %v5752_v44 }
 0x207   : > { %4069 = vmatpush2.bf16.msra.mxu0 %v5609_v37 }
 0x208   : > { %4110 = vmatpush2.bf16.msra.mxu1 %v5612_v42  ;;  %4070 = vmatprep.subr.bf16.mxu0 %v5617_v43 }
 0x209   : > { %4111 = vmatprep.subr.bf16.mxu1 %v5620_v4 }
 0x20b   : > { %4071 = vmatpush2.bf16.msra.mxu0 %v5615_v38 }
 0x20c   : > { %4112 = vmatpush2.bf16.msra.mxu1 %v5618_v39  ;;  %4072 = vmatprep.subr.bf16.mxu0 %v5623_v40  ;;  %v4138_v39 = vrot.slane %v4130_v30, %v4137_v35 }
 0x20d   : > { %4113 = vmatprep.subr.bf16.mxu1 %v5626_v33  ;;  %v279_v33 = vld [vmem:[#allocation2] sm:$0xff] }
 0x20f   : > { %4073 = vmatpush2.bf16.msra.mxu0 %v5621_v61 }
 0x210   : > { %4114 = vmatpush2.bf16.msra.mxu1 %v5624_v1  ;;  %4074 = vmatprep.subr.bf16.mxu0 %v5629_v45 }
 0x211   : > { %4115 = vmatprep.subr.bf16.mxu1 %v5632_v46 }
 0x213   : > { %4075 = vmatpush2.bf16.msra.mxu0 %v5627_v47 }
 0x214   : > { %4116 = vmatpush2.bf16.msra.mxu1 %v5630_v49 }
 0x216   : > { %v3832_v56 = vpop.f32.mrf.mxu0  ;;  %4077 = vmatmul.mubr.bf16.vlgmr.msra.gmra.mxu0 %v6062_v9 }
 0x217   : > { %v3873_v29 = vpop.f32.mrf.mxu1  ;;  %4118 = vmatmul.mubr.bf16.vlgmr.msra.gmra.mxu1 %v6070_v15 }
 0x218   : > { %v3874_v52 = vadd.f32 %v3873_v29, %v3832_v56  ;;  %v3834_v53 = vpop.f32.mrf.mxu0 }
 0x219   : > { %v3875_v54 = vpop.f32.mrf.mxu1 }
 0x21a   : > { %v3876_v36 = vadd.f32 %v3875_v54, %v3834_v53  ;;  %v3836_v55 = vpop.f32.mrf.mxu0 }
 0x21b   : > { %v3877_v60 = vpop.f32.mrf.mxu1 }
 0x21c   : > { %v3837_v57 = vpop.f32.mrf.mxu0 }
 0x21d   : > { %v3878_v58 = vpop.f32.mrf.mxu1 }
 0x256   : > { %v3914_v59 = vpop.f32.mrf.mxu0 }
 0x257   : > { %v3955_v62 = vpop.f32.mrf.mxu1  ;;  %v3915_v63 = vadd.f32 %v3914_v59, %v3874_v52 }
 0x258   : > { %v3916_v0 = vpop.f32.mrf.mxu0 }
 0x259   : > { %v3957_v2 = vpop.f32.mrf.mxu1  ;;  %v3956_v14 = vadd.f32 %v3955_v62, %v3915_v63  ;;  %v3917_v19 = vadd.f32 %v3916_v0, %v3876_v36 }
 0x25a   : > { %v3918_v25 = vpop.f32.mrf.mxu0 }
 0x25b   : > { %v3959_v5 = vpop.f32.mrf.mxu1  ;;  %v3958_v9 = vadd.f32 %v3957_v2, %v3917_v19 }
 0x25c   : > { %v3919_v6 = vpop.f32.mrf.mxu0 }
 0x25d   : > { %v3960_v15 = vpop.f32.mrf.mxu1 }
 0x296   : > { %v3996_v8 = vpop.f32.mrf.mxu0 }
 0x297   : > { %v4037_v10 = vpop.f32.mrf.mxu1  ;;  %v3997_v18 = vadd.f32 %v3996_v8, %v3956_v14 }
 0x298   : > { %v3998_v24 = vpop.f32.mrf.mxu0 }
 0x299   : > { %v4039_v32 = vpop.f32.mrf.mxu1  ;;  %v4038_v11 = vadd.f32 %v4037_v10, %v3997_v18  ;;  %v3999_v20 = vadd.f32 %v3998_v24, %v3958_v9 }
 0x29a   : > { %v4000_v12 = vpop.f32.mrf.mxu0 }
 0x29b   : > { %v4041_v13 = vpop.f32.mrf.mxu1  ;;  %v4040_v26 = vadd.f32 %v4039_v32, %v3999_v20 }
 0x29c   : > { %v4001_v16 = vpop.f32.mrf.mxu0 }
 0x29d   : > { %v4042_v50 = vpop.f32.mrf.mxu1 }
 0x2d6   : > { %v4078_v21 = vpop.f32.mrf.mxu0 }
 0x2d7   : > { %v4119_v22 = vpop.f32.mrf.mxu1  ;;  %v4079_v28 = vadd.f32 %v4078_v21, %v4038_v11 }
 0x2d8   : > { %v4080_v27 = vpop.f32.mrf.mxu0 }
 0x2d9   : > { %v4121_v31 = vpop.f32.mrf.mxu1  ;;  %v4081_v3 = vadd.f32 %v4080_v27, %v4040_v26  ;;  %v4120_v37 = vadd.f32 %v4119_v22, %v4079_v28 }
 0x2da   : > { %v4082_v7 = vpop.f32.mrf.mxu0 }
 0x2db   : > { %v4123_v34 = vpop.f32.mrf.mxu1  ;;  %v4122_v42 = vadd.f32 %v4121_v31, %v4081_v3 }
 0x2dc   : > { %v4083_v43 = vpop.f32.mrf.mxu0 }
 0x2dd   : > { %v4124_v4 = vpop.f32.mrf.mxu1  ;;  %v4131_v38 = vcombine.low %v4120_v37, %v4122_v42 }
 0x2df   : > { %v4145_v40 = vrot.slane %v4131_v38, %v4137_v35 }
 0x2e1   : > { %v4146_v61 = vcombine.low %v4138_v39, %v4145_v40  ;;  %4153 = sbr.rel (%p4830_p7) target bundleno = 757 (0x2f5), region = 40 }
 0x2e3   : > { %v4148_v1 = vadd.f32 %v4146_v61, %v279_v33 }
 0x2e5   : > { %4149 = vst [vmem:[#allocation2] sm:$0xff] %v4148_v1 }
 0x2e6   : > { %v4155_v45 = vld [vmem:[%s6394_s2] sm:$0xf]  ;;  %v4159_v46 = vsub.s32 0, %v5752_v44  ;;  %v4163_v47 = vsub.s32 1, %v5752_v44  ;;  %v4167_v49 = vsub.s32 2, %v5752_v44  ;;  %v4171_v48 = vsub.s32 3, %v5752_v44 }
 0x2e8   : > { %v4160_v51 = vrot.slane %v4155_v45, %v4159_v46  ;;  %v4164_v30 = vrot.slane %v4155_v45, %v4163_v47  ;;  %v4168_v56 = vrot.slane %v4155_v45, %v4167_v49  ;;  %v4172_v29 = vrot.slane %v4155_v45, %v4171_v48 }
 0x2ea   : > { %v4173_v52 = vcombine.low %v4160_v51, %v4164_v30  ;;  %v4174_v53 = vcombine.low %v4168_v56, %v4172_v29 }
 0x2ec   : > { %v4181_v54 = vrot.slane %v4173_v52, %v4137_v35  ;;  %v4188_v36 = vrot.slane %v4174_v53, %v4137_v35  ;;  %v4154_v55 = vld [vmem:[#allocation2] sm:$0xff] }
 0x2ee   : > { %v4189_v60 = vcombine.low %v4181_v54, %v4188_v36 }
 0x2f0   : > { %v4191_v57 = vadd.f32 %v4189_v60, %v4154_v55 }
 0x2f2   : > { %v4192_v58 = vmax.f32 %v4191_v57, 0.0 }
 0x2f4   : > { %4193 = vst [vmem:[%s6395_s3] sm:$0xff] %v4192_v58 }
 0x2f5 PF: > { %s13_s14 = sadd.s32 1, %s5655_s14   ;;  %s6396_s12 = smov %s5651_s13 }
 0x2f6   : > { %p10_p8 = scmp.ge.s32.totalorder %s13_s14, 6   ;;  %s6397_s13 = smov %s6399_s15 }
 0x2f8   :  { %12 = sbr.rel (!%p10_p8) target bundleno = 2 (0x2), region = 76 }

</bundles_post_ra>
